<compile_context>
chip_gen: v7x
topology: tpu7x:2x2x1
jax: 0.10.0
libtpu: 0.0.40
codegen_flags: <defaults>
</compile_context>

<pallas_src>
import functools
import math

import numpy as np
import jax
import jax.numpy as jnp
from jax.experimental import pallas as pl
from jax.experimental.pallas import tpu as pltpu


# -----------------------------------------------------------------------------------------------
# Integrated directional encoding constants (ref-NeRF IDE, deg_view=5 -> 72 dims), as in sph_enc.
# -----------------------------------------------------------------------------------------------
def _generalized_binomial_coeff(a, k):
    return float(np.prod(a - np.arange(k))) / math.factorial(k)


def _assoc_legendre_coeff(l, m, k):
    return ((-1) ** m * 2 ** l * math.factorial(l) / math.factorial(k) /
            math.factorial(l - k - m) *
            _generalized_binomial_coeff(0.5 * (l + k + m - 1.0), l))


def _sph_harm_coeff(l, m, k):
    return (math.sqrt((2.0 * l + 1.0) * math.factorial(l - m) /
                      (4.0 * math.pi * math.factorial(l + m))) *
            _assoc_legendre_coeff(l, m, k))


def _build_ide_consts(deg_view):
    ml_list = []
    for i in range(deg_view):
        l = 2 ** i
        for m in range(l + 1):
            ml_list.append((m, l))
    ml = np.array(ml_list).T                       # (2, 36)
    l_max = 2 ** (deg_view - 1)
    mat = np.zeros((l_max + 1, ml.shape[1]))
    for i, (m, l) in enumerate(ml.T):
        for k in range(int(l) - int(m) + 1):
            mat[k, i] = _sph_harm_coeff(int(l), int(m), int(k))
    sigma = 0.5 * ml[1, :] * (ml[1, :] + 1)
    return (ml[0, :].astype(np.int32),
            mat.astype(np.float32),
            sigma.astype(np.float32))


_M_ARR, _IDE_MAT, _IDE_SIGMA = _build_ide_consts(5)     # 36 (m,l) pairs -> 72-d encoding
_M_MAX = int(_M_ARR.max())                              # 16
# Attenuation exp(-sigma * kappa_inv) with kappa_inv == 1 (roughness := ones in this forward)
# is a compile-time constant; fold it into the Legendre matrix.
_IDE_MAT_ATT = (_IDE_MAT * np.exp(-_IDE_SIGMA)[None, :]).astype(np.float32)


def _dir_power_feats(xyz):
    """z powers and (x+iy) real/imag powers, p = 0..16.  xyz (N,3) -> three (N,17) arrays."""
    x, y, z = xyz[:, 0:1], xyz[:, 1:2], xyz[:, 2:3]
    re = [jnp.ones_like(x)]
    im = [jnp.zeros_like(x)]
    zp = [jnp.ones_like(x)]
    for _ in range(_M_MAX):
        r_p, i_p = re[-1], im[-1]
        re.append(r_p * x - i_p * y)
        im.append(r_p * y + i_p * x)
        zp.append(zp[-1] * z)
    return (jnp.concatenate(re, axis=-1),
            jnp.concatenate(im, axis=-1),
            jnp.concatenate(zp, axis=-1))


def sph_enc_ones(xyz):
    """Integrated directional encoding with kappa_inv == 1 (attenuation pre-folded).  -> (N,72)."""
    re17, im17, z17 = _dir_power_feats(xyz)
    leg = z17 @ jnp.asarray(_IDE_MAT_ATT)                # (N,36), f32, attenuation folded in
    vm_re = re17[:, _M_ARR]                              # (N,36), static gather (plain JAX)
    vm_im = im17[:, _M_ARR]
    return jnp.concatenate([vm_re * leg, vm_im * leg], axis=-1)


def _sph_enc_reference(xyz, kappa_inv):
    """Direct transcription of the torch IDE (explicit attenuation) — used only for checking."""
    re17, im17, z17 = _dir_power_feats(xyz)
    leg = z17 @ jnp.asarray(_IDE_MAT)
    vm_re = re17[:, _M_ARR]
    vm_im = im17[:, _M_ARR]
    atten = jnp.exp(-jnp.asarray(_IDE_SIGMA)[None, :] * kappa_inv)
    return jnp.concatenate([vm_re * leg * atten, vm_im * leg * atten], axis=-1)


# -----------------------------------------------------------------------------------------------
# Geometry helpers (plain JAX glue, tiny elementwise work).
# -----------------------------------------------------------------------------------------------
def _normalize(x, eps=1e-12):
    n = jnp.linalg.norm(x, axis=-1, keepdims=True)
    return x / jnp.maximum(n, eps)


def offset_points_to_sphere(points):
    norm = jnp.linalg.norm(points, axis=-1, keepdims=True)
    scaled = points / jnp.maximum(norm, 1e-12) * 0.999
    return jnp.where(norm > 0.999, scaled, points)


def get_sphere_intersection(pts, dirs):
    dtx = jnp.sum(pts * dirs, axis=-1, keepdims=True)
    xtx = jnp.sum(pts ** 2, axis=-1, keepdims=True)
    dist = dtx ** 2 - xtx + 1.0
    return -dtx + jnp.sqrt(dist + 1e-6)


_F32_EPS = float(np.finfo(np.float32).eps)


def _linear_to_srgb(x):
    srgb0 = 12.92 * x
    srgb1 = 1.055 * jnp.exp(jnp.log(jnp.maximum(x, _F32_EPS)) * (1.0 / 2.4)) - 0.055
    return jnp.where(x <= 0.0031308, srgb0, srgb1)


# -----------------------------------------------------------------------------------------------
# Fused Pallas kernel: albedo MLP + outer_light MLP (interleaved) + sigmoid/exp + double srgb.
# -----------------------------------------------------------------------------------------------
def _fused_kernel(fv_ref, pts_ref, enc_ref,
                  aw1f, aw1p, ab1, aw2, ab2, aw3, ab3, aw4, ab4,
                  ow1, ob1, ow2, ob2, ow3, ob3, ow4, ob4,
                  color_ref, *, exp_max):
    f32 = jnp.float32
    bf16 = jnp.bfloat16

    fv = fv_ref[...].astype(bf16)                   # (T,256) cast in-kernel (no HBM pad/cast)
    enc = enc_ref[...].astype(bf16)                 # (T,144)
    pts = pts_ref[...]                              # (T,3) f32

    # ---- layer 1 of both heads (independent MXU chains, interleaved) ----
    ha = jnp.dot(fv, aw1f[...], preferred_element_type=f32)        # K = 256 (lane-aligned)
    ho = jnp.dot(enc, ow1[...], preferred_element_type=f32)        # K = 144 (true K, no pad)
    wp = aw1p[...]                                                 # (3,256) f32
    ha = (ha
          + pts[:, 0:1] * wp[0:1, :]
          + pts[:, 1:2] * wp[1:2, :]
          + pts[:, 2:3] * wp[2:3, :]
          + ab1[...])
    ho = ho + ob1[...]
    ha = jnp.maximum(ha, 0.0).astype(bf16)
    ho = jnp.maximum(ho, 0.0).astype(bf16)

    # ---- layer 2 ----
    ha = jnp.dot(ha, aw2[...], preferred_element_type=f32) + ab2[...]
    ho = jnp.dot(ho, ow2[...], preferred_element_type=f32) + ob2[...]
    ha = jnp.maximum(ha, 0.0).astype(bf16)
    ho = jnp.maximum(ho, 0.0).astype(bf16)

    # ---- layer 3 ----
    ha = jnp.dot(ha, aw3[...], preferred_element_type=f32) + ab3[...]
    ho = jnp.dot(ho, ow3[...], preferred_element_type=f32) + ob3[...]
    ha = jnp.maximum(ha, 0.0).astype(bf16)
    ho = jnp.maximum(ho, 0.0).astype(bf16)

    # ---- output heads ----
    albedo = jax.nn.sigmoid(jnp.dot(ha, aw4[...], preferred_element_type=f32) + ab4[...])
    light_raw = jnp.dot(ho, ow4[...], preferred_element_type=f32) + ob4[...]
    diffuse_light = jnp.exp(jnp.minimum(light_raw, exp_max))       # ExpActivation(max=3.0)

    diffuse_color = _linear_to_srgb(albedo * diffuse_light)
    # The reference forward applies linear_to_srgb a second time to produce `color`.
    color_ref[...] = _linear_to_srgb(diffuse_color)


def fused_shading(fv, pts, enc, albedo_params, outer_params, exp_max, tile):
    n, fdim = fv.shape
    edim = enc.shape[1]                                            # 144
    grid = (pl.cdiv(n, tile),)

    aw1, ab1, aw2, ab2, aw3, ab3, aw4, ab4 = albedo_params
    ow1, ob1, ow2, ob2, ow3, ob3, ow4, ob4 = outer_params
    a_par = (aw1[:fdim].astype(jnp.bfloat16),      # (256,256) bf16, lane-aligned K
             aw1[fdim:fdim + 3],                   # (3,256) f32 -> VPU broadcast-FMA in kernel
             ab1,
             aw2.astype(jnp.bfloat16), ab2,
             aw3.astype(jnp.bfloat16), ab3,
             aw4.astype(jnp.bfloat16), ab4)
    o_par = (ow1.astype(jnp.bfloat16), ob1,
             ow2.astype(jnp.bfloat16), ob2,
             ow3.astype(jnp.bfloat16), ob3,
             ow4.astype(jnp.bfloat16), ob4)

    def row_spec(d):
        return pl.BlockSpec((tile, d), lambda i: (i, 0))

    def const_spec(shape):
        return pl.BlockSpec(shape, lambda i: tuple(0 for _ in shape))

    w_specs = [const_spec(p.shape) for p in a_par] + [const_spec(p.shape) for p in o_par]

    # Advisory cost estimate so XLA overlaps the surrounding glue with the custom call.
    macs_per_pt = (fdim * 256 + 3 * 256 + 2 * 256 * 256 + 256 * 3
                   + edim * 256 + 2 * 256 * 256 + 256 * 3)
    weight_bytes = int(sum(int(np.prod(p.shape)) for p in (a_par + o_par))) * 2
    cost = pl.CostEstimate(
        flops=int(2 * macs_per_pt) * int(n),
        transcendentals=24 * int(n),
        bytes_accessed=int(n) * 4 * (fdim + 3 + edim + 3) + weight_bytes,
    )

    kern = functools.partial(_fused_kernel, exp_max=float(exp_max))
    color = pl.pallas_call(
        kern,
        out_shape=jax.ShapeDtypeStruct((n, 3), jnp.float32),
        grid=grid,
        in_specs=[row_spec(fdim), row_spec(3), row_spec(edim)] + w_specs,
        out_specs=pl.BlockSpec((tile, 3), lambda i: (i, 0)),
        compiler_params=pltpu.CompilerParams(dimension_semantics=("parallel",)),
        cost_estimate=cost,
    )(fv, pts, enc, *a_par, *o_par)
    return color


# -----------------------------------------------------------------------------------------------
# Forward pass (AppShadingNetwork_DiffuseInner.forward, human_light=False, sphere_direction=True).
# -----------------------------------------------------------------------------------------------
@functools.partial(jax.jit, static_argnames=("tile",))
def _forward_impl(params, points, normals, view_dirs, feature_vectors, tile):
    n = points.shape[0]
    pts = points.reshape(n, 3).astype(jnp.float32)
    nrm = _normalize(normals.reshape(n, 3).astype(jnp.float32))
    vd = _normalize(view_dirs.reshape(n, 3).astype(jnp.float32))
    fv = feature_vectors.reshape(n, -1).astype(jnp.float32)

    NoV = jnp.sum(nrm * vd, axis=-1, keepdims=True)
    reflective = NoV * nrm * 2.0 - vd

    # metallic / roughness / transmission predictors are dead in this forward
    # (multiplied by 0 or never used); skipping them leaves the outputs unchanged.

    # predict_diffuse_lights (sphere_direction=True), roughness := ones -> attenuation constant.
    ref_enc = sph_enc_ones(nrm)                                     # (N,72)
    sph_pts = offset_points_to_sphere(pts)
    sph_dir = _normalize(sph_pts + nrm * get_sphere_intersection(sph_pts, nrm))
    sph_enc_v = sph_enc_ones(sph_dir)                               # (N,72)
    enc = jnp.concatenate([ref_enc, sph_enc_v], axis=-1)            # (N,144)

    color = fused_shading(fv, pts, enc, params["albedo"], params["outer_light"],
                          exp_max=3.0, tile=tile)                   # light_exp_max = 3.0
    occ_info = {"reflective": reflective}
    return color, occ_info


def _pick_tile(n):
    # >= 2 grid blocks whenever possible (both v7x TensorCores under 'parallel');
    # tile <= 512 keeps VMEM far below v5e's 16 MiB default scoped limit.
    if n >= 2048:
        return 512
    if n >= 512:
        return 256
    if n >= 128:
        return 128
    return max(int(n), 1)


def app_shading_forward(params, points, normals, view_dirs, feature_vectors, human_poses=None):
    del human_poses                                  # human_light=False in the default cfg
    tile = _pick_tile(points.shape[0])
    return _forward_impl(params, points, normals, view_dirs, feature_vectors, tile)


# -----------------------------------------------------------------------------------------------
# Pure-JAX f32 reference of the same forward (for an in-script sanity check).
# -----------------------------------------------------------------------------------------------
def _mlp_ref(p, x):
    w1, b1, w2, b2, w3, b3, w4, b4 = p
    h = jnp.maximum(x @ w1 + b1, 0.0)
    h = jnp.maximum(h @ w2 + b2, 0.0)
    h = jnp.maximum(h @ w3 + b3, 0.0)
    return h @ w4 + b4


def _reference_forward(params, points, normals, view_dirs, feature_vectors):
    n = points.shape[0]
    nrm = _normalize(normals)
    vd = _normalize(view_dirs)
    reflective = jnp.sum(vd * nrm, axis=-1, keepdims=True) * nrm * 2.0 - vd
    x = jnp.concatenate([feature_vectors, points], axis=-1)
    albedo = jax.nn.sigmoid(_mlp_ref(params["albedo"], x))
    ones_r = jnp.ones((n, 1), jnp.float32)
    ref = _sph_enc_reference(nrm, ones_r)
    sp = offset_points_to_sphere(points)
    sp = _normalize(sp + nrm * get_sphere_intersection(sp, nrm))
    spe = _sph_enc_reference(sp, ones_r)
    raw = _mlp_ref(params["outer_light"], jnp.concatenate([ref, spe], axis=-1))
    light = jnp.exp(jnp.minimum(raw, 3.0))
    diffuse_color = _linear_to_srgb(albedo * light)
    return _linear_to_srgb(diffuse_color), reflective


# -----------------------------------------------------------------------------------------------
# Deterministic parameter construction (synthetic, matches make_predictor geometry).
# -----------------------------------------------------------------------------------------------
def _init_mlp(key, din, dout, last_bias=0.0):
    dims = [(din, 256), (256, 256), (256, 256), (256, dout)]
    params = []
    ks = jax.random.split(key, len(dims))
    for idx, (k, (a, b)) in enumerate(zip(ks, dims)):
        w = (jax.random.normal(k, (a, b), jnp.float32) / np.sqrt(a)).astype(jnp.float32)
        params.append(w)
        bias_val = last_bias if idx == len(dims) - 1 else 0.0
        params.append(jnp.full((1, b), bias_val, jnp.float32))
    return tuple(params)


def init_params(key):
    ka, ko = jax.random.split(key, 2)
    return {
        "albedo": _init_mlp(ka, 256 + 3, 3),                                    # sigmoid head
        "outer_light": _init_mlp(ko, 72 * 2, 3, last_bias=float(np.log(0.5))),  # exp head
    }
    # TODO(synk): FG_LUT (assets/bsdf_256_256.bin) and the heads that are dead in this forward
    # (metallic, roughness, transmission, iors, inner_light, inner_weight, refrac_light,
    # human_light) are not constructed: they do not affect the returned values and the LUT
    # needs file I/O.  weight_norm is folded into the effective weight matrices.


# -----------------------------------------------------------------------------------------------
if __name__ == "__main__":
    N = 512
    key = jax.random.PRNGKey(0)
    k_pts, k_nrm, k_vd, k_fv, k_params = jax.random.split(key, 5)

    points = jax.random.uniform(k_pts, (N, 3), jnp.float32, minval=-0.8, maxval=0.8)
    normals = jax.random.normal(k_nrm, (N, 3), jnp.float32)
    view_dirs = jax.random.normal(k_vd, (N, 3), jnp.float32)
    feature_vectors = jax.random.normal(k_fv, (N, 256), jnp.float32) * 0.1

    params = init_params(k_params)

    color, occ_info = app_shading_forward(params, points, normals, view_dirs, feature_vectors)
    color = jax.block_until_ready(color)
    reflective = jax.block_until_ready(occ_info["reflective"])

    assert color.shape == (N, 3)
    assert reflective.shape == (N, 3)
    assert bool(jnp.all(jnp.isfinite(color)))
    assert bool(jnp.all(jnp.isfinite(reflective)))

    # Loose sanity check against a pure-JAX f32 reference (bf16 MXU inputs -> small deviations).
    color_ref, reflective_ref = _reference_forward(params, points, normals, view_dirs,
                                                   feature_vectors)
    max_err = float(jnp.max(jnp.abs(color - color_ref)))
    max_err_refl = float(jnp.max(jnp.abs(reflective - reflective_ref)))
    assert max_err < 0.1, f"color mismatch vs f32 reference: {max_err}"
    assert max_err_refl < 1e-4, f"reflective mismatch vs reference: {max_err_refl}"

    print("KERNEL_OK")
</pallas_src>

<mosaic_0001>
module attributes {stable_mosaic.version = 11 : i64} {
  func.func @_fused_kernel(%arg0: i32, %arg1: memref<256x256xf32, #tpu.memory_space<vmem>>, %arg2: memref<256x3xf32, #tpu.memory_space<vmem>>, %arg3: memref<256x144xf32, #tpu.memory_space<vmem>>, %arg4: memref<256x256xbf16, #tpu.memory_space<vmem>>, %arg5: memref<3x256xf32, #tpu.memory_space<vmem>>, %arg6: memref<1x256xf32, #tpu.memory_space<vmem>>, %arg7: memref<256x256xbf16, #tpu.memory_space<vmem>>, %arg8: memref<1x256xf32, #tpu.memory_space<vmem>>, %arg9: memref<256x256xbf16, #tpu.memory_space<vmem>>, %arg10: memref<1x256xf32, #tpu.memory_space<vmem>>, %arg11: memref<256x3xbf16, #tpu.memory_space<vmem>>, %arg12: memref<1x3xf32, #tpu.memory_space<vmem>>, %arg13: memref<144x256xbf16, #tpu.memory_space<vmem>>, %arg14: memref<1x256xf32, #tpu.memory_space<vmem>>, %arg15: memref<256x256xbf16, #tpu.memory_space<vmem>>, %arg16: memref<1x256xf32, #tpu.memory_space<vmem>>, %arg17: memref<256x256xbf16, #tpu.memory_space<vmem>>, %arg18: memref<1x256xf32, #tpu.memory_space<vmem>>, %arg19: memref<256x3xbf16, #tpu.memory_space<vmem>>, %arg20: memref<1x3xf32, #tpu.memory_space<vmem>>, %arg21: memref<256x3xf32, #tpu.memory_space<vmem>>) attributes {dimension_semantics = [#tpu.dimension_semantics<parallel>], iteration_bounds = array<i64: 2>, scalar_prefetch = 0 : i64, scratch_operands = 0 : i64, tpu.core_type = #tpu.core_type<tc>, window_params = [{transform_indices = @transform_0, window_bounds = array<i64: 256, 256>}, {transform_indices = @transform_1, window_bounds = array<i64: 256, 3>}, {transform_indices = @transform_2, window_bounds = array<i64: 256, 144>}, {pipeline_mode = #tpu.pipeline_mode<synchronous>, transform_indices = @transform_3, window_bounds = array<i64: 256, 256>}, {pipeline_mode = #tpu.pipeline_mode<synchronous>, transform_indices = @transform_4, window_bounds = array<i64: 3, 256>}, {pipeline_mode = #tpu.pipeline_mode<synchronous>, transform_indices = @transform_5, window_bounds = array<i64: 1, 256>}, {pipeline_mode = #tpu.pipeline_mode<synchronous>, transform_indices = @transform_6, window_bounds = array<i64: 256, 256>}, {pipeline_mode = #tpu.pipeline_mode<synchronous>, transform_indices = @transform_7, window_bounds = array<i64: 1, 256>}, {pipeline_mode = #tpu.pipeline_mode<synchronous>, transform_indices = @transform_8, window_bounds = array<i64: 256, 256>}, {pipeline_mode = #tpu.pipeline_mode<synchronous>, transform_indices = @transform_9, window_bounds = array<i64: 1, 256>}, {pipeline_mode = #tpu.pipeline_mode<synchronous>, transform_indices = @transform_10, window_bounds = array<i64: 256, 3>}, {pipeline_mode = #tpu.pipeline_mode<synchronous>, transform_indices = @transform_11, window_bounds = array<i64: 1, 3>}, {pipeline_mode = #tpu.pipeline_mode<synchronous>, transform_indices = @transform_12, window_bounds = array<i64: 144, 256>}, {pipeline_mode = #tpu.pipeline_mode<synchronous>, transform_indices = @transform_13, window_bounds = array<i64: 1, 256>}, {pipeline_mode = #tpu.pipeline_mode<synchronous>, transform_indices = @transform_14, window_bounds = array<i64: 256, 256>}, {pipeline_mode = #tpu.pipeline_mode<synchronous>, transform_indices = @transform_15, window_bounds = array<i64: 1, 256>}, {pipeline_mode = #tpu.pipeline_mode<synchronous>, transform_indices = @transform_16, window_bounds = array<i64: 256, 256>}, {pipeline_mode = #tpu.pipeline_mode<synchronous>, transform_indices = @transform_17, window_bounds = array<i64: 1, 256>}, {pipeline_mode = #tpu.pipeline_mode<synchronous>, transform_indices = @transform_18, window_bounds = array<i64: 256, 3>}, {pipeline_mode = #tpu.pipeline_mode<synchronous>, transform_indices = @transform_19, window_bounds = array<i64: 1, 3>}, {transform_indices = @transform_20, window_bounds = array<i64: 256, 3>}]} {
    %c0 = arith.constant 0 : index
    %c0_0 = arith.constant 0 : index
    %0 = vector.load %arg1[%c0, %c0_0] : memref<256x256xf32, #tpu.memory_space<vmem>>, vector<256x256xf32>
    %1 = arith.truncf %0 : vector<256x256xf32> to vector<256x256xbf16>
    %c0_1 = arith.constant 0 : index
    %c0_2 = arith.constant 0 : index
    %2 = vector.load %arg3[%c0_1, %c0_2] : memref<256x144xf32, #tpu.memory_space<vmem>>, vector<256x144xf32>
    %3 = arith.truncf %2 : vector<256x144xf32> to vector<256x144xbf16>
    %c0_3 = arith.constant 0 : index
    %c0_4 = arith.constant 0 : index
    %4 = vector.load %arg2[%c0_3, %c0_4] : memref<256x3xf32, #tpu.memory_space<vmem>>, vector<256x3xf32>
    %c0_5 = arith.constant 0 : index
    %c0_6 = arith.constant 0 : index
    %5 = vector.load %arg4[%c0_5, %c0_6] : memref<256x256xbf16, #tpu.memory_space<vmem>>, vector<256x256xbf16>
    %cst = arith.constant dense<0.000000e+00> : vector<256x256xf32>
    %6 = tpu.matmul %1, %5, %cst {dimension_numbers = #tpu.dot_dimension_numbers<[1], [0], [0], [1], [0, 0, 1, 1], [], []>} : vector<256x256xbf16>, vector<256x256xbf16>, vector<256x256xf32> -> vector<256x256xf32>
    %c0_7 = arith.constant 0 : index
    %c0_8 = arith.constant 0 : index
    %7 = vector.load %arg13[%c0_7, %c0_8] : memref<144x256xbf16, #tpu.memory_space<vmem>>, vector<144x256xbf16>
    %cst_9 = arith.constant dense<0.000000e+00> : vector<256x256xf32>
    %8 = tpu.matmul %3, %7, %cst_9 {dimension_numbers = #tpu.dot_dimension_numbers<[1], [0], [0], [1], [0, 0, 1, 1], [], []>} : vector<256x144xbf16>, vector<144x256xbf16>, vector<256x256xf32> -> vector<256x256xf32>
    %c0_10 = arith.constant 0 : index
    %c0_11 = arith.constant 0 : index
    %9 = vector.load %arg5[%c0_10, %c0_11] : memref<3x256xf32, #tpu.memory_space<vmem>>, vector<3x256xf32>
    %10 = vector.extract_strided_slice %4 {offsets = [0, 0], sizes = [256, 1], strides = [1, 1]} : vector<256x3xf32> to vector<256x1xf32>
    %11 = vector.extract_strided_slice %9 {offsets = [0, 0], sizes = [1, 256], strides = [1, 1]} : vector<3x256xf32> to vector<1x256xf32>
    %12 = vector.broadcast %10 : vector<256x1xf32> to vector<256x256xf32>
    %13 = vector.broadcast %11 : vector<1x256xf32> to vector<256x256xf32>
    %14 = arith.mulf %12, %13 : vector<256x256xf32>
    %15 = arith.addf %6, %14 : vector<256x256xf32>
    %16 = vector.extract_strided_slice %4 {offsets = [0, 1], sizes = [256, 1], strides = [1, 1]} : vector<256x3xf32> to vector<256x1xf32>
    %17 = vector.extract_strided_slice %9 {offsets = [1, 0], sizes = [1, 256], strides = [1, 1]} : vector<3x256xf32> to vector<1x256xf32>
    %18 = vector.broadcast %16 : vector<256x1xf32> to vector<256x256xf32>
    %19 = vector.broadcast %17 : vector<1x256xf32> to vector<256x256xf32>
    %20 = arith.mulf %18, %19 : vector<256x256xf32>
    %21 = arith.addf %15, %20 : vector<256x256xf32>
    %22 = vector.extract_strided_slice %4 {offsets = [0, 2], sizes = [256, 1], strides = [1, 1]} : vector<256x3xf32> to vector<256x1xf32>
    %23 = vector.extract_strided_slice %9 {offsets = [2, 0], sizes = [1, 256], strides = [1, 1]} : vector<3x256xf32> to vector<1x256xf32>
    %24 = vector.broadcast %22 : vector<256x1xf32> to vector<256x256xf32>
    %25 = vector.broadcast %23 : vector<1x256xf32> to vector<256x256xf32>
    %26 = arith.mulf %24, %25 : vector<256x256xf32>
    %27 = arith.addf %21, %26 : vector<256x256xf32>
    %c0_12 = arith.constant 0 : index
    %c0_13 = arith.constant 0 : index
    %28 = vector.load %arg6[%c0_12, %c0_13] : memref<1x256xf32, #tpu.memory_space<vmem>>, vector<1x256xf32>
    %29 = vector.broadcast %28 : vector<1x256xf32> to vector<256x256xf32>
    %30 = arith.addf %27, %29 : vector<256x256xf32>
    %c0_14 = arith.constant 0 : index
    %c0_15 = arith.constant 0 : index
    %31 = vector.load %arg14[%c0_14, %c0_15] : memref<1x256xf32, #tpu.memory_space<vmem>>, vector<1x256xf32>
    %32 = vector.broadcast %31 : vector<1x256xf32> to vector<256x256xf32>
    %33 = arith.addf %8, %32 : vector<256x256xf32>
    %cst_16 = arith.constant 0.000000e+00 : f32
    %34 = vector.broadcast %cst_16 : f32 to vector<256x256xf32>
    %35 = arith.maximumf %30, %34 : vector<256x256xf32>
    %36 = arith.truncf %35 : vector<256x256xf32> to vector<256x256xbf16>
    %cst_17 = arith.constant 0.000000e+00 : f32
    %37 = vector.broadcast %cst_17 : f32 to vector<256x256xf32>
    %38 = arith.maximumf %33, %37 : vector<256x256xf32>
    %39 = arith.truncf %38 : vector<256x256xf32> to vector<256x256xbf16>
    %c0_18 = arith.constant 0 : index
    %c0_19 = arith.constant 0 : index
    %40 = vector.load %arg7[%c0_18, %c0_19] : memref<256x256xbf16, #tpu.memory_space<vmem>>, vector<256x256xbf16>
    %cst_20 = arith.constant dense<0.000000e+00> : vector<256x256xf32>
    %41 = tpu.matmul %36, %40, %cst_20 {dimension_numbers = #tpu.dot_dimension_numbers<[1], [0], [0], [1], [0, 0, 1, 1], [], []>} : vector<256x256xbf16>, vector<256x256xbf16>, vector<256x256xf32> -> vector<256x256xf32>
    %c0_21 = arith.constant 0 : index
    %c0_22 = arith.constant 0 : index
    %42 = vector.load %arg8[%c0_21, %c0_22] : memref<1x256xf32, #tpu.memory_space<vmem>>, vector<1x256xf32>
    %43 = vector.broadcast %42 : vector<1x256xf32> to vector<256x256xf32>
    %44 = arith.addf %41, %43 : vector<256x256xf32>
    %c0_23 = arith.constant 0 : index
    %c0_24 = arith.constant 0 : index
    %45 = vector.load %arg15[%c0_23, %c0_24] : memref<256x256xbf16, #tpu.memory_space<vmem>>, vector<256x256xbf16>
    %cst_25 = arith.constant dense<0.000000e+00> : vector<256x256xf32>
    %46 = tpu.matmul %39, %45, %cst_25 {dimension_numbers = #tpu.dot_dimension_numbers<[1], [0], [0], [1], [0, 0, 1, 1], [], []>} : vector<256x256xbf16>, vector<256x256xbf16>, vector<256x256xf32> -> vector<256x256xf32>
    %c0_26 = arith.constant 0 : index
    %c0_27 = arith.constant 0 : index
    %47 = vector.load %arg16[%c0_26, %c0_27] : memref<1x256xf32, #tpu.memory_space<vmem>>, vector<1x256xf32>
    %48 = vector.broadcast %47 : vector<1x256xf32> to vector<256x256xf32>
    %49 = arith.addf %46, %48 : vector<256x256xf32>
    %cst_28 = arith.constant 0.000000e+00 : f32
    %50 = vector.broadcast %cst_28 : f32 to vector<256x256xf32>
    %51 = arith.maximumf %44, %50 : vector<256x256xf32>
    %52 = arith.truncf %51 : vector<256x256xf32> to vector<256x256xbf16>
    %cst_29 = arith.constant 0.000000e+00 : f32
    %53 = vector.broadcast %cst_29 : f32 to vector<256x256xf32>
    %54 = arith.maximumf %49, %53 : vector<256x256xf32>
    %55 = arith.truncf %54 : vector<256x256xf32> to vector<256x256xbf16>
    %c0_30 = arith.constant 0 : index
    %c0_31 = arith.constant 0 : index
    %56 = vector.load %arg9[%c0_30, %c0_31] : memref<256x256xbf16, #tpu.memory_space<vmem>>, vector<256x256xbf16>
    %cst_32 = arith.constant dense<0.000000e+00> : vector<256x256xf32>
    %57 = tpu.matmul %52, %56, %cst_32 {dimension_numbers = #tpu.dot_dimension_numbers<[1], [0], [0], [1], [0, 0, 1, 1], [], []>} : vector<256x256xbf16>, vector<256x256xbf16>, vector<256x256xf32> -> vector<256x256xf32>
    %c0_33 = arith.constant 0 : index
    %c0_34 = arith.constant 0 : index
    %58 = vector.load %arg10[%c0_33, %c0_34] : memref<1x256xf32, #tpu.memory_space<vmem>>, vector<1x256xf32>
    %59 = vector.broadcast %58 : vector<1x256xf32> to vector<256x256xf32>
    %60 = arith.addf %57, %59 : vector<256x256xf32>
    %c0_35 = arith.constant 0 : index
    %c0_36 = arith.constant 0 : index
    %61 = vector.load %arg17[%c0_35, %c0_36] : memref<256x256xbf16, #tpu.memory_space<vmem>>, vector<256x256xbf16>
    %cst_37 = arith.constant dense<0.000000e+00> : vector<256x256xf32>
    %62 = tpu.matmul %55, %61, %cst_37 {dimension_numbers = #tpu.dot_dimension_numbers<[1], [0], [0], [1], [0, 0, 1, 1], [], []>} : vector<256x256xbf16>, vector<256x256xbf16>, vector<256x256xf32> -> vector<256x256xf32>
    %c0_38 = arith.constant 0 : index
    %c0_39 = arith.constant 0 : index
    %63 = vector.load %arg18[%c0_38, %c0_39] : memref<1x256xf32, #tpu.memory_space<vmem>>, vector<1x256xf32>
    %64 = vector.broadcast %63 : vector<1x256xf32> to vector<256x256xf32>
    %65 = arith.addf %62, %64 : vector<256x256xf32>
    %cst_40 = arith.constant 0.000000e+00 : f32
    %66 = vector.broadcast %cst_40 : f32 to vector<256x256xf32>
    %67 = arith.maximumf %60, %66 : vector<256x256xf32>
    %68 = arith.truncf %67 : vector<256x256xf32> to vector<256x256xbf16>
    %cst_41 = arith.constant 0.000000e+00 : f32
    %69 = vector.broadcast %cst_41 : f32 to vector<256x256xf32>
    %70 = arith.maximumf %65, %69 : vector<256x256xf32>
    %71 = arith.truncf %70 : vector<256x256xf32> to vector<256x256xbf16>
    %c0_42 = arith.constant 0 : index
    %c0_43 = arith.constant 0 : index
    %72 = vector.load %arg11[%c0_42, %c0_43] : memref<256x3xbf16, #tpu.memory_space<vmem>>, vector<256x3xbf16>
    %cst_44 = arith.constant dense<0.000000e+00> : vector<256x3xf32>
    %73 = tpu.matmul %68, %72, %cst_44 {dimension_numbers = #tpu.dot_dimension_numbers<[1], [0], [0], [1], [0, 0, 1, 1], [], []>} : vector<256x256xbf16>, vector<256x3xbf16>, vector<256x3xf32> -> vector<256x3xf32>
    %c0_45 = arith.constant 0 : index
    %c0_46 = arith.constant 0 : index
    %74 = vector.load %arg12[%c0_45, %c0_46] : memref<1x3xf32, #tpu.memory_space<vmem>>, vector<1x3xf32>
    %75 = vector.broadcast %74 : vector<1x3xf32> to vector<256x3xf32>
    %76 = arith.addf %73, %75 : vector<256x3xf32>
    %77 = arith.negf %76 : vector<256x3xf32>
    %78 = math.exp %77 : vector<256x3xf32>
    %cst_47 = arith.constant 1.000000e+00 : f32
    %79 = vector.broadcast %cst_47 : f32 to vector<256x3xf32>
    %80 = arith.addf %79, %78 : vector<256x3xf32>
    %81 = arith.divf %79, %80 : vector<256x3xf32>
    %c0_48 = arith.constant 0 : index
    %c0_49 = arith.constant 0 : index
    %82 = vector.load %arg19[%c0_48, %c0_49] : memref<256x3xbf16, #tpu.memory_space<vmem>>, vector<256x3xbf16>
    %cst_50 = arith.constant dense<0.000000e+00> : vector<256x3xf32>
    %83 = tpu.matmul %71, %82, %cst_50 {dimension_numbers = #tpu.dot_dimension_numbers<[1], [0], [0], [1], [0, 0, 1, 1], [], []>} : vector<256x256xbf16>, vector<256x3xbf16>, vector<256x3xf32> -> vector<256x3xf32>
    %c0_51 = arith.constant 0 : index
    %c0_52 = arith.constant 0 : index
    %84 = vector.load %arg20[%c0_51, %c0_52] : memref<1x3xf32, #tpu.memory_space<vmem>>, vector<1x3xf32>
    %85 = vector.broadcast %84 : vector<1x3xf32> to vector<256x3xf32>
    %86 = arith.addf %83, %85 : vector<256x3xf32>
    %cst_53 = arith.constant 3.000000e+00 : f32
    %87 = vector.broadcast %cst_53 : f32 to vector<256x3xf32>
    %88 = arith.minimumf %86, %87 : vector<256x3xf32>
    %89 = math.exp %88 : vector<256x3xf32>
    %90 = arith.mulf %81, %89 : vector<256x3xf32>
    %cst_54 = arith.constant 1.292000e+01 : f32
    %91 = vector.broadcast %cst_54 : f32 to vector<256x3xf32>
    %92 = arith.mulf %91, %90 : vector<256x3xf32>
    %cst_55 = arith.constant 1.1920929E-7 : f32
    %93 = vector.broadcast %cst_55 : f32 to vector<256x3xf32>
    %94 = arith.maximumf %90, %93 : vector<256x3xf32>
    %95 = math.log %94 : vector<256x3xf32>
    %cst_56 = arith.constant 0.416666657 : f32
    %96 = vector.broadcast %cst_56 : f32 to vector<256x3xf32>
    %97 = arith.mulf %95, %96 : vector<256x3xf32>
    %98 = math.exp %97 : vector<256x3xf32>
    %cst_57 = arith.constant 1.055000e+00 : f32
    %99 = vector.broadcast %cst_57 : f32 to vector<256x3xf32>
    %100 = arith.mulf %99, %98 : vector<256x3xf32>
    %cst_58 = arith.constant 5.500000e-02 : f32
    %101 = vector.broadcast %cst_58 : f32 to vector<256x3xf32>
    %102 = arith.subf %100, %101 : vector<256x3xf32>
    %cst_59 = arith.constant 3.130800e-03 : f32
    %103 = vector.broadcast %cst_59 : f32 to vector<256x3xf32>
    %104 = arith.cmpf ole, %90, %103 : vector<256x3xf32>
    %105 = arith.select %104, %92, %102 : vector<256x3xi1>, vector<256x3xf32>
    %cst_60 = arith.constant 1.292000e+01 : f32
    %106 = vector.broadcast %cst_60 : f32 to vector<256x3xf32>
    %107 = arith.mulf %106, %105 : vector<256x3xf32>
    %cst_61 = arith.constant 1.1920929E-7 : f32
    %108 = vector.broadcast %cst_61 : f32 to vector<256x3xf32>
    %109 = arith.maximumf %105, %108 : vector<256x3xf32>
    %110 = math.log %109 : vector<256x3xf32>
    %cst_62 = arith.constant 0.416666657 : f32
    %111 = vector.broadcast %cst_62 : f32 to vector<256x3xf32>
    %112 = arith.mulf %110, %111 : vector<256x3xf32>
    %113 = math.exp %112 : vector<256x3xf32>
    %cst_63 = arith.constant 1.055000e+00 : f32
    %114 = vector.broadcast %cst_63 : f32 to vector<256x3xf32>
    %115 = arith.mulf %114, %113 : vector<256x3xf32>
    %cst_64 = arith.constant 5.500000e-02 : f32
    %116 = vector.broadcast %cst_64 : f32 to vector<256x3xf32>
    %117 = arith.subf %115, %116 : vector<256x3xf32>
    %cst_65 = arith.constant 3.130800e-03 : f32
    %118 = vector.broadcast %cst_65 : f32 to vector<256x3xf32>
    %119 = arith.cmpf ole, %105, %118 : vector<256x3xf32>
    %120 = arith.select %119, %107, %117 : vector<256x3xi1>, vector<256x3xf32>
    %c0_66 = arith.constant 0 : index
    %c0_67 = arith.constant 0 : index
    %121 = vector.load %arg21[%c0_66, %c0_67] : memref<256x3xf32, #tpu.memory_space<vmem>>, vector<256x3xf32>
    tpu.vector_store %arg21[%c0_66, %c0_67], %120 {strides = array<i32>} : memref<256x3xf32, #tpu.memory_space<vmem>>, vector<256x3xf32>,
    return
  }
  func.func @transform_0(%arg0: i32) -> (i32, i32) {
    %c0_i32 = arith.constant 0 : i32
    %c0_i32_0 = arith.constant 0 : i32
    return %arg0, %c0_i32 : i32, i32
  }
  func.func @transform_1(%arg0: i32) -> (i32, i32) {
    %c0_i32 = arith.constant 0 : i32
    %c0_i32_0 = arith.constant 0 : i32
    return %arg0, %c0_i32 : i32, i32
  }
  func.func @transform_2(%arg0: i32) -> (i32, i32) {
    %c0_i32 = arith.constant 0 : i32
    %c0_i32_0 = arith.constant 0 : i32
    return %arg0, %c0_i32 : i32, i32
  }
  func.func @transform_3(%arg0: i32) -> (i32, i32) {
    %c0_i32 = arith.constant 0 : i32
    %c0_i32_0 = arith.constant 0 : i32
    %c0_i32_1 = arith.constant 0 : i32
    return %c0_i32, %c0_i32_0 : i32, i32
  }
  func.func @transform_4(%arg0: i32) -> (i32, i32) {
    %c0_i32 = arith.constant 0 : i32
    %c0_i32_0 = arith.constant 0 : i32
    %c0_i32_1 = arith.constant 0 : i32
    return %c0_i32, %c0_i32_0 : i32, i32
  }
  func.func @transform_5(%arg0: i32) -> (i32, i32) {
    %c0_i32 = arith.constant 0 : i32
    %c0_i32_0 = arith.constant 0 : i32
    %c0_i32_1 = arith.constant 0 : i32
    return %c0_i32, %c0_i32_0 : i32, i32
  }
  func.func @transform_6(%arg0: i32) -> (i32, i32) {
    %c0_i32 = arith.constant 0 : i32
    %c0_i32_0 = arith.constant 0 : i32
    %c0_i32_1 = arith.constant 0 : i32
    return %c0_i32, %c0_i32_0 : i32, i32
  }
  func.func @transform_7(%arg0: i32) -> (i32, i32) {
    %c0_i32 = arith.constant 0 : i32
    %c0_i32_0 = arith.constant 0 : i32
    %c0_i32_1 = arith.constant 0 : i32
    return %c0_i32, %c0_i32_0 : i32, i32
  }
  func.func @transform_8(%arg0: i32) -> (i32, i32) {
    %c0_i32 = arith.constant 0 : i32
    %c0_i32_0 = arith.constant 0 : i32
    %c0_i32_1 = arith.constant 0 : i32
    return %c0_i32, %c0_i32_0 : i32, i32
  }
  func.func @transform_9(%arg0: i32) -> (i32, i32) {
    %c0_i32 = arith.constant 0 : i32
    %c0_i32_0 = arith.constant 0 : i32
    %c0_i32_1 = arith.constant 0 : i32
    return %c0_i32, %c0_i32_0 : i32, i32
  }
  func.func @transform_10(%arg0: i32) -> (i32, i32) {
    %c0_i32 = arith.constant 0 : i32
    %c0_i32_0 = arith.constant 0 : i32
    %c0_i32_1 = arith.constant 0 : i32
    return %c0_i32, %c0_i32_0 : i32, i32
  }
  func.func @transform_11(%arg0: i32) -> (i32, i32) {
    %c0_i32 = arith.constant 0 : i32
    %c0_i32_0 = arith.constant 0 : i32
    %c0_i32_1 = arith.constant 0 : i32
    return %c0_i32, %c0_i32_0 : i32, i32
  }
  func.func @transform_12(%arg0: i32) -> (i32, i32) {
    %c0_i32 = arith.constant 0 : i32
    %c0_i32_0 = arith.constant 0 : i32
    %c0_i32_1 = arith.constant 0 : i32
    return %c0_i32, %c0_i32_0 : i32, i32
  }
  func.func @transform_13(%arg0: i32) -> (i32, i32) {
    %c0_i32 = arith.constant 0 : i32
    %c0_i32_0 = arith.constant 0 : i32
    %c0_i32_1 = arith.constant 0 : i32
    return %c0_i32, %c0_i32_0 : i32, i32
  }
  func.func @transform_14(%arg0: i32) -> (i32, i32) {
    %c0_i32 = arith.constant 0 : i32
    %c0_i32_0 = arith.constant 0 : i32
    %c0_i32_1 = arith.constant 0 : i32
    return %c0_i32, %c0_i32_0 : i32, i32
  }
  func.func @transform_15(%arg0: i32) -> (i32, i32) {
    %c0_i32 = arith.constant 0 : i32
    %c0_i32_0 = arith.constant 0 : i32
    %c0_i32_1 = arith.constant 0 : i32
    return %c0_i32, %c0_i32_0 : i32, i32
  }
  func.func @transform_16(%arg0: i32) -> (i32, i32) {
    %c0_i32 = arith.constant 0 : i32
    %c0_i32_0 = arith.constant 0 : i32
    %c0_i32_1 = arith.constant 0 : i32
    return %c0_i32, %c0_i32_0 : i32, i32
  }
  func.func @transform_17(%arg0: i32) -> (i32, i32) {
    %c0_i32 = arith.constant 0 : i32
    %c0_i32_0 = arith.constant 0 : i32
    %c0_i32_1 = arith.constant 0 : i32
    return %c0_i32, %c0_i32_0 : i32, i32
  }
  func.func @transform_18(%arg0: i32) -> (i32, i32) {
    %c0_i32 = arith.constant 0 : i32
    %c0_i32_0 = arith.constant 0 : i32
    %c0_i32_1 = arith.constant 0 : i32
    return %c0_i32, %c0_i32_0 : i32, i32
  }
  func.func @transform_19(%arg0: i32) -> (i32, i32) {
    %c0_i32 = arith.constant 0 : i32
    %c0_i32_0 = arith.constant 0 : i32
    %c0_i32_1 = arith.constant 0 : i32
    return %c0_i32, %c0_i32_0 : i32, i32
  }
  func.func @transform_20(%arg0: i32) -> (i32, i32) {
    %c0_i32 = arith.constant 0 : i32
    %c0_i32_0 = arith.constant 0 : i32
    return %arg0, %c0_i32 : i32, i32
  }
}

</mosaic_0001>

<bundles_post_ra>
// kernel: _forward_impl.1
= control target key start
LH: loop header
LB: loop body
LE: loop exit
PB: predicated region body
PF: predicated region fallthrough
CT: control target
= control target key end

     0   :  { %s11439_s0 = inlined_call_operand.vmem [shape: f32[512,256], index: 0, kind: input, shape index: {}]   ;;  %s11440_s1 = inlined_call_operand.vmem [shape: f32[512,3], index: 1, kind: input, shape index: {}]   ;;  %s11441_s2 = inlined_call_operand.vmem [shape: f32[512,144], index: 2, kind: input, shape index: {}]   ;;  %s11442_s3 = inlined_call_operand.vmem [shape: bf16[256,256], index: 3, kind: input, shape index: {}]   ;;  %s11443_s4 = inlined_call_operand.vmem [shape: f32[3,256], index: 4, kind: input, shape index: {}]   ;;  %s11444_s5 = inlined_call_operand.vmem [shape: f32[1,256], index: 5, kind: input, shape index: {}]   ;;  %s11445_s6 = inlined_call_operand.vmem [shape: bf16[256,256], index: 6, kind: input, shape index: {}]   ;;  %s11446_s7 = inlined_call_operand.vmem [shape: f32[1,256], index: 7, kind: input, shape index: {}]   ;;  %s11447_s8 = inlined_call_operand.vmem [shape: bf16[256,256], index: 8, kind: input, shape index: {}]   ;;  %s11448_s9 = inlined_call_operand.vmem [shape: f32[1,256], index: 9, kind: input, shape index: {}]   ;;  %s11449_s10 = inlined_call_operand.vmem [shape: bf16[256,3], index: 10, kind: input, shape index: {}]   ;;  %s11450_s11 = inlined_call_operand.vmem [shape: f32[1,3], index: 11, kind: input, shape index: {}]   ;;  %s11451_s12 = inlined_call_operand.vmem [shape: bf16[144,256], index: 12, kind: input, shape index: {}]   ;;  %s11452_s13 = inlined_call_operand.vmem [shape: f32[1,256], index: 13, kind: input, shape index: {}]   ;;  %s11453_s14 = inlined_call_operand.vmem [shape: bf16[256,256], index: 14, kind: input, shape index: {}]   ;;  %s11454_s15 = inlined_call_operand.vmem [shape: f32[1,256], index: 15, kind: input, shape index: {}]   ;;  %s11455_s16 = inlined_call_operand.vmem [shape: bf16[256,256], index: 16, kind: input, shape index: {}]   ;;  %s11456_s17 = inlined_call_operand.vmem [shape: f32[1,256], index: 17, kind: input, shape index: {}]   ;;  %s11457_s18 = inlined_call_operand.vmem [shape: bf16[256,3], index: 18, kind: input, shape index: {}]   ;;  %s11458_s19 = inlined_call_operand.vmem [shape: f32[1,3], index: 19, kind: input, shape index: {}]   ;;  %s11459_s20 = inlined_call_operand.vmem [shape: f32[512,3], index: 20, kind: output, shape index: {}]  }
   0x1   :  { %11485 = sst [smem:[#allocation100_spill]] %s11439_s0 }
   0x2   :  { %11486 = sst [smem:[#allocation101_spill]] %s11440_s1  ;;  %s7940_s1 = smov 0  }
   0x3   :  { %11487 = sst [smem:[#allocation102_spill]] %s11441_s2 }
   0x4   :  { %11488 = sst [smem:[#allocation103_spill]] %s11442_s3 }
   0x5   :  { %11489 = sst [smem:[#allocation104_spill]] %s11443_s4 }
   0x6 LB: > { %11490 = sst [smem:[#allocation2_spill]] %s7830_s1  ;;  %s6416_s22 = sadd.s32 4294967295, %s7830_s1   ;;  %s7830_s1 = sphi %s7940_s1, %s30_s1  }
   0x7   : > { %p6420_p0 = scmp.ge.s32.totalorder %s7830_s1, 1  ;;  %p587_p1 = scmp.lt.s32.totalorder %s7830_s1, 3 }
   0x9   : > { %p588_p2 = pnand %p6420_p0, %p587_p1 }
   0xb   : > { %591 = sbr.rel (%p588_p2) target bundleno = 1324 (0x52c), region = 100 }
  0x12   : > { %s11491_s2 = sld [smem:[#allocation103_spill]]  ;;  %s6421_s25 = sshll.u32 %s6416_s22, 5  ;;  %v11475_v2 = vmov 1   ;;  %v11465_v4 = vmov 2   ;;  %v7100_v17 = vld [vmem:[%s11451_s12 + $0x4] ss:$8 sps:$4 sm:$0xff]  }
  0x13   : > { %7010 = vset.pattern.permute.xlu1 %v11475_v2  ;;  %p658_p3 = scmp.lt.s32.totalorder %s6421_s25, 63  ;;  %7011 = vset.pattern.permute.xlu0 %v11465_v4  ;;  %s11492_s24 = sld [smem:[#allocation101_spill]]  ;;  %v7102_v18 = vld [vmem:[%s11451_s12] ss:$8 sps:$4 sm:$0xff]   ;;  %v11463_v21 = vmov 0   ;;  %vm2281_vm0 = vcmask 130048  }
  0x14   : > { %2330 = vmatprep.subr.bf16.mxu1 %v7100_v17  ;;  %v7106_v22 = vld [vmem:[%s11451_s12 + $0x14] ss:$8 sps:$4 sm:$0xff]   ;;  %v7108_v23 = vld [vmem:[%s11451_s12 + $0x10] ss:$8 sps:$4 sm:$0xff]   ;;  %v7112_v26 = vld [vmem:[%s11451_s12 + $0x24] ss:$8 sps:$4 sm:$0xff]  }
  0x15   : > { %s11755_s25 = smov (!%p658_p3, %s6421_s25), 63  ;;  %2331 = vmatpush1.bf16.msra.mxu1 %v7102_v18  ;;  %v7114_v27 = vld [vmem:[%s11451_s12 + $0x20] ss:$8 sps:$4 sm:$0xff]   ;;  %v7118_v28 = vld [vmem:[%s11451_s12 + $0x34] ss:$8 sps:$4 sm:$0xff]   ;;  %s11493_s23 = sld [smem:[#allocation100_spill]] }
  0x16   : > { %s11461_s21 = sshll.u32 %s11755_s25, 3  ;;  %2332 = vmatprep.subr.bf16.mxu1 %v7106_v22  ;;  %s6757_s0 = sshll.u32 %s11755_s25, 4  ;;  %v7120_v32 = vld [vmem:[%s11451_s12 + $0x30] ss:$8 sps:$4 sm:$0xff]   ;;  %v7124_v33 = vld [vmem:[%s11451_s12 + $0x44] ss:$8 sps:$4 sm:$0xff]  }
  0x17   : > { %v7126_v39 = vld [vmem:[%s11451_s12 + $0x40] ss:$8 sps:$4 sm:$0xff]   ;;  %v7127_v40 = vld [vmem:[%s11451_s12 + $0x54] ss:$8 sps:$4 sm:$0xff]   ;;  %s11494_s4 = sld [smem:[#allocation102_spill]]  ;;  %vm6303_vm9 = vcmask 23552  }
  0x18   : > { %v7064_v0 = vld [vmem:[%s11491_s2 + $0x4] ss:$8 sps:$4 sm:$0xff]   ;;  %v7066_v1 = vld [vmem:[%s11491_s2] ss:$8 sps:$4 sm:$0xff]   ;;  %v7067_v3 = vld [vmem:[%s11491_s2 + $0x14] ss:$8 sps:$4 sm:$0xff]  }
  0x19   : > { %1362 = vmatprep.subr.bf16.mxu0 %v7064_v0  ;;  %v7069_v5 = vld [vmem:[%s11491_s2 + $0x10] ss:$8 sps:$4 sm:$0xff]   ;;  %v7070_v6 = vld [vmem:[%s11491_s2 + $0x24] ss:$8 sps:$4 sm:$0xff]   ;;  %s7973_s3 = scalar_lea.vmem %s11492_s24, %s11461_s21  ;;  %v7072_v8 = vld [vmem:[%s11491_s2 + $0x20] ss:$8 sps:$4 sm:$0xff]   ;;  %2333 = vmatpush1.bf16.msra.mxu1 %v7108_v23 }
  0x1a   : > { %1363 = vmatpush1.bf16.msra.mxu0 %v7066_v1  ;;  %v876_v7 = vld [vmem:[%s7973_s3] sm:$0xff]  ;;  %v7073_v9 = vld [vmem:[%s11491_s2 + $0x34] ss:$8 sps:$4 sm:$0xff]   ;;  %v877_v10 = vld [vmem:[%s7973_s3 + $0x8] sm:$0xff]  ;;  %2334 = vmatprep.subr.bf16.mxu1 %v7112_v26  ;;  %s11500_s24 = sld [smem:[#allocation104_spill]] }
  0x1b   : > { %1364 = vmatprep.subr.bf16.mxu0 %v7067_v3  ;;  %1556 = vperm.xlu1 %7010, %v876_v7   ;;  %v7075_v11 = vld [vmem:[%s11491_s2 + $0x30] ss:$8 sps:$4 sm:$0xff]   ;;  %v7076_v12 = vld [vmem:[%s11491_s2 + $0x44] ss:$8 sps:$4 sm:$0xff]   ;;  %v7078_v14 = vld [vmem:[%s11491_s2 + $0x40] ss:$8 sps:$4 sm:$0xff]   ;;  %s8043_s21 = scalar_lea.vmem %s11493_s23, %s6757_s0 }
  0x1c   : > { %1830 = vperm.xlu0 %7011, %v876_v7   ;;  %v878_v13 = vld [vmem:[%s7973_s3 + $0x10] sm:$0xff]  ;;  %v7998_v16 = vld [vmem:[%s7973_s3 + $0x20] sm:$0xff]  ;;  %v879_v30 = vld [vmem:[%s7973_s3 + $0x18] sm:$0xff] }
  0x1d   : > { %v7079_v15 = vld [vmem:[%s11491_s2 + $0x54] ss:$8 sps:$4 sm:$0xff]   ;;  %v7081_v19 = vld [vmem:[%s11491_s2 + $0x50] ss:$8 sps:$4 sm:$0xff]   ;;  %v7082_v20 = vld [vmem:[%s11491_s2 + $0x64] ss:$8 sps:$4 sm:$0xff]   ;;  %2335 = vmatpush1.bf16.msra.mxu1 %v7114_v27  ;;  %s8085_s29 = scalar_lea.vmem %s11494_s4, %s6757_s0 }
  0x1e   : > { %1365 = vmatpush1.bf16.msra.mxu0 %v7069_v5  ;;  %v7084_v24 = vld [vmem:[%s11491_s2 + $0x60] ss:$8 sps:$4 sm:$0xff]   ;;  %v7085_v25 = vld [vmem:[%s11491_s2 + $0x74] ss:$8 sps:$4 sm:$0xff]   ;;  %v7087_v29 = vld [vmem:[%s11491_s2 + $0x70] ss:$8 sps:$4 sm:$0xff]   ;;  %2336 = vmatprep.subr.bf16.mxu1 %v7118_v28 }
  0x1f   : > { %1366 = vmatprep.subr.bf16.mxu0 %v7070_v6  ;;  %1560 = vperm.xlu1 %7010, %v877_v10   ;;  %v7088_v31 = vld [vmem:[%s11491_s2 + $0x84] ss:$8 sps:$4 sm:$0xff]   ;;  %v687_v35 = vld [vmem:[%s8043_s21 + $0x18] sm:$0xff]  ;;  %v7090_v36 = vld [vmem:[%s11491_s2 + $0x80] ss:$8 sps:$4 sm:$0xff]  }
  0x20   : > { %1838 = vperm.xlu0 %7011, %v878_v13   ;;  %v685_v34 = vld [vmem:[%s8043_s21 + $0x8] sm:$0xff]  ;;  %v7091_v38 = vld [vmem:[%s11491_s2 + $0x94] ss:$8 sps:$4 sm:$0xff]   ;;  %v7093_v41 = vld [vmem:[%s11491_s2 + $0x90] ss:$8 sps:$4 sm:$0xff]  }
  0x21   : > { %v749_v37 = vpack.c.bf16 %v687_v35, %v685_v34  ;;  %2337 = vmatpush1.bf16.msra.mxu1 %v7120_v32  ;;  %v7094_v42 = vld [vmem:[%s11491_s2 + $0xa4] ss:$8 sps:$4 sm:$0xff]   ;;  %v7129_v44 = vld [vmem:[%s11451_s12 + $0x50] ss:$8 sps:$4 sm:$0xff]   ;;  %v7096_v46 = vld [vmem:[%s11491_s2 + $0xa0] ss:$8 sps:$4 sm:$0xff]  }
  0x22   : > { %1367 = vmatpush1.bf16.msra.mxu0 %v7072_v8  ;;  %2338 = vmatprep.subr.bf16.mxu1 %v7124_v33  ;;  %v881_v43 = vld [vmem:[%s7973_s3 + $0x28] sm:$0xff]  ;;  %v7097_v47 = vld [vmem:[%s11491_s2 + $0xb4] ss:$8 sps:$4 sm:$0xff]   ;;  %v7099_v54 = vld [vmem:[%s11491_s2 + $0xb0] ss:$8 sps:$4 sm:$0xff]  }
  0x23   : > { %1368 = vmatprep.subr.bf16.mxu0 %v7073_v9  ;;  %7012 = vset.pattern.permute.xlu1 %v11465_v4  ;;  %v7130_v45 = vld [vmem:[%s11451_s12 + $0x64] ss:$8 sps:$4 sm:$0xff]   ;;  %v783_v49 = vld [vmem:[%s8085_s29 + $0x18] sm:$0xff]  ;;  %v7132_v51 = vld [vmem:[%s11451_s12 + $0x60] ss:$8 sps:$4 sm:$0xff]  }
  0x24   : > { %1834 = vperm.xlu1 %7012, %v877_v10   ;;  %1846 = vperm.xlu0 %7011, %v7998_v16   ;;  %v781_v48 = vld [vmem:[%s8085_s29 + $0x8] sm:$0xff]  ;;  %v8104_v50 = vld [vmem:[%s7973_s3 + $0x38] sm:$0xff]  ;;  %v780_v62 = vld [vmem:[%s8085_s29] sm:$0xff] }
  0x25   : > { %1394 = vmatprep.mubr.bf16.mxu0 %v749_v37  ;;  %2339 = vmatpush1.bf16.msra.mxu1 %v7126_v39  ;;  %v845_v52 = vpack.c.bf16 %v783_v49, %v781_v48  ;;  %v7133_v53 = vld [vmem:[%s11451_s12 + $0x74] ss:$8 sps:$4 sm:$0xff]   ;;  %v7103_v55 = vld [vmem:[%s11491_s2 + $0xc4] ss:$8 sps:$4 sm:$0xff]   ;;  %v7135_v56 = vld [vmem:[%s11451_s12 + $0x70] ss:$8 sps:$4 sm:$0xff]  }
  0x26   : > { %1369 = vmatpush1.bf16.msra.mxu0 %v7075_v11  ;;  %2340 = vmatprep.subr.bf16.mxu1 %v7127_v40  ;;  %v7136_v57 = vld [vmem:[%s11451_s12 + $0x84] ss:$8 sps:$4 sm:$0xff]   ;;  %v7105_v59 = vld [vmem:[%s11491_s2 + $0xc0] ss:$8 sps:$4 sm:$0xff]   ;;  %v7109_v60 = vld [vmem:[%s11491_s2 + $0xd4] ss:$8 sps:$4 sm:$0xff]  }
  0x27   : > { %1370 = vmatprep.subr.bf16.mxu0 %v7076_v12  ;;  %6481 = vmatprep.mubr.msk.bf16.mxu1 %vm2281_vm0, %v845_v52  ;;  %v8129_v58 = vld [vmem:[%s7973_s3 + $0x48] sm:$0xff]  ;;  %v782_v63 = vld [vmem:[%s8085_s29 + $0x10] sm:$0xff]  ;;  %v787_v1 = vld [vmem:[%s8085_s29 + $0x38] sm:$0xff] }
  0x28   : > { %7013 = vset.pattern.permute.xlu1 %v11463_v21  ;;  %7018 = vset.pattern.permute.xlu0 %v11463_v21  ;;  %v7138_v61 = vld [vmem:[%s11451_s12 + $0x80] ss:$8 sps:$4 sm:$0xff]   ;;  %v8146_v3 = vld [vmem:[%s7973_s3 + $0x58] sm:$0xff]  ;;  %v7115_v6 = vld [vmem:[%s11491_s2 + $0xe4] ss:$8 sps:$4 sm:$0xff]  }
  0x29   : > { %971 = vperm.xlu1 %7013, %v878_v13   ;;  %961 = vperm.xlu0 %7018, %v876_v7   ;;  %v785_v0 = vld [vmem:[%s8085_s29 + $0x28] sm:$0xff]  ;;  %v7111_v5 = vld [vmem:[%s11491_s2 + $0xd0] ss:$8 sps:$4 sm:$0xff]   ;;  %v844_v7 = vpack.c.bf16 %v782_v63, %v780_v62  ;;  %v684_v18 = vld [vmem:[%s8043_s21] sm:$0xff] }
  0x2a   : > { %1371 = vmatpush1.bf16.msra.mxu0 %v7078_v14  ;;  %2341 = vmatpush1.bf16.msra.mxu1 %v7129_v44  ;;  %v847_v8 = vpack.c.bf16 %v787_v1, %v785_v0  ;;  %v7117_v9 = vld [vmem:[%s11491_s2 + $0xe0] ss:$8 sps:$4 sm:$0xff]   ;;  %v882_v12 = vld [vmem:[%s7973_s3 + $0x30] sm:$0xff]  ;;  %v691_v22 = vld [vmem:[%s8043_s21 + $0x38] sm:$0xff] }
  0x2b   : > { %1372 = vmatprep.subr.bf16.mxu0 %v7079_v15  ;;  %2342 = vmatprep.subr.bf16.mxu1 %v7130_v45  ;;  %v8163_v11 = vld [vmem:[%s7973_s3 + $0x68] sm:$0xff]  ;;  %v786_v14 = vld [vmem:[%s8085_s29 + $0x30] sm:$0xff]  ;;  %v8181_v26 = vld [vmem:[%s7973_s3 + $0x78] sm:$0xff] }
  0x2c   : > { %v789_v15 = vld [vmem:[%s8085_s29 + $0x48] sm:$0xff]  ;;  %v7123_v17 = vld [vmem:[%s11491_s2 + $0xf0] ss:$8 sps:$4 sm:$0xff]   ;;  %v788_v28 = vld [vmem:[%s8085_s29 + $0x40] sm:$0xff] }
  0x2d   : > { %7014 = vset.pattern.permute.xlu1 %v11475_v2  ;;  %966 = vperm.xlu0 %7018, %v877_v10   ;;  %v7121_v10 = vld [vmem:[%s11491_s2 + $0xf4] ss:$8 sps:$4 sm:$0xff]   ;;  %v688_v32 = vld [vmem:[%s8043_s21 + $0x20] sm:$0xff]  ;;  %v693_v34 = vld [vmem:[%s8043_s21 + $0x48] sm:$0xff] }
  0x2e   : > { %1373 = vmatpush1.bf16.msra.mxu0 %v7081_v19  ;;  %1564 = vperm.xlu1 %7014, %v878_v13   ;;  %v784_v13 = vld [vmem:[%s8085_s29 + $0x20] sm:$0xff]  ;;  %v686_v19 = vld [vmem:[%s8043_s21 + $0x10] sm:$0xff]  ;;  %v695_v35 = vld [vmem:[%s8043_s21 + $0x58] sm:$0xff] }
  0x2f   : > { %1374 = vmatprep.subr.bf16.mxu0 %v7082_v20  ;;  %2343 = vmatpush1.bf16.msra.mxu1 %v7132_v51  ;;  %v689_v20 = vld [vmem:[%s8043_s21 + $0x28] sm:$0xff]  ;;  %v846_v23 = vpack.c.bf16 %v786_v14, %v784_v13  ;;  %v690_v33 = vld [vmem:[%s8043_s21 + $0x30] sm:$0xff]  ;;  %v884_v39 = vld [vmem:[%s7973_s3 + $0x40] sm:$0xff]  ;;  %v753_v40 = vpack.c.bf16 %v695_v35, %v693_v34 }
  0x30   : > { %2344 = vmatprep.subr.bf16.mxu1 %v7133_v53  ;;  %v751_v27 = vpack.c.bf16 %v691_v22, %v689_v20  ;;  %v799_v44 = vld [vmem:[%s8085_s29 + $0x98] sm:$0xff]  ;;  %v692_v45 = vld [vmem:[%s8043_s21 + $0x40] sm:$0xff]  ;;  %v697_v48 = vld [vmem:[%s8043_s21 + $0x68] sm:$0xff] }
  0x31   : > { %976 = vperm.xlu0 %7018, %v879_v30   ;;  %v699_v49 = vld [vmem:[%s8043_s21 + $0x78] sm:$0xff]  ;;  %v698_v62 = vld [vmem:[%s8043_s21 + $0x70] sm:$0xff]  ;;  %v700_v22 = vld [vmem:[%s8043_s21 + $0x80] sm:$0xff] }
  0x32   : > { %1375 = vmatpush1.bf16.msra.mxu0 %v7084_v24  ;;  %1568 = vperm.xlu1 %7014, %v879_v30   ;;  %v755_v53 = vpack.c.bf16 %v699_v49, %v697_v48  ;;  %v803_v63 = vld [vmem:[%s8085_s29 + $0xb8] sm:$0xff]  ;;  %v7159_v35 = vld [vmem:[%s11453_s14 + $0x24] ss:$8 sps:$4 sm:$0xff]  }
  0x33   : > { %1376 = vmatprep.subr.bf16.mxu0 %v7085_v25  ;;  %2345 = vmatpush1.bf16.msra.mxu1 %v7135_v56  ;;  %v748_v25 = vpack.c.bf16 %v686_v19, %v684_v18  ;;  %v7139_v56 = vld [vmem:[%s11445_s6] ss:$8 sps:$4 sm:$0xff]   ;;  %v7144_v0 = vld [vmem:[%s11445_s6 + $0x14] ss:$8 sps:$4 sm:$0xff]   ;;  %v7142_v1 = vld [vmem:[%s11445_s6 + $0x10] ss:$8 sps:$4 sm:$0xff]  }
  0x34   : > { %2346 = vmatprep.subr.bf16.mxu1 %v7136_v57  ;;  %v7141_v57 = vld [vmem:[%s11445_s6 + $0x4] ss:$8 sps:$4 sm:$0xff]   ;;  %v7153_v20 = vld [vmem:[%s11453_s14 + $0x14] ss:$8 sps:$4 sm:$0xff]  }
  0x35   : > { %986 = vperm.xlu0 %7018, %v881_v43   ;;  %v7150_v18 = vld [vmem:[%s11445_s6 + $0x24] ss:$8 sps:$4 sm:$0xff]   ;;  %v711_v48 = vld [vmem:[%s8043_s21 + $0xd8] sm:$0xff] }
  0x36   : > { %1377 = vmatpush1.bf16.msra.mxu0 %v7087_v29  ;;  %7015 = vset.pattern.permute.xlu1 %v11465_v4  ;;  %v790_v29 = vld [vmem:[%s8085_s29 + $0x50] sm:$0xff]  ;;  %v8259_v19 = vld [vmem:[%s7973_s3 + $0x80] sm:$0xff] }
  0x37   : > { %1378 = vmatprep.subr.bf16.mxu0 %v7088_v31  ;;  %1842 = vperm.xlu1 %7015, %v879_v30   ;;  %v793_v30 = vld [vmem:[%s8085_s29 + $0x68] sm:$0xff]  ;;  %v795_v31 = vld [vmem:[%s8085_s29 + $0x78] sm:$0xff]  ;;  %v8308_v49 = vld [vmem:[%s7973_s3 + $0xa0] sm:$0xff] }
  0x38   : > { %2347 = vmatpush1.bf16.msra.mxu1 %v7138_v61  ;;  %v851_v37 = vpack.c.bf16 %v795_v31, %v793_v30  ;;  %v696_v61 = vld [vmem:[%s8043_s21 + $0x60] sm:$0xff]  ;;  %v707_v30 = vld [vmem:[%s8043_s21 + $0xb8] sm:$0xff] }
  0x39   : > { %996 = vperm.xlu0 %7018, %v8104_v50   ;;  %2919 = vmatprep.subr.bf16.mxu1 %v7141_v57  ;;  %v754_v13 = vpack.c.bf16 %v698_v62, %v696_v61  ;;  %v7154_v31 = vld [vmem:[%s11445_s6 + $0x30] ss:$8 sps:$4 sm:$0xff]   ;;  %v7168_v62 = vld [vmem:[%s11445_s6 + $0x54] ss:$8 sps:$4 sm:$0xff]  }
  0x3a   : > { %1379 = vmatpush1.bf16.msra.mxu0 %v7090_v36  ;;  %v848_v36 = vpack.c.bf16 %v790_v29, %v788_v28  ;;  %v7156_v28 = vld [vmem:[%s11445_s6 + $0x34] ss:$8 sps:$4 sm:$0xff]   ;;  %v705_v29 = vld [vmem:[%s8043_s21 + $0xa8] sm:$0xff]  ;;  %v7166_v61 = vld [vmem:[%s11445_s6 + $0x50] ss:$8 sps:$4 sm:$0xff]  }
  0x3b   : > { %1380 = vmatprep.subr.bf16.mxu0 %v7091_v38  ;;  %7016 = vset.pattern.permute.xlu1 %v11463_v21  ;;  %v750_v38 = vpack.c.bf16 %v690_v33, %v688_v32  ;;  %v894_v33 = vld [vmem:[%s7973_s3 + $0x90] sm:$0xff] }
  0x3c   : > { %981 = vperm.xlu1 %7016, %v7998_v16   ;;  %2363 = vmatmul.mubr.bf16.vlgmr.msra.gmra.mrb[0].mxu1 %v844_v7  ;;  %v7147_v7 = vld [vmem:[%s11453_s14 + $0x4] ss:$8 sps:$4 sm:$0xff]  }
  0x3d   : > { %1006 = vperm.xlu0 %7018, %v8129_v58   ;;  %6482 = vmatprep.mubr.msk.bf16.mxu1 %vm2281_vm0, %v847_v8  ;;  %v701_v8 = vld [vmem:[%s8043_s21 + $0x88] sm:$0xff] }
  0x3e   : > { %1381 = vmatpush1.bf16.msra.mxu0 %v7093_v41  ;;  %v792_v41 = vld [vmem:[%s8085_s29 + $0x60] sm:$0xff]  ;;  %2920 = vmatpush1.bf16.msra.mxu1 %v7139_v56  ;;  %v8319_v56 = vld [vmem:[%s7973_s3 + $0x88] sm:$0xff] }
  0x3f   : > { %1382 = vmatprep.subr.bf16.mxu0 %v7094_v42  ;;  %v794_v42 = vld [vmem:[%s8085_s29 + $0x70] sm:$0xff]  ;;  %2921 = vmatprep.subr.bf16.mxu1 %v7144_v0  ;;  %v815_v0 = vld [vmem:[%s8085_s29 + $0x118] sm:$0xff] }
  0x40   : > { %7017 = vset.pattern.permute.xlu1 %v11475_v2  ;;  %v850_v51 = vpack.c.bf16 %v794_v42, %v792_v41  ;;  %v806_v41 = vld [vmem:[%s8085_s29 + $0xd0] sm:$0xff]  ;;  %v809_v42 = vld [vmem:[%s8085_s29 + $0xe8] sm:$0xff] }
  0x41   : > { %1572 = vperm.xlu1 %7017, %v7998_v16   ;;  %1016 = vperm.xlu0 %7018, %v8146_v3   ;;  %v791_v16 = vld [vmem:[%s8085_s29 + $0x58] sm:$0xff] }
  0x42   : > { %1383 = vmatpush1.bf16.msra.mxu0 %v7096_v46  ;;  %v849_v24 = vpack.c.bf16 %v791_v16, %v789_v15  ;;  %v694_v46 = vld [vmem:[%s8043_s21 + $0x50] sm:$0xff]  ;;  %2922 = vmatpush1.bf16.msra.mxu1 %v7142_v1  ;;  %v800_v15 = vld [vmem:[%s8085_s29 + $0xa0] sm:$0xff] }
  0x43   : > { %1384 = vmatprep.subr.bf16.mxu0 %v7097_v47  ;;  %v8207_v47 = vld [vmem:[%s7973_s3 + $0x50] sm:$0xff]  ;;  %v752_v52 = vpack.c.bf16 %v694_v46, %v692_v45  ;;  %2923 = vmatprep.subr.bf16.mxu1 %v7150_v18  ;;  %v709_v46 = vld [vmem:[%s8043_s21 + $0xc8] sm:$0xff] }
  0x44   : > { %2373 = vmatmul.mubr.bf16.gmra.mrb[4].mxu1 %v846_v23  ;;  %v802_v16 = vld [vmem:[%s8085_s29 + $0xb0] sm:$0xff]  ;;  %v761_v57 = vpack.c.bf16 %v711_v48, %v709_v46  ;;  %v8404_v46 = vld [vmem:[%s7973_s3 + $0xd8] sm:$0xff]  ;;  %v7181_v48 = vld [vmem:[%s11453_s14 + $0x60] ss:$8 sps:$4 sm:$0xff]  }
  0x45   : > { %1576 = vperm.xlu1 %7017, %v881_v43   ;;  %1026 = vperm.xlu0 %7018, %v8163_v11   ;;  %v702_v23 = vld [vmem:[%s8043_s21 + $0x90] sm:$0xff]  ;;  %v854_v32 = vpack.c.bf16 %v802_v16, %v800_v15  ;;  %v8351_v15 = vld [vmem:[%s7973_s3 + $0xa8] sm:$0xff] }
  0x46   : > { %1385 = vmatpush1.bf16.msra.mxu0 %v7099_v54  ;;  %6483 = vmatprep.mubr.msk.bf16.mxu1 %vm2281_vm0, %v849_v24  ;;  %v796_v54 = vld [vmem:[%s8085_s29 + $0x80] sm:$0xff]  ;;  %v805_v24 = vld [vmem:[%s8085_s29 + $0xc8] sm:$0xff]  ;;  %v706_v45 = vld [vmem:[%s8043_s21 + $0xb0] sm:$0xff] }
  0x47   : > { %1386 = vmatprep.subr.bf16.mxu0 %v7103_v55  ;;  %v8215_v55 = vld [vmem:[%s7973_s3 + $0x60] sm:$0xff]  ;;  %v710_v1 = vld [vmem:[%s8043_s21 + $0xd0] sm:$0xff] }
  0x48   : > { %v814_v18 = vld [vmem:[%s8085_s29 + $0x110] sm:$0xff] }
  0x49   : > { %7019 = vset.pattern.permute.xlu1 %v11465_v4  ;;  %1036 = vperm.xlu0 %7018, %v8181_v26  }
  0x4a   : > { %1387 = vmatpush1.bf16.msra.mxu0 %v7105_v59  ;;  %1850 = vperm.xlu1 %7019, %v881_v43   ;;  %v797_v43 = vld [vmem:[%s8085_s29 + $0x88] sm:$0xff]  ;;  %v798_v59 = vld [vmem:[%s8085_s29 + $0x90] sm:$0xff] }
  0x4b   : > { %1388 = vmatprep.subr.bf16.mxu0 %v7109_v60  ;;  %v801_v60 = vld [vmem:[%s8085_s29 + $0xa8] sm:$0xff] }
  0x4c   : > { %2383 = vmatmul.mubr.bf16.gmra.mrb[8].mxu1 %v848_v36  ;;  %v756_v36 = vpack.c.bf16 %v702_v23, %v700_v22  ;;  %v819_v22 = vld [vmem:[%s8085_s29 + $0x138] sm:$0xff]  ;;  %v7172_v23 = vld [vmem:[%s11445_s6 + $0x60] ss:$8 sps:$4 sm:$0xff]  }
  0x4d   : > { %7033 = vset.pattern.permute.xlu0 %v11465_v4  ;;  %6484 = vmatprep.mubr.msk.bf16.mxu1 %vm2281_vm0, %v851_v37  ;;  %v7157_v37 = vld [vmem:[%s11453_s14 + $0x20] ss:$8 sps:$4 sm:$0xff]  }
  0x4e   : > { %1389 = vmatpush1.bf16.msra.mxu0 %v7111_v5  ;;  %7020 = vset.pattern.permute.xlu1 %v11463_v21  ;;  %v8238_v5 = vld [vmem:[%s7973_s3 + $0x70] sm:$0xff] }
  0x4f   : > { %1390 = vmatprep.subr.bf16.mxu0 %v7115_v6  ;;  %991 = vperm.xlu1 %7020, %v882_v12   ;;  %v7145_v6 = vld [vmem:[%s11453_s14] ss:$8 sps:$4 sm:$0xff]  }
  0x50   : > { %1854 = vperm.xlu0 %7033, %v882_v12  }
  0x52   : > { %1391 = vmatpush1.bf16.msra.mxu0 %v7117_v9  ;;  %v703_v9 = vld [vmem:[%s8043_s21 + $0x98] sm:$0xff] }
  0x53   : > { %1392 = vmatprep.subr.bf16.mxu0 %v7121_v10  ;;  %7021 = vset.pattern.permute.xlu1 %v11475_v2  ;;  %v852_v10 = vpack.c.bf16 %v798_v59, %v796_v54  ;;  %v757_v14 = vpack.c.bf16 %v703_v9, %v701_v8  ;;  %v808_v59 = vld [vmem:[%s8085_s29 + $0xe0] sm:$0xff]  ;;  %v8340_v8 = vld [vmem:[%s7973_s3 + $0x98] sm:$0xff] }
  0x54   : > { %1580 = vperm.xlu1 %7021, %v882_v12   ;;  %1862 = vperm.xlu0 %7033, %v884_v39   ;;  %v855_v12 = vpack.c.bf16 %v803_v63, %v801_v60  ;;  %v810_v60 = vld [vmem:[%s8085_s29 + $0xf0] sm:$0xff]  ;;  %v813_v63 = vld [vmem:[%s8085_s29 + $0x108] sm:$0xff] }
  0x55   : > { %2393 = vmatmul.mubr.bf16.gmra.mrb[12].mxu1 %v850_v51  ;;  %v7165_v51 = vld [vmem:[%s11453_s14 + $0x34] ss:$8 sps:$4 sm:$0xff]   ;;  %v7169_v9 = vld [vmem:[%s11453_s14 + $0x40] ss:$8 sps:$4 sm:$0xff]  }
  0x56   : > { %1393 = vmatpush1.bf16.msra.mxu0 %v7123_v17  ;;  %v7148_v17 = vld [vmem:[%s11445_s6 + $0x20] ss:$8 sps:$4 sm:$0xff]  }
  0x57   : > { %3316 = vmatprep.subr.bf16.mxu0 %v7147_v7  ;;  %2924 = vmatpush1.bf16.msra.mxu1 %v7148_v17  ;;  %v715_v7 = vld [vmem:[%s8043_s21 + $0xf8] sm:$0xff]  ;;  %v812_v17 = vld [vmem:[%s8085_s29 + $0x100] sm:$0xff] }
  0x58   : > { %1584 = vperm.xlu1 %7021, %v8104_v50   ;;  %1870 = vperm.xlu0 %7033, %v8207_v47  }
  0x59   : > { %1395 = vmatmul.mubr.bf16.vlgmr.msra.gmra.mrb[0].mxu0 %v748_v25  ;;  %v807_v25 = vld [vmem:[%s8085_s29 + $0xd8] sm:$0xff]  ;;  %2925 = vmatprep.subr.bf16.mxu1 %v7156_v28  ;;  %v714_v28 = vld [vmem:[%s8043_s21 + $0xf0] sm:$0xff] }
  0x5a   : > { %1404 = vmatprep.mubr.bf16.mxu0 %v751_v27  ;;  %3317 = vmatpush1.bf16.msra.mxu0 %v7145_v6  ;;  %v7151_v27 = vld [vmem:[%s11453_s14 + $0x10] ss:$8 sps:$4 sm:$0xff]   ;;  %v857_v34 = vpack.c.bf16 %v807_v25, %v805_v24  ;;  %v713_v6 = vld [vmem:[%s8043_s21 + $0xe8] sm:$0xff] }
  0x5b   : > { %3318 = vmatprep.subr.bf16.mxu0 %v7153_v20  ;;  %2926 = vmatpush1.bf16.msra.mxu1 %v7154_v31  ;;  %v763_v16 = vpack.c.bf16 %v715_v7, %v713_v6  ;;  %v817_v20 = vld [vmem:[%s8085_s29 + $0x128] sm:$0xff]  ;;  %v7175_v25 = vld [vmem:[%s11453_s14 + $0x50] ss:$8 sps:$4 sm:$0xff]  }
  0x5c   : > { %7022 = vset.pattern.permute.xlu1 %v11465_v4  ;;  %1878 = vperm.xlu0 %7033, %v8215_v55   ;;  %v7174_v24 = vld [vmem:[%s11445_s6 + $0x64] ss:$8 sps:$4 sm:$0xff]   ;;  %v8378_v31 = vld [vmem:[%s7973_s3 + $0xb8] sm:$0xff]  ;;  %v8432_v6 = vld [vmem:[%s7973_s3 + $0xb0] sm:$0xff] }
  0x5d   : > { %1858 = vperm.xlu1 %7022, %v8104_v50   ;;  %v853_v50 = vpack.c.bf16 %v799_v44, %v797_v43  ;;  %v811_v43 = vld [vmem:[%s8085_s29 + $0xf8] sm:$0xff]  ;;  %v704_v44 = vld [vmem:[%s8043_s21 + $0xa0] sm:$0xff] }
  0x5e   : > { %3319 = vmatpush1.bf16.msra.mxu0 %v7151_v27  ;;  %v758_v54 = vpack.c.bf16 %v706_v45, %v704_v44  ;;  %v712_v27 = vld [vmem:[%s8043_s21 + $0xe0] sm:$0xff]  ;;  %v721_v44 = vld [vmem:[%s8043_s21 + $0x128] sm:$0xff]  ;;  %v723_v45 = vld [vmem:[%s8043_s21 + $0x138] sm:$0xff] }
  0x5f   : > { %6485 = vmatprep.mubr.msk.bf16.mxu1 %vm2281_vm0, %v853_v50  ;;  %3320 = vmatprep.subr.bf16.mxu0 %v7159_v35  ;;  %v7163_v50 = vld [vmem:[%s11453_s14 + $0x30] ss:$8 sps:$4 sm:$0xff]   ;;  %v762_v35 = vpack.c.bf16 %v714_v28, %v712_v27  ;;  %v7193_v27 = vld [vmem:[%s11453_s14 + $0x80] ss:$8 sps:$4 sm:$0xff]  }
  0x60   : > { %1886 = vperm.xlu0 %7033, %v8238_v5   ;;  %2403 = vmatmul.mubr.bf16.gmra.mrb[16].mxu1 %v852_v10  ;;  %v7171_v10 = vld [vmem:[%s11453_s14 + $0x44] ss:$8 sps:$4 sm:$0xff]   ;;  %v7187_v7 = vld [vmem:[%s11453_s14 + $0x70] ss:$8 sps:$4 sm:$0xff]  }
  0x61   : > { %1405 = vmatmul.mubr.bf16.gmra.mrb[4].mxu0 %v750_v38  ;;  %7023 = vset.pattern.permute.xlu1 %v11463_v21  ;;  %v7162_v38 = vld [vmem:[%s11445_s6 + $0x44] ss:$8 sps:$4 sm:$0xff]  }
  0x62   : > { %1414 = vmatprep.mubr.bf16.mxu0 %v753_v40  ;;  %1001 = vperm.xlu1 %7023, %v884_v39   ;;  %v804_v40 = vld [vmem:[%s8085_s29 + $0xc0] sm:$0xff] }
  0x63   : > { %6486 = vmatprep.mubr.msk.bf16.mxu1 %vm2281_vm0, %v855_v12  ;;  %2927 = vmatprep.subr.bf16.mxu1 %v7162_v38  ;;  %v858_v12 = vpack.c.bf16 %v810_v60, %v808_v59  ;;  %v816_v38 = vld [vmem:[%s8085_s29 + $0x120] sm:$0xff] }
  0x64   : > { %1894 = vperm.xlu0 %7033, %v8259_v19   ;;  %3321 = vmatpush1.bf16.msra.mxu0 %v7157_v37  ;;  %v7178_v37 = vld [vmem:[%s11445_s6 + $0x70] ss:$8 sps:$4 sm:$0xff]   ;;  %v7184_v59 = vld [vmem:[%s11445_s6 + $0x80] ss:$8 sps:$4 sm:$0xff]   ;;  %v7186_v60 = vld [vmem:[%s11445_s6 + $0x84] ss:$8 sps:$4 sm:$0xff]  }
  0x65   : > { %3322 = vmatprep.subr.bf16.mxu0 %v7165_v51  ;;  %v7183_v51 = vld [vmem:[%s11453_s14 + $0x64] ss:$8 sps:$4 sm:$0xff]  }
  0x66   : > { %7024 = vset.pattern.permute.xlu1 %v11475_v2  ;;  %v724_v28 = vld [vmem:[%s8043_s21 + $0x140] sm:$0xff] }
  0x67   : > { %1588 = vperm.xlu1 %7024, %v884_v39   ;;  %v759_v39 = vpack.c.bf16 %v707_v30, %v705_v29  ;;  %v717_v29 = vld [vmem:[%s8043_s21 + $0x108] sm:$0xff]  ;;  %v719_v30 = vld [vmem:[%s8043_s21 + $0x118] sm:$0xff] }
  0x68   : > { %1902 = vperm.xlu0 %7033, %v894_v33   ;;  %2413 = vmatmul.mubr.bf16.gmra.mrb[20].mxu1 %v854_v32  ;;  %v860_v32 = vpack.c.bf16 %v814_v18, %v812_v17  ;;  %v863_v33 = vpack.c.bf16 %v819_v22, %v817_v20  ;;  %v824_v17 = vld [vmem:[%s8085_s29 + $0x160] sm:$0xff]  ;;  %v826_v18 = vld [vmem:[%s8085_s29 + $0x170] sm:$0xff]  ;;  %v829_v20 = vld [vmem:[%s8085_s29 + $0x188] sm:$0xff] }
  0x69   : > { %1415 = vmatmul.mubr.bf16.gmra.mrb[8].mxu0 %v752_v52  ;;  %6487 = vmatprep.mubr.msk.bf16.mxu1 %vm2281_vm0, %v857_v34  ;;  %v856_v52 = vpack.c.bf16 %v806_v41, %v804_v40  ;;  %v7180_v34 = vld [vmem:[%s11445_s6 + $0x74] ss:$8 sps:$4 sm:$0xff]   ;;  %v821_v40 = vld [vmem:[%s8085_s29 + $0x148] sm:$0xff]  ;;  %v716_v41 = vld [vmem:[%s8043_s21 + $0x100] sm:$0xff] }
  0x6a   : > { %1424 = vmatprep.mubr.bf16.mxu0 %v755_v53  ;;  %v859_v53 = vpack.c.bf16 %v811_v43, %v809_v42  ;;  %3323 = vmatpush1.bf16.msra.mxu0 %v7163_v50  ;;  %v718_v42 = vld [vmem:[%s8043_s21 + $0x110] sm:$0xff]  ;;  %v823_v43 = vld [vmem:[%s8085_s29 + $0x158] sm:$0xff] }
  0x6b   : > { %1592 = vperm.xlu1 %7024, %v8129_v58   ;;  %3324 = vmatprep.subr.bf16.mxu0 %v7171_v10  ;;  %v865_v50 = vpack.c.bf16 %v823_v43, %v821_v40  ;;  %v831_v22 = vld [vmem:[%s8085_s29 + $0x198] sm:$0xff]  ;;  %v7196_v40 = vld [vmem:[%s11445_s6 + $0xa0] ss:$8 sps:$4 sm:$0xff]  }
  0x6c   : > { %1910 = vperm.xlu0 %7033, %v8308_v49   ;;  %v828_v43 = vld [vmem:[%s8085_s29 + $0x180] sm:$0xff] }
  0x6e   : > { %3325 = vmatpush1.bf16.msra.mxu0 %v7169_v9  ;;  %v7189_v9 = vld [vmem:[%s11453_s14 + $0x74] ss:$8 sps:$4 sm:$0xff]  }
  0x6f   : > { %7025 = vset.pattern.permute.xlu1 %v11465_v4 }
  0x70   : > { %1866 = vperm.xlu1 %7025, %v8129_v58   ;;  %v7160_v58 = vld [vmem:[%s11445_s6 + $0x40] ss:$8 sps:$4 sm:$0xff]   ;;  %7044 = vset.pattern.permute.xlu0 %v11463_v21 }
  0x71   : > { %1425 = vmatmul.mubr.bf16.gmra.mrb[12].mxu0 %v754_v13  ;;  %2928 = vmatpush1.bf16.msra.mxu1 %v7160_v58  ;;  %v861_v13 = vpack.c.bf16 %v815_v0, %v813_v63  ;;  %v765_v58 = vpack.c.bf16 %v719_v30, %v717_v29  ;;  %v720_v63 = vld [vmem:[%s8043_s21 + $0x120] sm:$0xff]  ;;  %v722_v0 = vld [vmem:[%s8043_s21 + $0x130] sm:$0xff]  ;;  %v729_v30 = vld [vmem:[%s8043_s21 + $0x168] sm:$0xff] }
  0x72   : > { %1434 = vmatprep.mubr.bf16.mxu0 %v757_v14  ;;  %2423 = vmatmul.mubr.bf16.gmra.mrb[24].mxu1 %v856_v52  ;;  %v764_v52 = vpack.c.bf16 %v718_v42, %v716_v41  ;;  %v7195_v29 = vld [vmem:[%s11453_s14 + $0x84] ss:$8 sps:$4 sm:$0xff]  }
  0x73   : > { %1046 = vperm.xlu0 %7044, %v8319_v56   ;;  %6488 = vmatprep.mubr.msk.bf16.mxu1 %vm2281_vm0, %v859_v53  ;;  %v767_v53 = vpack.c.bf16 %v723_v45, %v721_v44  ;;  %v830_v44 = vld [vmem:[%s8085_s29 + $0x190] sm:$0xff]  ;;  %v833_v45 = vld [vmem:[%s8085_s29 + $0x1a8] sm:$0xff] }
  0x74   : > { %7026 = vset.pattern.permute.xlu1 %v11463_v21  ;;  %2929 = vmatprep.subr.bf16.mxu1 %v7168_v62  ;;  %v827_v62 = vld [vmem:[%s8085_s29 + $0x178] sm:$0xff] }
  0x75   : > { %1011 = vperm.xlu1 %7026, %v8207_v47   ;;  %2930 = vmatpush1.bf16.msra.mxu1 %v7166_v61  ;;  %v825_v61 = vld [vmem:[%s8085_s29 + $0x168] sm:$0xff] }
  0x76   : > { %2931 = vmatprep.subr.bf16.mxu1 %v7174_v24  ;;  %v7190_v24 = vld [vmem:[%s11445_s6 + $0x90] ss:$8 sps:$4 sm:$0xff]  }
  0x77   : > { %1056 = vperm.xlu0 %7044, %v8340_v8  }
  0x79   : > { %1435 = vmatmul.mubr.bf16.gmra.mrb[16].mxu0 %v756_v36  ;;  %7027 = vset.pattern.permute.xlu1 %v11475_v2  ;;  %v8387_v36 = vld [vmem:[%s7973_s3 + $0xc8] sm:$0xff] }
  0x7a   : > { %1444 = vmatprep.mubr.bf16.mxu0 %v759_v39  ;;  %1596 = vperm.xlu1 %7027, %v8207_v47   ;;  %v708_v47 = vld [vmem:[%s8043_s21 + $0xc0] sm:$0xff]  ;;  %v818_v39 = vld [vmem:[%s8085_s29 + $0x130] sm:$0xff] }
  0x7b   : > { %v760_v14 = vpack.c.bf16 %v710_v1, %v708_v47  ;;  %2433 = vmatmul.mubr.bf16.gmra.mrb[28].mxu1 %v858_v12  ;;  %1066 = vperm.xlu0 %7044, %v8351_v15   ;;  %v725_v47 = vld [vmem:[%s8043_s21 + $0x148] sm:$0xff]  ;;  %v727_v1 = vld [vmem:[%s8043_s21 + $0x158] sm:$0xff]  ;;  %v867_v12 = vpack.c.bf16 %v827_v62, %v825_v61  ;;  %v868_v62 = vpack.c.bf16 %v830_v44, %v828_v43  ;;  %v836_v44 = vld [vmem:[%s8085_s29 + $0x1c0] sm:$0xff] }
  0x7c   : > { %6489 = vmatprep.mubr.msk.bf16.mxu1 %vm2281_vm0, %v861_v13  ;;  %2932 = vmatpush1.bf16.msra.mxu1 %v7172_v23  ;;  %v8444_v13 = vld [vmem:[%s7973_s3 + $0xc0] sm:$0xff]  ;;  %v8521_v61 = vld [vmem:[%s7973_s3 + $0xe8] sm:$0xff] }
  0x7d   : > { %2933 = vmatprep.subr.bf16.mxu1 %v7180_v34  ;;  %v866_v34 = vpack.c.bf16 %v826_v18, %v824_v17  ;;  %11496 = vst [vmem:[#allocation4_spill] sm:$0xff] %v8521_v61  ;;  %v839_v17 = vld [vmem:[%s8085_s29 + $0x1d8] sm:$0xff] }
  0x7e   : > { %1600 = vperm.xlu1 %7027, %v8146_v3   ;;  %v7213_v18 = vld [vmem:[%s11445_s6 + $0xd4] ss:$8 sps:$4 sm:$0xff]  }
  0x7f   : > { %1076 = vperm.xlu0 %7044, %v8378_v31  }
  0x80   : > { %2934 = vmatpush1.bf16.msra.mxu1 %v7178_v37 }
  0x81   : > { %1445 = vmatmul.mubr.bf16.gmra.mrb[20].mxu0 %v758_v54  ;;  %v820_v54 = vld [vmem:[%s8085_s29 + $0x140] sm:$0xff]  ;;  %2935 = vmatprep.subr.bf16.mxu1 %v7186_v60  ;;  %v7204_v60 = vld [vmem:[%s11453_s14 + $0x94] ss:$8 sps:$4 sm:$0xff]  }
  0x82   : > { %1454 = vmatprep.mubr.bf16.mxu0 %v761_v57  ;;  %7028 = vset.pattern.permute.xlu1 %v11465_v4  ;;  %v822_v57 = vld [vmem:[%s8085_s29 + $0x150] sm:$0xff] }
  0x83   : > { %1874 = vperm.xlu1 %7028, %v8146_v3   ;;  %v7177_v3 = vld [vmem:[%s11453_s14 + $0x54] ss:$8 sps:$4 sm:$0xff]   ;;  %2443 = vmatmul.mubr.bf16.gmra.mrb[32].mxu1 %v860_v32  ;;  %v864_v10 = vpack.c.bf16 %v822_v57, %v820_v54  ;;  %v733_v54 = vld [vmem:[%s8043_s21 + $0x188] sm:$0xff] }
  0x84   : > { %3326 = vmatprep.subr.bf16.mxu0 %v7177_v3  ;;  %6490 = vmatprep.mubr.msk.bf16.mxu1 %vm2281_vm0, %v863_v33  ;;  %v726_v3 = vld [vmem:[%s8043_s21 + $0x150] sm:$0xff]  ;;  %v731_v32 = vld [vmem:[%s8043_s21 + $0x178] sm:$0xff] }
  0x85   : > { %3327 = vmatpush1.bf16.msra.mxu0 %v7175_v25  ;;  %1086 = vperm.xlu0 %7044, %v8387_v36   ;;  %v7192_v25 = vld [vmem:[%s11445_s6 + $0x94] ss:$8 sps:$4 sm:$0xff]   ;;  %v768_v41 = vpack.c.bf16 %v726_v3, %v724_v28  ;;  %v771_v42 = vpack.c.bf16 %v731_v32, %v729_v30  ;;  %v737_v28 = vld [vmem:[%s8043_s21 + $0x1a8] sm:$0xff] }
  0x86   : > { %3328 = vmatprep.subr.bf16.mxu0 %v7183_v51  ;;  %2936 = vmatpush1.bf16.msra.mxu1 %v7184_v59  ;;  %v7201_v51 = vld [vmem:[%s11445_s6 + $0xb4] ss:$8 sps:$4 sm:$0xff]   ;;  %v7202_v59 = vld [vmem:[%s11453_s14 + $0x90] ss:$8 sps:$4 sm:$0xff]  }
  0x87   : > { %7029 = vset.pattern.permute.xlu1 %v11463_v21  ;;  %2937 = vmatprep.subr.bf16.mxu1 %v7192_v25  ;;  %v735_v57 = vld [vmem:[%s8043_s21 + $0x198] sm:$0xff] }
  0x88   : > { %1021 = vperm.xlu1 %7029, %v8215_v55   ;;  %v7211_v25 = vld [vmem:[%s11445_s6 + $0xd0] ss:$8 sps:$4 sm:$0xff]   ;;  %v7216_v30 = vld [vmem:[%s11453_s14 + $0xb4] ss:$8 sps:$4 sm:$0xff]  }
  0x89   : > { %1455 = vmatmul.mubr.bf16.gmra.mrb[24].mxu0 %v760_v14  ;;  %1096 = vperm.xlu0 %7044, %v8404_v46   ;;  %v739_v3 = vld [vmem:[%s8043_s21 + $0x1b8] sm:$0xff] }
  0x8a   : > { %1464 = vmatprep.mubr.bf16.mxu0 %v763_v16  ;;  %3329 = vmatpush1.bf16.msra.mxu0 %v7181_v48  ;;  %v769_v16 = vpack.c.bf16 %v727_v1, %v725_v47  ;;  %v835_v48 = vld [vmem:[%s8085_s29 + $0x1b8] sm:$0xff]  ;;  %v7205_v1 = vld [vmem:[%s11445_s6 + $0xc0] ss:$8 sps:$4 sm:$0xff]   ;;  %v775_v43 = vpack.c.bf16 %v739_v3, %v737_v28  ;;  %v742_v28 = vld [vmem:[%s8043_s21 + $0x1d0] sm:$0xff] }
  0x8b   : > { %3330 = vmatprep.subr.bf16.mxu0 %v7189_v9  ;;  %2938 = vmatpush1.bf16.msra.mxu1 %v7190_v24  ;;  %v871_v47 = vpack.c.bf16 %v835_v48, %v833_v45  ;;  %v773_v9 = vpack.c.bf16 %v735_v57, %v733_v54  ;;  %v7208_v24 = vld [vmem:[%s11453_s14 + $0xa0] ss:$8 sps:$4 sm:$0xff]   ;;  %v838_v45 = vld [vmem:[%s8085_s29 + $0x1d0] sm:$0xff] }
  0x8c   : > { %7030 = vset.pattern.permute.xlu1 %v11475_v2  ;;  %v738_v54 = vld [vmem:[%s8043_s21 + $0x1b0] sm:$0xff]  ;;  %v7220_v57 = vld [vmem:[%s11453_s14 + $0xc0] ss:$8 sps:$4 sm:$0xff]  }
  0x8d   : > { %1604 = vperm.xlu1 %7030, %v8215_v55   ;;  %v862_v55 = vpack.c.bf16 %v818_v39, %v816_v38  ;;  %7053 = vset.pattern.permute.xlu0 %v11465_v4  ;;  %v869_v38 = vpack.c.bf16 %v831_v22, %v829_v20  ;;  %v8488_v39 = vld [vmem:[%s7973_s3 + $0xe0] sm:$0xff]  ;;  %v734_v22 = vld [vmem:[%s8043_s21 + $0x190] sm:$0xff] }
  0x8e   : > { %1918 = vperm.xlu0 %7053, %v8432_v6   ;;  %3331 = vmatpush1.bf16.msra.mxu0 %v7187_v7  ;;  %11495 = vst [vmem:[#allocation3_spill] sm:$0xff] %v8488_v39  ;;  %v732_v20 = vld [vmem:[%s8043_s21 + $0x180] sm:$0xff] }
  0x8f   : > { %2453 = vmatmul.mubr.bf16.gmra.mrb[36].mxu1 %v862_v55  ;;  %3332 = vmatprep.subr.bf16.mxu0 %v7195_v29  ;;  %v728_v55 = vld [vmem:[%s8043_s21 + $0x160] sm:$0xff] }
  0x90   : > { %6491 = vmatprep.mubr.msk.bf16.mxu1 %vm2281_vm0, %v865_v50  ;;  %v730_v50 = vld [vmem:[%s8043_s21 + $0x170] sm:$0xff] }
  0x91   : > { %1465 = vmatmul.mubr.bf16.gmra.mrb[28].mxu0 %v762_v35  ;;  %1608 = vperm.xlu1 %7030, %v8163_v11   ;;  %v8478_v35 = vld [vmem:[%s7973_s3 + $0xd0] sm:$0xff]  ;;  %v770_v7 = vpack.c.bf16 %v730_v50, %v728_v55  ;;  %v843_v55 = vld [vmem:[%s8085_s29 + $0x1f8] sm:$0xff]  ;;  %v7222_v50 = vld [vmem:[%s11453_s14 + $0xc4] ss:$8 sps:$4 sm:$0xff]  }
  0x92   : > { %1474 = vmatprep.mubr.bf16.mxu0 %v765_v58  ;;  %1926 = vperm.xlu0 %7053, %v8444_v13   ;;  %v7198_v58 = vld [vmem:[%s11445_s6 + $0xa4] ss:$8 sps:$4 sm:$0xff]  }
  0x93   : > { %3333 = vmatpush1.bf16.msra.mxu0 %v7193_v27  ;;  %2939 = vmatprep.subr.bf16.mxu1 %v7198_v58  ;;  %v7219_v58 = vld [vmem:[%s11445_s6 + $0xe4] ss:$8 sps:$4 sm:$0xff]  }
  0x94   : > { %2940 = vmatpush1.bf16.msra.mxu1 %v7196_v40  ;;  %3334 = vmatprep.subr.bf16.mxu0 %v7204_v60  ;;  %v7217_v40 = vld [vmem:[%s11445_s6 + $0xe0] ss:$8 sps:$4 sm:$0xff]   ;;  %v743_v60 = vld [vmem:[%s8043_s21 + $0x1d8] sm:$0xff] }
  0x95   : > { %7031 = vset.pattern.permute.xlu1 %v11465_v4  ;;  %2941 = vmatprep.subr.bf16.mxu1 %v7201_v51  ;;  %v841_v51 = vld [vmem:[%s8085_s29 + $0x1e8] sm:$0xff] }
  0x96   : > { %1882 = vperm.xlu1 %7031, %v8163_v11   ;;  %v766_v11 = vpack.c.bf16 %v722_v0, %v720_v63  ;;  %1934 = vperm.xlu0 %7053, %v8478_v35   ;;  %v7207_v63 = vld [vmem:[%s11445_s6 + $0xc4] ss:$8 sps:$4 sm:$0xff]  }
  0x97   : > { %2463 = vmatmul.mubr.bf16.gmra.mrb[40].mxu1 %v864_v10  ;;  %3335 = vmatpush1.bf16.msra.mxu0 %v7202_v59  ;;  %v832_v10 = vld [vmem:[%s8085_s29 + $0x1a0] sm:$0xff]  ;;  %v741_v59 = vld [vmem:[%s8043_s21 + $0x1c8] sm:$0xff] }
  0x98   : > { %6492 = vmatprep.mubr.msk.bf16.mxu1 %vm2281_vm0, %v867_v12  ;;  %v834_v12 = vld [vmem:[%s8085_s29 + $0x1b0] sm:$0xff] }
  0x99   : > { %1475 = vmatmul.mubr.bf16.gmra.mrb[32].mxu0 %v764_v52  ;;  %v870_v32 = vpack.c.bf16 %v834_v12, %v832_v10  ;;  %v875_v10 = vpack.c.bf16 %v843_v55, %v841_v51  ;;  %v7226_v12 = vld [vmem:[%s11453_s14 + $0xd0] ss:$8 sps:$4 sm:$0xff]   ;;  %v744_v55 = vld [vmem:[%s8043_s21 + $0x1e0] sm:$0xff] }
  0x9a   : > { %1484 = vmatprep.mubr.bf16.mxu0 %v767_v53  ;;  %7032 = vset.pattern.permute.xlu1 %v11463_v21  ;;  %v8447_v14 = vpop.permute.xlu1 %1556  ;;  %v7199_v53 = vld [vmem:[%s11445_s6 + $0xb0] ss:$8 sps:$4 sm:$0xff]  }
  0x9b   : > { %1031 = vperm.xlu1 %7032, %v8238_v5   ;;  %v8454_v23 = vpop.permute.xlu0 %1830  ;;  %1942 = vperm.xlu0 %7053, %v8488_v39  }
  0x9c   : > { %2942 = vmatpush1.bf16.msra.mxu1 %v7199_v53  ;;  %v736_v53 = vld [vmem:[%s8043_s21 + $0x1a0] sm:$0xff] }
  0x9d   : > { %2943 = vmatprep.subr.bf16.mxu1 %v7207_v63  ;;  %v7223_v63 = vld [vmem:[%s11445_s6 + $0xf0] ss:$8 sps:$4 sm:$0xff]  }
  0x9e   : > { %v8474_v33 = vpop.permute.xlu1 %1560 }
  0x9f   : > { %7034 = vset.pattern.permute.xlu1 %v11475_v2  ;;  %v8480_v37 = vpop.permute.xlu0 %1838  ;;  %2473 = vmatmul.mubr.bf16.gmra.mrb[44].mxu1 %v866_v34  ;;  %v7214_v34 = vld [vmem:[%s11453_s14 + $0xb0] ss:$8 sps:$4 sm:$0xff]  }
  0xa0   : > { %1612 = vperm.xlu1 %7034, %v8238_v5   ;;  %6493 = vmatprep.mubr.msk.bf16.mxu1 %vm2281_vm0, %v869_v38 }
  0xa1   : > { %1485 = vmatmul.mubr.bf16.gmra.mrb[36].mxu0 %v766_v11  ;;  %7058 = vset.pattern.permute.xlu0 %v11463_v21 }
  0xa2   : > { %1494 = vmatprep.mubr.bf16.mxu0 %v769_v16  ;;  %1106 = vperm.xlu0 %7058, %v8521_v61   ;;  %v837_v16 = vld [vmem:[%s8085_s29 + $0x1c8] sm:$0xff] }
  0xa3   : > { %v8495_v5 = vpop.permute.xlu1 %1834  ;;  %v8506_v52 = vpop.permute.xlu0 %1846  ;;  %2944 = vmatpush1.bf16.msra.mxu1 %v7205_v1  ;;  %v873_v38 = vpack.c.bf16 %v839_v17, %v837_v16  ;;  %v872_v1 = vpack.c.bf16 %v838_v45, %v836_v44  ;;  %v774_v16 = vpack.c.bf16 %v738_v54, %v736_v53  ;;  %v777_v17 = vpack.c.bf16 %v743_v60, %v741_v59  ;;  %v7232_v45 = vld [vmem:[%s11453_s14 + $0xf0] ss:$8 sps:$4 sm:$0xff]  }
  0xa4   : > { %1616 = vperm.xlu1 %7034, %v8181_v26   ;;  %2945 = vmatprep.subr.bf16.mxu1 %v7213_v18  ;;  %v842_v18 = vld [vmem:[%s8085_s29 + $0x1f0] sm:$0xff] }
  0xa7   : > { %2483 = vmatmul.mubr.bf16.gmra.mrb[48].mxu1 %v868_v62  ;;  %v8601_v62 = vld [vmem:[%s7973_s3 + $0xf8] sm:$0xff] }
  0xa8   : > { %7035 = vset.pattern.permute.xlu1 %v11465_v4  ;;  %v8527_v0 = vpop.permute.xlu1 %971  ;;  %v8536_v11 = vpop.permute.xlu0 %961  ;;  %6494 = vmatprep.mubr.msk.bf16.mxu1 %vm2281_vm0, %v871_v47  ;;  %11497 = vst [vmem:[#allocation5_spill] sm:$0xff] %v8601_v62 }
  0xa9   : > { %1495 = vmatmul.mubr.bf16.gmra.mrb[40].mxu0 %v768_v41  ;;  %1890 = vperm.xlu1 %7035, %v8181_v26   ;;  %v7210_v26 = vld [vmem:[%s11453_s14 + $0xa4] ss:$8 sps:$4 sm:$0xff]  }
  0xaa   : > { %1504 = vmatprep.mubr.bf16.mxu0 %v771_v42  ;;  %3336 = vmatprep.subr.bf16.mxu0 %v7210_v26  ;;  %v772_v42 = vpack.c.bf16 %v734_v22, %v732_v20  ;;  %v840_v26 = vld [vmem:[%s8085_s29 + $0x1e0] sm:$0xff]  ;;  %v8625_v22 = vld [vmem:[%s7973_s3 + $0xf0] sm:$0xff] }
  0xab   : > { %3337 = vmatpush1.bf16.msra.mxu0 %v7208_v24  ;;  %2946 = vmatpush1.bf16.msra.mxu1 %v7211_v25  ;;  %11498 = vst [vmem:[#allocation6_spill] sm:$0xff] %v8625_v22  ;;  %v7231_v24 = vld [vmem:[%s11453_s14 + $0xe4] ss:$8 sps:$4 sm:$0xff]  }
  0xac   : > { %v8562_v29 = vpop.permute.xlu0 %966  ;;  %3338 = vmatprep.subr.bf16.mxu0 %v7216_v30  ;;  %2947 = vmatprep.subr.bf16.mxu1 %v7219_v58  ;;  %v740_v25 = vld [vmem:[%s8043_s21 + $0x1c0] sm:$0xff]  ;;  %v874_v58 = vpack.c.bf16 %v842_v18, %v840_v26 }
  0xad   : > { %7036 = vset.pattern.permute.xlu1 %v11463_v21  ;;  %v8557_v27 = vpop.permute.xlu1 %1564  ;;  %1116 = vperm.xlu0 %7058, %v8601_v62   ;;  %v7229_v30 = vld [vmem:[%s11453_s14 + $0xe0] ss:$8 sps:$4 sm:$0xff]  }
  0xae   : > { %1041 = vperm.xlu1 %7036, %v8259_v19  }
  0xaf   : > { %2493 = vmatmul.mubr.bf16.gmra.mrb[52].mxu1 %v870_v32  ;;  %3339 = vmatpush1.bf16.msra.mxu0 %v7214_v34  ;;  %v745_v32 = vld [vmem:[%s8043_s21 + $0x1e8] sm:$0xff]  ;;  %v747_v34 = vld [vmem:[%s8043_s21 + $0x1f8] sm:$0xff] }
  0xb0   : > { %v8581_v48 = vpop.permute.xlu0 %976  ;;  %6495 = vmatprep.mubr.msk.bf16.mxu1 %vm2281_vm0, %v873_v38  ;;  %2948 = vmatpush1.bf16.msra.mxu1 %v7217_v40  ;;  %v7811_v40 = vld [vmem:[%s7973_s3 + $0x90] sm:$0xff]  ;;  %v779_v44 = vpack.c.bf16 %v747_v34, %v745_v32 }
  0xb1   : > { %1505 = vmatmul.mubr.bf16.gmra.mrb[44].mxu0 %v770_v7  ;;  %v8576_v41 = vpop.permute.xlu1 %1568  ;;  %3340 = vmatprep.subr.bf16.mxu0 %v7222_v50  ;;  %v746_v50 = vld [vmem:[%s8043_s21 + $0x1f0] sm:$0xff] }
  0xb2   : > { %1514 = vmatprep.mubr.bf16.mxu0 %v773_v9  ;;  %7037 = vset.pattern.permute.xlu1 %v11475_v2  ;;  %v7228_v9 = vld [vmem:[%s11453_s14 + $0xd4] ss:$8 sps:$4 sm:$0xff]  }
  0xb3   : > { %1620 = vperm.xlu1 %7037, %v8259_v19   ;;  %v7225_v19 = vld [vmem:[%s11445_s6 + $0xf4] ss:$8 sps:$4 sm:$0xff]   ;;  %3341 = vmatpush1.bf16.msra.mxu0 %v7220_v57  ;;  %v778_v57 = vpack.c.bf16 %v746_v50, %v744_v55 }
  0xb4   : > { %v8610_v7 = vpop.permute.xlu0 %986  ;;  %2949 = vmatprep.subr.bf16.mxu1 %v7225_v19  ;;  %3342 = vmatprep.subr.bf16.mxu0 %v7228_v9 }
  0xb5   : > { %2950 = vmatpush1.bf16.msra.mxu1 %v7223_v63  ;;  %7062 = vset.pattern.permute.xlu0 %v11465_v4 }
  0xb6   : > { %v8606_v47 = vpop.permute.xlu1 %1842  ;;  %1950 = vperm.xlu0 %7062, %v8625_v22  }
  0xb7   : > { %1624 = vperm.xlu1 %7037, %v8319_v56   ;;  %2503 = vmatmul.mubr.bf16.gmra.mrb[56].mxu1 %v872_v1 }
  0xb8   : > { %6496 = vmatprep.mubr.msk.bf16.mxu1 %vm2281_vm0, %v875_v10  ;;  %v8634_v3 = vpop.permute.xlu0 %996  ;;  %3343 = vmatpush1.bf16.msra.mxu0 %v7226_v12  ;;  %v7812_v10 = vld [vmem:[%s7973_s3 + $0xa0] sm:$0xff] }
  0xb9   : > { %1515 = vmatmul.mubr.bf16.gmra.mrb[48].mxu0 %v772_v42  ;;  %3344 = vmatprep.subr.bf16.mxu0 %v7231_v24  ;;  %v776_v42 = vpack.c.bf16 %v742_v28, %v740_v25 }
  0xba   : > { %1524 = vmatprep.mubr.bf16.mxu0 %v775_v43 }
  0xbb   : > { %7038 = vset.pattern.permute.xlu1 %v11465_v4  ;;  %v8622_v20 = vpop.permute.xlu1 %981 }
  0xbc   : > { %1898 = vperm.xlu1 %7038, %v8319_v56   ;;  %v7234_v56 = vld [vmem:[%s11453_s14 + $0xf4] ss:$8 sps:$4 sm:$0xff]   ;;  %v8649_v43 = vpop.permute.xlu0 %1006  ;;  %3345 = vmatpush1.bf16.msra.mxu0 %v7229_v30  ;;  %v1120_v30 = vlaneseq }
  0xbd   : > { %3346 = vmatprep.subr.bf16.mxu0 %v7234_v56 }
  0xbe   : > { %v1121_v34 = vshrl.u32 %v1120_v30, 7 }
  0xbf   : > { %2513 = vmatmul.mubr.bf16.gmra.mrb[60].mxu1 %v874_v58 }
  0xc0   : > { %7039 = vset.pattern.permute.xlu1 %v11463_v21  ;;  %v8646_v38 = vpop.permute.xlu1 %1572  ;;  %v8659_v53 = vpop.permute.xlu0 %1016  ;;  %3347 = vmatpush1.bf16.msra.mxu0 %v7232_v45  ;;  %v8722_v56 = vsub.s32 1, %v1121_v34  ;;  %v1963_v55 = vsub.s32 6, %v1121_v34  ;;  %v8732_v50 = vsub.s32 0, %v1121_v34 }
  0xc1   : > { %1525 = vmatmul.mubr.bf16.gmra.mrb[52].mxu0 %v774_v16  ;;  %1051 = vperm.xlu1 %7039, %v7811_v40  }
  0xc2   : > { %1534 = vmatprep.mubr.bf16.mxu0 %v777_v17  ;;  %11499 = vst [vmem:[#allocation7_spill] sm:$0xff] %v8722_v56  ;;  %11501 = vst [vmem:[#allocation8_spill] sm:$0xff] %v8732_v50 }
  0xc4   : > { %v8654_v51 = vpop.permute.xlu1 %1576  ;;  %v8664_v19 = vpop.permute.xlu0 %1026 }
  0xc5   : > { %7040 = vset.pattern.permute.xlu1 %v11475_v2 }
  0xc6   : > { %1628 = vperm.xlu1 %7040, %v7811_v40   ;;  %v1689_v40 = vsub.s32 5, %v1121_v34 }
  0xc8   : > { %v8670_v60 = vpop.permute.xlu0 %1036 }
  0xc9   : > { %1535 = vmatmul.mubr.bf16.gmra.mrb[56].mxu0 %v776_v42  ;;  %v8661_v54 = vpop.permute.xlu1 %1850 }
  0xca   : > { %1544 = vmatprep.mubr.bf16.mxu0 %v779_v44  ;;  %1632 = vperm.xlu1 %7040, %v8340_v8   ;;  %v958_v44 = vld [vmem:[%s11500_s24] sm:$0x77]  ;;  %s11732_s24 = sshll.u32 %s11755_s25, 3 }
  0xcb   : > { %v1690_v30 = vrot.slane %v958_v44, %v1689_v40  ;;  %v1964_v62 = vrot.slane %v958_v44, %v1963_v55  ;;  %v1123_v61 = vrot.slane %v958_v44, %v8732_v50  ;;  %s10858_s27 = scalar_lea.vmem %s11459_s20, %s11732_s24 }
  0xcd   : > { %v8755_v55 = vrot.slane %v1123_v61, %v8732_v50 }
  0xce   : > { %7041 = vset.pattern.permute.xlu1 %v11465_v4  ;;  %v8667_v59 = vpop.permute.xlu1 %991 }
  0xcf   : > { %1906 = vperm.xlu1 %7041, %v8340_v8   ;;  %v8676_v1 = vpop.permute.xlu0 %1854 }
  0xd1   : > { %1545 = vmatmul.mubr.bf16.gmra.mrb[60].mxu0 %v778_v57  ;;  %v1126_v57 = vsub.s32 4, %v1121_v34 }
  0xd3   : > { %7042 = vset.pattern.permute.xlu1 %v11463_v21  ;;  %v8673_v63 = vpop.permute.xlu1 %1580  ;;  %v8682_v12 = vpop.permute.xlu0 %1862  ;;  %v1127_v39 = vrot.slane %v958_v44, %v1126_v57 }
  0xd4   : > { %1061 = vperm.xlu1 %7042, %v8308_v49  }
  0xd7   : > { %v8678_v9 = vpop.permute.xlu1 %1584  ;;  %v8687_v8 = vpop.permute.xlu0 %1870 }
  0xd8   : > { %7043 = vset.pattern.permute.xlu1 %v11475_v2 }
  0xd9   : > { %1636 = vperm.xlu1 %7043, %v7812_v10   ;;  %v1686_v10 = vrot.slane %v958_v44, %v8722_v56 }
  0xdb   : > { %v8693_v49 = vpop.permute.xlu0 %1878 }
  0xdc   : > { %v8684_v16 = vpop.permute.xlu1 %1858 }
  0xdd   : > { %1640 = vperm.xlu1 %7043, %v8351_v15  }
  0xdf   : > { %v8698_v18 = vpop.permute.xlu0 %1886 }
  0xe1   : > { %7045 = vset.pattern.permute.xlu1 %v11465_v4  ;;  %v8690_v17 = vpop.permute.xlu1 %1001 }
  0xe2   : > { %1914 = vperm.xlu1 %7045, %v8351_v15  }
  0xe3   : > { %v8705_v25 = vpop.permute.xlu0 %1894 }
  0xe6   : > { %7046 = vset.pattern.permute.xlu1 %v11463_v21  ;;  %v8696_v26 = vpop.permute.xlu1 %1588 }
  0xe7   : > { %1071 = vperm.xlu1 %7046, %v8432_v6   ;;  %v8710_v15 = vpop.permute.xlu0 %1902 }
  0xea   : > { %v8701_v24 = vpop.permute.xlu1 %1592 }
  0xeb   : > { %7047 = vset.pattern.permute.xlu1 %v11475_v2  ;;  %v8716_v58 = vpop.permute.xlu0 %1910 }
  0xec   : > { %1644 = vperm.xlu1 %7047, %v8432_v6  }
  0xef   : > { %v8707_v28 = vpop.permute.xlu1 %1866 }
  0xf0   : > { %1648 = vperm.xlu1 %7047, %v8378_v31  }
  0xf2   : > { %v8724_v42 = vpop.permute.xlu0 %1046 }
  0xf4   : > { %7048 = vset.pattern.permute.xlu1 %v11465_v4  ;;  %v8713_v32 = vpop.permute.xlu1 %1011 }
  0xf5   : > { %1922 = vperm.xlu1 %7048, %v8378_v31   ;;  %v1959_v31 = vsub.s32 2, %v1121_v34  ;;  %v8746_v34 = vrot.slane %v1690_v30, %v8722_v56 }
  0xf7   : > { %v1960_v4 = vrot.slane %v958_v44, %v1959_v31  ;;  %v8750_v40 = vrot.slane %v1964_v62, %v1959_v31  ;;  %v11504_v44 = vmov 2  }
  0xf9   : > { %7049 = vset.pattern.permute.xlu1 %v11463_v21  ;;  %v8719_v6 = vpop.permute.xlu1 %1596  ;;  %v8736_v21 = vpop.permute.xlu0 %1056 }
  0xfa   : > { %1081 = vperm.xlu1 %7049, %v8444_v13   ;;  %11502 = vst [vmem:[#allocation9_spill] sm:$0xff] %v8736_v21 }
  0xfd   : > { %v8729_v45 = vpop.permute.xlu1 %1600  ;;  %v8752_v21 = vpop.permute.xlu0 %1066 }
  0xfe   : > { %7050 = vset.pattern.permute.xlu1 %v11475_v2  ;;  %v8743_v2 = vrot.slane %v1686_v10, %v8722_v56 }
  0xff   : > { %1652 = vperm.xlu1 %7050, %v8444_v13   ;;  %v8748_v13 = vrot.slane %v1960_v4, %v1959_v31  ;;  %v8769_v4 = vmul.f32 %v8746_v34, %v8447_v14  ;;  %v8786_v31 = vmul.f32 %v8750_v40, %v8454_v23 }
 0x100   : > { %v8765_v10 = vmul.f32 %v8743_v2, %v8447_v14  ;;  %v8774_v61 = vmul.f32 %v8743_v2, %v8474_v33 }
 0x101   : > { %v8782_v62 = vmul.f32 %v8748_v13, %v8454_v23  ;;  %11506 = vst [vmem:[#allocation12_spill] sm:$0xff] %v8786_v31  ;;  %v8793_v14 = vmul.f32 %v8748_v13, %v8495_v5  ;;  %v8801_v30 = vmul.f32 %v8748_v13, %v8480_v37  ;;  %v8805_v23 = vmul.f32 %v8750_v40, %v8480_v37 }
 0x102   : > { %v8738_v22 = vpop.permute.xlu1 %1874  ;;  %v8813_v31 = vmul.f32 %v8750_v40, %v8506_v52  ;;  %v8825_v37 = vmul.f32 %v8743_v2, %v8557_v27 }
 0x103   : > { %11503 = vst [vmem:[#allocation10_spill] sm:$0xff] %v8738_v22  ;;  %1656 = vperm.xlu1 %7050, %v8387_v36   ;;  %v8758_v22 = vrot.slane %v1127_v39, %v8732_v50  ;;  %v8778_v39 = vmul.f32 %v8746_v34, %v8474_v33  ;;  %11507 = vst [vmem:[#allocation13_spill] sm:$0xff] %v8793_v14  ;;  %v8797_v33 = vmul.f32 %v8750_v40, %v8495_v5  ;;  %v2179_v14 = vld [vmem:[%s11452_s13] sm:$0x3] }
 0x104   : > { %11509 = vst [vmem:[#allocation15_spill] sm:$0xff] %v8801_v30  ;;  %11510 = vst [vmem:[#allocation16_spill] sm:$0xff] %v8805_v23  ;;  %v8817_v5 = vmul.f32 %v8755_v55, %v8527_v0  ;;  %v11516_v23 = vmov 0  }
 0x105   : > { %11505 = vst [vmem:[#allocation11_spill] sm:$0xff] %v8778_v39  ;;  %11508 = vst [vmem:[#allocation14_spill] sm:$0xff] %v8797_v33  ;;  %v8809_v39 = vmul.f32 %v8748_v13, %v8506_v52  ;;  %v8821_v33 = vmul.f32 %v8758_v22, %v8527_v0  ;;  %v8832_v52 = vmul.f32 %v8755_v55, %v8536_v11  ;;  %v8841_v0 = vpop.permute.xlu0 %1076 }
 0x106   : > { %11512 = vst [vmem:[#allocation18_spill] sm:$0xff] %v8813_v31  ;;  %11513 = vst [vmem:[#allocation19_spill] sm:$0xff] %v8817_v5  ;;  %v8836_v31 = vmul.f32 %v8758_v22, %v8536_v11  ;;  %v8854_v5 = vmul.f32 %v8758_v22, %v8562_v29 }
 0x107   : > { %7051 = vset.pattern.permute.xlu1 %v11504_v44  ;;  %v8761_v57 = vpop.permute.xlu1 %1021  ;;  %11511 = vst [vmem:[#allocation17_spill] sm:$0xff] %v8809_v39  ;;  %11514 = vst [vmem:[#allocation20_spill] sm:$0xff] %v8821_v33  ;;  %v8850_v33 = vmul.f32 %v8755_v55, %v8562_v29  ;;  %v8876_v29 = vmul.f32 %v8758_v22, %v8581_v48 }
 0x108   : > { %1930 = vperm.xlu1 %7051, %v8387_v36   ;;  %v2103_v36 = vld [vmem:[%s11444_s5] sm:$0x3]  ;;  %11515 = vst [vmem:[#allocation21_spill] sm:$0xff] %v8825_v37  ;;  %v8845_v37 = vmul.f32 %v8746_v34, %v8557_v27  ;;  %v8864_v27 = vmul.f32 %v8743_v2, %v8576_v41 }
 0x109   : > { %v8839_v39 = vrot.slane %v2103_v36, %v8732_v50  ;;  %v8857_v11 = vrot.slane %v2103_v36, %v8722_v56  ;;  %v8880_v36 = vmul.f32 %v8748_v13, %v8606_v47 }
 0x10a   : > { %11518 = vst [vmem:[#allocation23_spill] sm:$0xff] %v8845_v37  ;;  %11520 = vst [vmem:[#allocation25_spill] sm:$0xff] %v8864_v27  ;;  %v8868_v37 = vmul.f32 %v8746_v34, %v8576_v41  ;;  %v8888_v41 = vmul.f32 %v8755_v55, %v8610_v7 }
 0x10b   : > { %11517 = vst [vmem:[#allocation22_spill] sm:$0xff] %v8839_v39  ;;  %11519 = vst [vmem:[#allocation24_spill] sm:$0xff] %v8857_v11  ;;  %v8872_v39 = vmul.f32 %v8755_v55, %v8581_v48  ;;  %v8884_v11 = vmul.f32 %v8750_v40, %v8606_v47  ;;  %v8898_v48 = vmul.f32 %v8755_v55, %v8634_v3 }
 0x10c   : > { %7052 = vset.pattern.permute.xlu1 %v11516_v23  ;;  %v8828_v30 = vpop.permute.xlu1 %1604  ;;  %11521 = vst [vmem:[#allocation26_spill] sm:$0xff] %v8868_v37  ;;  %11522 = vst [vmem:[#allocation27_spill] sm:$0xff] %v8880_v36  ;;  %v8892_v37 = vmul.f32 %v8758_v22, %v8610_v7  ;;  %v8902_v36 = vmul.f32 %v8755_v55, %v8622_v20  ;;  %v8906_v47 = vmul.f32 %v8758_v22, %v8622_v20 }
 0x10d   : > { %1091 = vperm.xlu1 %7052, %v8478_v35   ;;  %11523 = vst [vmem:[#allocation28_spill] sm:$0xff] %v8888_v41  ;;  %11525 = vst [vmem:[#allocation30_spill] sm:$0xff] %v8898_v48  ;;  %v8909_v41 = vrot.slane %v2179_v14, %v8722_v56  ;;  %v8913_v7 = vmul.f32 %v8743_v2, %v8646_v38  ;;  %v11528_v48 = vmov 1   ;;  %v8925_v20 = vrot.slane %v2179_v14, %v8732_v50  ;;  %v8944_v14 = vpop.permute.xlu0 %1086 }
 0x10e   : > { %11524 = vst [vmem:[#allocation29_spill] sm:$0xff] %v8892_v37  ;;  %11526 = vst [vmem:[#allocation31_spill] sm:$0xff] %v8902_v36  ;;  %v8917_v37 = vmul.f32 %v8746_v34, %v8646_v38  ;;  %v8922_v36 = vmul.f32 %v8758_v22, %v8634_v3  ;;  %v8929_v56 = vmul.f32 %v8743_v2, %v8654_v51 }
 0x10f   : > { %11527 = vst [vmem:[#allocation32_spill] sm:$0xff] %v8913_v7  ;;  %v8933_v7 = vmul.f32 %v8746_v34, %v8654_v51  ;;  %v8938_v38 = vmul.f32 %v8755_v55, %v8649_v43  ;;  %v8942_v3 = vmul.f32 %v8758_v22, %v8649_v43  ;;  %v8948_v50 = vmul.f32 %v8748_v13, %v8661_v54 }
 0x110   : > { %v8894_v27 = vpop.permute.xlu1 %1608  ;;  %11529 = vst [vmem:[#allocation33_spill] sm:$0xff] %v8922_v36  ;;  %v8952_v51 = vmul.f32 %v8750_v40, %v8661_v54  ;;  %v8964_v43 = vmul.f32 %v8755_v55, %v8664_v19  ;;  %v8972_v54 = vmul.f32 %v8755_v55, %v8667_v59  ;;  %v8976_v36 = vmul.f32 %v8758_v22, %v8667_v59 }
 0x111   : > { %7054 = vset.pattern.permute.xlu1 %v11528_v48  ;;  %11530 = vst [vmem:[#allocation34_spill] sm:$0xff] %v8938_v38  ;;  %11531 = vst [vmem:[#allocation35_spill] sm:$0xff] %v8942_v3  ;;  %v8960_v38 = vmul.f32 %v8758_v22, %v8659_v53  ;;  %v8968_v3 = vmul.f32 %v8758_v22, %v8664_v19  ;;  %v8990_v19 = vmul.f32 %v8755_v55, %v8670_v60 }
 0x112   : > { %1660 = vperm.xlu1 %7054, %v8478_v35   ;;  %v8956_v35 = vmul.f32 %v8755_v55, %v8659_v53  ;;  %11534 = vst [vmem:[#allocation38_spill] sm:$0xff] %v8964_v43  ;;  %v8980_v53 = vmul.f32 %v8743_v2, %v8673_v63  ;;  %v8998_v59 = vmul.f32 %v8743_v2, %v8678_v9 }
 0x113   : > { %11533 = vst [vmem:[#allocation37_spill] sm:$0xff] %v8960_v38  ;;  %11535 = vst [vmem:[#allocation39_spill] sm:$0xff] %v8968_v3  ;;  %v8984_v38 = vmul.f32 %v8746_v34, %v8673_v63  ;;  %v8994_v3 = vmul.f32 %v8758_v22, %v8670_v60  ;;  %v9007_v63 = vmul.f32 %v8748_v13, %v8676_v1 }
 0x114   : > { %11532 = vst [vmem:[#allocation36_spill] sm:$0xff] %v8956_v35  ;;  %11536 = vst [vmem:[#allocation40_spill] sm:$0xff] %v8990_v19  ;;  %v9002_v35 = vmul.f32 %v8746_v34, %v8678_v9  ;;  %v9011_v19 = vmul.f32 %v8750_v40, %v8676_v1  ;;  %v9015_v60 = vmul.f32 %v8748_v13, %v8684_v16 }
 0x115   : > { %v8986_v43 = vpop.permute.xlu1 %1882  ;;  %11537 = vst [vmem:[#allocation41_spill] sm:$0xff] %v8994_v3  ;;  %v9019_v3 = vmul.f32 %v8750_v40, %v8684_v16  ;;  %v9023_v9 = vmul.f32 %v8748_v13, %v8682_v12  ;;  %v9031_v1 = vmul.f32 %v8755_v55, %v8690_v17  ;;  %v9039_v16 = vmul.f32 %v8748_v13, %v8687_v8 }
 0x116   : > { %11538 = vst [vmem:[#allocation42_spill] sm:$0xff] %v9002_v35  ;;  %1664 = vperm.xlu1 %7054, %v8404_v46   ;;  %v9027_v46 = vmul.f32 %v8750_v40, %v8682_v12  ;;  %v9035_v35 = vmul.f32 %v8758_v22, %v8690_v17  ;;  %v9049_v12 = vmul.f32 %v8743_v2, %v8696_v26 }
 0x117   : > { %11539 = vst [vmem:[#allocation43_spill] sm:$0xff] %v9019_v3  ;;  %11540 = vst [vmem:[#allocation44_spill] sm:$0xff] %v9023_v9  ;;  %v9043_v9 = vmul.f32 %v8750_v40, %v8687_v8  ;;  %v9045_v3 = vpop.permute.xlu0 %1096  ;;  %v9057_v17 = vmul.f32 %v8748_v13, %v8693_v49  ;;  %v9065_v8 = vmul.f32 %v8743_v2, %v8701_v24 }
 0x118   : > { %11541 = vst [vmem:[#allocation45_spill] sm:$0xff] %v9027_v46  ;;  %11542 = vst [vmem:[#allocation46_spill] sm:$0xff] %v9039_v16  ;;  %v9053_v46 = vmul.f32 %v8746_v34, %v8696_v26  ;;  %v9061_v16 = vmul.f32 %v8750_v40, %v8693_v49  ;;  %v9080_v49 = vmul.f32 %v8750_v40, %v8698_v18 }
 0x119   : > { %11543 = vst [vmem:[#allocation47_spill] sm:$0xff] %v9043_v9  ;;  %11545 = vst [vmem:[#allocation49_spill] sm:$0xff] %v9057_v17  ;;  %v9069_v9 = vmul.f32 %v8746_v34, %v8701_v24  ;;  %v9088_v24 = vmul.f32 %v8750_v40, %v8707_v28  ;;  %v7813_v17 = vld [vmem:[%s7973_s3 + $0xd8] sm:$0xff] }
 0x11a   : > { %11544 = vst [vmem:[#allocation48_spill] sm:$0xff] %v9053_v46  ;;  %11546 = vst [vmem:[#allocation50_spill] sm:$0xff] %v9061_v16  ;;  %7055 = vset.pattern.permute.xlu1 %v11504_v44  ;;  %v9072_v26 = vpop.permute.xlu1 %1031  ;;  %v9076_v46 = vmul.f32 %v8748_v13, %v8698_v18  ;;  %v9084_v16 = vmul.f32 %v8748_v13, %v8707_v28  ;;  %v9101_v18 = vmul.f32 %v8755_v55, %v8713_v32 }
 0x11b   : > { %11547 = vst [vmem:[#allocation51_spill] sm:$0xff] %v9069_v9  ;;  %11549 = vst [vmem:[#allocation53_spill] sm:$0xff] %v9080_v49  ;;  %1938 = vperm.xlu1 %7055, %v7813_v17   ;;  %v9093_v9 = vmul.f32 %v8748_v13, %v8705_v25  ;;  %v9105_v49 = vmul.f32 %v8758_v22, %v8713_v32  ;;  %v9109_v28 = vmul.f32 %v8748_v13, %v8710_v15 }
 0x11c   : > { %11548 = vst [vmem:[#allocation52_spill] sm:$0xff] %v9076_v46  ;;  %11550 = vst [vmem:[#allocation54_spill] sm:$0xff] %v9084_v16  ;;  %v9097_v46 = vmul.f32 %v8750_v40, %v8705_v25  ;;  %v9113_v17 = vmul.f32 %v8750_v40, %v8710_v15  ;;  %v9117_v25 = vmul.f32 %v8743_v2, %v8719_v6 }
 0x11d   : > { %11551 = vst [vmem:[#allocation55_spill] sm:$0xff] %v9088_v24  ;;  %11552 = vst [vmem:[#allocation56_spill] sm:$0xff] %v9093_v9  ;;  %v9121_v9 = vmul.f32 %v8746_v34, %v8719_v6  ;;  %v9125_v32 = vmul.f32 %v8748_v13, %v8716_v58  ;;  %v9133_v15 = vmul.f32 %v8743_v2, %v8729_v45 }
 0x11e   : > { %11553 = vst [vmem:[#allocation57_spill] sm:$0xff] %v9097_v46  ;;  %11554 = vst [vmem:[#allocation58_spill] sm:$0xff] %v9101_v18  ;;  %v9129_v46 = vmul.f32 %v8750_v40, %v8716_v58  ;;  %v9141_v6 = vmul.f32 %v8755_v55, %v8724_v42  ;;  %v11566_v58 = vld [vmem:[#allocation10_spill] sm:$0xff] }
 0x11f   : > { %11555 = vst [vmem:[#allocation59_spill] sm:$0xff] %v9105_v49  ;;  %11556 = vst [vmem:[#allocation60_spill] sm:$0xff] %v9109_v28  ;;  %v2364_v28 = vpop.f32.mrb[0].mxu1  ;;  %7056 = vset.pattern.permute.xlu1 %v11516_v23 }
 0x120   : > { %11557 = vst [vmem:[#allocation61_spill] sm:$0xff] %v9113_v17  ;;  %11558 = vst [vmem:[#allocation62_spill] sm:$0xff] %v9117_v25  ;;  %v9137_v17 = vmul.f32 %v8746_v34, %v8729_v45  ;;  %v2365_v45 = vadd.f32 %v2364_v28, %v8925_v20  ;;  %v11568_v25 = vld [vmem:[#allocation9_spill] sm:$0xff]  ;;  %v9169_v28 = vmul.f32 %v8755_v55, %v8752_v21 }
 0x121   : > { %11559 = vst [vmem:[#allocation63_spill] sm:$0xff] %v9121_v9  ;;  %11560 = vst [vmem:[#allocation64_spill] sm:$0xff] %v9125_v32  ;;  %v9145_v32 = vmul.f32 %v8758_v22, %v8724_v42  ;;  %v1919_v9 = vpop.permute.xlu0 %1918  ;;  %v9155_v49 = vmul.f32 %v8755_v55, %v11568_v25  ;;  %v9163_v42 = vmul.f32 %v8750_v40, %v11566_v58 }
 0x122   : > { %11561 = vst [vmem:[#allocation65_spill] sm:$0xff] %v9129_v46  ;;  %11562 = vst [vmem:[#allocation66_spill] sm:$0xff] %v9133_v15  ;;  %v9149_v46 = vmul.f32 %v8748_v13, %v11566_v58  ;;  %v1613_v15 = vpop.permute.xlu1 %1612  ;;  %v9181_v58 = vmul.f32 %v8758_v22, %v8761_v57 }
 0x123   : > { %11563 = vst [vmem:[#allocation67_spill] sm:$0xff] %v9137_v17  ;;  %11564 = vst [vmem:[#allocation68_spill] sm:$0xff] %v9141_v6  ;;  %v2366_v17 = vpop.f32.mrb[1].mxu1  ;;  %v9159_v6 = vmul.f32 %v8758_v22, %v11568_v25  ;;  %v9177_v25 = vmul.f32 %v8755_v55, %v8761_v57  ;;  %v9195_v57 = vmul.f32 %v8743_v2, %v8828_v30 }
 0x124   : > { %11565 = vst [vmem:[#allocation69_spill] sm:$0xff] %v9145_v32  ;;  %11567 = vst [vmem:[#allocation10_spill] sm:$0xff] %v9149_v46  ;;  %v11572_v32 = vld [vmem:[#allocation3_spill] sm:$0xff]  ;;  %v2367_v46 = vadd.f32 %v2366_v17, %v8909_v41  ;;  %v2368_v18 = vpop.f32.mrb[2].mxu1 }
 0x125   : > { %11569 = vst [vmem:[#allocation9_spill] sm:$0xff] %v9155_v49  ;;  %11570 = vst [vmem:[#allocation70_spill] sm:$0xff] %v9159_v6  ;;  %1101 = vperm.xlu1 %7056, %v11572_v32   ;;  %v9173_v49 = vmul.f32 %v8758_v22, %v8752_v21  ;;  %v2619_v6 = vmax.f32 %v2365_v45, 0.0  ;;  %v2369_v17 = vadd.f32 %v2368_v18, %v8925_v20 }
 0x126   : > { %11571 = vst [vmem:[#allocation71_spill] sm:$0xff] %v9163_v42  ;;  %11573 = vst [vmem:[#allocation3_spill] sm:$0xff] %v9169_v28  ;;  %v2370_v42 = vpop.f32.mrb[3].mxu1  ;;  %v2620_v24 = vmax.f32 %v2367_v46, 0.0  ;;  %v9187_v28 = vmul.f32 %v8755_v55, %v8841_v0  ;;  %v9191_v21 = vmul.f32 %v8758_v22, %v8841_v0  ;;  %v9199_v18 = vmul.f32 %v8746_v34, %v8828_v30  ;;  %v1617_v46 = vpop.permute.xlu1 %1616 }
 0x127   : > { %11574 = vst [vmem:[#allocation72_spill] sm:$0xff] %v9173_v49  ;;  %11575 = vst [vmem:[#allocation73_spill] sm:$0xff] %v9177_v25  ;;  %v2371_v16 = vadd.f32 %v2370_v42, %v8909_v41  ;;  %v1927_v49 = vpop.permute.xlu0 %1926  ;;  %v2621_v45 = vmax.f32 %v2369_v17, 0.0  ;;  %v9203_v42 = vmul.f32 %v8755_v55, %v8944_v14  ;;  %v9211_v0 = vmul.f32 %v8746_v34, %v8894_v27 }
 0x128   : > { %11576 = vst [vmem:[#allocation74_spill] sm:$0xff] %v9181_v58  ;;  %11577 = vst [vmem:[#allocation75_spill] sm:$0xff] %v9187_v28  ;;  %v9207_v28 = vmul.f32 %v8743_v2, %v8894_v27  ;;  %v9216_v30 = vmul.f32 %v8758_v22, %v8944_v14  ;;  %v9220_v17 = vmul.f32 %v8748_v13, %v8986_v43  ;;  %v2374_v14 = vpop.f32.mrb[4].mxu1  ;;  %v11621_v58 = vld [vmem:[#allocation26_spill] sm:$0xff] }
 0x129   : > { %11578 = vst [vmem:[#allocation76_spill] sm:$0xff] %v9191_v21  ;;  %11579 = vst [vmem:[#allocation77_spill] sm:$0xff] %v9195_v57  ;;  %7057 = vset.pattern.permute.xlu1 %v11528_v48  ;;  %v2622_v21 = vmax.f32 %v2371_v16, 0.0  ;;  %v9229_v27 = vmul.f32 %v8758_v22, %v9045_v3  ;;  %v9233_v16 = vmul.f32 %v8750_v40, %v8986_v43 }
 0x12a   : > { %11580 = vst [vmem:[#allocation78_spill] sm:$0xff] %v9199_v18  ;;  %11581 = vst [vmem:[#allocation79_spill] sm:$0xff] %v9203_v42  ;;  %1668 = vperm.xlu1 %7057, %v11572_v32   ;;  %v2683_v42 = vpack.c.bf16 %v2621_v45, %v2619_v6  ;;  %v9239_v32 = vmul.f32 %v8750_v40, %v1919_v9  ;;  %v9243_v45 = vmul.f32 %v8755_v55, %v9072_v26  ;;  %v11620_v18 = vld [vmem:[#allocation25_spill] sm:$0xff] }
 0x12b   : > { %11582 = vst [vmem:[#allocation80_spill] sm:$0xff] %v9207_v28  ;;  %11583 = vst [vmem:[#allocation81_spill] sm:$0xff] %v9211_v0  ;;  %v9225_v28 = vmul.f32 %v8755_v55, %v9045_v3  ;;  %v9236_v0 = vmul.f32 %v8748_v13, %v1919_v9  ;;  %v1935_v6 = vpop.permute.xlu0 %1934  ;;  %v9247_v3 = vmul.f32 %v8758_v22, %v9072_v26 }
 0x12c   : > { %11584 = vst [vmem:[#allocation82_spill] sm:$0xff] %v9216_v30  ;;  %11585 = vst [vmem:[#allocation83_spill] sm:$0xff] %v9220_v17  ;;  %v2684_v30 = vpack.c.bf16 %v2622_v21, %v2620_v24  ;;  %v2375_v43 = vadd.f32 %v2374_v14, %v8925_v20  ;;  %v9251_v24 = vmul.f32 %v8748_v13, %v1927_v49 }
 0x12d   : > { %11586 = vst [vmem:[#allocation84_spill] sm:$0xff] %v9225_v28  ;;  %11587 = vst [vmem:[#allocation85_spill] sm:$0xff] %v9229_v27  ;;  %v2376_v27 = vpop.f32.mrb[5].mxu1  ;;  %v9254_v21 = vmul.f32 %v8743_v2, %v1613_v15  ;;  %v9257_v9 = vmul.f32 %v8746_v34, %v1613_v15  ;;  %v1891_v28 = vpop.permute.xlu1 %1890  ;;  %v9261_v26 = vmul.f32 %v8750_v40, %v1927_v49 }
 0x12e   : > { %11588 = vst [vmem:[#allocation86_spill] sm:$0xff] %v9233_v16  ;;  %11589 = vst [vmem:[#allocation87_spill] sm:$0xff] %v9236_v0  ;;  %v2377_v0 = vadd.f32 %v2376_v27, %v8909_v41  ;;  %3348 = vmatprep.mubr.bf16.mxu0 %v2684_v30  ;;  %v9269_v15 = vmul.f32 %v8750_v40, %v1935_v6  ;;  %v2623_v27 = vmax.f32 %v2375_v43, 0.0 }
 0x12f   : > { %11590 = vst [vmem:[#allocation88_spill] sm:$0xff] %v9239_v32  ;;  %11591 = vst [vmem:[#allocation89_spill] sm:$0xff] %v9243_v45  ;;  %v1396_v32 = vpop.f32.mrb[0].mxu0  ;;  %3349 = vmatmul.mubr.bf16.vlgmr.msra.gmra.mrb[64].mxu0 %v2683_v42  ;;  %v9285_v43 = vmul.f32 %v8748_v13, %v1891_v28 }
 0x130   : > { %11592 = vst [vmem:[#allocation90_spill] sm:$0xff] %v9247_v3  ;;  %11593 = vst [vmem:[#allocation91_spill] sm:$0xff] %v9251_v24  ;;  %v11597_v3 = vld [vmem:[#allocation4_spill] sm:$0xff]  ;;  %v1397_v14 = vadd.f32 %v1396_v32, %v8832_v52  ;;  %v1398_v45 = vpop.f32.mrb[1].mxu0  ;;  %v2378_v24 = vpop.f32.mrb[6].mxu1  ;;  %v2624_v17 = vmax.f32 %v2377_v0, 0.0 }
 0x131   : > { %11594 = vst [vmem:[#allocation92_spill] sm:$0xff] %v9254_v21  ;;  %11595 = vst [vmem:[#allocation93_spill] sm:$0xff] %v9257_v9  ;;  %1672 = vperm.xlu1 %7057, %v11597_v3   ;;  %v9266_v21 = vmul.f32 %v8748_v13, %v1935_v6  ;;  %v9272_v9 = vmul.f32 %v8743_v2, %v1617_v46  ;;  %v1399_v30 = vadd.f32 %v1398_v45, %v8836_v31  ;;  %v1400_v49 = vpop.f32.mrb[2].mxu0  ;;  %v2380_v16 = vpop.f32.mrb[7].mxu1 }
 0x132   : > { %11596 = vst [vmem:[#allocation94_spill] sm:$0xff] %v9261_v26  ;;  %11599 = vst [vmem:[#allocation95_spill] sm:$0xff] %v9269_v15  ;;  %v2379_v26 = vadd.f32 %v2378_v24, %v8925_v20  ;;  %v1765_v52 = vadd.f32 %v8765_v10, %v1397_v14  ;;  %v1401_v42 = vadd.f32 %v1400_v49, %v8850_v33  ;;  %v1402_v32 = vpop.f32.mrb[3].mxu0  ;;  %v1042_v33 = vpop.permute.xlu1 %1041 }
 0x133   : > { %11598 = vst [vmem:[#allocation4_spill] sm:$0xff] %v9266_v21  ;;  %11600 = vst [vmem:[#allocation96_spill] sm:$0xff] %v9272_v9  ;;  %v2381_v21 = vadd.f32 %v2380_v16, %v8909_v41  ;;  %v9280_v6 = vmul.f32 %v8746_v34, %v1617_v46  ;;  %v1766_v15 = vadd.f32 %v8769_v4, %v1399_v30  ;;  %v11604_v46 = vld [vmem:[#allocation12_spill] sm:$0xff]  ;;  %v11605_v4 = vld [vmem:[#allocation11_spill] sm:$0xff] }
 0x134   : > { %v1403_v31 = vadd.f32 %v1402_v32, %v8854_v5  ;;  %v2625_v45 = vmax.f32 %v2379_v26, 0.0  ;;  %11602 = vst [vmem:[#allocation98_spill] sm:$0xff] %v9285_v43  ;;  %v2039_v24 = vadd.f32 %v8782_v62, %v1765_v52  ;;  %v1767_v10 = vadd.f32 %v8774_v61, %v1401_v42  ;;  %v2384_v26 = vpop.f32.mrb[8].mxu1  ;;  %v11607_v62 = vld [vmem:[#allocation22_spill] sm:$0xff]  ;;  %v11608_v61 = vld [vmem:[#allocation13_spill] sm:$0xff] }
 0x135   : > { %11601 = vst [vmem:[#allocation97_spill] sm:$0xff] %v9280_v6  ;;  %7059 = vset.pattern.permute.xlu1 %v11504_v44  ;;  %v2626_v0 = vmax.f32 %v2381_v21, 0.0  ;;  %v9291_v16 = vmul.f32 %v8750_v40, %v1891_v28  ;;  %v2040_v14 = vadd.f32 %v11604_v46, %v1766_v15  ;;  %v9296_v5 = vmul.f32 %v8755_v55, %v1042_v33  ;;  %v2386_v21 = vpop.f32.mrb[9].mxu1  ;;  %v11609_v43 = vld [vmem:[#allocation14_spill] sm:$0xff]  ;;  %v1406_v15 = vpop.f32.mrb[4].mxu0  ;;  %v11612_v6 = vld [vmem:[#allocation19_spill] sm:$0xff] }
 0x136   : > { %v1768_v30 = vadd.f32 %v11605_v4, %v1403_v31  ;;  %1946 = vperm.xlu1 %7059, %v11597_v3   ;;  %v2115_v49 = vadd.f32 %v11607_v62, %v2039_v24  ;;  %v2041_v52 = vadd.f32 %v11608_v61, %v1767_v10  ;;  %v2685_v42 = vpack.c.bf16 %v2625_v45, %v2623_v27  ;;  %v11611_v31 = vld [vmem:[#allocation24_spill] sm:$0xff]  ;;  %v1408_v9 = vpop.f32.mrb[5].mxu0  ;;  %v1621_v10 = vpop.permute.xlu1 %1620  ;;  %v11614_v61 = vld [vmem:[#allocation21_spill] sm:$0xff] }
 0x137   : > { %11603 = vst [vmem:[#allocation99_spill] sm:$0xff] %v9291_v16  ;;  %11606 = vst [vmem:[#allocation12_spill] sm:$0xff] %v9296_v5  ;;  %v2686_v32 = vpack.c.bf16 %v2626_v0, %v2624_v17  ;;  %v9303_v16 = vmul.f32 %v8758_v22, %v1042_v33  ;;  %v2116_v46 = vadd.f32 %v11611_v31, %v2040_v14  ;;  %v2388_v5 = vpop.f32.mrb[10].mxu1  ;;  %v11613_v33 = vld [vmem:[#allocation20_spill] sm:$0xff]  ;;  %v1410_v14 = vpop.f32.mrb[6].mxu0 }
 0x138   : > { %v2042_v28 = vadd.f32 %v11609_v43, %v1768_v30  ;;  %v2385_v4 = vadd.f32 %v2384_v26, %v8925_v20  ;;  %v2117_v3 = vadd.f32 %v11607_v62, %v2041_v52  ;;  %v1407_v24 = vadd.f32 %v1406_v15, %v11612_v6  ;;  %v2390_v45 = vpop.f32.mrb[11].mxu1 }
 0x139   : > { %11610 = vst [vmem:[#allocation11_spill] sm:$0xff] %v9303_v16  ;;  %v9310_v27 = vadd.f32 %v2386_v21, %v8909_v41  ;;  %v2389_v17 = vadd.f32 %v2388_v5, %v8925_v20  ;;  %3358 = vmatprep.mubr.bf16.mxu0 %v2686_v32  ;;  %v2523_v43 = vmax.f32 %v2115_v49, 0.0  ;;  %v1409_v0 = vadd.f32 %v1408_v9, %v11613_v33  ;;  %v11616_v5 = vld [vmem:[#allocation6_spill] sm:$0xff]  ;;  %v1412_v32 = vpop.f32.mrb[7].mxu0  ;;  %v11617_v9 = vld [vmem:[#allocation23_spill] sm:$0xff] }
 0x13a   : > { %7060 = vset.pattern.permute.xlu1 %v11516_v23  ;;  %v2118_v30 = vadd.f32 %v11611_v31, %v2042_v28  ;;  %v2524_v26 = vmax.f32 %v2116_v46, 0.0  ;;  %3359 = vmatmul.mubr.bf16.gmra.mrb[68].mxu0 %v2685_v42  ;;  %v2525_v6 = vmax.f32 %v2117_v3, 0.0  ;;  %v1769_v52 = vadd.f32 %v11614_v61, %v1407_v24  ;;  %v7237_v23 = vld [vmem:[%s11447_s8 + $0x4] ss:$8 sps:$4 sm:$0xff]  }
 0x13b   : > { %v9318_v21 = vmul.f32 %v8743_v2, %v1621_v10  ;;  %1111 = vperm.xlu1 %7060, %v11616_v5   ;;  %v2627_v49 = vmax.f32 %v2385_v4, 0.0  ;;  %v1770_v15 = vadd.f32 %v11617_v9, %v1409_v0  ;;  %v1411_v28 = vadd.f32 %v1410_v14, %v8872_v39  ;;  %v11618_v24 = vld [vmem:[#allocation15_spill] sm:$0xff]  ;;  %3905 = vmatprep.subr.bf16.mxu1 %v7237_v23  ;;  %v11619_v4 = vld [vmem:[#allocation16_spill] sm:$0xff]  ;;  %v1625_v0 = vpop.permute.xlu1 %1624  ;;  %v2394_v39 = vpop.f32.mrb[12].mxu1 }
 0x13c   : > { %v1413_v42 = vadd.f32 %v1412_v32, %v8876_v29  ;;  %v2526_v46 = vmax.f32 %v2118_v30, 0.0  ;;  %v2587_v3 = vpack.c.bf16 %v2525_v6, %v2523_v43  ;;  %v2043_v33 = vadd.f32 %v11618_v24, %v1769_v52  ;;  %v7235_v29 = vld [vmem:[%s11447_s8] ss:$8 sps:$4 sm:$0xff]   ;;  %v1416_v6 = vpop.f32.mrb[8].mxu0 }
 0x13d   : > { %11615 = vst [vmem:[#allocation22_spill] sm:$0xff] %v9318_v21  ;;  %v9329_v61 = vmul.f32 %v8746_v34, %v1621_v10  ;;  %v2629_v21 = vmax.f32 %v2389_v17, 0.0  ;;  %v2044_v16 = vadd.f32 %v11619_v4, %v1770_v15  ;;  %v1771_v57 = vadd.f32 %v11620_v18, %v1411_v28  ;;  %v11622_v14 = vld [vmem:[#allocation27_spill] sm:$0xff]  ;;  %v1418_v28 = vpop.f32.mrb[9].mxu0 }
 0x13e   : > { %v1772_v25 = vadd.f32 %v11621_v58, %v1413_v42  ;;  %v2588_v9 = vpack.c.bf16 %v2526_v46, %v2524_v26  ;;  %v9338_v43 = vmul.f32 %v8743_v2, %v1625_v0  ;;  %v9341_v10 = vmul.f32 %v8746_v34, %v1625_v0  ;;  %v2396_v58 = vpop.f32.mrb[13].mxu1  ;;  %v11623_v15 = vld [vmem:[#allocation31_spill] sm:$0xff]  ;;  %v11624_v46 = vld [vmem:[#allocation32_spill] sm:$0xff] }
 0x13f   : > { %7061 = vset.pattern.permute.xlu1 %v11528_v48  ;;  %v2119_v17 = vadd.f32 %v11607_v62, %v2043_v33  ;;  %v9345_v18 = vpack.c.bf16 %v2629_v21, %v2627_v49  ;;  %v2045_v30 = vadd.f32 %v11622_v14, %v1771_v57  ;;  %v2120_v52 = vadd.f32 %v11611_v31, %v2044_v16  ;;  %v2398_v23 = vpop.f32.mrb[14].mxu1  ;;  %v11625_v33 = vld [vmem:[#allocation28_spill] sm:$0xff]  ;;  %v11626_v14 = vld [vmem:[#allocation5_spill] sm:$0xff] }
 0x140   : > { %v2046_v26 = vadd.f32 %v8884_v11, %v1772_v25  ;;  %1676 = vperm.xlu1 %7061, %v11616_v5   ;;  %2951 = vmatprep.mubr.bf16.mxu1 %v2588_v9  ;;  %v2628_v32 = vmax.f32 %v9310_v27, 0.0  ;;  %v1417_v48 = vadd.f32 %v1416_v6, %v11623_v15  ;;  %v2391_v49 = vadd.f32 %v2390_v45, %v8909_v41  ;;  %v9357_v11 = vpop.f32.mrb[15].mxu1  ;;  %v1420_v5 = vpop.f32.mrb[10].mxu0 }
 0x141   : > { %2952 = vmatmul.mubr.bf16.vlgmr.msra.gmra.mrb[64].mxu1 %v2587_v3  ;;  %v2527_v21 = vmax.f32 %v2119_v17, 0.0  ;;  %v9355_v57 = vadd.f32 %v2394_v39, %v8925_v20  ;;  %v1419_v25 = vadd.f32 %v1418_v28, %v8906_v47  ;;  %v2528_v42 = vmax.f32 %v2120_v52, 0.0  ;;  %v1899_v3 = vpop.permute.xlu1 %1898  ;;  %v1422_v45 = vpop.f32.mrb[11].mxu0  ;;  %v11629_v28 = vld [vmem:[#allocation18_spill] sm:$0xff] }
 0x142   : > { %v2122_v16 = vadd.f32 %v11611_v31, %v2046_v26  ;;  %v2121_v27 = vadd.f32 %v11607_v62, %v2045_v30  ;;  %3906 = vmatpush1.bf16.msra.mxu1 %v7235_v29  ;;  %v1773_v24 = vadd.f32 %v11624_v46, %v1417_v48  ;;  %v1421_v4 = vadd.f32 %v1420_v5, %v11625_v33  ;;  %v11627_v29 = vld [vmem:[#allocation29_spill] sm:$0xff]  ;;  %v9381_v46 = vpop.f32.mrb[16].mxu1 }
 0x143   : > { %v2630_v0 = vmax.f32 %v2391_v49, 0.0  ;;  %v2631_v9 = vmax.f32 %v9355_v57, 0.0  ;;  %v1774_v39 = vadd.f32 %v8917_v37, %v1419_v25  ;;  %v9367_v47 = vmul.f32 %v8748_v13, %v1899_v3  ;;  %v11628_v26 = vld [vmem:[#allocation17_spill] sm:$0xff] }
 0x144   : > { %v9370_v17 = vmul.f32 %v8750_v40, %v1899_v3  ;;  %1680 = vperm.xlu1 %7061, %v11626_v14   ;;  %v1423_v30 = vadd.f32 %v1422_v45, %v11627_v29  ;;  %v2047_v6 = vadd.f32 %v11628_v26, %v1773_v24  ;;  %v1775_v52 = vadd.f32 %v8929_v56, %v1421_v4  ;;  %v9385_v29 = vpop.f32.mrb[17].mxu1 }
 0x145   : > { %v2530_v15 = vmax.f32 %v2122_v16, 0.0  ;;  %v2529_v48 = vmax.f32 %v2121_v27, 0.0  ;;  %v2048_v49 = vadd.f32 %v11629_v28, %v1774_v39  ;;  %v2688_v25 = vpack.c.bf16 %v2630_v0, %v2628_v32  ;;  %v1052_v16 = vpop.permute.xlu1 %1051  ;;  %v9406_v0 = vpop.f32.mrb[18].mxu1  ;;  %v7241_v39 = vld [vmem:[%s11455_s16] ss:$8 sps:$4 sm:$0xff]   ;;  %v11630_v28 = vld [vmem:[#allocation30_spill] sm:$0xff] }
 0x146   : > { %v1776_v37 = vadd.f32 %v8933_v7, %v1423_v30  ;;  %v9379_v5 = vadd.f32 %v2396_v58, %v8909_v41  ;;  %v2049_v3 = vadd.f32 %v8948_v50, %v1775_v52  ;;  %v2123_v24 = vadd.f32 %v11607_v62, %v2047_v6  ;;  %v1426_v7 = vpop.f32.mrb[12].mxu0  ;;  %v7238_v50 = vld [vmem:[%s11447_s8 + $0x10] ss:$8 sps:$4 sm:$0xff]  }
 0x147   : > { %v2590_v33 = vpack.c.bf16 %v2530_v15, %v2528_v42  ;;  %v2589_v45 = vpack.c.bf16 %v2529_v48, %v2527_v21  ;;  %v2124_v32 = vadd.f32 %v11611_v31, %v2048_v49  ;;  %v2399_v27 = vadd.f32 %v2398_v23, %v8925_v20  ;;  %3368 = vmatprep.mubr.bf16.mxu0 %v2688_v25  ;;  %v7240_v21 = vld [vmem:[%s11447_s8 + $0x14] ss:$8 sps:$4 sm:$0xff]   ;;  %v1428_v23 = vpop.f32.mrb[13].mxu0  ;;  %v7243_v15 = vld [vmem:[%s11455_s16 + $0x4] ss:$8 sps:$4 sm:$0xff]  }
 0x148   : > { %v2050_v56 = vadd.f32 %v8952_v51, %v1776_v37  ;;  %7063 = vset.pattern.permute.xlu1 %v11504_v44  ;;  %v2632_v58 = vmax.f32 %v9379_v5, 0.0  ;;  %v9399_v51 = vmul.f32 %v8755_v55, %v1052_v16  ;;  %v9402_v44 = vmul.f32 %v8758_v22, %v1052_v16  ;;  %v1430_v26 = vpop.f32.mrb[14].mxu0  ;;  %3369 = vmatmul.mubr.bf16.gmra.mrb[72].mxu0 %v9345_v18 }
 0x149   : > { %1954 = vperm.xlu1 %7063, %v11626_v14   ;;  %v1427_v42 = vadd.f32 %v1426_v7, %v8972_v54  ;;  %2961 = vmatprep.mubr.bf16.mxu1 %v2590_v33  ;;  %v2531_v4 = vmax.f32 %v2123_v24, 0.0  ;;  %v1429_v30 = vadd.f32 %v1428_v23, %v8976_v36  ;;  %v2532_v52 = vmax.f32 %v2124_v32, 0.0  ;;  %v9415_v54 = vpop.f32.mrb[19].mxu1  ;;  %v1432_v36 = vpop.f32.mrb[15].mxu0  ;;  %v11632_v32 = vld [vmem:[#allocation42_spill] sm:$0xff] }
 0x14a   : > { %2962 = vmatmul.mubr.bf16.gmra.mrb[68].mxu1 %v2589_v45  ;;  %v2126_v6 = vadd.f32 %v11611_v31, %v2050_v56  ;;  %v2125_v14 = vadd.f32 %v11607_v62, %v2049_v3  ;;  %v1431_v49 = vadd.f32 %v1430_v26, %v11630_v28  ;;  %v2633_v37 = vmax.f32 %v2399_v27, 0.0  ;;  %3907 = vmatprep.subr.bf16.mxu1 %v7240_v21  ;;  %v11631_v3 = vld [vmem:[#allocation33_spill] sm:$0xff]  ;;  %v1629_v56 = vpop.permute.xlu1 %1628  ;;  %v9438_v21 = vpop.f32.mrb[20].mxu1  ;;  %v7246_v23 = vld [vmem:[%s11447_s8 + $0x24] ss:$8 sps:$4 sm:$0xff]  }
 0x14b   : > { %v1777_v48 = vadd.f32 %v8980_v53, %v1427_v42  ;;  %v2401_v25 = vadd.f32 %v9357_v11, %v8909_v41  ;;  %v1778_v5 = vadd.f32 %v8984_v38, %v1429_v30  ;;  %v1433_v18 = vadd.f32 %v1432_v36, %v11631_v3  ;;  %3908 = vmatpush1.bf16.msra.mxu1 %v7238_v50  ;;  %v9442_v42 = vpop.f32.mrb[21].mxu1  ;;  %v11633_v30 = vld [vmem:[#allocation43_spill] sm:$0xff] }
 0x14c   : > { %v2534_v33 = vmax.f32 %v2126_v6, 0.0  ;;  %v2533_v45 = vmax.f32 %v2125_v14, 0.0  ;;  %4302 = vmatprep.subr.bf16.mxu0 %v7243_v15  ;;  %v1779_v53 = vadd.f32 %v8998_v59, %v1431_v49  ;;  %v2689_v16 = vpack.c.bf16 %v2633_v37, %v2631_v9  ;;  %v1436_v6 = vpop.f32.mrb[16].mxu0  ;;  %3909 = vmatprep.subr.bf16.mxu1 %v7246_v23  ;;  %v7252_v37 = vld [vmem:[%s11447_s8 + $0x34] ss:$8 sps:$4 sm:$0xff]  }
 0x14d   : > { %v2051_v24 = vadd.f32 %v9007_v63, %v1777_v48  ;;  %v2634_v7 = vmax.f32 %v2401_v25, 0.0  ;;  %4303 = vmatpush1.bf16.msra.mxu0 %v7241_v39  ;;  %v2052_v11 = vadd.f32 %v9011_v19, %v1778_v5  ;;  %v1780_v38 = vadd.f32 %v11632_v32, %v1433_v18  ;;  %v7244_v19 = vld [vmem:[%s11447_s8 + $0x20] ss:$8 sps:$4 sm:$0xff]   ;;  %v1438_v28 = vpop.f32.mrb[17].mxu0 }
 0x14e   : > { %v9433_v27 = vmul.f32 %v8743_v2, %v1629_v56  ;;  %v9436_v50 = vmul.f32 %v8746_v34, %v1629_v56  ;;  %v2053_v63 = vadd.f32 %v9015_v60, %v1779_v53  ;;  %v2592_v57 = vpack.c.bf16 %v2534_v33, %v2532_v52  ;;  %v7249_v52 = vld [vmem:[%s11455_s16 + $0x14] ss:$8 sps:$4 sm:$0xff]   ;;  %v1633_v15 = vpop.permute.xlu1 %1632 }
 0x14f   : > { %v2127_v59 = vadd.f32 %v11607_v62, %v2051_v24  ;;  %v2591_v9 = vpack.c.bf16 %v2533_v45, %v2531_v4  ;;  %v2128_v39 = vadd.f32 %v11611_v31, %v2052_v11  ;;  %v2054_v26 = vadd.f32 %v11633_v30, %v1780_v38  ;;  %v9456_v4 = vpop.f32.mrb[22].mxu1  ;;  %v11634_v45 = vld [vmem:[#allocation34_spill] sm:$0xff]  ;;  %3910 = vmatpush1.bf16.msra.mxu1 %v7244_v19  ;;  %v11636_v38 = vld [vmem:[#allocation35_spill] sm:$0xff] }
 0x150   : > { %v2690_v14 = vpack.c.bf16 %v2634_v7, %v2632_v58  ;;  %v9454_v60 = vadd.f32 %v9381_v46, %v8925_v20  ;;  %v1437_v48 = vadd.f32 %v1436_v6, %v9031_v1  ;;  %2971 = vmatprep.mubr.bf16.mxu1 %v2592_v57  ;;  %v2129_v49 = vadd.f32 %v11607_v62, %v2053_v63  ;;  %v7247_v46 = vld [vmem:[%s11455_s16 + $0x10] ss:$8 sps:$4 sm:$0xff]   ;;  %v9481_v18 = vpop.f32.mrb[23].mxu1 }
 0x151   : > { %v2535_v36 = vmax.f32 %v2127_v59, 0.0  ;;  %v9465_v58 = vadd.f32 %v9385_v29, %v8909_v41  ;;  %v9474_v1 = vmul.f32 %v8743_v2, %v1633_v15  ;;  %v9477_v25 = vmul.f32 %v8746_v34, %v1633_v15  ;;  %v1440_v29 = vpop.f32.mrb[18].mxu0  ;;  %v7250_v11 = vld [vmem:[%s11447_s8 + $0x30] ss:$8 sps:$4 sm:$0xff]   ;;  %4304 = vmatprep.subr.bf16.mxu0 %v7249_v52  ;;  %3911 = vmatprep.subr.bf16.mxu1 %v7252_v37 }
 0x152   : > { %v1439_v5 = vadd.f32 %v1438_v28, %v9035_v35  ;;  %2972 = vmatmul.mubr.bf16.gmra.mrb[72].mxu1 %v2591_v9  ;;  %v2130_v3 = vadd.f32 %v11611_v31, %v2054_v26  ;;  %v1781_v33 = vadd.f32 %v9049_v12, %v1437_v48  ;;  %v1441_v24 = vadd.f32 %v1440_v29, %v11634_v45  ;;  %v1442_v53 = vpop.f32.mrb[19].mxu0  ;;  %v11635_v35 = vld [vmem:[#allocation48_spill] sm:$0xff]  ;;  %v11638_v6 = vld [vmem:[#allocation45_spill] sm:$0xff]  ;;  %v1907_v15 = vpop.permute.xlu1 %1906 }
 0x153   : > { %v2536_v56 = vmax.f32 %v2128_v39, 0.0  ;;  %v2537_v7 = vmax.f32 %v2129_v49, 0.0  ;;  %3378 = vmatprep.mubr.bf16.mxu0 %v2690_v14  ;;  %v1443_v59 = vadd.f32 %v1442_v53, %v11636_v38  ;;  %v2635_v57 = vmax.f32 %v9454_v60, 0.0  ;;  %v7255_v12 = vld [vmem:[%s11455_s16 + $0x24] ss:$8 sps:$4 sm:$0xff]   ;;  %4305 = vmatpush1.bf16.msra.mxu0 %v7247_v46  ;;  %v9507_v28 = vpop.f32.mrb[24].mxu1 }
 0x154   : > { %v1782_v32 = vadd.f32 %v11635_v35, %v1439_v5  ;;  %v2538_v63 = vmax.f32 %v2130_v3, 0.0  ;;  %3379 = vmatmul.mubr.bf16.gmra.mrb[76].mxu0 %v2689_v16  ;;  %v11637_v9 = vld [vmem:[#allocation44_spill] sm:$0xff]  ;;  %v1783_v19 = vadd.f32 %v9065_v8, %v1441_v24  ;;  %v2636_v30 = vmax.f32 %v9465_v58, 0.0  ;;  %v11639_v60 = vld [vmem:[#allocation51_spill] sm:$0xff]  ;;  %4306 = vmatprep.subr.bf16.mxu0 %v7255_v12  ;;  %v7261_v49 = vld [vmem:[%s11455_s16 + $0x34] ss:$8 sps:$4 sm:$0xff]  }
 0x155   : > { %v2055_v23 = vadd.f32 %v11637_v9, %v1781_v33  ;;  %v2593_v39 = vpack.c.bf16 %v2537_v7, %v2535_v36  ;;  %v7253_v26 = vld [vmem:[%s11455_s16 + $0x20] ss:$8 sps:$4 sm:$0xff]   ;;  %v7258_v16 = vld [vmem:[%s11447_s8 + $0x44] ss:$8 sps:$4 sm:$0xff]   ;;  %v1784_v52 = vadd.f32 %v11639_v60, %v1443_v59  ;;  %v2409_v8 = vadd.f32 %v9406_v0, %v8925_v20  ;;  %v11640_v36 = vld [vmem:[#allocation54_spill] sm:$0xff]  ;;  %v9520_v3 = vpop.f32.mrb[25].mxu1  ;;  %3912 = vmatpush1.bf16.msra.mxu1 %v7250_v11 }
 0x156   : > { %v2056_v14 = vadd.f32 %v11638_v6, %v1782_v32  ;;  %v2594_v48 = vpack.c.bf16 %v2538_v63, %v2536_v56  ;;  %v2057_v46 = vadd.f32 %v11640_v36, %v1783_v19  ;;  %v9514_v37 = vmul.f32 %v8748_v13, %v1907_v15  ;;  %v7256_v0 = vld [vmem:[%s11447_s8 + $0x40] ss:$8 sps:$4 sm:$0xff]   ;;  %v1446_v24 = vpop.f32.mrb[20].mxu0  ;;  %v9529_v35 = vpop.f32.mrb[26].mxu1  ;;  %3913 = vmatprep.subr.bf16.mxu1 %v7258_v16  ;;  %v7264_v11 = vld [vmem:[%s11447_s8 + $0x54] ss:$8 sps:$4 sm:$0xff]  }
 0x157   : > { %v9517_v5 = vmul.f32 %v8750_v40, %v1907_v15  ;;  %v2131_v29 = vadd.f32 %v11607_v62, %v2055_v23  ;;  %v11641_v33 = vld [vmem:[#allocation55_spill] sm:$0xff]  ;;  %v2637_v56 = vmax.f32 %v2409_v8, 0.0  ;;  %v2411_v7 = vadd.f32 %v9415_v54, %v8909_v41  ;;  %v11642_v32 = vld [vmem:[#allocation58_spill] sm:$0xff]  ;;  %v1448_v59 = vpop.f32.mrb[21].mxu0  ;;  %v9540_v23 = vpop.f32.mrb[27].mxu1  ;;  %4307 = vmatpush1.bf16.msra.mxu0 %v7253_v26  ;;  %v11645_v8 = vld [vmem:[#allocation36_spill] sm:$0xff] }
 0x158   : > { %v2058_v45 = vadd.f32 %v11641_v33, %v1784_v52  ;;  %2981 = vmatprep.mubr.bf16.mxu1 %v2594_v48  ;;  %v2132_v53 = vadd.f32 %v11611_v31, %v2056_v14  ;;  %v1447_v38 = vadd.f32 %v1446_v24, %v11642_v32  ;;  %v2133_v63 = vadd.f32 %v11607_v62, %v2057_v46  ;;  %v7259_v54 = vld [vmem:[%s11455_s16 + $0x30] ss:$8 sps:$4 sm:$0xff]   ;;  %v11643_v19 = vld [vmem:[#allocation59_spill] sm:$0xff]  ;;  %v1450_v6 = vpop.f32.mrb[22].mxu0  ;;  %v1062_v26 = vpop.permute.xlu1 %1061 }
 0x159   : > { %v2539_v12 = vmax.f32 %v2131_v29, 0.0  ;;  %v9538_v9 = vadd.f32 %v9438_v21, %v8925_v20  ;;  %v1449_v16 = vadd.f32 %v1448_v59, %v11643_v19  ;;  %v2691_v52 = vpack.c.bf16 %v2637_v56, %v2635_v57  ;;  %4308 = vmatprep.subr.bf16.mxu0 %v7261_v49  ;;  %v7267_v21 = vld [vmem:[%s11455_s16 + $0x44] ss:$8 sps:$4 sm:$0xff]   ;;  %v11644_v15 = vld [vmem:[#allocation62_spill] sm:$0xff]  ;;  %v1452_v46 = vpop.f32.mrb[23].mxu0  ;;  %3914 = vmatpush1.bf16.msra.mxu1 %v7256_v0 }
 0x15a   : > { %2982 = vmatmul.mubr.bf16.gmra.mrb[76].mxu1 %v2593_v39  ;;  %v2134_v14 = vadd.f32 %v11611_v31, %v2058_v45  ;;  %v2540_v60 = vmax.f32 %v2132_v53, 0.0  ;;  %v1785_v48 = vadd.f32 %v11644_v15, %v1447_v38  ;;  %v1451_v36 = vadd.f32 %v1450_v6, %v11645_v8  ;;  %v7262_v39 = vld [vmem:[%s11447_s8 + $0x50] ss:$8 sps:$4 sm:$0xff]   ;;  %v11646_v45 = vld [vmem:[#allocation63_spill] sm:$0xff]  ;;  %3915 = vmatprep.subr.bf16.mxu1 %v7264_v11 }
 0x15b   : > { %v2541_v29 = vmax.f32 %v2133_v63, 0.0  ;;  %v2638_v33 = vmax.f32 %v2411_v7, 0.0  ;;  %v1786_v57 = vadd.f32 %v11646_v45, %v1449_v16  ;;  %v9557_v49 = vmul.f32 %v8755_v55, %v1062_v26  ;;  %v11648_v53 = vld [vmem:[#allocation37_spill] sm:$0xff]  ;;  %v11649_v32 = vld [vmem:[#allocation46_spill] sm:$0xff]  ;;  %4309 = vmatpush1.bf16.msra.mxu0 %v7259_v54  ;;  %v11651_v19 = vld [vmem:[#allocation47_spill] sm:$0xff]  ;;  %v9570_v45 = vpop.f32.mrb[28].mxu1 }
 0x15c   : > { %v9560_v24 = vmul.f32 %v8758_v22, %v1062_v26  ;;  %v1453_v56 = vadd.f32 %v1452_v46, %v11648_v53  ;;  %v2059_v38 = vadd.f32 %v11649_v32, %v1785_v48  ;;  %v11650_v59 = vld [vmem:[#allocation66_spill] sm:$0xff]  ;;  %v2542_v0 = vmax.f32 %v2134_v14, 0.0  ;;  %v11652_v15 = vld [vmem:[#allocation67_spill] sm:$0xff]  ;;  %4310 = vmatprep.subr.bf16.mxu0 %v7267_v21  ;;  %v9578_v54 = vpop.f32.mrb[29].mxu1 }
 0x15d   : > { %v1787_v7 = vadd.f32 %v11650_v59, %v1451_v36  ;;  %v2595_v63 = vpack.c.bf16 %v2541_v29, %v2539_v12  ;;  %v2060_v6 = vadd.f32 %v11651_v19, %v1786_v57  ;;  %v2692_v8 = vpack.c.bf16 %v2638_v33, %v2636_v30  ;;  %v11653_v11 = vld [vmem:[#allocation10_spill] sm:$0xff]  ;;  %3916 = vmatpush1.bf16.msra.mxu1 %v7262_v39  ;;  %v7265_v58 = vld [vmem:[%s11455_s16 + $0x40] ss:$8 sps:$4 sm:$0xff]   ;;  %v7270_v30 = vld [vmem:[%s11447_s8 + $0x64] ss:$8 sps:$4 sm:$0xff]   ;;  %v1456_v29 = vpop.f32.mrb[24].mxu0 }
 0x15e   : > { %11647 = vst [vmem:[#allocation13_spill] sm:$0xff] %v9560_v24  ;;  %v1788_v16 = vadd.f32 %v11652_v15, %v1453_v56  ;;  %v2596_v48 = vpack.c.bf16 %v2542_v0, %v2540_v60  ;;  %v2135_v36 = vadd.f32 %v11607_v62, %v2059_v38  ;;  %v9576_v12 = vadd.f32 %v9442_v42, %v8909_v41  ;;  %v11654_v14 = vld [vmem:[#allocation71_spill] sm:$0xff]  ;;  %v1637_v60 = vpop.permute.xlu1 %1636  ;;  %v7273_v53 = vld [vmem:[%s11455_s16 + $0x54] ss:$8 sps:$4 sm:$0xff]   ;;  %v1458_v59 = vpop.f32.mrb[25].mxu0 }
 0x15f   : > { %v2061_v46 = vadd.f32 %v11653_v11, %v1787_v7  ;;  %v2136_v33 = vadd.f32 %v11611_v31, %v2060_v6  ;;  %v2419_v42 = vadd.f32 %v9456_v4, %v8925_v20  ;;  %3388 = vmatprep.mubr.bf16.mxu0 %v2692_v8  ;;  %v9592_v39 = vadd.f32 %v9481_v18, %v8909_v41  ;;  %v7268_v57 = vld [vmem:[%s11447_s8 + $0x60] ss:$8 sps:$4 sm:$0xff]   ;;  %v11657_v4 = vld [vmem:[#allocation73_spill] sm:$0xff]  ;;  %v9608_v7 = vpop.f32.mrb[30].mxu1  ;;  %v11658_v19 = vld [vmem:[#allocation74_spill] sm:$0xff]  ;;  %v1460_v15 = vpop.f32.mrb[26].mxu0 }
 0x160   : > { %v2062_v21 = vadd.f32 %v11654_v14, %v1788_v16  ;;  %v9601_v56 = vmul.f32 %v8743_v2, %v1637_v60  ;;  %v9604_v32 = vmul.f32 %v8746_v34, %v1637_v60  ;;  %v1457_v38 = vadd.f32 %v1456_v29, %v11657_v4  ;;  %2991 = vmatprep.mubr.bf16.mxu1 %v2596_v48  ;;  %v7276_v0 = vld [vmem:[%s11447_s8 + $0x74] ss:$8 sps:$4 sm:$0xff]   ;;  %v9615_v14 = vpop.f32.mrb[31].mxu1  ;;  %v1462_v4 = vpop.f32.mrb[27].mxu0 }
 0x161   : > { %v2137_v18 = vadd.f32 %v11607_v62, %v2061_v46  ;;  %v1459_v6 = vadd.f32 %v1458_v59, %v11658_v19  ;;  %v2544_v8 = vmax.f32 %v2136_v33, 0.0  ;;  %v2543_v11 = vmax.f32 %v2135_v36, 0.0  ;;  %3389 = vmatmul.mubr.bf16.gmra.mrb[80].mxu0 %v2691_v52  ;;  %v11659_v48 = vld [vmem:[#allocation77_spill] sm:$0xff]  ;;  %v11660_v46 = vld [vmem:[#allocation38_spill] sm:$0xff]  ;;  %3917 = vmatprep.subr.bf16.mxu1 %v7270_v30  ;;  %v11662_v52 = vld [vmem:[#allocation39_spill] sm:$0xff] }
 0x162   : > { %11655 = vst [vmem:[#allocation14_spill] sm:$0xff] %v9601_v56  ;;  %11656 = vst [vmem:[#allocation24_spill] sm:$0xff] %v9604_v32  ;;  %2992 = vmatmul.mubr.bf16.gmra.mrb[80].mxu1 %v2595_v63  ;;  %v2138_v16 = vadd.f32 %v11611_v31, %v2062_v21  ;;  %v1789_v60 = vadd.f32 %v11659_v48, %v1457_v38  ;;  %v1461_v29 = vadd.f32 %v1460_v15, %v11660_v46  ;;  %v7271_v63 = vld [vmem:[%s11455_s16 + $0x50] ss:$8 sps:$4 sm:$0xff]   ;;  %v1641_v36 = vpop.permute.xlu1 %1640 }
 0x163   : > { %v2545_v26 = vmax.f32 %v2137_v18, 0.0  ;;  %v2640_v32 = vmax.f32 %v9576_v12, 0.0  ;;  %4311 = vmatpush1.bf16.msra.mxu0 %v7265_v58  ;;  %v11661_v21 = vld [vmem:[#allocation78_spill] sm:$0xff]  ;;  %v1463_v59 = vadd.f32 %v1462_v4, %v11662_v52  ;;  %v2641_v56 = vmax.f32 %v2419_v42, 0.0  ;;  %3918 = vmatpush1.bf16.msra.mxu1 %v7268_v57  ;;  %v11663_v38 = vld [vmem:[#allocation49_spill] sm:$0xff]  ;;  %v11664_v18 = vld [vmem:[#allocation80_spill] sm:$0xff] }
 0x164   : > { %v1790_v33 = vadd.f32 %v11661_v21, %v1459_v6  ;;  %v2546_v19 = vmax.f32 %v2138_v16, 0.0  ;;  %4312 = vmatprep.subr.bf16.mxu0 %v7273_v53  ;;  %v2063_v15 = vadd.f32 %v11663_v38, %v1789_v60  ;;  %v1791_v48 = vadd.f32 %v11664_v18, %v1461_v29  ;;  %v7274_v30 = vld [vmem:[%s11447_s8 + $0x70] ss:$8 sps:$4 sm:$0xff]   ;;  %3919 = vmatprep.subr.bf16.mxu1 %v7276_v0  ;;  %v7279_v42 = vld [vmem:[%s11455_s16 + $0x64] ss:$8 sps:$4 sm:$0xff]   ;;  %v9641_v29 = vpop.f32.mrb[32].mxu1 }
 0x165   : > { %v9628_v12 = vmul.f32 %v8743_v2, %v1641_v36  ;;  %v9631_v58 = vmul.f32 %v8746_v34, %v1641_v36  ;;  %v11667_v57 = vld [vmem:[#allocation50_spill] sm:$0xff]  ;;  %v11668_v6 = vld [vmem:[#allocation81_spill] sm:$0xff]  ;;  %v2597_v46 = vpack.c.bf16 %v2545_v26, %v2543_v11  ;;  %v11669_v4 = vld [vmem:[#allocation83_spill] sm:$0xff]  ;;  %v11670_v36 = vmax.f32 %v9538_v9, 0.0  ;;  %v9651_v18 = vpop.f32.mrb[33].mxu1 }
 0x166   : > { %v2064_v53 = vadd.f32 %v11667_v57, %v1790_v33  ;;  %v1792_v16 = vadd.f32 %v11668_v6, %v1463_v59  ;;  %v2598_v60 = vpack.c.bf16 %v2546_v19, %v2544_v8  ;;  %v2065_v21 = vadd.f32 %v11669_v4, %v1791_v48  ;;  %v7277_v26 = vld [vmem:[%s11455_s16 + $0x60] ss:$8 sps:$4 sm:$0xff]   ;;  %v11671_v8 = vld [vmem:[#allocation86_spill] sm:$0xff]  ;;  %v1466_v33 = vpop.f32.mrb[28].mxu0  ;;  %v1915_v59 = vpop.permute.xlu1 %1914  ;;  %v11672_v19 = vld [vmem:[#allocation89_spill] sm:$0xff] }
 0x167   : > { %11665 = vst [vmem:[#allocation19_spill] sm:$0xff] %v9628_v12  ;;  %11666 = vst [vmem:[#allocation20_spill] sm:$0xff] %v9631_v58  ;;  %v2693_v52 = vpack.c.bf16 %v2641_v56, %v11670_v36  ;;  %v2642_v38 = vmax.f32 %v9592_v39, 0.0  ;;  %v9649_v0 = vadd.f32 %v9507_v28, %v8925_v20  ;;  %4313 = vmatpush1.bf16.msra.mxu0 %v7271_v63  ;;  %v9663_v28 = vpop.f32.mrb[34].mxu1  ;;  %v7282_v63 = vld [vmem:[%s11447_s8 + $0x84] ss:$8 sps:$4 sm:$0xff]   ;;  %3920 = vmatpush1.bf16.msra.mxu1 %v7274_v30 }
 0x168   : > { %v2066_v11 = vadd.f32 %v11671_v8, %v1792_v16  ;;  %3001 = vmatprep.mubr.bf16.mxu1 %v2598_v60  ;;  %v2140_v9 = vadd.f32 %v11611_v31, %v2064_v53  ;;  %v2139_v56 = vadd.f32 %v11607_v62, %v2063_v15  ;;  %v9661_v39 = vadd.f32 %v9520_v3, %v8909_v41  ;;  %v1468_v57 = vpop.f32.mrb[29].mxu0  ;;  %v7280_v3 = vld [vmem:[%s11447_s8 + $0x80] ss:$8 sps:$4 sm:$0xff]   ;;  %v7285_v15 = vld [vmem:[%s11455_s16 + $0x74] ss:$8 sps:$4 sm:$0xff]  }
 0x169   : > { %v1467_v48 = vadd.f32 %v1466_v33, %v11672_v19  ;;  %v2694_v6 = vpack.c.bf16 %v2642_v38, %v2640_v32  ;;  %v2141_v16 = vadd.f32 %v11607_v62, %v2065_v21  ;;  %4314 = vmatprep.subr.bf16.mxu0 %v7279_v42  ;;  %v9677_v53 = vmul.f32 %v8748_v13, %v1915_v59  ;;  %v11675_v4 = vld [vmem:[#allocation90_spill] sm:$0xff]  ;;  %v1470_v21 = vpop.f32.mrb[30].mxu0  ;;  %v9684_v42 = vpop.f32.mrb[35].mxu1  ;;  %v11676_v38 = vld [vmem:[#allocation92_spill] sm:$0xff] }
 0x16a   : > { %v9680_v60 = vmul.f32 %v8750_v40, %v1915_v59  ;;  %v1469_v32 = vadd.f32 %v1468_v57, %v11675_v4  ;;  %3002 = vmatmul.mubr.bf16.gmra.mrb[84].mxu1 %v2597_v46  ;;  %v2142_v30 = vadd.f32 %v11611_v31, %v2066_v11  ;;  %v7288_v36 = vld [vmem:[%s11447_s8 + $0x94] ss:$8 sps:$4 sm:$0xff]   ;;  %v11677_v33 = vld [vmem:[#allocation40_spill] sm:$0xff]  ;;  %v2548_v58 = vmax.f32 %v2140_v9, 0.0  ;;  %v7283_v46 = vld [vmem:[%s11455_s16 + $0x70] ss:$8 sps:$4 sm:$0xff]   ;;  %3921 = vmatprep.subr.bf16.mxu1 %v7282_v63  ;;  %v1072_v63 = vpop.permute.xlu1 %1071 }
 0x16b   : > { %11673 = vst [vmem:[#allocation21_spill] sm:$0xff] %v9677_v53  ;;  %v1793_v8 = vadd.f32 %v11676_v38, %v1467_v48  ;;  %v1471_v19 = vadd.f32 %v1470_v21, %v11677_v33  ;;  %v1472_v53 = vpop.f32.mrb[31].mxu0  ;;  %v2547_v59 = vmax.f32 %v2139_v56, 0.0  ;;  %3398 = vmatprep.mubr.bf16.mxu0 %v2694_v6  ;;  %4315 = vmatpush1.bf16.msra.mxu0 %v7277_v26  ;;  %v11678_v11 = vld [vmem:[#allocation93_spill] sm:$0xff]  ;;  %v2549_v24 = vmax.f32 %v2141_v16, 0.0  ;;  %v11680_v48 = vld [vmem:[#allocation52_spill] sm:$0xff] }
 0x16c   : > { %11674 = vst [vmem:[#allocation6_spill] sm:$0xff] %v9680_v60  ;;  %v1794_v57 = vadd.f32 %v11678_v11, %v1469_v32  ;;  %v11679_v4 = vld [vmem:[#allocation41_spill] sm:$0xff]  ;;  %v2550_v12 = vmax.f32 %v2142_v30, 0.0  ;;  %3399 = vmatmul.mubr.bf16.gmra.mrb[84].mxu0 %v2693_v52  ;;  %v11681_v21 = vld [vmem:[#allocation96_spill] sm:$0xff]  ;;  %v2643_v9 = vmax.f32 %v9649_v0, 0.0  ;;  %v2429_v26 = vadd.f32 %v9529_v35, %v8925_v20  ;;  %3922 = vmatpush1.bf16.msra.mxu1 %v7280_v3  ;;  %v11684_v3 = vld [vmem:[#allocation98_spill] sm:$0xff] }
 0x16d   : > { %v1473_v60 = vadd.f32 %v1472_v53, %v11679_v4  ;;  %v2067_v38 = vadd.f32 %v11680_v48, %v1793_v8  ;;  %v1795_v33 = vadd.f32 %v11681_v21, %v1471_v19  ;;  %4316 = vmatprep.subr.bf16.mxu0 %v7285_v15  ;;  %v7286_v56 = vld [vmem:[%s11447_s8 + $0x90] ss:$8 sps:$4 sm:$0xff]   ;;  %v2599_v30 = vpack.c.bf16 %v2549_v24, %v2547_v59  ;;  %v9706_v8 = vpop.f32.mrb[36].mxu1  ;;  %v7289_v35 = vld [vmem:[%s11455_s16 + $0x80] ss:$8 sps:$4 sm:$0xff]   ;;  %v1476_v11 = vpop.f32.mrb[32].mxu0 }
 0x16e   : > { %v11682_v6 = vld [vmem:[#allocation53_spill] sm:$0xff]  ;;  %v2600_v32 = vpack.c.bf16 %v2550_v12, %v2548_v58  ;;  %3923 = vmatprep.subr.bf16.mxu1 %v7288_v36  ;;  %v7291_v0 = vld [vmem:[%s11455_s16 + $0x84] ss:$8 sps:$4 sm:$0xff]   ;;  %v9716_v19 = vmul.f32 %v8755_v55, %v1072_v63  ;;  %v2645_v12 = vmax.f32 %v2429_v26, 0.0  ;;  %v9719_v24 = vpop.f32.mrb[37].mxu1  ;;  %v9738_v21 = vmul.f32 %v8758_v22, %v1072_v63 }
 0x16f   : > { %v2068_v53 = vadd.f32 %v11682_v6, %v1794_v57  ;;  %v11683_v16 = vld [vmem:[#allocation97_spill] sm:$0xff]  ;;  %v2069_v15 = vadd.f32 %v11684_v3, %v1795_v33  ;;  %4317 = vmatpush1.bf16.msra.mxu0 %v7283_v46  ;;  %v7294_v58 = vld [vmem:[%s11447_s8 + $0xa4] ss:$8 sps:$4 sm:$0xff]   ;;  %v2431_v57 = vadd.f32 %v9540_v23, %v8909_v41  ;;  %v9732_v48 = vpop.f32.mrb[38].mxu1  ;;  %v1478_v6 = vpop.f32.mrb[33].mxu0  ;;  %v2143_v23 = vadd.f32 %v11607_v62, %v2067_v38 }
 0x170   : > { %v1796_v52 = vadd.f32 %v11683_v16, %v1473_v60  ;;  %v2644_v60 = vmax.f32 %v9661_v39, 0.0  ;;  %v11685_v36 = vld [vmem:[#allocation99_spill] sm:$0xff]  ;;  %3011 = vmatprep.mubr.bf16.mxu1 %v2600_v32  ;;  %v9730_v39 = vadd.f32 %v9570_v45, %v8925_v20  ;;  %11686 = vst [vmem:[#allocation23_spill] sm:$0xff] %v9732_v48  ;;  %v7300_v46 = vld [vmem:[%s11455_s16 + $0x94] ss:$8 sps:$4 sm:$0xff]   ;;  %11687 = vst [vmem:[#allocation15_spill] sm:$0xff] %v9738_v21  ;;  %3924 = vmatpush1.bf16.msra.mxu1 %v7286_v56 }
 0x171   : > { %v2144_v4 = vadd.f32 %v11611_v31, %v2068_v53  ;;  %v11688_v33 = vld [vmem:[#allocation12_spill] sm:$0xff]  ;;  %v2695_v16 = vpack.c.bf16 %v2645_v12, %v2643_v9  ;;  %v9742_v53 = vpop.f32.mrb[39].mxu1  ;;  %v1480_v3 = vpop.f32.mrb[34].mxu0  ;;  %4318 = vmatprep.subr.bf16.mxu0 %v7291_v0  ;;  %v7297_v38 = vld [vmem:[%s11447_s8 + $0xb4] ss:$8 sps:$4 sm:$0xff]   ;;  %3925 = vmatprep.subr.bf16.mxu1 %v7294_v58 }
 0x172   : > { %v2070_v59 = vadd.f32 %v11685_v36, %v1796_v52  ;;  %v1477_v26 = vadd.f32 %v1476_v11, %v11688_v33  ;;  %11689 = vst [vmem:[#allocation16_spill] sm:$0xff] %v9742_v53  ;;  %v7292_v45 = vld [vmem:[%s11447_s8 + $0xa0] ss:$8 sps:$4 sm:$0xff]   ;;  %3012 = vmatmul.mubr.bf16.gmra.mrb[88].mxu1 %v2599_v30  ;;  %v2646_v36 = vmax.f32 %v2431_v57, 0.0  ;;  %v2145_v11 = vadd.f32 %v11607_v62, %v2069_v15  ;;  %v11691_v9 = vld [vmem:[#allocation22_spill] sm:$0xff]  ;;  %v1645_v12 = vpop.permute.xlu1 %1644  ;;  %v1482_v21 = vpop.f32.mrb[35].mxu0 }
 0x173   : > { %v11690_v52 = vld [vmem:[#allocation11_spill] sm:$0xff]  ;;  %v11692_v33 = vld [vmem:[#allocation68_spill] sm:$0xff]  ;;  %v2552_v48 = vmax.f32 %v2144_v4, 0.0  ;;  %v2647_v30 = vmax.f32 %v9730_v39, 0.0  ;;  %4319 = vmatpush1.bf16.msra.mxu0 %v7289_v35  ;;  %v9758_v15 = vmul.f32 %v8743_v2, %v1645_v12  ;;  %v11693_v0 = vld [vmem:[#allocation69_spill] sm:$0xff] }
 0x174   : > { %v1479_v32 = vadd.f32 %v1478_v6, %v11690_v52  ;;  %v2146_v63 = vadd.f32 %v11611_v31, %v2070_v59  ;;  %v1797_v56 = vadd.f32 %v11691_v9, %v1477_v26  ;;  %v1481_v53 = vadd.f32 %v1480_v3, %v11692_v33  ;;  %4320 = vmatprep.subr.bf16.mxu0 %v7300_v46  ;;  %v7295_v35 = vld [vmem:[%s11447_s8 + $0xb0] ss:$8 sps:$4 sm:$0xff]  }
 0x175   : > { %v1483_v57 = vadd.f32 %v1482_v21, %v11693_v0  ;;  %v2551_v6 = vmax.f32 %v2143_v23, 0.0  ;;  %v9762_v26 = vmul.f32 %v8746_v34, %v1645_v12  ;;  %v2696_v3 = vpack.c.bf16 %v2646_v36, %v2644_v60  ;;  %3926 = vmatpush1.bf16.msra.mxu1 %v7292_v45  ;;  %v9772_v21 = vpop.f32.mrb[40].mxu1  ;;  %v11695_v23 = vld [vmem:[#allocation56_spill] sm:$0xff] }
 0x176   : > { %v1798_v59 = vadd.f32 %v9329_v61, %v1479_v32  ;;  %v1799_v52 = vadd.f32 %v9338_v43, %v1481_v53  ;;  %v2554_v4 = vmax.f32 %v2146_v63, 0.0  ;;  %v11694_v61 = vld [vmem:[#allocation57_spill] sm:$0xff]  ;;  %v2553_v32 = vmax.f32 %v2145_v11, 0.0  ;;  %3927 = vmatprep.subr.bf16.mxu1 %v7297_v38  ;;  %v1649_v60 = vpop.permute.xlu1 %1648  ;;  %v9779_v63 = vpop.f32.mrb[41].mxu1 }
 0x177   : > { %v1800_v39 = vadd.f32 %v9341_v10, %v1483_v57  ;;  %v2437_v46 = vadd.f32 %v9578_v54, %v8909_v41  ;;  %v2071_v43 = vadd.f32 %v11695_v23, %v1797_v56  ;;  %v2439_v45 = vadd.f32 %v9608_v7, %v8925_v20  ;;  %3408 = vmatprep.mubr.bf16.mxu0 %v2696_v3  ;;  %v7298_v10 = vld [vmem:[%s11455_s16 + $0x90] ss:$8 sps:$4 sm:$0xff]   ;;  %v9789_v7 = vpop.f32.mrb[42].mxu1  ;;  %v7306_v56 = vld [vmem:[%s11455_s16 + $0xa4] ss:$8 sps:$4 sm:$0xff]  }
 0x178   : > { %v2072_v58 = vadd.f32 %v11694_v61, %v1798_v59  ;;  %v2602_v53 = vpack.c.bf16 %v2554_v4, %v2552_v48  ;;  %v2441_v36 = vadd.f32 %v9615_v14, %v8909_v41  ;;  %v2073_v54 = vadd.f32 %v9367_v47, %v1799_v52  ;;  %v1486_v48 = vpop.f32.mrb[36].mxu0  ;;  %3409 = vmatmul.mubr.bf16.gmra.mrb[88].mxu0 %v2695_v16  ;;  %v7303_v14 = vld [vmem:[%s11447_s8 + $0xc4] ss:$8 sps:$4 sm:$0xff]   ;;  %v9798_v0 = vpop.f32.mrb[43].mxu1  ;;  %v11696_v61 = vld [vmem:[#allocation9_spill] sm:$0xff]  ;;  %v11697_v23 = vld [vmem:[#allocation70_spill] sm:$0xff] }
 0x179   : > { %v2074_v11 = vadd.f32 %v9370_v17, %v1800_v39  ;;  %v9787_v38 = vmul.f32 %v8743_v2, %v1649_v60  ;;  %v2601_v9 = vpack.c.bf16 %v2553_v32, %v2551_v6  ;;  %v1487_v47 = vadd.f32 %v1486_v48, %v9399_v51  ;;  %v1488_v17 = vpop.f32.mrb[37].mxu0  ;;  %3928 = vmatpush1.bf16.msra.mxu1 %v7295_v35  ;;  %v7301_v51 = vld [vmem:[%s11447_s8 + $0xc0] ss:$8 sps:$4 sm:$0xff]  }
 0x17a   : > { %3021 = vmatprep.mubr.bf16.mxu1 %v2602_v53  ;;  %v2648_v12 = vmax.f32 %v2437_v46, 0.0  ;;  %v2649_v33 = vmax.f32 %v2439_v45, 0.0  ;;  %v2650_v59 = vmax.f32 %v2441_v36, 0.0  ;;  %v1489_v16 = vadd.f32 %v1488_v17, %v9402_v44  ;;  %v1490_v57 = vpop.f32.mrb[38].mxu0  ;;  %4321 = vmatpush1.bf16.msra.mxu0 %v7298_v10  ;;  %v9835_v17 = vpop.f32.mrb[44].mxu1 }
 0x17b   : > { %3022 = vmatmul.mubr.bf16.gmra.mrb[92].mxu1 %v2601_v9  ;;  %v2148_v6 = vadd.f32 %v11611_v31, %v2072_v58  ;;  %v2150_v52 = vadd.f32 %v11611_v31, %v2074_v11  ;;  %v9805_v3 = vadd.f32 %v9641_v29, %v8925_v20  ;;  %v1801_v4 = vadd.f32 %v9433_v27, %v1487_v47  ;;  %v1492_v39 = vpop.f32.mrb[39].mxu0  ;;  %v7309_v58 = vld [vmem:[%s11447_s8 + $0xd4] ss:$8 sps:$4 sm:$0xff]   ;;  %v1923_v29 = vpop.permute.xlu1 %1922  ;;  %v11698_v11 = vld [vmem:[#allocation60_spill] sm:$0xff] }
 0x17c   : > { %v1491_v35 = vadd.f32 %v1490_v57, %v11696_v61  ;;  %v2697_v44 = vpack.c.bf16 %v2649_v33, %v2647_v30  ;;  %v2698_v32 = vpack.c.bf16 %v2650_v59, %v2648_v12  ;;  %v1802_v46 = vadd.f32 %v9436_v50, %v1489_v16  ;;  %3929 = vmatprep.subr.bf16.mxu1 %v7303_v14  ;;  %v7304_v50 = vld [vmem:[%s11455_s16 + $0xa0] ss:$8 sps:$4 sm:$0xff]   ;;  %v11699_v9 = vld [vmem:[#allocation61_spill] sm:$0xff]  ;;  %v9845_v57 = vpop.f32.mrb[45].mxu1 }
 0x17d   : > { %v1493_v53 = vadd.f32 %v1492_v39, %v11697_v23  ;;  %v2556_v45 = vmax.f32 %v2148_v6, 0.0  ;;  %v2558_v36 = vmax.f32 %v2150_v52, 0.0  ;;  %4322 = vmatprep.subr.bf16.mxu0 %v7306_v56  ;;  %v9818_v27 = vmul.f32 %v8746_v34, %v1649_v60  ;;  %3930 = vmatpush1.bf16.msra.mxu1 %v7301_v51  ;;  %v1496_v6 = vpop.f32.mrb[40].mxu0  ;;  %v11702_v23 = vld [vmem:[#allocation3_spill] sm:$0xff] }
 0x17e   : > { %v9821_v30 = vadd.f32 %v11698_v11, %v1801_v4  ;;  %v1803_v10 = vadd.f32 %v9474_v1, %v1491_v35  ;;  %v9825_v48 = vmul.f32 %v8748_v13, %v1923_v29  ;;  %3418 = vmatprep.mubr.bf16.mxu0 %v2698_v32  ;;  %v2076_v47 = vadd.f32 %v11699_v9, %v1802_v46  ;;  %v7307_v1 = vld [vmem:[%s11447_s8 + $0xd0] ss:$8 sps:$4 sm:$0xff]   ;;  %v1498_v4 = vpop.f32.mrb[41].mxu0  ;;  %v11703_v11 = vld [vmem:[#allocation24_spill] sm:$0xff] }
 0x17f   : > { %v9832_v14 = vmul.f32 %v8750_v40, %v1923_v29  ;;  %v1804_v60 = vadd.f32 %v9477_v25, %v1493_v53  ;;  %v2604_v56 = vpack.c.bf16 %v2558_v36, %v2556_v45  ;;  %v2147_v33 = vadd.f32 %v11607_v62, %v2071_v43  ;;  %3931 = vmatprep.subr.bf16.mxu1 %v7309_v58  ;;  %v9853_v43 = vpop.f32.mrb[46].mxu1  ;;  %v11701_v46 = vld [vmem:[#allocation14_spill] sm:$0xff] }
 0x180   : > { %v2077_v12 = vadd.f32 %v9514_v37, %v1803_v10  ;;  %v2149_v59 = vadd.f32 %v11607_v62, %v2073_v54  ;;  %v2447_v16 = vadd.f32 %v9651_v18, %v8909_v41  ;;  %v2651_v52 = vmax.f32 %v9805_v3, 0.0  ;;  %3419 = vmatmul.mubr.bf16.gmra.mrb[92].mxu0 %v2697_v44  ;;  %v1082_v54 = vpop.permute.xlu1 %1081  ;;  %v9863_v58 = vpop.f32.mrb[47].mxu1 }
 0x181   : > { %v2078_v25 = vadd.f32 %v9517_v5, %v1804_v60  ;;  %3031 = vmatprep.mubr.bf16.mxu1 %v2604_v56  ;;  %v2449_v51 = vadd.f32 %v9663_v28, %v8925_v20  ;;  %v2451_v37 = vadd.f32 %v9684_v42, %v8909_v41  ;;  %v1497_v18 = vadd.f32 %v1496_v6, %v9557_v49  ;;  %v11700_v28 = vld [vmem:[#allocation13_spill] sm:$0xff]  ;;  %v1500_v42 = vpop.f32.mrb[42].mxu0 }
 0x182   : > { %v2555_v61 = vmax.f32 %v2147_v33, 0.0  ;;  %v2557_v35 = vmax.f32 %v2149_v59, 0.0  ;;  %v2652_v5 = vmax.f32 %v2447_v16, 0.0  ;;  %4323 = vmatpush1.bf16.msra.mxu0 %v7304_v50  ;;  %v9857_v39 = vmul.f32 %v8755_v55, %v1082_v54  ;;  %3932 = vmatpush1.bf16.msra.mxu1 %v7307_v1  ;;  %v1502_v45 = vpop.f32.mrb[43].mxu0  ;;  %v11704_v50 = vld [vmem:[#allocation72_spill] sm:$0xff]  ;;  %v11706_v16 = vld [vmem:[#allocation19_spill] sm:$0xff] }
 0x183   : > { %v9860_v3 = vmul.f32 %v8758_v22, %v1082_v54  ;;  %v1499_v32 = vadd.f32 %v1498_v4, %v11700_v28  ;;  %v2653_v44 = vmax.f32 %v2449_v51, 0.0  ;;  %v1805_v49 = vadd.f32 %v11701_v46, %v1497_v18  ;;  %v11705_v33 = vld [vmem:[#allocation64_spill] sm:$0xff]  ;;  %v11707_v54 = vld [vmem:[#allocation65_spill] sm:$0xff]  ;;  %v9879_v28 = vpop.f32.mrb[48].mxu1  ;;  %v11710_v46 = vld [vmem:[#allocation6_spill] sm:$0xff] }
 0x184   : > { %v2603_v29 = vpack.c.bf16 %v2557_v35, %v2555_v61  ;;  %v1501_v53 = vadd.f32 %v1500_v42, %v11702_v23  ;;  %v2654_v36 = vmax.f32 %v2451_v37, 0.0  ;;  %v1503_v9 = vadd.f32 %v1502_v45, %v11704_v50  ;;  %v11708_v4 = vld [vmem:[#allocation20_spill] sm:$0xff]  ;;  %v1653_v61 = vpop.permute.xlu1 %1652 }
 0x185   : > { %v1806_v10 = vadd.f32 %v11703_v11, %v1499_v32  ;;  %v2699_v60 = vpack.c.bf16 %v2653_v44, %v2651_v52  ;;  %v2152_v56 = vadd.f32 %v11611_v31, %v2076_v47  ;;  %v9871_v59 = vadd.f32 %v11705_v33, %v1805_v49  ;;  %v11709_v47 = vld [vmem:[#allocation21_spill] sm:$0xff]  ;;  %v9890_v44 = vpop.f32.mrb[49].mxu1 }
 0x186   : > { %3032 = vmatmul.mubr.bf16.gmra.mrb[96].mxu1 %v2603_v29  ;;  %v1807_v1 = vadd.f32 %v11706_v16, %v1501_v53  ;;  %v2700_v6 = vpack.c.bf16 %v2654_v36, %v2652_v5  ;;  %v2154_v51 = vadd.f32 %v11611_v31, %v2078_v25  ;;  %v1808_v37 = vadd.f32 %v11708_v4, %v1503_v9  ;;  %v1506_v29 = vpop.f32.mrb[44].mxu0  ;;  %v9896_v45 = vpop.f32.mrb[50].mxu1  ;;  %v11711_v9 = vld [vmem:[#allocation23_spill] sm:$0xff] }
 0x187   : > { %v2080_v18 = vadd.f32 %v11707_v54, %v1806_v10  ;;  %v2560_v35 = vmax.f32 %v2152_v56, 0.0  ;;  %v2455_v52 = vadd.f32 %v9706_v8, %v8925_v20  ;;  %v9885_v42 = vmul.f32 %v8743_v2, %v1653_v61  ;;  %v1508_v10 = vpop.f32.mrb[45].mxu0  ;;  %v9903_v33 = vpop.f32.mrb[51].mxu1 }
 0x188   : > { %v9882_v32 = vadd.f32 %v11709_v47, %v1807_v1  ;;  %v9888_v5 = vmul.f32 %v8746_v34, %v1653_v61  ;;  %v2562_v25 = vmax.f32 %v2154_v51, 0.0  ;;  %3428 = vmatprep.mubr.bf16.mxu0 %v2700_v6  ;;  %v2082_v49 = vadd.f32 %v11710_v46, %v1808_v37  ;;  %v1657_v16 = vpop.permute.xlu1 %1656  ;;  %v11712_v1 = vld [vmem:[#allocation15_spill] sm:$0xff]  ;;  %v11713_v51 = vld [vmem:[#allocation16_spill] sm:$0xff] }
 0x189   : > { %v2655_v23 = vmax.f32 %v2455_v52, 0.0  ;;  %v2151_v8 = vadd.f32 %v11607_v62, %v9821_v30  ;;  %v2153_v53 = vadd.f32 %v11607_v62, %v2077_v12  ;;  %3429 = vmatmul.mubr.bf16.gmra.mrb[96].mxu0 %v2699_v60  ;;  %v1507_v36 = vadd.f32 %v1506_v29, %v9716_v19  ;;  %v1510_v60 = vpop.f32.mrb[46].mxu0  ;;  %v11714_v37 = vld [vmem:[#allocation75_spill] sm:$0xff]  ;;  %v11715_v46 = vld [vmem:[#allocation76_spill] sm:$0xff] }
 0x18a   : > { %v2606_v11 = vpack.c.bf16 %v2562_v25, %v2560_v35  ;;  %v2457_v50 = vadd.f32 %v9719_v24, %v8909_v41  ;;  %v2459_v56 = vadd.f32 %v11711_v9, %v8925_v20  ;;  %v1509_v30 = vadd.f32 %v1508_v10, %v11712_v1  ;;  %v1512_v35 = vpop.f32.mrb[47].mxu0 }
 0x18b   : > { %v2559_v6 = vmax.f32 %v2151_v8, 0.0  ;;  %v2561_v12 = vmax.f32 %v2153_v53, 0.0  ;;  %v2461_v54 = vadd.f32 %v11713_v51, %v8909_v41  ;;  %v1809_v19 = vadd.f32 %v9758_v15, %v1507_v36  ;;  %v11716_v8 = vld [vmem:[#allocation87_spill] sm:$0xff] }
 0x18c   : > { %3041 = vmatprep.mubr.bf16.mxu1 %v2606_v11  ;;  %v1751_v4 = vmul.f32 %v8743_v2, %v1657_v16  ;;  %v9911_v24 = vmul.f32 %v8746_v34, %v1657_v16  ;;  %v1511_v61 = vadd.f32 %v1510_v60, %v11714_v37  ;;  %v1810_v52 = vadd.f32 %v9762_v26, %v1509_v30  ;;  %v11717_v11 = vld [vmem:[#allocation88_spill] sm:$0xff]  ;;  %v9922_v26 = vpop.f32.mrb[52].mxu1 }
 0x18d   : > { %v2605_v47 = vpack.c.bf16 %v2561_v12, %v2559_v6  ;;  %v2656_v25 = vmax.f32 %v2457_v50, 0.0  ;;  %v1513_v29 = vadd.f32 %v1512_v35, %v11715_v46  ;;  %v2083_v53 = vadd.f32 %v11716_v8, %v1809_v19  ;;  %v1931_v6 = vpop.permute.xlu1 %1930  ;;  %v9930_v12 = vpop.f32.mrb[53].mxu1 }
 0x18e   : > { %v1811_v10 = vadd.f32 %v9787_v38, %v1511_v61  ;;  %v2657_v15 = vmax.f32 %v2459_v56, 0.0  ;;  %v2658_v36 = vmax.f32 %v2461_v54, 0.0  ;;  %v2084_v9 = vadd.f32 %v11717_v11, %v1810_v52  ;;  %v1516_v54 = vpop.f32.mrb[48].mxu0  ;;  %v9938_v19 = vpop.f32.mrb[54].mxu1 }
 0x18f   : > { %3042 = vmatmul.mubr.bf16.gmra.mrb[100].mxu1 %v2605_v47  ;;  %v1812_v16 = vadd.f32 %v9818_v27, %v1513_v29  ;;  %v2156_v1 = vadd.f32 %v11611_v31, %v2080_v18  ;;  %v2158_v60 = vadd.f32 %v11611_v31, %v2082_v49  ;;  %v9925_v50 = vadd.f32 %v11607_v62, %v2083_v53  ;;  %v1518_v61 = vpop.f32.mrb[49].mxu0  ;;  %v9943_v52 = vpop.f32.mrb[55].mxu1  ;;  %v11718_v53 = vld [vmem:[#allocation79_spill] sm:$0xff] }
 0x190   : > { %v9928_v30 = vadd.f32 %v9825_v48, %v1811_v10  ;;  %v2701_v38 = vpack.c.bf16 %v2657_v15, %v2655_v23  ;;  %v2702_v56 = vpack.c.bf16 %v2658_v36, %v2656_v25  ;;  %v9933_v51 = vadd.f32 %v11611_v31, %v2084_v9  ;;  %v1520_v46 = vpop.f32.mrb[50].mxu0 }
 0x191   : > { %v2086_v27 = vadd.f32 %v9832_v14, %v1812_v16  ;;  %v2025_v18 = vmul.f32 %v8748_v13, %v1931_v6  ;;  %v2026_v49 = vmul.f32 %v8750_v40, %v1931_v6  ;;  %v1517_v48 = vadd.f32 %v1516_v54, %v9857_v39  ;;  %v1522_v15 = vpop.f32.mrb[51].mxu0  ;;  %v1092_v9 = vpop.permute.xlu1 %1091  ;;  %v11721_v6 = vld [vmem:[#allocation82_spill] sm:$0xff] }
 0x192   : > { %v2564_v37 = vmax.f32 %v2156_v1, 0.0  ;;  %v2566_v23 = vmax.f32 %v2158_v60, 0.0  ;;  %v2465_v35 = vadd.f32 %v9772_v21, %v8925_v20  ;;  %3438 = vmatprep.mubr.bf16.mxu0 %v2702_v56  ;;  %v1519_v14 = vadd.f32 %v1518_v61, %v9860_v3 }
 0x193   : > { %v2155_v47 = vadd.f32 %v11607_v62, %v9871_v59  ;;  %v2157_v25 = vadd.f32 %v11607_v62, %v9882_v32  ;;  %v2467_v39 = vadd.f32 %v9779_v63, %v8909_v41  ;;  %3439 = vmatmul.mubr.bf16.gmra.mrb[100].mxu0 %v2701_v38  ;;  %v1813_v29 = vadd.f32 %v9885_v42, %v1517_v48  ;;  %v11719_v32 = vld [vmem:[#allocation91_spill] sm:$0xff]  ;;  %v11720_v38 = vld [vmem:[#allocation94_spill] sm:$0xff]  ;;  %v9962_v48 = vpop.f32.mrb[56].mxu1 }
 0x194   : > { %v2608_v8 = vpack.c.bf16 %v2566_v23, %v2564_v37  ;;  %v2659_v21 = vmax.f32 %v2465_v35, 0.0  ;;  %v1521_v10 = vadd.f32 %v1520_v46, %v11718_v53  ;;  %v1814_v3 = vadd.f32 %v9888_v5, %v1519_v14  ;;  %v9972_v35 = vpop.f32.mrb[57].mxu1 }
 0x195   : > { %v2563_v36 = vmax.f32 %v2155_v47, 0.0  ;;  %v2565_v11 = vmax.f32 %v2157_v25, 0.0  ;;  %v2660_v59 = vmax.f32 %v2467_v39, 0.0  ;;  %v2087_v16 = vadd.f32 %v11719_v32, %v1813_v29  ;;  %v1526_v25 = vpop.f32.mrb[52].mxu0  ;;  %v9979_v39 = vpop.f32.mrb[58].mxu1 }
 0x196   : > { %3051 = vmatprep.mubr.bf16.mxu1 %v2608_v8  ;;  %v1815_v1 = vadd.f32 %v1751_v4, %v1521_v10  ;;  %v1190_v63 = vmul.f32 %v8755_v55, %v1092_v9  ;;  %v1191_v60 = vmul.f32 %v8758_v22, %v1092_v9  ;;  %v2088_v56 = vadd.f32 %v11720_v38, %v1814_v3  ;;  %v1661_v29 = vpop.permute.xlu1 %1660  ;;  %v1528_v53 = vpop.f32.mrb[53].mxu0 }
 0x197   : > { %v2607_v42 = vpack.c.bf16 %v2565_v11, %v2563_v36  ;;  %v1523_v54 = vadd.f32 %v1522_v15, %v11721_v6  ;;  %v2469_v5 = vadd.f32 %v9789_v7, %v8925_v20  ;;  %v9965_v37 = vadd.f32 %v11607_v62, %v2087_v16  ;;  %v1530_v36 = vpop.f32.mrb[54].mxu0  ;;  %v9985_v11 = vpop.f32.mrb[59].mxu1 }
 0x198   : > { %v9967_v23 = vadd.f32 %v2025_v18, %v1815_v1  ;;  %v2471_v4 = vadd.f32 %v9798_v0, %v8909_v41  ;;  %v2162_v61 = vadd.f32 %v11611_v31, %v2086_v27  ;;  %v9975_v14 = vadd.f32 %v11611_v31, %v2088_v56  ;;  %v1532_v1 = vpop.f32.mrb[55].mxu0 }
 0x199   : > { %3052 = vmatmul.mubr.bf16.gmra.mrb[104].mxu1 %v2607_v42  ;;  %v1816_v7 = vadd.f32 %v9911_v24, %v1523_v54  ;;  %v2661_v47 = vmax.f32 %v2469_v5, 0.0  ;;  %v2568_v46 = vmax.f32 %v9933_v51, 0.0  ;;  %v1527_v8 = vadd.f32 %v1526_v25, %v1190_v63  ;;  %v7312_v63 = vld [vmem:[%s11455_s16 + $0xb4] ss:$8 sps:$4 sm:$0xff]  }
 0x19a   : > { %v2662_v18 = vmax.f32 %v2471_v4, 0.0  ;;  %v2570_v0 = vmax.f32 %v2162_v61, 0.0  ;;  %v2475_v27 = vadd.f32 %v9835_v17, %v8925_v20  ;;  %v1753_v3 = vmul.f32 %v8743_v2, %v1661_v29  ;;  %v11723_v54 = vld [vmem:[#allocation85_spill] sm:$0xff]  ;;  %v7313_v4 = vld [vmem:[%s11447_s8 + $0xe0] ss:$8 sps:$4 sm:$0xff]   ;;  %4324 = vmatprep.subr.bf16.mxu0 %v7312_v63 }
 0x19b   : > { %v2090_v10 = vadd.f32 %v2026_v49, %v1816_v7  ;;  %v2703_v15 = vpack.c.bf16 %v2661_v47, %v2659_v21  ;;  %v1754_v24 = vmul.f32 %v8746_v34, %v1661_v29  ;;  %v1529_v32 = vadd.f32 %v1528_v53, %v1191_v60  ;;  %v11722_v21 = vld [vmem:[#allocation84_spill] sm:$0xff]  ;;  %v11725_v29 = vld [vmem:[#allocation95_spill] sm:$0xff] }
 0x19c   : > { %v2704_v51 = vpack.c.bf16 %v2662_v18, %v2660_v59  ;;  %v2610_v9 = vpack.c.bf16 %v2570_v0, %v2568_v46  ;;  %v2663_v16 = vmax.f32 %v2475_v27, 0.0  ;;  %v1817_v42 = vadd.f32 %v1753_v3, %v1527_v8  ;;  %v7310_v59 = vld [vmem:[%s11455_s16 + $0xb0] ss:$8 sps:$4 sm:$0xff]   ;;  %v7315_v60 = vld [vmem:[%s11447_s8 + $0xe4] ss:$8 sps:$4 sm:$0xff]   ;;  %v10014_v18 = vpop.f32.mrb[60].mxu1 }
 0x19d   : > { %v2161_v17 = vadd.f32 %v11607_v62, %v9928_v30  ;;  %v2567_v49 = vmax.f32 %v9925_v50, 0.0  ;;  %v1531_v38 = vadd.f32 %v1530_v36, %v11722_v21  ;;  %v1818_v56 = vadd.f32 %v1754_v24, %v1529_v32  ;;  %v1665_v30 = vpop.permute.xlu1 %1664  ;;  %v7318_v61 = vld [vmem:[%s11455_s16 + $0xc4] ss:$8 sps:$4 sm:$0xff]   ;;  %v10022_v3 = vpop.f32.mrb[61].mxu1  ;;  %3933 = vmatprep.subr.bf16.mxu1 %v7315_v60  ;;  %4325 = vmatpush1.bf16.msra.mxu0 %v7310_v59  ;;  %v7316_v63 = vld [vmem:[%s11455_s16 + $0xc0] ss:$8 sps:$4 sm:$0xff]  }
 0x19e   : > { %3061 = vmatprep.mubr.bf16.mxu1 %v2610_v9  ;;  %v2477_v6 = vadd.f32 %v9845_v57, %v8909_v41  ;;  %v1533_v5 = vadd.f32 %v1532_v1, %v11723_v54  ;;  %v2479_v50 = vadd.f32 %v9853_v43, %v8925_v20  ;;  %v11724_v47 = vld [vmem:[#allocation4_spill] sm:$0xff]  ;;  %3448 = vmatprep.mubr.bf16.mxu0 %v2704_v51  ;;  %v7321_v43 = vld [vmem:[%s11447_s8 + $0xf4] ss:$8 sps:$4 sm:$0xff]   ;;  %v10027_v32 = vpop.f32.mrb[56].mxu0  ;;  %v10029_v1 = vpop.f32.mrb[62].mxu1 }
 0x19f   : > { %v2569_v7 = vmax.f32 %v2161_v17, 0.0  ;;  %v2091_v25 = vadd.f32 %v11724_v47, %v1817_v42  ;;  %v1755_v57 = vmul.f32 %v8743_v2, %v1665_v30  ;;  %v1756_v46 = vmul.f32 %v8746_v34, %v1665_v30  ;;  %3449 = vmatmul.mubr.bf16.gmra.mrb[104].mxu0 %v2703_v15  ;;  %v10040_v21 = vpop.f32.mrb[63].mxu1  ;;  %3934 = vmatpush1.bf16.msra.mxu1 %v7313_v4  ;;  %v10055_v30 = vpop.permute.xlu0 %1942  ;;  %v7324_v47 = vld [vmem:[%s11455_s16 + $0xd4] ss:$8 sps:$4 sm:$0xff]  }
 0x1a0   : > { %v2092_v8 = vadd.f32 %v11725_v29, %v1818_v56  ;;  %v2664_v0 = vmax.f32 %v2477_v6, 0.0  ;;  %v2665_v53 = vmax.f32 %v2479_v50, 0.0  ;;  %v2481_v27 = vadd.f32 %v9863_v58, %v8909_v41  ;;  %4326 = vmatprep.subr.bf16.mxu0 %v7318_v61  ;;  %3935 = vmatprep.subr.bf16.mxu1 %v7321_v43 }
 0x1a1   : > { %v2609_v24 = vpack.c.bf16 %v2569_v7, %v2567_v49  ;;  %v10025_v36 = vadd.f32 %v11607_v62, %v2091_v25  ;;  %v1819_v51 = vadd.f32 %v1755_v57, %v1531_v38  ;;  %v1820_v9 = vadd.f32 %v1756_v46, %v1533_v5  ;;  %v10038_v49 = vpop.f32.mrb[57].mxu0  ;;  %v1939_v59 = vpop.permute.xlu1 %1938  ;;  %4327 = vmatpush1.bf16.msra.mxu0 %v7316_v63  ;;  %v7322_v7 = vld [vmem:[%s11455_s16 + $0xd0] ss:$8 sps:$4 sm:$0xff]  }
 0x1a2   : > { %v10035_v58 = vadd.f32 %v11611_v31, %v2092_v8  ;;  %v2705_v15 = vpack.c.bf16 %v2665_v53, %v2663_v16  ;;  %v2666_v42 = vmax.f32 %v2481_v27, 0.0  ;;  %v2166_v17 = vadd.f32 %v11611_v31, %v2090_v10  ;;  %v10048_v6 = vpop.f32.mrb[58].mxu0  ;;  %v7319_v10 = vld [vmem:[%s11447_s8 + $0xf0] ss:$8 sps:$4 sm:$0xff]   ;;  %4328 = vmatprep.subr.bf16.mxu0 %v7324_v47 }
 0x1a3   : > { %3062 = vmatmul.mubr.bf16.gmra.mrb[108].mxu1 %v2609_v24  ;;  %v2572_v38 = vmax.f32 %v9975_v14, 0.0  ;;  %v2485_v60 = vadd.f32 %v9879_v28, %v8925_v20  ;;  %v2165_v56 = vadd.f32 %v11607_v62, %v9967_v23  ;;  %v2571_v16 = vmax.f32 %v9965_v37, 0.0  ;;  %v10057_v28 = vpop.f32.mrb[59].mxu0 }
 0x1a4   : > { %v2706_v54 = vpack.c.bf16 %v2666_v42, %v2664_v0  ;;  %v2574_v5 = vmax.f32 %v2166_v17, 0.0  ;;  %v2029_v14 = vmul.f32 %v8748_v13, %v1939_v59  ;;  %v2030_v50 = vmul.f32 %v8750_v40, %v1939_v59  ;;  %3936 = vmatpush1.bf16.msra.mxu1 %v7319_v10  ;;  %v7325_v59 = vld [vmem:[%s11455_s16 + $0xe0] ss:$8 sps:$4 sm:$0xff]  }
 0x1a5   : > { %v2667_v23 = vmax.f32 %v2485_v60, 0.0  ;;  %v2573_v4 = vmax.f32 %v2165_v56, 0.0  ;;  %v2487_v37 = vadd.f32 %v9890_v44, %v8909_v41  ;;  %v2489_v61 = vadd.f32 %v9896_v45, %v8925_v20  ;;  %v7327_v44 = vld [vmem:[%s11455_s16 + $0xe4] ss:$8 sps:$4 sm:$0xff]   ;;  %v1102_v24 = vpop.permute.xlu1 %1101  ;;  %4329 = vmatpush1.bf16.msra.mxu0 %v7322_v7 }
 0x1a6   : > { %v2612_v25 = vpack.c.bf16 %v2574_v5, %v2572_v38  ;;  %v2093_v57 = vadd.f32 %v2029_v14, %v1819_v51  ;;  %v2094_v46 = vadd.f32 %v2030_v50, %v1820_v9  ;;  %3458 = vmatprep.mubr.bf16.mxu0 %v2706_v54  ;;  %v2491_v43 = vadd.f32 %v9903_v33, %v8909_v41  ;;  %v1107_v51 = vpop.permute.xlu0 %1106  ;;  %v10081_v38 = vpop.f32.mrb[60].mxu0 }
 0x1a7   : > { %v2611_v45 = vpack.c.bf16 %v2573_v4, %v2571_v16  ;;  %v2668_v29 = vmax.f32 %v2487_v37, 0.0  ;;  %v2669_v8 = vmax.f32 %v2489_v61, 0.0  ;;  %3459 = vmatmul.mubr.bf16.gmra.mrb[108].mxu0 %v2705_v15  ;;  %v2495_v33 = vadd.f32 %v9922_v26, %v8925_v20  ;;  %v10087_v26 = vpop.f32.mrb[61].mxu0  ;;  %4330 = vmatprep.subr.bf16.mxu0 %v7327_v44 }
 0x1a8   : > { %3071 = vmatprep.mubr.bf16.mxu1 %v2612_v25  ;;  %v2169_v0 = vadd.f32 %v11607_v62, %v2093_v57  ;;  %v2170_v53 = vadd.f32 %v11611_v31, %v2094_v46  ;;  %v2670_v27 = vmax.f32 %v2491_v43, 0.0  ;;  %v1194_v63 = vmul.f32 %v8755_v55, %v1102_v24  ;;  %v10093_v5 = vpop.f32.mrb[62].mxu0  ;;  %v7328_v25 = vld [vmem:[%s11455_s16 + $0xf0] ss:$8 sps:$4 sm:$0xff]  }
 0x1a9   : > { %v2707_v9 = vpack.c.bf16 %v2669_v8, %v2667_v23  ;;  %v1195_v42 = vmul.f32 %v8758_v22, %v1102_v24  ;;  %v2576_v17 = vmax.f32 %v10035_v58, 0.0  ;;  %v2575_v56 = vmax.f32 %v10025_v36, 0.0  ;;  %v10097_v4 = vpop.f32.mrb[63].mxu0  ;;  %v1669_v7 = vpop.permute.xlu1 %1668  ;;  %4331 = vmatpush1.bf16.msra.mxu0 %v7325_v59 }
 0x1aa   : > { %v2708_v15 = vpack.c.bf16 %v2670_v27, %v2668_v29  ;;  %v2578_v60 = vmax.f32 %v2170_v53, 0.0  ;;  %v2577_v16 = vmax.f32 %v2169_v0, 0.0  ;;  %v1196_v10 = vmul.f32 %v8755_v55, %v1107_v51 }
 0x1ab   : > { %3072 = vmatmul.mubr.bf16.gmra.mrb[112].mxu1 %v2611_v45  ;;  %v1197_v58 = vmul.f32 %v8758_v22, %v1107_v51  ;;  %v2497_v54 = vadd.f32 %v9930_v12, %v8909_v41  ;;  %v2671_v50 = vmax.f32 %v2495_v33, 0.0  ;;  %v2499_v36 = vadd.f32 %v9938_v19, %v8925_v20  ;;  %v7330_v19 = vld [vmem:[%s11455_s16 + $0xf4] ss:$8 sps:$4 sm:$0xff]  }
 0x1ac   : > { %3468 = vmatprep.mubr.bf16.mxu0 %v2708_v15  ;;  %v2614_v14 = vpack.c.bf16 %v2578_v60, %v2576_v17  ;;  %v2613_v23 = vpack.c.bf16 %v2577_v16, %v2575_v56  ;;  %v1537_v37 = vadd.f32 %v10027_v32, %v1194_v63  ;;  %v1539_v61 = vadd.f32 %v10038_v49, %v1195_v42 }
 0x1ad   : > { %v2672_v47 = vmax.f32 %v2497_v54, 0.0  ;;  %v2501_v12 = vadd.f32 %v9943_v52, %v8909_v41  ;;  %v1757_v57 = vmul.f32 %v8743_v2, %v1669_v7  ;;  %v1758_v32 = vmul.f32 %v8746_v34, %v1669_v7  ;;  %4332 = vmatprep.subr.bf16.mxu0 %v7330_v19 }
 0x1ae   : > { %3081 = vmatprep.mubr.bf16.mxu1 %v2614_v14  ;;  %v2673_v49 = vmax.f32 %v2499_v36, 0.0  ;;  %v2505_v46 = vadd.f32 %v9962_v48, %v8925_v20  ;;  %v2031_v52 = vmul.f32 %v8748_v13, %v10055_v30  ;;  %v2032_v43 = vmul.f32 %v8750_v40, %v10055_v30  ;;  %4333 = vmatpush1.bf16.msra.mxu0 %v7328_v25 }
 0x1af   : > { %v2674_v44 = vmax.f32 %v2501_v12, 0.0  ;;  %v2507_v45 = vadd.f32 %v9972_v35, %v8909_v41  ;;  %v1821_v29 = vadd.f32 %v1757_v57, %v1537_v37  ;;  %v1822_v8 = vadd.f32 %v1758_v32, %v1539_v61  ;;  %3469 = vmatmul.mubr.bf16.gmra.mrb[112].mxu0 %v2707_v9  ;;  %v1117_v12 = vpop.permute.xlu0 %1116 }
 0x1b0   : > { %v2709_v0 = vpack.c.bf16 %v2673_v49, %v2671_v50  ;;  %v2675_v53 = vmax.f32 %v2505_v46, 0.0  ;;  %v1673_v27 = vpop.permute.xlu1 %1672  ;;  %v2509_v48 = vadd.f32 %v9979_v39, %v8925_v20  ;;  %v2511_v33 = vadd.f32 %v9985_v11, %v8909_v41 }
 0x1b1   : > { %v2710_v24 = vpack.c.bf16 %v2674_v44, %v2672_v47  ;;  %v2676_v51 = vmax.f32 %v2507_v45, 0.0  ;;  %v1541_v30 = vadd.f32 %v10048_v6, %v1196_v10  ;;  %v1759_v35 = vmul.f32 %v8743_v2, %v1673_v27 }
 0x1b2   : > { %v1760_v63 = vmul.f32 %v8746_v34, %v1673_v27  ;;  %v1543_v9 = vadd.f32 %v10057_v28, %v1197_v58  ;;  %v2677_v42 = vmax.f32 %v2509_v48, 0.0  ;;  %v2678_v17 = vmax.f32 %v2511_v33, 0.0 }
 0x1b3   : > { %3082 = vmatmul.mubr.bf16.gmra.mrb[116].mxu1 %v2613_v23  ;;  %3478 = vmatprep.mubr.bf16.mxu0 %v2710_v24  ;;  %v2095_v59 = vadd.f32 %v2031_v52, %v1821_v29  ;;  %v2096_v15 = vadd.f32 %v2032_v43, %v1822_v8  ;;  %v2515_v11 = vadd.f32 %v10014_v18, %v8925_v20  ;;  %v1951_v8 = vpop.permute.xlu0 %1950 }
 0x1b4   : > { %v2711_v60 = vpack.c.bf16 %v2677_v42, %v2675_v53  ;;  %v2712_v39 = vpack.c.bf16 %v2678_v17, %v2676_v51  ;;  %v2517_v6 = vadd.f32 %v10022_v3, %v8909_v41  ;;  %v1823_v56 = vadd.f32 %v1759_v35, %v1541_v30 }
 0x1b5   : > { %v1824_v16 = vadd.f32 %v1760_v63, %v1543_v9  ;;  %v1947_v10 = vpop.permute.xlu1 %1946  ;;  %v2519_v28 = vadd.f32 %v10029_v1, %v8925_v20  ;;  %v2521_v58 = vadd.f32 %v10040_v21, %v8909_v41  ;;  %v2679_v50 = vmax.f32 %v2515_v11, 0.0 }
 0x1b6   : > { %v2033_v54 = vmul.f32 %v8748_v13, %v1947_v10  ;;  %v2034_v14 = vmul.f32 %v8750_v40, %v1947_v10  ;;  %v2680_v23 = vmax.f32 %v2517_v6, 0.0  ;;  %v2172_v61 = vadd.f32 %v11611_v31, %v2096_v15 }
 0x1b7   : > { %3479 = vmatmul.mubr.bf16.gmra.mrb[116].mxu0 %v2709_v0  ;;  %v2681_v18 = vmax.f32 %v2519_v28, 0.0  ;;  %v2682_v36 = vmax.f32 %v2521_v58, 0.0  ;;  %v2171_v7 = vadd.f32 %v11607_v62, %v2095_v59  ;;  %v1200_v27 = vmul.f32 %v8755_v55, %v1117_v12 }
 0x1b8   : > { %v2097_v37 = vadd.f32 %v2033_v54, %v1823_v56  ;;  %v2098_v3 = vadd.f32 %v2034_v14, %v1824_v16  ;;  %3488 = vmatprep.mubr.bf16.mxu0 %v2712_v39  ;;  %v2580_v25 = vmax.f32 %v2172_v61, 0.0  ;;  %v1201_v24 = vmul.f32 %v8758_v22, %v1117_v12  ;;  %v11727_v14 = vld [vmem:[#allocation7_spill] sm:$0xff] }
 0x1b9   : > { %v2713_v20 = vpack.c.bf16 %v2681_v18, %v2679_v50  ;;  %v2714_v1 = vpack.c.bf16 %v2682_v36, %v2680_v23  ;;  %v2579_v57 = vmax.f32 %v2171_v7, 0.0  ;;  %v2035_v33 = vmul.f32 %v8748_v13, %v1951_v8 }
 0x1ba   : > { %v2173_v41 = vadd.f32 %v11607_v62, %v2097_v37  ;;  %v2174_v21 = vadd.f32 %v11611_v31, %v2098_v3  ;;  %v1112_v47 = vpop.permute.xlu1 %1111  ;;  %v2036_v30 = vmul.f32 %v8750_v40, %v1951_v8 }
 0x1bb   : > { %v1198_v49 = vmul.f32 %v8755_v55, %v1112_v47  ;;  %v1199_v46 = vmul.f32 %v8758_v22, %v1112_v47 }
 0x1bc   : > { %v2582_v19 = vmax.f32 %v2174_v21, 0.0  ;;  %v2581_v32 = vmax.f32 %v2173_v41, 0.0 }
 0x1bd   : > { %v1547_v0 = vadd.f32 %v10081_v38, %v1198_v49  ;;  %v1549_v53 = vadd.f32 %v10087_v26, %v1199_v46  ;;  %v1551_v38 = vadd.f32 %v10093_v5, %v1200_v27  ;;  %v1553_v26 = vadd.f32 %v10097_v4, %v1201_v24 }
 0x1be   : > { %v2616_v52 = vpack.c.bf16 %v2582_v19, %v2580_v25  ;;  %v2615_v43 = vpack.c.bf16 %v2581_v32, %v2579_v57  ;;  %v2747_v25 = vld [vmem:[%s11446_s7] sm:$0x3] }
 0x1bf   : > { %v1677_v44 = vpop.permute.xlu1 %1676  ;;  %3489 = vmatmul.mubr.bf16.gmra.mrb[120].mxu0 %v2711_v60  ;;  %v10185_v8 = vrot.slane %v2747_v25, %v11727_v14 }
 0x1c0   : > { %v1761_v45 = vmul.f32 %v8743_v2, %v1677_v44  ;;  %v1762_v29 = vmul.f32 %v8746_v34, %v1677_v44  ;;  %3091 = vmatprep.mubr.bf16.mxu1 %v2616_v52  ;;  %3498 = vmatprep.mubr.bf16.mxu0 %v2714_v1 }
 0x1c1   : > { %3092 = vmatmul.mubr.bf16.gmra.mrb[120].mxu1 %v2615_v43 }
 0x1c2   : > { %v1825_v51 = vadd.f32 %v1761_v45, %v1547_v0  ;;  %v1826_v48 = vadd.f32 %v1762_v29, %v1549_v53 }
 0x1c3   : > { %v1681_v35 = vpop.permute.xlu1 %1680 }
 0x1c4   : > { %v1763_v63 = vmul.f32 %v8743_v2, %v1681_v35  ;;  %v1764_v9 = vmul.f32 %v8746_v34, %v1681_v35  ;;  %v2099_v42 = vadd.f32 %v2035_v33, %v1825_v51  ;;  %v2100_v17 = vadd.f32 %v2036_v30, %v1826_v48 }
 0x1c6   : > { %v1827_v22 = vadd.f32 %v1763_v63, %v1551_v38  ;;  %v1828_v59 = vadd.f32 %v1764_v9, %v1553_v26  ;;  %v2175_v39 = vadd.f32 %v11607_v62, %v2099_v42  ;;  %v2176_v2 = vadd.f32 %v11611_v31, %v2100_v17 }
 0x1c7   : > { %3499 = vmatmul.mubr.bf16.gmra.mrb[124].mxu0 %v2713_v20 }
 0x1c8   : > { %v1955_v55 = vpop.permute.xlu1 %1954  ;;  %v2583_v6 = vmax.f32 %v2175_v39, 0.0  ;;  %v2584_v56 = vmax.f32 %v2176_v2, 0.0 }
 0x1c9   : > { %v2037_v15 = vmul.f32 %v8748_v13, %v1955_v55  ;;  %v2038_v60 = vmul.f32 %v8750_v40, %v1955_v55  ;;  %v3144_v13 = vld [vmem:[%s11454_s15] sm:$0x3]  ;;  %v11726_v40 = vld [vmem:[#allocation8_spill] sm:$0xff] }
 0x1ca   : > { %v10165_v54 = vrot.slane %v3144_v13, %v11726_v40  ;;  %v10168_v50 = vrot.slane %v3144_v13, %v11727_v14  ;;  %v10181_v44 = vrot.slane %v2747_v25, %v11726_v40 }
 0x1cb   : > { %v2101_v11 = vadd.f32 %v2037_v15, %v1827_v22  ;;  %v2102_v34 = vadd.f32 %v2038_v60, %v1828_v59  ;;  %v7331_v15 = vld [vmem:[%s11449_s10 + $0x40] sm:$0xff]  }
 0x1cc   : > { %v7332_v60 = vld [vmem:[%s11449_s10] sm:$0xff]   ;;  %6759 = vmatprep.subr.bf16.mxu1 %v7331_v15 }
 0x1cd   : > { %v2177_v5 = vadd.f32 %v11607_v62, %v2101_v11  ;;  %v2178_v4 = vadd.f32 %v11611_v31, %v2102_v34 }
 0x1cf   : > { %v2585_v16 = vmax.f32 %v2177_v5, 0.0  ;;  %v2586_v10 = vmax.f32 %v2178_v4, 0.0 }
 0x1d1   : > { %v2618_v28 = vpack.c.bf16 %v2586_v10, %v2584_v56  ;;  %v2617_v58 = vpack.c.bf16 %v2585_v16, %v2583_v6 }
 0x1d3   : > { %3101 = vmatprep.mubr.bf16.mxu1 %v2618_v28 }
 0x1d4   : > { %3102 = vmatmul.mubr.bf16.gmra.mrb[124].mxu1 %v2617_v58 }
 0x202   : > { %v3350_v62 = vpop.f32.mrb[64].mxu0 }
 0x203   : > { %v3351_v31 = vadd.f32 %v3350_v62, %v10165_v54  ;;  %v3352_v23 = vpop.f32.mrb[65].mxu0 }
 0x204   : > { %v3353_v18 = vadd.f32 %v3352_v23, %v10168_v50  ;;  %v3354_v36 = vpop.f32.mrb[66].mxu0 }
 0x205   : > { %v3605_v37 = vmax.f32 %v3351_v31, 0.0  ;;  %v3355_v3 = vadd.f32 %v3354_v36, %v10165_v54  ;;  %v3356_v61 = vpop.f32.mrb[67].mxu0 }
 0x206   : > { %v3606_v7 = vmax.f32 %v3353_v18, 0.0  ;;  %v3357_v20 = vadd.f32 %v3356_v61, %v10168_v50 }
 0x207   : > { %v3607_v1 = vmax.f32 %v3355_v3, 0.0 }
 0x208   : > { %v3608_v41 = vmax.f32 %v3357_v20, 0.0 }
 0x209   : > { %v3669_v21 = vpack.c.bf16 %v3607_v1, %v3605_v37 }
 0x20a   : > { %v3670_v47 = vpack.c.bf16 %v3608_v41, %v3606_v7 }
 0x20c   : > { %4334 = vmatprep.mubr.bf16.mxu0 %v3670_v47 }
 0x20d   : > { %v3360_v12 = vpop.f32.mrb[68].mxu0  ;;  %4335 = vmatmul.mubr.bf16.vlgmr.msra.gmra.mrb[128].mxu0 %v3669_v21 }
 0x20e   : > { %v3361_v19 = vadd.f32 %v3360_v12, %v10165_v54  ;;  %v3362_v57 = vpop.f32.mrb[69].mxu0 }
 0x20f   : > { %v3363_v32 = vadd.f32 %v3362_v57, %v10168_v50  ;;  %v3364_v49 = vpop.f32.mrb[70].mxu0 }
 0x210   : > { %v3609_v46 = vmax.f32 %v3361_v19, 0.0  ;;  %v3365_v52 = vadd.f32 %v3364_v49, %v10165_v54  ;;  %v3366_v43 = vpop.f32.mrb[71].mxu0 }
 0x211   : > { %v3610_v45 = vmax.f32 %v3363_v32, 0.0  ;;  %v3367_v29 = vadd.f32 %v3366_v43, %v10168_v50 }
 0x212   : > { %v3611_v0 = vmax.f32 %v3365_v52, 0.0 }
 0x213   : > { %v3612_v53 = vmax.f32 %v3367_v29, 0.0 }
 0x214   : > { %v2953_v27 = vpop.f32.mrb[64].mxu1  ;;  %v3671_v24 = vpack.c.bf16 %v3611_v0, %v3609_v46 }
 0x215   : > { %v2954_v51 = vadd.f32 %v2953_v27, %v10181_v44  ;;  %v2955_v48 = vpop.f32.mrb[65].mxu1  ;;  %v3672_v33 = vpack.c.bf16 %v3612_v53, %v3610_v45 }
 0x216   : > { %v2956_v30 = vadd.f32 %v2955_v48, %v10185_v8  ;;  %v2957_v35 = vpop.f32.mrb[66].mxu1 }
 0x217   : > { %v2958_v63 = vadd.f32 %v2957_v35, %v10181_v44  ;;  %v2959_v9 = vpop.f32.mrb[67].mxu1  ;;  %4344 = vmatprep.mubr.bf16.mxu0 %v3672_v33  ;;  %v3509_v26 = vmax.f32 %v2954_v51, 0.0  ;;  %v7333_v35 = vld [vmem:[%s11449_s10 + $0x48] sm:$0xff]  }
 0x218   : > { %v2960_v38 = vadd.f32 %v2959_v9, %v10185_v8  ;;  %4345 = vmatmul.mubr.bf16.gmra.mrb[132].mxu0 %v3671_v24  ;;  %v3510_v17 = vmax.f32 %v2956_v30, 0.0 }
 0x219   : > { %v3511_v42 = vmax.f32 %v2958_v63, 0.0 }
 0x21a   : > { %v3512_v55 = vmax.f32 %v2960_v38, 0.0 }
 0x21b   : > { %v3573_v22 = vpack.c.bf16 %v3511_v42, %v3509_v26  ;;  %v3370_v2 = vpop.f32.mrb[72].mxu0  ;;  %v7334_v42 = vld [vmem:[%s11449_s10 + $0x8] sm:$0xff]  }
 0x21c   : > { %v3574_v59 = vpack.c.bf16 %v3512_v55, %v3510_v17  ;;  %v3371_v5 = vadd.f32 %v3370_v2, %v10165_v54  ;;  %v3372_v4 = vpop.f32.mrb[73].mxu0 }
 0x21d   : > { %v2963_v39 = vpop.f32.mrb[68].mxu1  ;;  %v3373_v16 = vadd.f32 %v3372_v4, %v10168_v50  ;;  %v3374_v10 = vpop.f32.mrb[74].mxu0  ;;  %v10224_v4 = vld [vmem:[%s11457_s18 + $0x40] sm:$0xff]  }
 0x21e   : > { %v2964_v11 = vadd.f32 %v2963_v39, %v10181_v44  ;;  %v2965_v34 = vpop.f32.mrb[69].mxu1  ;;  %3937 = vmatprep.mubr.bf16.mxu1 %v3574_v59  ;;  %v3613_v13 = vmax.f32 %v3371_v5, 0.0  ;;  %v3375_v62 = vadd.f32 %v3374_v10, %v10165_v54  ;;  %v3376_v31 = vpop.f32.mrb[75].mxu0  ;;  %6871 = vmatprep.subr.bf16.mxu0 %v10224_v4 }
 0x21f   : > { %v2966_v6 = vadd.f32 %v2965_v34, %v10185_v8  ;;  %v2967_v56 = vpop.f32.mrb[70].mxu1  ;;  %3938 = vmatmul.mubr.bf16.vlgmr.msra.gmra.mrb[128].mxu1 %v3573_v22  ;;  %v3614_v18 = vmax.f32 %v3373_v16, 0.0  ;;  %v3377_v36 = vadd.f32 %v3376_v31, %v10168_v50  ;;  %v7339_v31 = vld [vmem:[%s11457_s18 + $0x48] sm:$0xff]  }
 0x220   : > { %v2968_v28 = vadd.f32 %v2967_v56, %v10181_v44  ;;  %v2969_v58 = vpop.f32.mrb[71].mxu1  ;;  %6760 = vmatpush3.bf16.msra.mxu1 %v7332_v60  ;;  %v3513_v37 = vmax.f32 %v2964_v11, 0.0  ;;  %v3615_v61 = vmax.f32 %v3375_v62, 0.0  ;;  %v7338_v62 = vld [vmem:[%s11449_s10 + $0x10] sm:$0xff]  }
 0x221   : > { %v2970_v23 = vadd.f32 %v2969_v58, %v10185_v8  ;;  %v3514_v7 = vmax.f32 %v2966_v6, 0.0  ;;  %v3616_v1 = vmax.f32 %v3377_v36, 0.0  ;;  %6761 = vmatprep.subr.bf16.mxu1 %v7333_v35  ;;  %v7336_v6 = vld [vmem:[%s11457_s18] sm:$0xff]   ;;  %v7340_v36 = vld [vmem:[%s11457_s18 + $0x8] sm:$0xff]  }
 0x222   : > { %v3515_v3 = vmax.f32 %v2968_v28, 0.0  ;;  %v3673_v21 = vpack.c.bf16 %v3615_v61, %v3613_v13  ;;  %v7337_v13 = vld [vmem:[%s11449_s10 + $0x50] sm:$0xff]   ;;  %6872 = vmatpush3.bf16.msra.mxu0 %v7336_v6 }
 0x223   : > { %v3516_v20 = vmax.f32 %v2970_v23, 0.0  ;;  %v3674_v25 = vpack.c.bf16 %v3616_v1, %v3614_v18  ;;  %6873 = vmatprep.subr.bf16.mxu0 %v7339_v31  ;;  %v7343_v61 = vld [vmem:[%s11457_s18 + $0x50] sm:$0xff]  }
 0x224   : > { %v3575_v41 = vpack.c.bf16 %v3515_v3, %v3513_v37  ;;  %6762 = vmatpush3.bf16.msra.mxu1 %v7334_v42  ;;  %v7341_v37 = vld [vmem:[%s11449_s10 + $0x58] sm:$0xff]  }
 0x225   : > { %v3576_v47 = vpack.c.bf16 %v3516_v20, %v3514_v7  ;;  %v2973_v12 = vpop.f32.mrb[72].mxu1  ;;  %4354 = vmatprep.mubr.bf16.mxu0 %v3674_v25  ;;  %6763 = vmatprep.subr.bf16.mxu1 %v7337_v13 }
 0x226   : > { %v2974_v19 = vadd.f32 %v2973_v12, %v10181_v44  ;;  %v2975_v57 = vpop.f32.mrb[73].mxu1  ;;  %4355 = vmatmul.mubr.bf16.gmra.mrb[136].mxu0 %v3673_v21 }
 0x227   : > { %v2976_v32 = vadd.f32 %v2975_v57, %v10185_v8  ;;  %v2977_v49 = vpop.f32.mrb[74].mxu1  ;;  %3947 = vmatprep.mubr.bf16.mxu1 %v3576_v47  ;;  %v3380_v46 = vpop.f32.mrb[76].mxu0  ;;  %6874 = vmatpush3.bf16.msra.mxu0 %v7340_v36 }
 0x228   : > { %v2978_v52 = vadd.f32 %v2977_v49, %v10181_v44  ;;  %v2979_v43 = vpop.f32.mrb[75].mxu1  ;;  %3948 = vmatmul.mubr.bf16.gmra.mrb[132].mxu1 %v3575_v41  ;;  %v3381_v45 = vadd.f32 %v3380_v46, %v10165_v54  ;;  %v3382_v29 = vpop.f32.mrb[77].mxu0  ;;  %v3517_v24 = vmax.f32 %v2974_v19, 0.0  ;;  %v7342_v41 = vld [vmem:[%s11449_s10 + $0x18] sm:$0xff]   ;;  %v7345_v19 = vld [vmem:[%s11449_s10 + $0x60] sm:$0xff]   ;;  %6875 = vmatprep.subr.bf16.mxu0 %v7343_v61 }
 0x229   : > { %v2980_v0 = vadd.f32 %v2979_v43, %v10185_v8  ;;  %v3383_v53 = vadd.f32 %v3382_v29, %v10168_v50  ;;  %v3384_v27 = vpop.f32.mrb[78].mxu0  ;;  %v3518_v63 = vmax.f32 %v2976_v32, 0.0  ;;  %6764 = vmatpush3.bf16.msra.mxu1 %v7338_v62 }
 0x22a   : > { %v3519_v51 = vmax.f32 %v2978_v52, 0.0  ;;  %v3617_v48 = vmax.f32 %v3381_v45, 0.0  ;;  %v3385_v33 = vadd.f32 %v3384_v27, %v10165_v54  ;;  %v3386_v30 = vpop.f32.mrb[79].mxu0  ;;  %6765 = vmatprep.subr.bf16.mxu1 %v7341_v37  ;;  %v7344_v52 = vld [vmem:[%s11457_s18 + $0x10] sm:$0xff]   ;;  %v7347_v27 = vld [vmem:[%s11457_s18 + $0x58] sm:$0xff]  }
 0x22b   : > { %v3520_v9 = vmax.f32 %v2980_v0, 0.0  ;;  %v3618_v38 = vmax.f32 %v3383_v53, 0.0  ;;  %v3387_v26 = vadd.f32 %v3386_v30, %v10168_v50  ;;  %6876 = vmatpush3.bf16.msra.mxu0 %v7344_v52 }
 0x22c   : > { %v3577_v17 = vpack.c.bf16 %v3519_v51, %v3517_v24  ;;  %v3619_v55 = vmax.f32 %v3385_v33, 0.0  ;;  %v7346_v33 = vld [vmem:[%s11449_s10 + $0x20] sm:$0xff]   ;;  %6877 = vmatprep.subr.bf16.mxu0 %v7347_v27 }
 0x22d   : > { %v3578_v22 = vpack.c.bf16 %v3520_v9, %v3518_v63  ;;  %v2983_v59 = vpop.f32.mrb[76].mxu1  ;;  %v3620_v15 = vmax.f32 %v3387_v26, 0.0  ;;  %6766 = vmatpush3.bf16.msra.mxu1 %v7342_v41  ;;  %v7349_v9 = vld [vmem:[%s11449_s10 + $0x68] sm:$0xff]  }
 0x22e   : > { %v2984_v60 = vadd.f32 %v2983_v59, %v10181_v44  ;;  %v2985_v39 = vpop.f32.mrb[77].mxu1  ;;  %v3675_v2 = vpack.c.bf16 %v3619_v55, %v3617_v48  ;;  %6767 = vmatprep.subr.bf16.mxu1 %v7345_v19 }
 0x22f   : > { %v2986_v11 = vadd.f32 %v2985_v39, %v10185_v8  ;;  %v2987_v34 = vpop.f32.mrb[78].mxu1  ;;  %3957 = vmatprep.mubr.bf16.mxu1 %v3578_v22  ;;  %v3676_v5 = vpack.c.bf16 %v3620_v15, %v3618_v38  ;;  %v7350_v39 = vld [vmem:[%s11449_s10 + $0x28] sm:$0xff]  }
 0x230   : > { %v2988_v56 = vadd.f32 %v2987_v34, %v10181_v44  ;;  %v2989_v16 = vpop.f32.mrb[79].mxu1  ;;  %3958 = vmatmul.mubr.bf16.gmra.mrb[136].mxu1 %v3577_v17  ;;  %v3521_v28 = vmax.f32 %v2984_v60, 0.0  ;;  %v10279_v60 = vld [vmem:[%s11457_s18 + $0x18] sm:$0xff]   ;;  %v10288_v34 = vld [vmem:[%s11457_s18 + $0x60] sm:$0xff]  }
 0x231   : > { %v2990_v10 = vadd.f32 %v2989_v16, %v10185_v8  ;;  %4364 = vmatprep.mubr.bf16.mxu0 %v3676_v5  ;;  %v3522_v23 = vmax.f32 %v2986_v11, 0.0  ;;  %6768 = vmatpush3.bf16.msra.mxu1 %v7346_v33 }
 0x232   : > { %v3523_v58 = vmax.f32 %v2988_v56, 0.0  ;;  %4365 = vmatmul.mubr.bf16.gmra.mrb[140].mxu0 %v3675_v2  ;;  %6769 = vmatprep.subr.bf16.mxu1 %v7349_v9 }
 0x233   : > { %v3524_v18 = vmax.f32 %v2990_v10, 0.0  ;;  %6878 = vmatpush3.bf16.msra.mxu0 %v10279_v60 }
 0x234   : > { %v3579_v3 = vpack.c.bf16 %v3523_v58, %v3521_v28  ;;  %v3390_v1 = vpop.f32.mrb[80].mxu0  ;;  %6879 = vmatprep.subr.bf16.mxu0 %v10288_v34 }
 0x235   : > { %v3580_v7 = vpack.c.bf16 %v3524_v18, %v3522_v23  ;;  %v2993_v20 = vpop.f32.mrb[80].mxu1  ;;  %v3391_v12 = vadd.f32 %v3390_v1, %v10165_v54  ;;  %v3392_v25 = vpop.f32.mrb[81].mxu0  ;;  %6770 = vmatpush3.bf16.msra.mxu1 %v7350_v39  ;;  %v10299_v23 = vld [vmem:[%s11457_s18 + $0x20] sm:$0xff]  }
 0x236   : > { %v2994_v21 = vadd.f32 %v2993_v20, %v10181_v44  ;;  %v2995_v47 = vpop.f32.mrb[81].mxu1  ;;  %v3393_v49 = vadd.f32 %v3392_v25, %v10168_v50  ;;  %v3394_v46 = vpop.f32.mrb[82].mxu0 }
 0x237   : > { %v2996_v57 = vadd.f32 %v2995_v47, %v10185_v8  ;;  %v2997_v32 = vpop.f32.mrb[82].mxu1  ;;  %3967 = vmatprep.mubr.bf16.mxu1 %v3580_v7  ;;  %v3621_v29 = vmax.f32 %v3391_v12, 0.0  ;;  %v3395_v0 = vadd.f32 %v3394_v46, %v10165_v54  ;;  %v3396_v53 = vpop.f32.mrb[83].mxu0  ;;  %6880 = vmatpush3.bf16.msra.mxu0 %v10299_v23 }
 0x238   : > { %v2998_v43 = vadd.f32 %v2997_v32, %v10181_v44  ;;  %v2999_v45 = vpop.f32.mrb[83].mxu1  ;;  %3968 = vmatmul.mubr.bf16.gmra.mrb[140].mxu1 %v3579_v3  ;;  %v3622_v51 = vmax.f32 %v3393_v49, 0.0  ;;  %v3397_v48 = vadd.f32 %v3396_v53, %v10168_v50  ;;  %v3525_v30 = vmax.f32 %v2994_v21, 0.0 }
 0x239   : > { %v3000_v24 = vadd.f32 %v2999_v45, %v10185_v8  ;;  %v3623_v63 = vmax.f32 %v3395_v0, 0.0  ;;  %v3526_v38 = vmax.f32 %v2996_v57, 0.0 }
 0x23a   : > { %v3527_v35 = vmax.f32 %v2998_v43, 0.0  ;;  %v3624_v42 = vmax.f32 %v3397_v48, 0.0 }
 0x23b   : > { %v3528_v26 = vmax.f32 %v3000_v24, 0.0  ;;  %v3677_v55 = vpack.c.bf16 %v3623_v63, %v3621_v29 }
 0x23c   : > { %v3581_v17 = vpack.c.bf16 %v3527_v35, %v3525_v30  ;;  %v3678_v15 = vpack.c.bf16 %v3624_v42, %v3622_v51 }
 0x23d   : > { %v3582_v22 = vpack.c.bf16 %v3528_v26, %v3526_v38  ;;  %v3003_v59 = vpop.f32.mrb[84].mxu1 }
 0x23e   : > { %v3004_v2 = vadd.f32 %v3003_v59, %v10181_v44  ;;  %v3005_v11 = vpop.f32.mrb[85].mxu1  ;;  %4374 = vmatprep.mubr.bf16.mxu0 %v3678_v15 }
 0x23f   : > { %v3006_v5 = vadd.f32 %v3005_v11, %v10185_v8  ;;  %v3007_v6 = vpop.f32.mrb[86].mxu1  ;;  %3977 = vmatprep.mubr.bf16.mxu1 %v3582_v22  ;;  %v3400_v56 = vpop.f32.mrb[84].mxu0  ;;  %4375 = vmatmul.mubr.bf16.gmra.mrb[144].mxu0 %v3677_v55 }
 0x240   : > { %v3008_v16 = vadd.f32 %v3007_v6, %v10181_v44  ;;  %v3009_v10 = vpop.f32.mrb[87].mxu1  ;;  %3978 = vmatmul.mubr.bf16.gmra.mrb[144].mxu1 %v3581_v17  ;;  %v3401_v28 = vadd.f32 %v3400_v56, %v10165_v54  ;;  %v3402_v58 = vpop.f32.mrb[85].mxu0  ;;  %v3529_v18 = vmax.f32 %v3004_v2, 0.0 }
 0x241   : > { %v3010_v13 = vadd.f32 %v3009_v10, %v10185_v8  ;;  %v3403_v62 = vadd.f32 %v3402_v58, %v10168_v50  ;;  %v3404_v31 = vpop.f32.mrb[86].mxu0  ;;  %v3530_v7 = vmax.f32 %v3006_v5, 0.0 }
 0x242   : > { %v3531_v36 = vmax.f32 %v3008_v16, 0.0  ;;  %v3625_v37 = vmax.f32 %v3401_v28, 0.0  ;;  %v3405_v3 = vadd.f32 %v3404_v31, %v10165_v54  ;;  %v3406_v61 = vpop.f32.mrb[87].mxu0 }
 0x243   : > { %v3532_v20 = vmax.f32 %v3010_v13, 0.0  ;;  %v3626_v1 = vmax.f32 %v3403_v62, 0.0  ;;  %v3407_v41 = vadd.f32 %v3406_v61, %v10168_v50 }
 0x244   : > { %v3583_v21 = vpack.c.bf16 %v3531_v36, %v3529_v18  ;;  %v3627_v47 = vmax.f32 %v3405_v3, 0.0 }
 0x245   : > { %v3584_v12 = vpack.c.bf16 %v3532_v20, %v3530_v7  ;;  %v3013_v25 = vpop.f32.mrb[88].mxu1  ;;  %v3628_v19 = vmax.f32 %v3407_v41, 0.0 }
 0x246   : > { %v3014_v57 = vadd.f32 %v3013_v25, %v10181_v44  ;;  %v3015_v32 = vpop.f32.mrb[89].mxu1  ;;  %v3679_v49 = vpack.c.bf16 %v3627_v47, %v3625_v37 }
 0x247   : > { %v3016_v46 = vadd.f32 %v3015_v32, %v10185_v8  ;;  %v3017_v52 = vpop.f32.mrb[90].mxu1  ;;  %3987 = vmatprep.mubr.bf16.mxu1 %v3584_v12  ;;  %v3680_v43 = vpack.c.bf16 %v3628_v19, %v3626_v1 }
 0x248   : > { %v3018_v45 = vadd.f32 %v3017_v52, %v10181_v44  ;;  %v3019_v29 = vpop.f32.mrb[91].mxu1  ;;  %3988 = vmatmul.mubr.bf16.gmra.mrb[148].mxu1 %v3583_v21  ;;  %v3533_v53 = vmax.f32 %v3014_v57, 0.0 }
 0x249   : > { %v3020_v0 = vadd.f32 %v3019_v29, %v10185_v8  ;;  %4384 = vmatprep.mubr.bf16.mxu0 %v3680_v43  ;;  %v3534_v24 = vmax.f32 %v3016_v46, 0.0 }
 0x24a   : > { %v3535_v27 = vmax.f32 %v3018_v45, 0.0  ;;  %4385 = vmatmul.mubr.bf16.gmra.mrb[148].mxu0 %v3679_v49 }
 0x24b   : > { %v3536_v51 = vmax.f32 %v3020_v0, 0.0  ;;  %v3410_v48 = vpop.f32.mrb[88].mxu0 }
 0x24c   : > { %v3585_v33 = vpack.c.bf16 %v3535_v27, %v3533_v53  ;;  %v3411_v30 = vadd.f32 %v3410_v48, %v10165_v54  ;;  %v3412_v35 = vpop.f32.mrb[89].mxu0 }
 0x24d   : > { %v3586_v63 = vpack.c.bf16 %v3536_v51, %v3534_v24  ;;  %v3413_v38 = vadd.f32 %v3412_v35, %v10168_v50  ;;  %v3414_v26 = vpop.f32.mrb[90].mxu0 }
 0x24e   : > { %v3023_v9 = vpop.f32.mrb[92].mxu1  ;;  %v3629_v55 = vmax.f32 %v3411_v30, 0.0  ;;  %v3415_v22 = vadd.f32 %v3414_v26, %v10165_v54  ;;  %v3416_v59 = vpop.f32.mrb[91].mxu0 }
 0x24f   : > { %v3024_v42 = vadd.f32 %v3023_v9, %v10181_v44  ;;  %v3025_v17 = vpop.f32.mrb[93].mxu1  ;;  %3997 = vmatprep.mubr.bf16.mxu1 %v3586_v63  ;;  %v3630_v2 = vmax.f32 %v3413_v38, 0.0  ;;  %v3417_v11 = vadd.f32 %v3416_v59, %v10168_v50 }
 0x250   : > { %v3026_v15 = vadd.f32 %v3025_v17, %v10185_v8  ;;  %v3027_v39 = vpop.f32.mrb[94].mxu1  ;;  %3998 = vmatmul.mubr.bf16.gmra.mrb[152].mxu1 %v3585_v33  ;;  %v3631_v56 = vmax.f32 %v3415_v22, 0.0 }
 0x251   : > { %v3028_v5 = vadd.f32 %v3027_v39, %v10181_v44  ;;  %v3029_v6 = vpop.f32.mrb[95].mxu1  ;;  %v3632_v10 = vmax.f32 %v3417_v11, 0.0  ;;  %v3537_v28 = vmax.f32 %v3024_v42, 0.0 }
 0x252   : > { %v3030_v16 = vadd.f32 %v3029_v6, %v10185_v8  ;;  %v3681_v13 = vpack.c.bf16 %v3631_v56, %v3629_v55  ;;  %v3538_v62 = vmax.f32 %v3026_v15, 0.0 }
 0x253   : > { %v3539_v58 = vmax.f32 %v3028_v5, 0.0  ;;  %v3682_v18 = vpack.c.bf16 %v3632_v10, %v3630_v2  ;;  %v3420_v36 = vpop.f32.mrb[92].mxu0 }
 0x254   : > { %v3540_v31 = vmax.f32 %v3030_v16, 0.0  ;;  %v3421_v3 = vadd.f32 %v3420_v36, %v10165_v54  ;;  %v3422_v61 = vpop.f32.mrb[93].mxu0 }
 0x255   : > { %v3587_v37 = vpack.c.bf16 %v3539_v58, %v3537_v28  ;;  %v3423_v20 = vadd.f32 %v3422_v61, %v10168_v50  ;;  %v3424_v1 = vpop.f32.mrb[94].mxu0  ;;  %4394 = vmatprep.mubr.bf16.mxu0 %v3682_v18 }
 0x256   : > { %v3588_v7 = vpack.c.bf16 %v3540_v31, %v3538_v62  ;;  %v3633_v41 = vmax.f32 %v3421_v3, 0.0  ;;  %v3425_v21 = vadd.f32 %v3424_v1, %v10165_v54  ;;  %v3426_v47 = vpop.f32.mrb[95].mxu0  ;;  %4395 = vmatmul.mubr.bf16.gmra.mrb[152].mxu0 %v3681_v13 }
 0x257   : > { %v3634_v12 = vmax.f32 %v3423_v20, 0.0  ;;  %v3427_v25 = vadd.f32 %v3426_v47, %v10168_v50 }
 0x258   : > { %4007 = vmatprep.mubr.bf16.mxu1 %v3588_v7  ;;  %v3635_v57 = vmax.f32 %v3425_v21, 0.0 }
 0x259   : > { %v3033_v19 = vpop.f32.mrb[96].mxu1  ;;  %4008 = vmatmul.mubr.bf16.gmra.mrb[156].mxu1 %v3587_v37  ;;  %v3636_v46 = vmax.f32 %v3427_v25, 0.0 }
 0x25a   : > { %v3034_v32 = vadd.f32 %v3033_v19, %v10181_v44  ;;  %v3035_v49 = vpop.f32.mrb[97].mxu1  ;;  %v3683_v45 = vpack.c.bf16 %v3635_v57, %v3633_v41 }
 0x25b   : > { %v3036_v52 = vadd.f32 %v3035_v49, %v10185_v8  ;;  %v3037_v43 = vpop.f32.mrb[98].mxu1  ;;  %v3684_v53 = vpack.c.bf16 %v3636_v46, %v3634_v12 }
 0x25c   : > { %v3038_v29 = vadd.f32 %v3037_v43, %v10181_v44  ;;  %v3039_v0 = vpop.f32.mrb[99].mxu1  ;;  %v3430_v27 = vpop.f32.mrb[96].mxu0  ;;  %v3541_v33 = vmax.f32 %v3034_v32, 0.0 }
 0x25d   : > { %v3040_v24 = vadd.f32 %v3039_v0, %v10185_v8  ;;  %v3431_v51 = vadd.f32 %v3430_v27, %v10165_v54  ;;  %v3432_v48 = vpop.f32.mrb[97].mxu0  ;;  %4404 = vmatprep.mubr.bf16.mxu0 %v3684_v53  ;;  %v3542_v9 = vmax.f32 %v3036_v52, 0.0 }
 0x25e   : > { %v3543_v30 = vmax.f32 %v3038_v29, 0.0  ;;  %v3433_v35 = vadd.f32 %v3432_v48, %v10168_v50  ;;  %v3434_v63 = vpop.f32.mrb[98].mxu0  ;;  %4405 = vmatmul.mubr.bf16.gmra.mrb[156].mxu0 %v3683_v45 }
 0x25f   : > { %v3544_v38 = vmax.f32 %v3040_v24, 0.0  ;;  %v3637_v26 = vmax.f32 %v3431_v51, 0.0  ;;  %v3435_v42 = vadd.f32 %v3434_v63, %v10165_v54  ;;  %v3436_v17 = vpop.f32.mrb[99].mxu0 }
 0x260   : > { %v3589_v55 = vpack.c.bf16 %v3543_v30, %v3541_v33  ;;  %v3638_v22 = vmax.f32 %v3433_v35, 0.0  ;;  %v3437_v59 = vadd.f32 %v3436_v17, %v10168_v50 }
 0x261   : > { %v3590_v15 = vpack.c.bf16 %v3544_v38, %v3542_v9  ;;  %v3639_v39 = vmax.f32 %v3435_v42, 0.0 }
 0x262   : > { %v3043_v2 = vpop.f32.mrb[100].mxu1  ;;  %v3640_v11 = vmax.f32 %v3437_v59, 0.0 }
 0x263   : > { %v3044_v5 = vadd.f32 %v3043_v2, %v10181_v44  ;;  %v3045_v6 = vpop.f32.mrb[101].mxu1  ;;  %4017 = vmatprep.mubr.bf16.mxu1 %v3590_v15  ;;  %v3685_v56 = vpack.c.bf16 %v3639_v39, %v3637_v26 }
 0x264   : > { %v3046_v16 = vadd.f32 %v3045_v6, %v10185_v8  ;;  %v3047_v10 = vpop.f32.mrb[102].mxu1  ;;  %4018 = vmatmul.mubr.bf16.gmra.mrb[160].mxu1 %v3589_v55  ;;  %v3686_v28 = vpack.c.bf16 %v3640_v11, %v3638_v22 }
 0x265   : > { %v3048_v58 = vadd.f32 %v3047_v10, %v10181_v44  ;;  %v3049_v13 = vpop.f32.mrb[103].mxu1  ;;  %v3545_v18 = vmax.f32 %v3044_v5, 0.0 }
 0x266   : > { %v3050_v62 = vadd.f32 %v3049_v13, %v10185_v8  ;;  %v3440_v31 = vpop.f32.mrb[100].mxu0  ;;  %4414 = vmatprep.mubr.bf16.mxu0 %v3686_v28  ;;  %v3546_v61 = vmax.f32 %v3046_v16, 0.0 }
 0x267   : > { %v3547_v36 = vmax.f32 %v3048_v58, 0.0  ;;  %v3441_v37 = vadd.f32 %v3440_v31, %v10165_v54  ;;  %v3442_v3 = vpop.f32.mrb[101].mxu0  ;;  %4415 = vmatmul.mubr.bf16.gmra.mrb[160].mxu0 %v3685_v56 }
 0x268   : > { %v3548_v7 = vmax.f32 %v3050_v62, 0.0  ;;  %v3443_v20 = vadd.f32 %v3442_v3, %v10168_v50  ;;  %v3444_v1 = vpop.f32.mrb[102].mxu0 }
 0x269   : > { %v3591_v41 = vpack.c.bf16 %v3547_v36, %v3545_v18  ;;  %v3641_v21 = vmax.f32 %v3441_v37, 0.0  ;;  %v3445_v47 = vadd.f32 %v3444_v1, %v10165_v54  ;;  %v3446_v12 = vpop.f32.mrb[103].mxu0 }
 0x26a   : > { %v3592_v25 = vpack.c.bf16 %v3548_v7, %v3546_v61  ;;  %v3642_v19 = vmax.f32 %v3443_v20, 0.0  ;;  %v3447_v57 = vadd.f32 %v3446_v12, %v10168_v50  ;;  %v7353_v61 = vld [vmem:[%s11449_s10 + $0x70] sm:$0xff]   ;;  %v7355_v20 = vld [vmem:[%s11449_s10 + $0x78] sm:$0xff]   ;;  %v10362_v12 = vld [vmem:[%s11457_s18 + $0x68] sm:$0xff]  }
 0x26b   : > { %v3643_v32 = vmax.f32 %v3445_v47, 0.0  ;;  %v7354_v7 = vld [vmem:[%s11449_s10 + $0x30] sm:$0xff]   ;;  %6771 = vmatprep.subr.bf16.mxu1 %v7353_v61  ;;  %6881 = vmatprep.subr.bf16.mxu0 %v10362_v12 }
 0x26c   : > { %v3053_v49 = vpop.f32.mrb[104].mxu1  ;;  %4027 = vmatprep.mubr.bf16.mxu1 %v3592_v25  ;;  %v3644_v46 = vmax.f32 %v3447_v57, 0.0  ;;  %6772 = vmatpush3.bf16.msra.mxu1 %v7354_v7 }
 0x26d   : > { %v3054_v52 = vadd.f32 %v3053_v49, %v10181_v44  ;;  %v3055_v43 = vpop.f32.mrb[105].mxu1  ;;  %4028 = vmatmul.mubr.bf16.gmra.mrb[164].mxu1 %v3591_v41  ;;  %v3687_v45 = vpack.c.bf16 %v3643_v32, %v3641_v21  ;;  %6773 = vmatprep.subr.bf16.mxu1 %v7355_v20 }
 0x26e   : > { %v3056_v29 = vadd.f32 %v3055_v43, %v10185_v8  ;;  %v3057_v0 = vpop.f32.mrb[106].mxu1  ;;  %v3688_v53 = vpack.c.bf16 %v3644_v46, %v3642_v19 }
 0x26f   : > { %v3058_v27 = vadd.f32 %v3057_v0, %v10181_v44  ;;  %v3059_v24 = vpop.f32.mrb[107].mxu1  ;;  %v3549_v48 = vmax.f32 %v3054_v52, 0.0 }
 0x270   : > { %v3060_v51 = vadd.f32 %v3059_v24, %v10185_v8  ;;  %4424 = vmatprep.mubr.bf16.mxu0 %v3688_v53  ;;  %v3550_v30 = vmax.f32 %v3056_v29, 0.0  ;;  %v10375_v24 = vld [vmem:[%s11457_s18 + $0x28] sm:$0xff]  }
 0x271   : > { %v3551_v33 = vmax.f32 %v3058_v27, 0.0  ;;  %4425 = vmatmul.mubr.bf16.gmra.mrb[164].mxu0 %v3687_v45  ;;  %v7357_v27 = vld [vmem:[%s11449_s10 + $0x38] sm:$0xff]  }
 0x272   : > { %v3552_v35 = vmax.f32 %v3060_v51, 0.0  ;;  %v3450_v9 = vpop.f32.mrb[104].mxu0  ;;  %6882 = vmatpush3.bf16.msra.mxu0 %v10375_v24  ;;  %6774 = vmatpush3.bf16.msra.mxu1 %v7357_v27 }
 0x273   : > { %v3593_v63 = vpack.c.bf16 %v3551_v33, %v3549_v48  ;;  %v3451_v26 = vadd.f32 %v3450_v9, %v10165_v54  ;;  %v3452_v42 = vpop.f32.mrb[105].mxu0  ;;  %6983 = vmatprep.subr.bf16.mxu1 %v10224_v4 }
 0x274   : > { %v3594_v38 = vpack.c.bf16 %v3552_v35, %v3550_v30  ;;  %v3453_v17 = vadd.f32 %v3452_v42, %v10168_v50  ;;  %v3454_v55 = vpop.f32.mrb[106].mxu0 }
 0x275   : > { %v3645_v59 = vmax.f32 %v3451_v26, 0.0  ;;  %v3455_v15 = vadd.f32 %v3454_v55, %v10165_v54  ;;  %v3456_v39 = vpop.f32.mrb[107].mxu0 }
 0x276   : > { %v3063_v22 = vpop.f32.mrb[108].mxu1  ;;  %4037 = vmatprep.mubr.bf16.mxu1 %v3594_v38  ;;  %v3646_v5 = vmax.f32 %v3453_v17, 0.0  ;;  %v3457_v6 = vadd.f32 %v3456_v39, %v10168_v50 }
 0x277   : > { %v3064_v2 = vadd.f32 %v3063_v22, %v10181_v44  ;;  %v3065_v11 = vpop.f32.mrb[109].mxu1  ;;  %4038 = vmatmul.mubr.bf16.gmra.mrb[168].mxu1 %v3593_v63  ;;  %v3647_v10 = vmax.f32 %v3455_v15, 0.0 }
 0x278   : > { %v3066_v56 = vadd.f32 %v3065_v11, %v10185_v8  ;;  %v3067_v16 = vpop.f32.mrb[110].mxu1  ;;  %v3648_v13 = vmax.f32 %v3457_v6, 0.0  ;;  %v10391_v11 = vld [vmem:[%s11457_s18 + $0x30] sm:$0xff]  }
 0x279   : > { %v3068_v28 = vadd.f32 %v3067_v16, %v10181_v44  ;;  %v3069_v58 = vpop.f32.mrb[111].mxu1  ;;  %v3689_v31 = vpack.c.bf16 %v3647_v10, %v3645_v59  ;;  %v3553_v18 = vmax.f32 %v3064_v2, 0.0  ;;  %v10386_v2 = vld [vmem:[%s11457_s18 + $0x70] sm:$0xff]  }
 0x27a   : > { %v3070_v62 = vadd.f32 %v3069_v58, %v10185_v8  ;;  %v3690_v37 = vpack.c.bf16 %v3648_v13, %v3646_v5  ;;  %v3460_v3 = vpop.f32.mrb[108].mxu0  ;;  %v3554_v1 = vmax.f32 %v3066_v56, 0.0  ;;  %6883 = vmatprep.subr.bf16.mxu0 %v10386_v2 }
 0x27b   : > { %v3555_v36 = vmax.f32 %v3068_v28, 0.0  ;;  %v3461_v21 = vadd.f32 %v3460_v3, %v10165_v54  ;;  %v3462_v47 = vpop.f32.mrb[109].mxu0  ;;  %6884 = vmatpush3.bf16.msra.mxu0 %v10391_v11 }
 0x27c   : > { %v3556_v41 = vmax.f32 %v3070_v62, 0.0  ;;  %v3463_v19 = vadd.f32 %v3462_v47, %v10168_v50  ;;  %v3464_v57 = vpop.f32.mrb[110].mxu0  ;;  %4434 = vmatprep.mubr.bf16.mxu0 %v3690_v37 }
 0x27d   : > { %v3595_v25 = vpack.c.bf16 %v3555_v36, %v3553_v18  ;;  %v3649_v46 = vmax.f32 %v3461_v21, 0.0  ;;  %v3465_v52 = vadd.f32 %v3464_v57, %v10165_v54  ;;  %v3466_v43 = vpop.f32.mrb[111].mxu0  ;;  %4435 = vmatmul.mubr.bf16.gmra.mrb[168].mxu0 %v3689_v31  ;;  %v10405_v57 = vld [vmem:[%s11457_s18 + $0x78] sm:$0xff]  }
 0x27e   : > { %v3596_v32 = vpack.c.bf16 %v3556_v41, %v3554_v1  ;;  %v3073_v49 = vpop.f32.mrb[112].mxu1  ;;  %v3650_v0 = vmax.f32 %v3463_v19, 0.0  ;;  %v3467_v53 = vadd.f32 %v3466_v43, %v10168_v50  ;;  %v10411_v43 = vld [vmem:[%s11457_s18 + $0x38] sm:$0xff]   ;;  %6885 = vmatprep.subr.bf16.mxu0 %v10405_v57 }
 0x27f   : > { %v3074_v45 = vadd.f32 %v3073_v49, %v10181_v44  ;;  %v3075_v29 = vpop.f32.mrb[113].mxu1  ;;  %v3651_v33 = vmax.f32 %v3465_v52, 0.0  ;;  %6886 = vmatpush3.bf16.msra.mxu0 %v10411_v43 }
 0x280   : > { %v3076_v51 = vadd.f32 %v3075_v29, %v10185_v8  ;;  %v3077_v48 = vpop.f32.mrb[114].mxu1  ;;  %4047 = vmatprep.mubr.bf16.mxu1 %v3596_v32  ;;  %v3652_v63 = vmax.f32 %v3467_v53, 0.0 }
 0x281   : > { %v3078_v30 = vadd.f32 %v3077_v48, %v10181_v44  ;;  %v3079_v35 = vpop.f32.mrb[115].mxu1  ;;  %4048 = vmatmul.mubr.bf16.gmra.mrb[172].mxu1 %v3595_v25  ;;  %v3691_v38 = vpack.c.bf16 %v3651_v33, %v3649_v46  ;;  %v3557_v26 = vmax.f32 %v3074_v45, 0.0 }
 0x282   : > { %v3080_v9 = vadd.f32 %v3079_v35, %v10185_v8  ;;  %v3692_v17 = vpack.c.bf16 %v3652_v63, %v3650_v0  ;;  %v3470_v55 = vpop.f32.mrb[112].mxu0  ;;  %v3558_v22 = vmax.f32 %v3076_v51, 0.0 }
 0x283   : > { %v3559_v42 = vmax.f32 %v3078_v30, 0.0  ;;  %v3471_v15 = vadd.f32 %v3470_v55, %v10165_v54  ;;  %v3472_v39 = vpop.f32.mrb[113].mxu0 }
 0x284   : > { %v3560_v59 = vmax.f32 %v3080_v9, 0.0  ;;  %v3473_v6 = vadd.f32 %v3472_v39, %v10168_v50  ;;  %v3474_v56 = vpop.f32.mrb[114].mxu0  ;;  %4444 = vmatprep.mubr.bf16.mxu0 %v3692_v17 }
 0x285   : > { %v3597_v5 = vpack.c.bf16 %v3559_v42, %v3557_v26  ;;  %v3653_v16 = vmax.f32 %v3471_v15, 0.0  ;;  %v3475_v28 = vadd.f32 %v3474_v56, %v10165_v54  ;;  %v3476_v58 = vpop.f32.mrb[115].mxu0  ;;  %4445 = vmatmul.mubr.bf16.gmra.mrb[172].mxu0 %v3691_v38 }
 0x286   : > { %v3598_v4 = vpack.c.bf16 %v3560_v59, %v3558_v22  ;;  %v3083_v10 = vpop.f32.mrb[116].mxu1  ;;  %v3654_v62 = vmax.f32 %v3473_v6, 0.0  ;;  %v3477_v18 = vadd.f32 %v3476_v58, %v10168_v50 }
 0x287   : > { %v3084_v13 = vadd.f32 %v3083_v10, %v10181_v44  ;;  %v3085_v31 = vpop.f32.mrb[117].mxu1  ;;  %v3655_v37 = vmax.f32 %v3475_v28, 0.0 }
 0x288   : > { %4057 = vmatprep.mubr.bf16.mxu1 %v3598_v4  ;;  %v3086_v36 = vadd.f32 %v3085_v31, %v10185_v8  ;;  %v3087_v3 = vpop.f32.mrb[118].mxu1  ;;  %v3656_v7 = vmax.f32 %v3477_v18, 0.0 }
 0x289   : > { %4058 = vmatmul.mubr.bf16.gmra.mrb[176].mxu1 %v3597_v5  ;;  %v3088_v61 = vadd.f32 %v3087_v3, %v10181_v44  ;;  %v3089_v20 = vpop.f32.mrb[119].mxu1  ;;  %v3693_v1 = vpack.c.bf16 %v3655_v37, %v3653_v16  ;;  %v3561_v21 = vmax.f32 %v3084_v13, 0.0 }
 0x28a   : > { %v3090_v41 = vadd.f32 %v3089_v20, %v10185_v8  ;;  %v3694_v25 = vpack.c.bf16 %v3656_v7, %v3654_v62  ;;  %v3480_v19 = vpop.f32.mrb[116].mxu0  ;;  %v3562_v32 = vmax.f32 %v3086_v36, 0.0 }
 0x28b   : > { %v3563_v47 = vmax.f32 %v3088_v61, 0.0  ;;  %v3481_v46 = vadd.f32 %v3480_v19, %v10165_v54  ;;  %v3482_v52 = vpop.f32.mrb[117].mxu0 }
 0x28c   : > { %v3564_v49 = vmax.f32 %v3090_v41, 0.0  ;;  %4454 = vmatprep.mubr.bf16.mxu0 %v3694_v25  ;;  %v3483_v29 = vadd.f32 %v3482_v52, %v10168_v50  ;;  %v3484_v0 = vpop.f32.mrb[118].mxu0 }
 0x28d   : > { %v3599_v45 = vpack.c.bf16 %v3563_v47, %v3561_v21  ;;  %4455 = vmatmul.mubr.bf16.gmra.mrb[176].mxu0 %v3693_v1  ;;  %v3657_v27 = vmax.f32 %v3481_v46, 0.0  ;;  %v3485_v51 = vadd.f32 %v3484_v0, %v10165_v54  ;;  %v3486_v48 = vpop.f32.mrb[119].mxu0 }
 0x28e   : > { %v3600_v53 = vpack.c.bf16 %v3564_v49, %v3562_v32  ;;  %v3658_v33 = vmax.f32 %v3483_v29, 0.0  ;;  %v3487_v30 = vadd.f32 %v3486_v48, %v10168_v50 }
 0x28f   : > { %v3659_v35 = vmax.f32 %v3485_v51, 0.0 }
 0x290   : > { %4067 = vmatprep.mubr.bf16.mxu1 %v3600_v53  ;;  %v3660_v63 = vmax.f32 %v3487_v30, 0.0 }
 0x291   : > { %4068 = vmatmul.mubr.bf16.gmra.mrb[180].mxu1 %v3599_v45  ;;  %v3695_v9 = vpack.c.bf16 %v3659_v35, %v3657_v27 }
 0x292   : > { %v3696_v38 = vpack.c.bf16 %v3660_v63, %v3658_v33  ;;  %v3490_v26 = vpop.f32.mrb[120].mxu0 }
 0x293   : > { %v3491_v42 = vadd.f32 %v3490_v26, %v10165_v54  ;;  %v3492_v17 = vpop.f32.mrb[121].mxu0 }
 0x294   : > { %v3093_v55 = vpop.f32.mrb[120].mxu1  ;;  %4464 = vmatprep.mubr.bf16.mxu0 %v3696_v38  ;;  %v3493_v22 = vadd.f32 %v3492_v17, %v10168_v50  ;;  %v3494_v59 = vpop.f32.mrb[122].mxu0 }
 0x295   : > { %v3094_v15 = vadd.f32 %v3093_v55, %v10181_v44  ;;  %v3095_v39 = vpop.f32.mrb[121].mxu1  ;;  %4465 = vmatmul.mubr.bf16.gmra.mrb[180].mxu0 %v3695_v9  ;;  %v3661_v5 = vmax.f32 %v3491_v42, 0.0  ;;  %v3495_v6 = vadd.f32 %v3494_v59, %v10165_v54  ;;  %v3496_v56 = vpop.f32.mrb[123].mxu0  ;;  %v4130_v59 = vld [vmem:[%s11456_s17] sm:$0x3] }
 0x296   : > { %v3096_v4 = vadd.f32 %v3095_v39, %v10185_v8  ;;  %v3097_v16 = vpop.f32.mrb[122].mxu1  ;;  %v3662_v10 = vmax.f32 %v3493_v22, 0.0  ;;  %v3497_v28 = vadd.f32 %v3496_v56, %v10168_v50 }
 0x297   : > { %v3098_v58 = vadd.f32 %v3097_v16, %v10181_v44  ;;  %v3099_v13 = vpop.f32.mrb[123].mxu1  ;;  %v3663_v62 = vmax.f32 %v3495_v6, 0.0  ;;  %v3565_v36 = vmax.f32 %v3094_v15, 0.0  ;;  %v10438_v15 = vrot.slane %v4130_v59, %v11726_v40 }
 0x298   : > { %v3100_v31 = vadd.f32 %v3099_v13, %v10185_v8  ;;  %v3664_v18 = vmax.f32 %v3497_v28, 0.0  ;;  %v3566_v61 = vmax.f32 %v3096_v4, 0.0 }
 0x299   : > { %v3567_v37 = vmax.f32 %v3098_v58, 0.0  ;;  %v3697_v3 = vpack.c.bf16 %v3663_v62, %v3661_v5 }
 0x29a   : > { %v3568_v7 = vmax.f32 %v3100_v31, 0.0  ;;  %v3698_v20 = vpack.c.bf16 %v3664_v18, %v3662_v10  ;;  %v3500_v1 = vpop.f32.mrb[124].mxu0 }
 0x29b   : > { %v3601_v41 = vpack.c.bf16 %v3567_v37, %v3565_v36  ;;  %v3501_v21 = vadd.f32 %v3500_v1, %v10165_v54  ;;  %v3502_v47 = vpop.f32.mrb[125].mxu0  ;;  %v3733_v37 = vld [vmem:[%s11448_s9] sm:$0x3] }
 0x29c   : > { %v3602_v25 = vpack.c.bf16 %v3568_v7, %v3566_v61  ;;  %4474 = vmatprep.mubr.bf16.mxu0 %v3698_v20  ;;  %v3503_v19 = vadd.f32 %v3502_v47, %v10168_v50  ;;  %v3504_v32 = vpop.f32.mrb[126].mxu0  ;;  %v10454_v47 = vrot.slane %v3733_v37, %v11726_v40 }
 0x29d   : > { %4475 = vmatmul.mubr.bf16.gmra.mrb[184].mxu0 %v3697_v3  ;;  %v3665_v49 = vmax.f32 %v3501_v21, 0.0  ;;  %v3505_v46 = vadd.f32 %v3504_v32, %v10165_v54  ;;  %v3506_v52 = vpop.f32.mrb[127].mxu0  ;;  %v10458_v32 = vrot.slane %v3733_v37, %v11727_v14 }
 0x29e   : > { %4077 = vmatprep.mubr.bf16.mxu1 %v3602_v25  ;;  %v3666_v45 = vmax.f32 %v3503_v19, 0.0  ;;  %v3507_v29 = vadd.f32 %v3506_v52, %v10168_v50 }
 0x29f   : > { %4078 = vmatmul.mubr.bf16.gmra.mrb[184].mxu1 %v3601_v41  ;;  %v3667_v0 = vmax.f32 %v3505_v46, 0.0 }
 0x2a0   : > { %v3668_v53 = vmax.f32 %v3507_v29, 0.0 }
 0x2a1   : > { %v3699_v27 = vpack.c.bf16 %v3667_v0, %v3665_v49 }
 0x2a2   : > { %v3700_v51 = vpack.c.bf16 %v3668_v53, %v3666_v45 }
 0x2a4   : > { %4484 = vmatprep.mubr.bf16.mxu0 %v3700_v51 }
 0x2a5   : > { %4485 = vmatmul.mubr.bf16.gmra.mrb[188].mxu0 %v3699_v27 }
 0x2a7   : > { %v3103_v48 = vpop.f32.mrb[124].mxu1 }
 0x2a8   : > { %v3104_v33 = vadd.f32 %v3103_v48, %v10181_v44  ;;  %v3105_v30 = vpop.f32.mrb[125].mxu1 }
 0x2a9   : > { %v3106_v35 = vadd.f32 %v3105_v30, %v10185_v8  ;;  %v3107_v63 = vpop.f32.mrb[126].mxu1 }
 0x2aa   : > { %v3108_v54 = vadd.f32 %v3107_v63, %v10181_v44  ;;  %v3109_v9 = vpop.f32.mrb[127].mxu1  ;;  %v3569_v50 = vmax.f32 %v3104_v33, 0.0  ;;  %v10441_v44 = vrot.slane %v4130_v59, %v11727_v14 }
 0x2ab   : > { %v3110_v38 = vadd.f32 %v3109_v9, %v10185_v8  ;;  %v3570_v42 = vmax.f32 %v3106_v35, 0.0 }
 0x2ac   : > { %v3571_v26 = vmax.f32 %v3108_v54, 0.0 }
 0x2ad   : > { %v3572_v17 = vmax.f32 %v3110_v38, 0.0 }
 0x2ae   : > { %v3603_v55 = vpack.c.bf16 %v3571_v26, %v3569_v50 }
 0x2af   : > { %v3604_v22 = vpack.c.bf16 %v3572_v17, %v3570_v42 }
 0x2b1   : > { %4087 = vmatprep.mubr.bf16.mxu1 %v3604_v22 }
 0x2b2   : > { %4088 = vmatmul.mubr.bf16.gmra.mrb[188].mxu1 %v3603_v55 }
 0x2e0   : > { %v4336_v39 = vpop.f32.mrb[128].mxu0 }
 0x2e1   : > { %v4337_v8 = vadd.f32 %v4336_v39, %v10438_v15  ;;  %v4338_v5 = vpop.f32.mrb[129].mxu0 }
 0x2e2   : > { %v4339_v6 = vadd.f32 %v4338_v5, %v10441_v44  ;;  %v4340_v56 = vpop.f32.mrb[130].mxu0 }
 0x2e3   : > { %v4591_v4 = vmax.f32 %v4337_v8, 0.0  ;;  %v4341_v16 = vadd.f32 %v4340_v56, %v10438_v15  ;;  %v4342_v10 = vpop.f32.mrb[131].mxu0 }
 0x2e4   : > { %v4592_v28 = vmax.f32 %v4339_v6, 0.0  ;;  %v4343_v58 = vadd.f32 %v4342_v10, %v10441_v44  ;;  %v7814_v10 = vld [vmem:[%s11457_s18] sm:$0xff]  }
 0x2e5   : > { %v4593_v13 = vmax.f32 %v4341_v16, 0.0 }
 0x2e6   : > { %v4594_v62 = vmax.f32 %v4343_v58, 0.0 }
 0x2e7   : > { %v4655_v31 = vpack.c.bf16 %v4593_v13, %v4591_v4 }
 0x2e8   : > { %v4656_v18 = vpack.c.bf16 %v4594_v62, %v4592_v28  ;;  %v7815_v62 = vld [vmem:[%s11457_s18 + $0x48] sm:$0xff]  }
 0x2ea   : > { %5342 = vmatprep.mubr.bf16.mxu0 %v4656_v18 }
 0x2eb   : > { %v4346_v36 = vpop.f32.mrb[132].mxu0  ;;  %5343 = vmatmul.mubr.bf16.vlgmr.msra.gmra.mrb[192].mxu0 %v4655_v31 }
 0x2ec   : > { %v4347_v3 = vadd.f32 %v4346_v36, %v10438_v15  ;;  %v4348_v61 = vpop.f32.mrb[133].mxu0 }
 0x2ed   : > { %v4349_v7 = vadd.f32 %v4348_v61, %v10441_v44  ;;  %v4350_v20 = vpop.f32.mrb[134].mxu0 }
 0x2ee   : > { %v4595_v1 = vmax.f32 %v4347_v3, 0.0  ;;  %v4351_v41 = vadd.f32 %v4350_v20, %v10438_v15  ;;  %v4352_v21 = vpop.f32.mrb[135].mxu0 }
 0x2ef   : > { %v4596_v25 = vmax.f32 %v4349_v7, 0.0  ;;  %v4353_v19 = vadd.f32 %v4352_v21, %v10441_v44 }
 0x2f0   : > { %v4597_v49 = vmax.f32 %v4351_v41, 0.0 }
 0x2f1   : > { %v4598_v46 = vmax.f32 %v4353_v19, 0.0  ;;  %v7817_v19 = vld [vmem:[%s11457_s18 + $0x50] sm:$0xff]  }
 0x2f2   : > { %v3939_v52 = vpop.f32.mrb[128].mxu1  ;;  %v4657_v45 = vpack.c.bf16 %v4597_v49, %v4595_v1  ;;  %v7816_v1 = vld [vmem:[%s11457_s18 + $0x8] sm:$0xff]  }
 0x2f3   : > { %v3940_v29 = vadd.f32 %v3939_v52, %v10454_v47  ;;  %v3941_v0 = vpop.f32.mrb[129].mxu1  ;;  %v4658_v53 = vpack.c.bf16 %v4598_v46, %v4596_v25 }
 0x2f4   : > { %v3942_v27 = vadd.f32 %v3941_v0, %v10458_v32  ;;  %v3943_v51 = vpop.f32.mrb[130].mxu1 }
 0x2f5   : > { %v3944_v40 = vadd.f32 %v3943_v51, %v10454_v47  ;;  %v3945_v48 = vpop.f32.mrb[131].mxu1  ;;  %5350 = vmatprep.mubr.bf16.mxu0 %v4658_v53  ;;  %v4495_v14 = vmax.f32 %v3940_v29, 0.0 }
 0x2f6   : > { %v3946_v33 = vadd.f32 %v3945_v48, %v10458_v32  ;;  %5351 = vmatmul.mubr.bf16.gmra.mrb[196].mxu0 %v4657_v45  ;;  %v4496_v35 = vmax.f32 %v3942_v27, 0.0 }
 0x2f7   : > { %v4497_v30 = vmax.f32 %v3944_v40, 0.0 }
 0x2f8   : > { %v4498_v63 = vmax.f32 %v3946_v33, 0.0 }
 0x2f9   : > { %v4559_v54 = vpack.c.bf16 %v4497_v30, %v4495_v14  ;;  %v4356_v50 = vpop.f32.mrb[136].mxu0  ;;  %v7818_v14 = vld [vmem:[%s11457_s18 + $0x10] sm:$0xff]  }
 0x2fa   : > { %v4560_v9 = vpack.c.bf16 %v4498_v63, %v4496_v35  ;;  %v4357_v17 = vadd.f32 %v4356_v50, %v10438_v15  ;;  %v4358_v55 = vpop.f32.mrb[137].mxu0 }
 0x2fb   : > { %v3949_v38 = vpop.f32.mrb[132].mxu1  ;;  %v4359_v39 = vadd.f32 %v4358_v55, %v10441_v44  ;;  %v4360_v8 = vpop.f32.mrb[138].mxu0 }
 0x2fc   : > { %v3950_v26 = vadd.f32 %v3949_v38, %v10454_v47  ;;  %v3951_v42 = vpop.f32.mrb[133].mxu1  ;;  %4854 = vmatprep.mubr.bf16.mxu1 %v4560_v9  ;;  %v4599_v56 = vmax.f32 %v4357_v17, 0.0  ;;  %v4361_v4 = vadd.f32 %v4360_v8, %v10438_v15  ;;  %v4362_v16 = vpop.f32.mrb[139].mxu0  ;;  %v7819_v38 = vld [vmem:[%s11457_s18 + $0x58] sm:$0xff]  }
 0x2fd   : > { %v3952_v22 = vadd.f32 %v3951_v42, %v10458_v32  ;;  %v3953_v59 = vpop.f32.mrb[134].mxu1  ;;  %4855 = vmatmul.mubr.bf16.vlgmr.msra.gmra.mrb[192].mxu1 %v4559_v54  ;;  %v4600_v58 = vmax.f32 %v4359_v39, 0.0  ;;  %v4363_v13 = vadd.f32 %v4362_v16, %v10441_v44 }
 0x2fe   : > { %v3954_v5 = vadd.f32 %v3953_v59, %v10454_v47  ;;  %v3955_v6 = vpop.f32.mrb[135].mxu1  ;;  %6991 = vmatpush3.bf16.msra.mxu1 %v7814_v10  ;;  %v4499_v31 = vmax.f32 %v3950_v26, 0.0  ;;  %v4601_v36 = vmax.f32 %v4361_v4, 0.0 }
 0x2ff   : > { %v3956_v28 = vadd.f32 %v3955_v6, %v10458_v32  ;;  %6984 = vmatprep.subr.bf16.mxu1 %v7815_v62  ;;  %v4500_v37 = vmax.f32 %v3952_v22, 0.0  ;;  %v4602_v61 = vmax.f32 %v4363_v13, 0.0 }
 0x300   : > { %v4501_v18 = vmax.f32 %v3954_v5, 0.0  ;;  %v4659_v20 = vpack.c.bf16 %v4601_v36, %v4599_v56 }
 0x301   : > { %v4502_v3 = vmax.f32 %v3956_v28, 0.0  ;;  %v4660_v25 = vpack.c.bf16 %v4602_v61, %v4600_v58 }
 0x302   : > { %v4561_v7 = vpack.c.bf16 %v4501_v18, %v4499_v31  ;;  %6992 = vmatpush3.bf16.msra.mxu1 %v7816_v1 }
 0x303   : > { %v4562_v41 = vpack.c.bf16 %v4502_v3, %v4500_v37  ;;  %v3959_v21 = vpop.f32.mrb[136].mxu1  ;;  %6985 = vmatprep.subr.bf16.mxu1 %v7817_v19  ;;  %5358 = vmatprep.mubr.bf16.mxu0 %v4660_v25 }
 0x304   : > { %v3960_v49 = vadd.f32 %v3959_v21, %v10454_v47  ;;  %v3961_v46 = vpop.f32.mrb[137].mxu1  ;;  %5359 = vmatmul.mubr.bf16.gmra.mrb[200].mxu0 %v4659_v20 }
 0x305   : > { %v3962_v52 = vadd.f32 %v3961_v46, %v10458_v32  ;;  %v3963_v45 = vpop.f32.mrb[138].mxu1  ;;  %4862 = vmatprep.mubr.bf16.mxu1 %v4562_v41  ;;  %v4366_v29 = vpop.f32.mrb[140].mxu0 }
 0x306   : > { %v3964_v0 = vadd.f32 %v3963_v45, %v10454_v47  ;;  %v3965_v53 = vpop.f32.mrb[139].mxu1  ;;  %4863 = vmatmul.mubr.bf16.gmra.mrb[196].mxu1 %v4561_v7  ;;  %v4367_v27 = vadd.f32 %v4366_v29, %v10438_v15  ;;  %v4368_v51 = vpop.f32.mrb[141].mxu0  ;;  %v4503_v30 = vmax.f32 %v3960_v49, 0.0 }
 0x307   : > { %v3966_v40 = vadd.f32 %v3965_v53, %v10458_v32  ;;  %v4369_v48 = vadd.f32 %v4368_v51, %v10441_v44  ;;  %v4370_v33 = vpop.f32.mrb[142].mxu0  ;;  %6993 = vmatpush3.bf16.msra.mxu1 %v7818_v14  ;;  %v4504_v50 = vmax.f32 %v3962_v52, 0.0 }
 0x308   : > { %v4505_v35 = vmax.f32 %v3964_v0, 0.0  ;;  %v4603_v63 = vmax.f32 %v4367_v27, 0.0  ;;  %v4371_v54 = vadd.f32 %v4370_v33, %v10438_v15  ;;  %v4372_v9 = vpop.f32.mrb[143].mxu0  ;;  %6986 = vmatprep.subr.bf16.mxu1 %v7819_v38 }
 0x309   : > { %v4506_v26 = vmax.f32 %v3966_v40, 0.0  ;;  %v4604_v42 = vmax.f32 %v4369_v48, 0.0  ;;  %v4373_v17 = vadd.f32 %v4372_v9, %v10441_v44 }
 0x30a   : > { %v4563_v55 = vpack.c.bf16 %v4505_v35, %v4503_v30  ;;  %v4605_v22 = vmax.f32 %v4371_v54, 0.0 }
 0x30b   : > { %v4564_v59 = vpack.c.bf16 %v4506_v26, %v4504_v50  ;;  %v3969_v39 = vpop.f32.mrb[140].mxu1  ;;  %v4606_v8 = vmax.f32 %v4373_v17, 0.0  ;;  %6994 = vmatpush3.bf16.msra.mxu1 %v10279_v60 }
 0x30c   : > { %v3970_v5 = vadd.f32 %v3969_v39, %v10454_v47  ;;  %v3971_v6 = vpop.f32.mrb[141].mxu1  ;;  %v4661_v56 = vpack.c.bf16 %v4605_v22, %v4603_v63  ;;  %6987 = vmatprep.subr.bf16.mxu1 %v10288_v34 }
 0x30d   : > { %v3972_v4 = vadd.f32 %v3971_v6, %v10458_v32  ;;  %v3973_v16 = vpop.f32.mrb[142].mxu1  ;;  %4870 = vmatprep.mubr.bf16.mxu1 %v4564_v59  ;;  %v4662_v10 = vpack.c.bf16 %v4606_v8, %v4604_v42 }
 0x30e   : > { %v3974_v28 = vadd.f32 %v3973_v16, %v10454_v47  ;;  %v3975_v58 = vpop.f32.mrb[143].mxu1  ;;  %4871 = vmatmul.mubr.bf16.gmra.mrb[200].mxu1 %v4563_v55  ;;  %v4507_v60 = vmax.f32 %v3970_v5, 0.0 }
 0x30f   : > { %v3976_v13 = vadd.f32 %v3975_v58, %v10458_v32  ;;  %5366 = vmatprep.mubr.bf16.mxu0 %v4662_v10  ;;  %6995 = vmatpush3.bf16.msra.mxu1 %v10299_v23  ;;  %v4508_v34 = vmax.f32 %v3972_v4, 0.0 }
 0x310   : > { %v4509_v62 = vmax.f32 %v3974_v28, 0.0  ;;  %5367 = vmatmul.mubr.bf16.gmra.mrb[204].mxu0 %v4661_v56  ;;  %6988 = vmatprep.subr.bf16.mxu1 %v10362_v12 }
 0x311   : > { %v4510_v31 = vmax.f32 %v3976_v13, 0.0 }
 0x312   : > { %v4565_v18 = vpack.c.bf16 %v4509_v62, %v4507_v60  ;;  %v4376_v3 = vpop.f32.mrb[144].mxu0 }
 0x313   : > { %v4566_v36 = vpack.c.bf16 %v4510_v31, %v4508_v34  ;;  %v3979_v37 = vpop.f32.mrb[144].mxu1  ;;  %6996 = vmatpush3.bf16.msra.mxu1 %v10375_v24  ;;  %v4377_v20 = vadd.f32 %v4376_v3, %v10438_v15  ;;  %v4378_v1 = vpop.f32.mrb[145].mxu0 }
 0x314   : > { %v3980_v61 = vadd.f32 %v3979_v37, %v10454_v47  ;;  %v3981_v7 = vpop.f32.mrb[145].mxu1  ;;  %6989 = vmatprep.subr.bf16.mxu1 %v10386_v2  ;;  %v4379_v12 = vadd.f32 %v4378_v1, %v10441_v44  ;;  %v4380_v21 = vpop.f32.mrb[146].mxu0 }
 0x315   : > { %v3982_v23 = vadd.f32 %v3981_v7, %v10458_v32  ;;  %v3983_v41 = vpop.f32.mrb[146].mxu1  ;;  %4878 = vmatprep.mubr.bf16.mxu1 %v4566_v36  ;;  %v4607_v24 = vmax.f32 %v4377_v20, 0.0  ;;  %v4381_v49 = vadd.f32 %v4380_v21, %v10438_v15  ;;  %v4382_v46 = vpop.f32.mrb[147].mxu0 }
 0x316   : > { %v3984_v25 = vadd.f32 %v3983_v41, %v10454_v47  ;;  %v3985_v19 = vpop.f32.mrb[147].mxu1  ;;  %4879 = vmatmul.mubr.bf16.gmra.mrb[204].mxu1 %v4565_v18  ;;  %v4608_v45 = vmax.f32 %v4379_v12, 0.0  ;;  %v4383_v2 = vadd.f32 %v4382_v46, %v10441_v44  ;;  %v4511_v29 = vmax.f32 %v3980_v61, 0.0 }
 0x317   : > { %v3986_v52 = vadd.f32 %v3985_v19, %v10458_v32  ;;  %6997 = vmatpush3.bf16.msra.mxu1 %v10391_v11  ;;  %v4609_v53 = vmax.f32 %v4381_v49, 0.0  ;;  %v4512_v27 = vmax.f32 %v3982_v23, 0.0 }
 0x318   : > { %v4513_v0 = vmax.f32 %v3984_v25, 0.0  ;;  %6990 = vmatprep.subr.bf16.mxu1 %v10405_v57  ;;  %v4610_v40 = vmax.f32 %v4383_v2, 0.0 }
 0x319   : > { %v4514_v51 = vmax.f32 %v3986_v52, 0.0  ;;  %v4663_v33 = vpack.c.bf16 %v4609_v53, %v4607_v24 }
 0x31a   : > { %v4567_v48 = vpack.c.bf16 %v4513_v0, %v4511_v29  ;;  %v4664_v35 = vpack.c.bf16 %v4610_v40, %v4608_v45 }
 0x31b   : > { %v4568_v14 = vpack.c.bf16 %v4514_v51, %v4512_v27  ;;  %v3989_v30 = vpop.f32.mrb[148].mxu1  ;;  %6998 = vmatpush3.bf16.msra.mxu1 %v10411_v43 }
 0x31c   : > { %v3990_v63 = vadd.f32 %v3989_v30, %v10454_v47  ;;  %v3991_v54 = vpop.f32.mrb[149].mxu1  ;;  %5374 = vmatprep.mubr.bf16.mxu0 %v4664_v35 }
 0x31d   : > { %v3992_v11 = vadd.f32 %v3991_v54, %v10458_v32  ;;  %v3993_v9 = vpop.f32.mrb[150].mxu1  ;;  %4886 = vmatprep.mubr.bf16.mxu1 %v4568_v14  ;;  %v4386_v38 = vpop.f32.mrb[148].mxu0  ;;  %5375 = vmatmul.mubr.bf16.gmra.mrb[208].mxu0 %v4663_v33 }
 0x31e   : > { %v3994_v57 = vadd.f32 %v3993_v9, %v10454_v47  ;;  %v3995_v50 = vpop.f32.mrb[151].mxu1  ;;  %4887 = vmatmul.mubr.bf16.gmra.mrb[208].mxu1 %v4567_v48  ;;  %v4387_v26 = vadd.f32 %v4386_v38, %v10438_v15  ;;  %v4388_v42 = vpop.f32.mrb[149].mxu0  ;;  %v4515_v22 = vmax.f32 %v3990_v63, 0.0 }
 0x31f   : > { %v3996_v17 = vadd.f32 %v3995_v50, %v10458_v32  ;;  %v4389_v43 = vadd.f32 %v4388_v42, %v10441_v44  ;;  %v4390_v55 = vpop.f32.mrb[150].mxu0  ;;  %v4516_v6 = vmax.f32 %v3992_v11, 0.0 }
 0x320   : > { %v4517_v59 = vmax.f32 %v3994_v57, 0.0  ;;  %v4611_v39 = vmax.f32 %v4387_v26, 0.0  ;;  %v4391_v8 = vadd.f32 %v4390_v55, %v10438_v15  ;;  %v4392_v5 = vpop.f32.mrb[151].mxu0 }
 0x321   : > { %v4518_v56 = vmax.f32 %v3996_v17, 0.0  ;;  %v4612_v4 = vmax.f32 %v4389_v43, 0.0  ;;  %v4393_v16 = vadd.f32 %v4392_v5, %v10441_v44 }
 0x322   : > { %v4569_v10 = vpack.c.bf16 %v4517_v59, %v4515_v22  ;;  %v4613_v28 = vmax.f32 %v4391_v8, 0.0 }
 0x323   : > { %v4570_v58 = vpack.c.bf16 %v4518_v56, %v4516_v6  ;;  %v3999_v13 = vpop.f32.mrb[152].mxu1  ;;  %v4614_v60 = vmax.f32 %v4393_v16, 0.0 }
 0x324   : > { %v4000_v62 = vadd.f32 %v3999_v13, %v10454_v47  ;;  %v4001_v34 = vpop.f32.mrb[153].mxu1  ;;  %v4665_v31 = vpack.c.bf16 %v4613_v28, %v4611_v39 }
 0x325   : > { %v4002_v18 = vadd.f32 %v4001_v34, %v10458_v32  ;;  %v4003_v36 = vpop.f32.mrb[154].mxu1  ;;  %4894 = vmatprep.mubr.bf16.mxu1 %v4570_v58  ;;  %v4666_v37 = vpack.c.bf16 %v4614_v60, %v4612_v4 }
 0x326   : > { %v4004_v3 = vadd.f32 %v4003_v36, %v10454_v47  ;;  %v4005_v61 = vpop.f32.mrb[155].mxu1  ;;  %4895 = vmatmul.mubr.bf16.gmra.mrb[212].mxu1 %v4569_v10  ;;  %v4519_v20 = vmax.f32 %v4000_v62, 0.0 }
 0x327   : > { %v4006_v7 = vadd.f32 %v4005_v61, %v10458_v32  ;;  %5382 = vmatprep.mubr.bf16.mxu0 %v4666_v37  ;;  %v4520_v23 = vmax.f32 %v4002_v18, 0.0 }
 0x328   : > { %v4521_v1 = vmax.f32 %v4004_v3, 0.0  ;;  %5383 = vmatmul.mubr.bf16.gmra.mrb[212].mxu0 %v4665_v31 }
 0x329   : > { %v4522_v41 = vmax.f32 %v4006_v7, 0.0  ;;  %v4396_v12 = vpop.f32.mrb[152].mxu0 }
 0x32a   : > { %v4571_v21 = vpack.c.bf16 %v4521_v1, %v4519_v20  ;;  %v4397_v25 = vadd.f32 %v4396_v12, %v10438_v15  ;;  %v4398_v19 = vpop.f32.mrb[153].mxu0 }
 0x32b   : > { %v4572_v24 = vpack.c.bf16 %v4522_v41, %v4520_v23  ;;  %v4399_v46 = vadd.f32 %v4398_v19, %v10441_v44  ;;  %v4400_v52 = vpop.f32.mrb[154].mxu0 }
 0x32c   : > { %v4009_v49 = vpop.f32.mrb[156].mxu1  ;;  %v4615_v29 = vmax.f32 %v4397_v25, 0.0  ;;  %v4401_v0 = vadd.f32 %v4400_v52, %v10438_v15  ;;  %v4402_v53 = vpop.f32.mrb[155].mxu0 }
 0x32d   : > { %v4010_v45 = vadd.f32 %v4009_v49, %v10454_v47  ;;  %v4011_v2 = vpop.f32.mrb[157].mxu1  ;;  %4902 = vmatprep.mubr.bf16.mxu1 %v4572_v24  ;;  %v4616_v40 = vmax.f32 %v4399_v46, 0.0  ;;  %v4403_v48 = vadd.f32 %v4402_v53, %v10441_v44 }
 0x32e   : > { %v4012_v27 = vadd.f32 %v4011_v2, %v10458_v32  ;;  %v4013_v51 = vpop.f32.mrb[158].mxu1  ;;  %4903 = vmatmul.mubr.bf16.gmra.mrb[216].mxu1 %v4571_v21  ;;  %v4617_v30 = vmax.f32 %v4401_v0, 0.0 }
 0x32f   : > { %v4014_v33 = vadd.f32 %v4013_v51, %v10454_v47  ;;  %v4015_v14 = vpop.f32.mrb[159].mxu1  ;;  %v4618_v63 = vmax.f32 %v4403_v48, 0.0  ;;  %v4523_v54 = vmax.f32 %v4010_v45, 0.0 }
 0x330   : > { %v4016_v35 = vadd.f32 %v4015_v14, %v10458_v32  ;;  %v4667_v9 = vpack.c.bf16 %v4617_v30, %v4615_v29  ;;  %v4524_v38 = vmax.f32 %v4012_v27, 0.0 }
 0x331   : > { %v4525_v11 = vmax.f32 %v4014_v33, 0.0  ;;  %v4668_v50 = vpack.c.bf16 %v4618_v63, %v4616_v40  ;;  %v4406_v26 = vpop.f32.mrb[156].mxu0 }
 0x332   : > { %v4526_v57 = vmax.f32 %v4016_v35, 0.0  ;;  %v4407_v17 = vadd.f32 %v4406_v26, %v10438_v15  ;;  %v4408_v43 = vpop.f32.mrb[157].mxu0 }
 0x333   : > { %v4573_v42 = vpack.c.bf16 %v4525_v11, %v4523_v54  ;;  %v4409_v22 = vadd.f32 %v4408_v43, %v10441_v44  ;;  %v4410_v59 = vpop.f32.mrb[158].mxu0  ;;  %5390 = vmatprep.mubr.bf16.mxu0 %v4668_v50 }
 0x334   : > { %v4574_v55 = vpack.c.bf16 %v4526_v57, %v4524_v38  ;;  %v4619_v39 = vmax.f32 %v4407_v17, 0.0  ;;  %v4411_v8 = vadd.f32 %v4410_v59, %v10438_v15  ;;  %v4412_v5 = vpop.f32.mrb[159].mxu0  ;;  %5391 = vmatmul.mubr.bf16.gmra.mrb[216].mxu0 %v4667_v9 }
 0x335   : > { %v4620_v6 = vmax.f32 %v4409_v22, 0.0  ;;  %v4413_v56 = vadd.f32 %v4412_v5, %v10441_v44 }
 0x336   : > { %4910 = vmatprep.mubr.bf16.mxu1 %v4574_v55  ;;  %v4621_v16 = vmax.f32 %v4411_v8, 0.0 }
 0x337   : > { %v4019_v4 = vpop.f32.mrb[160].mxu1  ;;  %4911 = vmatmul.mubr.bf16.gmra.mrb[220].mxu1 %v4573_v42  ;;  %v4622_v58 = vmax.f32 %v4413_v56, 0.0 }
 0x338   : > { %v4020_v10 = vadd.f32 %v4019_v4, %v10454_v47  ;;  %v4021_v28 = vpop.f32.mrb[161].mxu1  ;;  %v4669_v62 = vpack.c.bf16 %v4621_v16, %v4619_v39 }
 0x339   : > { %v4022_v13 = vadd.f32 %v4021_v28, %v10458_v32  ;;  %v4023_v60 = vpop.f32.mrb[162].mxu1  ;;  %v4670_v18 = vpack.c.bf16 %v4622_v58, %v4620_v6 }
 0x33a   : > { %v4024_v34 = vadd.f32 %v4023_v60, %v10454_v47  ;;  %v4025_v31 = vpop.f32.mrb[163].mxu1  ;;  %v4416_v36 = vpop.f32.mrb[160].mxu0  ;;  %v4527_v7 = vmax.f32 %v4020_v10, 0.0 }
 0x33b   : > { %v4026_v37 = vadd.f32 %v4025_v31, %v10458_v32  ;;  %v4417_v3 = vadd.f32 %v4416_v36, %v10438_v15  ;;  %v4418_v61 = vpop.f32.mrb[161].mxu0  ;;  %5398 = vmatprep.mubr.bf16.mxu0 %v4670_v18  ;;  %v4528_v41 = vmax.f32 %v4022_v13, 0.0 }
 0x33c   : > { %v4529_v20 = vmax.f32 %v4024_v34, 0.0  ;;  %v4419_v1 = vadd.f32 %v4418_v61, %v10441_v44  ;;  %v4420_v23 = vpop.f32.mrb[162].mxu0  ;;  %5399 = vmatmul.mubr.bf16.gmra.mrb[220].mxu0 %v4669_v62 }
 0x33d   : > { %v4530_v12 = vmax.f32 %v4026_v37, 0.0  ;;  %v4623_v21 = vmax.f32 %v4417_v3, 0.0  ;;  %v4421_v25 = vadd.f32 %v4420_v23, %v10438_v15  ;;  %v4422_v19 = vpop.f32.mrb[163].mxu0 }
 0x33e   : > { %v4575_v24 = vpack.c.bf16 %v4529_v20, %v4527_v7  ;;  %v4624_v49 = vmax.f32 %v4419_v1, 0.0  ;;  %v4423_v46 = vadd.f32 %v4422_v19, %v10441_v44 }
 0x33f   : > { %v4576_v52 = vpack.c.bf16 %v4530_v12, %v4528_v41  ;;  %v4625_v45 = vmax.f32 %v4421_v25, 0.0 }
 0x340   : > { %v4029_v2 = vpop.f32.mrb[164].mxu1  ;;  %v4626_v29 = vmax.f32 %v4423_v46, 0.0 }
 0x341   : > { %v4030_v0 = vadd.f32 %v4029_v2, %v10454_v47  ;;  %v4031_v53 = vpop.f32.mrb[165].mxu1  ;;  %4918 = vmatprep.mubr.bf16.mxu1 %v4576_v52  ;;  %v4671_v27 = vpack.c.bf16 %v4625_v45, %v4623_v21 }
 0x342   : > { %v4032_v51 = vadd.f32 %v4031_v53, %v10458_v32  ;;  %v4033_v40 = vpop.f32.mrb[166].mxu1  ;;  %4919 = vmatmul.mubr.bf16.gmra.mrb[224].mxu1 %v4575_v24  ;;  %v4672_v48 = vpack.c.bf16 %v4626_v29, %v4624_v49 }
 0x343   : > { %v4034_v33 = vadd.f32 %v4033_v40, %v10454_v47  ;;  %v4035_v14 = vpop.f32.mrb[167].mxu1  ;;  %v4531_v63 = vmax.f32 %v4030_v0, 0.0 }
 0x344   : > { %v4036_v30 = vadd.f32 %v4035_v14, %v10458_v32  ;;  %v4426_v35 = vpop.f32.mrb[164].mxu0  ;;  %5406 = vmatprep.mubr.bf16.mxu0 %v4672_v48  ;;  %v4532_v38 = vmax.f32 %v4032_v51, 0.0 }
 0x345   : > { %v4533_v54 = vmax.f32 %v4034_v33, 0.0  ;;  %v4427_v11 = vadd.f32 %v4426_v35, %v10438_v15  ;;  %v4428_v9 = vpop.f32.mrb[165].mxu0  ;;  %5407 = vmatmul.mubr.bf16.gmra.mrb[224].mxu0 %v4671_v27 }
 0x346   : > { %v4534_v57 = vmax.f32 %v4036_v30, 0.0  ;;  %v4429_v50 = vadd.f32 %v4428_v9, %v10441_v44  ;;  %v4430_v26 = vpop.f32.mrb[166].mxu0 }
 0x347   : > { %v4577_v42 = vpack.c.bf16 %v4533_v54, %v4531_v63  ;;  %v4627_v17 = vmax.f32 %v4427_v11, 0.0  ;;  %v4431_v43 = vadd.f32 %v4430_v26, %v10438_v15  ;;  %v4432_v55 = vpop.f32.mrb[167].mxu0 }
 0x348   : > { %v4578_v22 = vpack.c.bf16 %v4534_v57, %v4532_v38  ;;  %v4628_v59 = vmax.f32 %v4429_v50, 0.0  ;;  %v4433_v39 = vadd.f32 %v4432_v55, %v10441_v44 }
 0x349   : > { %v4629_v8 = vmax.f32 %v4431_v43, 0.0 }
 0x34a   : > { %v4039_v5 = vpop.f32.mrb[168].mxu1  ;;  %4926 = vmatprep.mubr.bf16.mxu1 %v4578_v22  ;;  %v4630_v6 = vmax.f32 %v4433_v39, 0.0 }
 0x34b   : > { %v4040_v56 = vadd.f32 %v4039_v5, %v10454_v47  ;;  %v4041_v4 = vpop.f32.mrb[169].mxu1  ;;  %4927 = vmatmul.mubr.bf16.gmra.mrb[228].mxu1 %v4577_v42  ;;  %v4673_v16 = vpack.c.bf16 %v4629_v8, %v4627_v17 }
 0x34c   : > { %v4042_v10 = vadd.f32 %v4041_v4, %v10458_v32  ;;  %v4043_v28 = vpop.f32.mrb[170].mxu1  ;;  %v4674_v58 = vpack.c.bf16 %v4630_v6, %v4628_v59 }
 0x34d   : > { %v4044_v13 = vadd.f32 %v4043_v28, %v10454_v47  ;;  %v4045_v60 = vpop.f32.mrb[171].mxu1  ;;  %v4535_v34 = vmax.f32 %v4040_v56, 0.0 }
 0x34e   : > { %v4046_v62 = vadd.f32 %v4045_v60, %v10458_v32  ;;  %5414 = vmatprep.mubr.bf16.mxu0 %v4674_v58  ;;  %v4536_v18 = vmax.f32 %v4042_v10, 0.0 }
 0x34f   : > { %v4537_v31 = vmax.f32 %v4044_v13, 0.0  ;;  %5415 = vmatmul.mubr.bf16.gmra.mrb[228].mxu0 %v4673_v16 }
 0x350   : > { %v4538_v36 = vmax.f32 %v4046_v62, 0.0  ;;  %v4436_v3 = vpop.f32.mrb[168].mxu0 }
 0x351   : > { %v4579_v37 = vpack.c.bf16 %v4537_v31, %v4535_v34  ;;  %v4437_v7 = vadd.f32 %v4436_v3, %v10438_v15  ;;  %v4438_v20 = vpop.f32.mrb[169].mxu0 }
 0x352   : > { %v4580_v61 = vpack.c.bf16 %v4538_v36, %v4536_v18  ;;  %v4439_v1 = vadd.f32 %v4438_v20, %v10441_v44  ;;  %v4440_v23 = vpop.f32.mrb[170].mxu0 }
 0x353   : > { %v4631_v12 = vmax.f32 %v4437_v7, 0.0  ;;  %v4441_v21 = vadd.f32 %v4440_v23, %v10438_v15  ;;  %v4442_v25 = vpop.f32.mrb[171].mxu0 }
 0x354   : > { %v4049_v41 = vpop.f32.mrb[172].mxu1  ;;  %4934 = vmatprep.mubr.bf16.mxu1 %v4580_v61  ;;  %v4632_v49 = vmax.f32 %v4439_v1, 0.0  ;;  %v4443_v46 = vadd.f32 %v4442_v25, %v10441_v44 }
 0x355   : > { %v4050_v19 = vadd.f32 %v4049_v41, %v10454_v47  ;;  %v4051_v24 = vpop.f32.mrb[173].mxu1  ;;  %4935 = vmatmul.mubr.bf16.gmra.mrb[232].mxu1 %v4579_v37  ;;  %v4633_v2 = vmax.f32 %v4441_v21, 0.0 }
 0x356   : > { %v4052_v52 = vadd.f32 %v4051_v24, %v10458_v32  ;;  %v4053_v45 = vpop.f32.mrb[174].mxu1  ;;  %v4634_v53 = vmax.f32 %v4443_v46, 0.0 }
 0x357   : > { %v4054_v29 = vadd.f32 %v4053_v45, %v10454_v47  ;;  %v4055_v0 = vpop.f32.mrb[175].mxu1  ;;  %v4675_v51 = vpack.c.bf16 %v4633_v2, %v4631_v12  ;;  %v4539_v40 = vmax.f32 %v4050_v19, 0.0 }
 0x358   : > { %v4056_v27 = vadd.f32 %v4055_v0, %v10458_v32  ;;  %v4676_v33 = vpack.c.bf16 %v4634_v53, %v4632_v49  ;;  %v4446_v14 = vpop.f32.mrb[172].mxu0  ;;  %v4540_v30 = vmax.f32 %v4052_v52, 0.0 }
 0x359   : > { %v4541_v48 = vmax.f32 %v4054_v29, 0.0  ;;  %v4447_v63 = vadd.f32 %v4446_v14, %v10438_v15  ;;  %v4448_v54 = vpop.f32.mrb[173].mxu0 }
 0x35a   : > { %v4542_v35 = vmax.f32 %v4056_v27, 0.0  ;;  %v4449_v9 = vadd.f32 %v4448_v54, %v10441_v44  ;;  %v4450_v38 = vpop.f32.mrb[174].mxu0  ;;  %5422 = vmatprep.mubr.bf16.mxu0 %v4676_v33 }
 0x35b   : > { %v4581_v11 = vpack.c.bf16 %v4541_v48, %v4539_v40  ;;  %v4635_v26 = vmax.f32 %v4447_v63, 0.0  ;;  %v4451_v42 = vadd.f32 %v4450_v38, %v10438_v15  ;;  %v4452_v17 = vpop.f32.mrb[175].mxu0  ;;  %5423 = vmatmul.mubr.bf16.gmra.mrb[232].mxu0 %v4675_v51 }
 0x35c   : > { %v4582_v57 = vpack.c.bf16 %v4542_v35, %v4540_v30  ;;  %v4059_v50 = vpop.f32.mrb[176].mxu1  ;;  %v4636_v22 = vmax.f32 %v4449_v9, 0.0  ;;  %v4453_v59 = vadd.f32 %v4452_v17, %v10441_v44 }
 0x35d   : > { %v4060_v43 = vadd.f32 %v4059_v50, %v10454_v47  ;;  %v4061_v55 = vpop.f32.mrb[177].mxu1  ;;  %v4637_v5 = vmax.f32 %v4451_v42, 0.0 }
 0x35e   : > { %v4062_v39 = vadd.f32 %v4061_v55, %v10458_v32  ;;  %v4063_v8 = vpop.f32.mrb[178].mxu1  ;;  %4942 = vmatprep.mubr.bf16.mxu1 %v4582_v57  ;;  %v4638_v4 = vmax.f32 %v4453_v59, 0.0 }
 0x35f   : > { %v4064_v6 = vadd.f32 %v4063_v8, %v10454_v47  ;;  %v4065_v56 = vpop.f32.mrb[179].mxu1  ;;  %4943 = vmatmul.mubr.bf16.gmra.mrb[236].mxu1 %v4581_v11  ;;  %v4677_v10 = vpack.c.bf16 %v4637_v5, %v4635_v26  ;;  %v4543_v28 = vmax.f32 %v4060_v43, 0.0 }
 0x360   : > { %v4066_v16 = vadd.f32 %v4065_v56, %v10458_v32  ;;  %v4678_v13 = vpack.c.bf16 %v4638_v4, %v4636_v22  ;;  %v4456_v60 = vpop.f32.mrb[176].mxu0  ;;  %v4544_v62 = vmax.f32 %v4062_v39, 0.0 }
 0x361   : > { %v4545_v58 = vmax.f32 %v4064_v6, 0.0  ;;  %v4457_v31 = vadd.f32 %v4456_v60, %v10438_v15  ;;  %v4458_v18 = vpop.f32.mrb[177].mxu0 }
 0x362   : > { %v4546_v34 = vmax.f32 %v4066_v16, 0.0  ;;  %v4459_v37 = vadd.f32 %v4458_v18, %v10441_v44  ;;  %v4460_v3 = vpop.f32.mrb[178].mxu0  ;;  %5430 = vmatprep.mubr.bf16.mxu0 %v4678_v13 }
 0x363   : > { %v4583_v36 = vpack.c.bf16 %v4545_v58, %v4543_v28  ;;  %v4639_v7 = vmax.f32 %v4457_v31, 0.0  ;;  %v4461_v1 = vadd.f32 %v4460_v3, %v10438_v15  ;;  %v4462_v23 = vpop.f32.mrb[179].mxu0  ;;  %5431 = vmatmul.mubr.bf16.gmra.mrb[236].mxu0 %v4677_v10 }
 0x364   : > { %v4584_v61 = vpack.c.bf16 %v4546_v34, %v4544_v62  ;;  %v4069_v20 = vpop.f32.mrb[180].mxu1  ;;  %v4640_v12 = vmax.f32 %v4459_v37, 0.0  ;;  %v4463_v25 = vadd.f32 %v4462_v23, %v10441_v44 }
 0x365   : > { %v4070_v41 = vadd.f32 %v4069_v20, %v10454_v47  ;;  %v4071_v21 = vpop.f32.mrb[181].mxu1  ;;  %v4641_v24 = vmax.f32 %v4461_v1, 0.0 }
 0x366   : > { %4950 = vmatprep.mubr.bf16.mxu1 %v4584_v61  ;;  %v4072_v19 = vadd.f32 %v4071_v21, %v10458_v32  ;;  %v4073_v49 = vpop.f32.mrb[182].mxu1  ;;  %v4642_v52 = vmax.f32 %v4463_v25, 0.0 }
 0x367   : > { %4951 = vmatmul.mubr.bf16.gmra.mrb[240].mxu1 %v4583_v36  ;;  %v4074_v46 = vadd.f32 %v4073_v49, %v10454_v47  ;;  %v4075_v45 = vpop.f32.mrb[183].mxu1  ;;  %v4679_v2 = vpack.c.bf16 %v4641_v24, %v4639_v7  ;;  %v4547_v0 = vmax.f32 %v4070_v41, 0.0 }
 0x368   : > { %v4076_v29 = vadd.f32 %v4075_v45, %v10458_v32  ;;  %v4680_v27 = vpack.c.bf16 %v4642_v52, %v4640_v12  ;;  %v4466_v51 = vpop.f32.mrb[180].mxu0  ;;  %v4548_v40 = vmax.f32 %v4072_v19, 0.0 }
 0x369   : > { %v4549_v53 = vmax.f32 %v4074_v46, 0.0  ;;  %v4467_v33 = vadd.f32 %v4466_v51, %v10438_v15  ;;  %v4468_v14 = vpop.f32.mrb[181].mxu0 }
 0x36a   : > { %v4550_v48 = vmax.f32 %v4076_v29, 0.0  ;;  %5438 = vmatprep.mubr.bf16.mxu0 %v4680_v27  ;;  %v4469_v35 = vadd.f32 %v4468_v14, %v10441_v44  ;;  %v4470_v63 = vpop.f32.mrb[182].mxu0 }
 0x36b   : > { %v4585_v30 = vpack.c.bf16 %v4549_v53, %v4547_v0  ;;  %5439 = vmatmul.mubr.bf16.gmra.mrb[240].mxu0 %v4679_v2  ;;  %v4643_v11 = vmax.f32 %v4467_v33, 0.0  ;;  %v4471_v9 = vadd.f32 %v4470_v63, %v10438_v15  ;;  %v4472_v38 = vpop.f32.mrb[183].mxu0 }
 0x36c   : > { %v4586_v54 = vpack.c.bf16 %v4550_v48, %v4548_v40  ;;  %v4644_v57 = vmax.f32 %v4469_v35, 0.0  ;;  %v4473_v50 = vadd.f32 %v4472_v38, %v10441_v44 }
 0x36d   : > { %v4645_v26 = vmax.f32 %v4471_v9, 0.0 }
 0x36e   : > { %4958 = vmatprep.mubr.bf16.mxu1 %v4586_v54  ;;  %v4646_v42 = vmax.f32 %v4473_v50, 0.0 }
 0x36f   : > { %4959 = vmatmul.mubr.bf16.gmra.mrb[244].mxu1 %v4585_v30  ;;  %v4681_v17 = vpack.c.bf16 %v4645_v26, %v4643_v11 }
 0x370   : > { %v4682_v43 = vpack.c.bf16 %v4646_v42, %v4644_v57  ;;  %v4476_v55 = vpop.f32.mrb[184].mxu0 }
 0x371   : > { %v4477_v22 = vadd.f32 %v4476_v55, %v10438_v15  ;;  %v4478_v59 = vpop.f32.mrb[185].mxu0 }
 0x372   : > { %v4079_v39 = vpop.f32.mrb[184].mxu1  ;;  %5446 = vmatprep.mubr.bf16.mxu0 %v4682_v43  ;;  %v4479_v8 = vadd.f32 %v4478_v59, %v10441_v44  ;;  %v4480_v5 = vpop.f32.mrb[186].mxu0 }
 0x373   : > { %v4080_v6 = vadd.f32 %v4079_v39, %v10454_v47  ;;  %v4081_v56 = vpop.f32.mrb[185].mxu1  ;;  %5447 = vmatmul.mubr.bf16.gmra.mrb[244].mxu0 %v4681_v17  ;;  %v4647_v4 = vmax.f32 %v4477_v22, 0.0  ;;  %v4481_v16 = vadd.f32 %v4480_v5, %v10438_v15  ;;  %v4482_v10 = vpop.f32.mrb[187].mxu0  ;;  %v10610_v5 = vld [vmem:[%s11450_s11] ss:$0 sm:$0xff] }
 0x374   : > { %v4082_v28 = vadd.f32 %v4081_v56, %v10458_v32  ;;  %v4083_v58 = vpop.f32.mrb[186].mxu1  ;;  %v4648_v13 = vmax.f32 %v4479_v8, 0.0  ;;  %v4483_v60 = vadd.f32 %v4482_v10, %v10441_v44  ;;  %v10615_v10 = vld [vmem:[%s11458_s19] ss:$0 sm:$0xff] }
 0x375   : > { %v4084_v62 = vadd.f32 %v4083_v58, %v10454_v47  ;;  %v4085_v34 = vpop.f32.mrb[187].mxu1  ;;  %v4649_v31 = vmax.f32 %v4481_v16, 0.0  ;;  %v4551_v37 = vmax.f32 %v4080_v6, 0.0 }
 0x376   : > { %v4086_v18 = vadd.f32 %v4085_v34, %v10458_v32  ;;  %v4650_v36 = vmax.f32 %v4483_v60, 0.0  ;;  %v4552_v7 = vmax.f32 %v4082_v28, 0.0 }
 0x377   : > { %v4553_v3 = vmax.f32 %v4084_v62, 0.0  ;;  %v4683_v61 = vpack.c.bf16 %v4649_v31, %v4647_v4 }
 0x378   : > { %v4554_v20 = vmax.f32 %v4086_v18, 0.0  ;;  %v4684_v1 = vpack.c.bf16 %v4650_v36, %v4648_v13  ;;  %v4486_v23 = vpop.f32.mrb[188].mxu0 }
 0x379   : > { %v4587_v41 = vpack.c.bf16 %v4553_v3, %v4551_v37  ;;  %v4487_v12 = vadd.f32 %v4486_v23, %v10438_v15  ;;  %v4488_v21 = vpop.f32.mrb[189].mxu0 }
 0x37a   : > { %v4588_v25 = vpack.c.bf16 %v4554_v20, %v4552_v7  ;;  %5454 = vmatprep.mubr.bf16.mxu0 %v4684_v1  ;;  %v4489_v19 = vadd.f32 %v4488_v21, %v10441_v44  ;;  %v4490_v24 = vpop.f32.mrb[190].mxu0 }
 0x37b   : > { %5455 = vmatmul.mubr.bf16.gmra.mrb[248].mxu0 %v4683_v61  ;;  %v4651_v49 = vmax.f32 %v4487_v12, 0.0  ;;  %v4491_v46 = vadd.f32 %v4490_v24, %v10438_v15  ;;  %v4492_v52 = vpop.f32.mrb[191].mxu0 }
 0x37c   : > { %4966 = vmatprep.mubr.bf16.mxu1 %v4588_v25  ;;  %v4652_v45 = vmax.f32 %v4489_v19, 0.0  ;;  %v4493_v2 = vadd.f32 %v4492_v52, %v10441_v44 }
 0x37d   : > { %4967 = vmatmul.mubr.bf16.gmra.mrb[248].mxu1 %v4587_v41  ;;  %v4653_v29 = vmax.f32 %v4491_v46, 0.0 }
 0x37e   : > { %v4654_v0 = vmax.f32 %v4493_v2, 0.0 }
 0x37f   : > { %v4685_v53 = vpack.c.bf16 %v4653_v29, %v4651_v49 }
 0x380   : > { %v4686_v27 = vpack.c.bf16 %v4654_v0, %v4652_v45 }
 0x385   : > { %v4089_v51 = vpop.f32.mrb[188].mxu1 }
 0x386   : > { %v4090_v40 = vadd.f32 %v4089_v51, %v10454_v47  ;;  %v4091_v48 = vpop.f32.mrb[189].mxu1 }
 0x387   : > { %v4092_v33 = vadd.f32 %v4091_v48, %v10458_v32  ;;  %v4093_v14 = vpop.f32.mrb[190].mxu1 }
 0x388   : > { %v4094_v30 = vadd.f32 %v4093_v14, %v10454_v47  ;;  %v4095_v15 = vpop.f32.mrb[191].mxu1  ;;  %v4555_v63 = vmax.f32 %v4090_v40, 0.0 }
 0x389   : > { %v4096_v35 = vadd.f32 %v4095_v15, %v10458_v32  ;;  %v4556_v44 = vmax.f32 %v4092_v33, 0.0 }
 0x38a   : > { %v4557_v54 = vmax.f32 %v4094_v30, 0.0 }
 0x38b   : > { %v4558_v11 = vmax.f32 %v4096_v35, 0.0 }
 0x38c   : > { %v4589_v9 = vpack.c.bf16 %v4557_v54, %v4555_v63 }
 0x38d   : > { %v4590_v38 = vpack.c.bf16 %v4558_v11, %v4556_v44 }
 0x38f   : > { %4974 = vmatprep.mubr.bf16.mxu1 %v4590_v38 }
 0x390   : > { %4975 = vmatmul.mubr.bf16.gmra.mrb[252].mxu1 %v4589_v9 }
 0x391   : > { %5462 = vmatprep.mubr.bf16.mxu1 %v4686_v27 }
 0x398   : > { %5463 = vmatmul.mubr.bf16.vlgmr.msra.gmra.mrb[0].mxu1 %v4685_v53 }
 0x3be   : > { %v6887_v57 = vpop.f32.mrb[192].mxu0 }
 0x3bf   : > { %v6888_v50 = vpop.f32.mrb[193].mxu0 }
 0x3c0   : > { %v6889_v26 = vadd.f32 %v6888_v50, %v6887_v57  ;;  %v6890_v42 = vpop.f32.mrb[194].mxu0 }
 0x3c1   : > { %v6891_v17 = vpop.f32.mrb[195].mxu0 }
 0x3c2   : > { %v6892_v43 = vadd.f32 %v6891_v17, %v6890_v42  ;;  %v5345_v62 = vadd.f32 %v6889_v26, %v10615_v10 }
 0x3c4   : > { %v5348_v31 = vadd.f32 %v6892_v43, %v10615_v10  ;;  %v5471_v3 = vmin.f32 %v5345_v62, 3.0 }
 0x3c6   : > { %v5472_v12 = vmin.f32 %v5348_v31, 3.0  ;;  %v5503_v49 = vmul.f32 1.442695, %v5471_v3 }
 0x3c8   : > { %v5505_v45 = vmul.f32 1.442695, %v5472_v12 }
 0x3c9   : > { %v6893_v47 = vpop.f32.mrb[196].mxu0 }
 0x3ca   : > { %v6894_v55 = vpop.f32.mrb[197].mxu0 }
 0x3cb   : > { %v6895_v22 = vadd.f32 %v6894_v55, %v6893_v47  ;;  %v6896_v32 = vpop.f32.mrb[198].mxu0 }
 0x3cc   : > { %v6897_v59 = vpop.f32.mrb[199].mxu0 }
 0x3cd   : > { %v6898_v39 = vadd.f32 %v6897_v59, %v6896_v32  ;;  %v5353_v2 = vadd.f32 %v6895_v22, %v10615_v10 }
 0x3cf   : > { %v5356_v29 = vadd.f32 %v6898_v39, %v10615_v10  ;;  %v5473_v63 = vmin.f32 %v5353_v2, 3.0 }
 0x3d0   : > { %v6775_v8 = vpop.f32.mrb[192].mxu1 }
 0x3d1   : > { %v6776_v6 = vpop.f32.mrb[193].mxu1  ;;  %v5474_v54 = vmin.f32 %v5356_v29, 3.0  ;;  %v5507_v22 = vmul.f32 1.442695, %v5473_v63 }
 0x3d2   : > { %v6777_v56 = vadd.f32 %v6776_v6, %v6775_v8  ;;  %v6778_v4 = vpop.f32.mrb[194].mxu1 }
 0x3d3   : > { %v6779_v16 = vpop.f32.mrb[195].mxu1  ;;  %v5509_v59 = vmul.f32 1.442695, %v5474_v54 }
 0x3d4   : > { %v4857_v28 = vadd.f32 %v6777_v56, %v10610_v5  ;;  %v6780_v58 = vadd.f32 %v6779_v16, %v6778_v4 }
 0x3d6   : > { %v6642_v13 = vmul.f32 -1.442695, %v4857_v28  ;;  %v4860_v60 = vadd.f32 %v6780_v58, %v10610_v5 }
 0x3d7   : > { %v6899_v36 = vpop.f32.mrb[200].mxu0 }
 0x3d8   : > { %7363 = vpow2.f32 %v6642_v13  ;;  %v6643_v34 = vmul.f32 -1.442695, %v4860_v60  ;;  %v6900_v61 = vpop.f32.mrb[201].mxu0 }
 0x3d9   : > { %v6781_v18 = vpop.f32.mrb[196].mxu1  ;;  %v6901_v1 = vadd.f32 %v6900_v61, %v6899_v36  ;;  %v6902_v23 = vpop.f32.mrb[202].mxu0 }
 0x3da   : > { %7365 = vpow2.f32 %v6643_v34  ;;  %v6782_v37 = vpop.f32.mrb[197].mxu1  ;;  %v6903_v21 = vpop.f32.mrb[203].mxu0 }
 0x3db   : > { %v6783_v7 = vadd.f32 %v6782_v37, %v6781_v18  ;;  %v6784_v20 = vpop.f32.mrb[198].mxu1  ;;  %v6904_v24 = vadd.f32 %v6903_v21, %v6902_v23  ;;  %v5361_v40 = vadd.f32 %v6901_v1, %v10615_v10 }
 0x3dc   : > { %v6785_v41 = vpop.f32.mrb[199].mxu1 }
 0x3dd   : > { %v4865_v25 = vadd.f32 %v6783_v7, %v10610_v5  ;;  %v6786_v19 = vadd.f32 %v6785_v41, %v6784_v20  ;;  %v5475_v50 = vmin.f32 %v5361_v40, 3.0  ;;  %v5364_v26 = vadd.f32 %v6904_v24, %v10615_v10 }
 0x3df   : > { %v6644_v46 = vmul.f32 -1.442695, %v4865_v25  ;;  %v4868_v52 = vadd.f32 %v6786_v19, %v10610_v5  ;;  %v5476_v6 = vmin.f32 %v5364_v26, 3.0  ;;  %v5511_v28 = vmul.f32 1.442695, %v5475_v50 }
 0x3e1   : > { %7367 = vpow2.f32 %v6644_v46  ;;  %v6645_v0 = vmul.f32 -1.442695, %v4868_v52  ;;  %v6787_v53 = vpop.f32.mrb[200].mxu1  ;;  %v5513_v3 = vmul.f32 1.442695, %v5476_v6 }
 0x3e2   : > { %v7364_v27 = vpop.eup %7363  ;;  %7369 = vpow2.f32 %v5503_v49  ;;  %v6788_v51 = vpop.f32.mrb[201].mxu1 }
 0x3e3   : > { %v5079_v48 = vadd.f32 1.0, %v7364_v27  ;;  %7371 = vpow2.f32 %v6645_v0  ;;  %v6789_v33 = vadd.f32 %v6788_v51, %v6787_v53  ;;  %v6790_v14 = vpop.f32.mrb[202].mxu1  ;;  %v6905_v30 = vpop.f32.mrb[204].mxu0 }
 0x3e4   : > { %v7366_v15 = vpop.eup %7365  ;;  %7373 = vpow2.f32 %v5505_v45  ;;  %v6791_v35 = vpop.f32.mrb[203].mxu1 }
 0x3e5   : > { %v6906_v44 = vpop.f32.mrb[205].mxu0  ;;  %7375 = vrcp.f32 %v5079_v48  ;;  %v5080_v11 = vadd.f32 1.0, %v7366_v15  ;;  %v4873_v9 = vadd.f32 %v6789_v33, %v10610_v5  ;;  %v6792_v38 = vadd.f32 %v6791_v35, %v6790_v14 }
 0x3e6   : > { %v6908_v57 = vpop.f32.mrb[206].mxu0  ;;  %v6907_v42 = vadd.f32 %v6906_v44, %v6905_v30 }
 0x3e7   : > { %v6909_v17 = vpop.f32.mrb[207].mxu0  ;;  %7377 = vrcp.f32 %v5080_v11  ;;  %v6646_v43 = vmul.f32 -1.442695, %v4873_v9  ;;  %v4876_v47 = vadd.f32 %v6792_v38, %v10610_v5 }
 0x3e8   : > { %v6910_v55 = vadd.f32 %v6909_v17, %v6908_v57  ;;  %v5369_v18 = vadd.f32 %v6907_v42, %v10615_v10 }
 0x3e9   : > { %7379 = vpow2.f32 %v6646_v43  ;;  %v6647_v32 = vmul.f32 -1.442695, %v4876_v47  ;;  %v6793_v39 = vpop.f32.mrb[204].mxu1 }
 0x3ea   : > { %v6794_v8 = vpop.f32.mrb[205].mxu1  ;;  %v5372_v61 = vadd.f32 %v6910_v55, %v10615_v10  ;;  %v5477_v25 = vmin.f32 %v5369_v18, 3.0 }
 0x3eb   : > { %v7368_v56 = vpop.eup %7367  ;;  %7381 = vpow2.f32 %v6647_v32  ;;  %v6795_v4 = vadd.f32 %v6794_v8, %v6793_v39  ;;  %v6796_v16 = vpop.f32.mrb[206].mxu1 }
 0x3ec   : > { %v7370_v58 = vpop.eup %7369  ;;  %v5081_v13 = vadd.f32 1.0, %v7368_v56  ;;  %7383 = vpow2.f32 %v5507_v22  ;;  %v6797_v60 = vpop.f32.mrb[207].mxu1  ;;  %v5478_v52 = vmin.f32 %v5372_v61, 3.0  ;;  %v5515_v14 = vmul.f32 1.442695, %v5477_v25 }
 0x3ed   : > { %v7372_v62 = vpop.eup %7371  ;;  %7385 = vpow2.f32 %v5509_v59  ;;  %v4881_v34 = vadd.f32 %v6795_v4, %v10610_v5  ;;  %v6798_v31 = vadd.f32 %v6797_v60, %v6796_v16 }
 0x3ee   : > { %v7374_v36 = vpop.eup %7373  ;;  %7387 = vrcp.f32 %v5081_v13  ;;  %v5082_v37 = vadd.f32 1.0, %v7372_v62  ;;  %v5517_v63 = vmul.f32 1.442695, %v5478_v52 }
 0x3ef   : > { %v7376_v7 = vpop.eup %7375  ;;  %v6648_v20 = vmul.f32 -1.442695, %v4881_v34  ;;  %v4884_v1 = vadd.f32 %v6798_v31, %v10610_v5  ;;  %7389 = vpow2.f32 %v5511_v28 }
 0x3f0   : > { %7391 = vrcp.f32 %v5082_v37  ;;  %v10633_v23 = vmul.f32 %v7376_v7, %v7370_v58  ;;  %v6911_v19 = vpop.f32.mrb[208].mxu0 }
 0x3f1   : > { %v7378_v41 = vpop.eup %7377  ;;  %7393 = vpow2.f32 %v6648_v20  ;;  %v6649_v12 = vmul.f32 -1.442695, %v4884_v1  ;;  %v6799_v21 = vpop.f32.mrb[208].mxu1 }
 0x3f2   : > { %v5631_v24 = vmax.f32 %v10633_v23, 1.1920929e-07  ;;  %v10636_v49 = vmul.f32 %v7378_v41, %v7374_v36  ;;  %7395 = vpow2.f32 %v5513_v3  ;;  %v6800_v46 = vpop.f32.mrb[209].mxu1  ;;  %v6912_v0 = vpop.f32.mrb[209].mxu0  ;;  %vm5887_vm1 = vcmp.le.f32.partialorder %v10633_v23, 0.0031308 }
 0x3f3   : > { %v7380_v45 = vpop.eup %7379  ;;  %7397 = vpow2.f32 %v6649_v12  ;;  %v6801_v2 = vadd.f32 %v6800_v46, %v6799_v21  ;;  %v6802_v29 = vpop.f32.mrb[210].mxu1  ;;  %v6913_v54 = vadd.f32 %v6912_v0, %v6911_v19 }
 0x3f4   : > { %7399 = vlog2.f32 %v5631_v24  ;;  %v5632_v53 = vmax.f32 %v10636_v49, 1.1920929e-07  ;;  %v6803_v27 = vpop.f32.mrb[211].mxu1  ;;  %v5083_v40 = vadd.f32 1.0, %v7380_v45  ;;  %v6914_v30 = vpop.f32.mrb[210].mxu0  ;;  %vm5888_vm2 = vcmp.le.f32.partialorder %v10636_v49, 0.0031308 }
 0x3f5   : > { %v7382_v51 = vpop.eup %7381  ;;  %v4889_v48 = vadd.f32 %v6801_v2, %v10610_v5  ;;  %v6804_v33 = vadd.f32 %v6803_v27, %v6802_v29  ;;  %v6915_v44 = vpop.f32.mrb[211].mxu0  ;;  %v5377_v26 = vadd.f32 %v6913_v54, %v10615_v10 }
 0x3f6   : > { %v7384_v15 = vpop.eup %7383  ;;  %7401 = vlog2.f32 %v5632_v53  ;;  %v5084_v35 = vadd.f32 1.0, %v7382_v51  ;;  %v6916_v57 = vadd.f32 %v6915_v44, %v6914_v30 }
 0x3f7   : > { %v7386_v11 = vpop.eup %7385  ;;  %7403 = vrcp.f32 %v5083_v40  ;;  %v6650_v9 = vmul.f32 -1.442695, %v4889_v48  ;;  %v4892_v38 = vadd.f32 %v6804_v33, %v10610_v5  ;;  %v5479_v32 = vmin.f32 %v5377_v26, 3.0 }
 0x3f8   : > { %v7388_v50 = vpop.eup %7387  ;;  %7405 = vrcp.f32 %v5084_v35  ;;  %v5380_v56 = vadd.f32 %v6916_v57, %v10615_v10 }
 0x3f9   : > { %v7390_v42 = vpop.eup %7389  ;;  %v10642_v17 = vmul.f32 %v7388_v50, %v7384_v15  ;;  %7407 = vpow2.f32 %v6650_v9  ;;  %v6651_v43 = vmul.f32 -1.442695, %v4892_v38  ;;  %v6805_v47 = vpop.f32.mrb[212].mxu1  ;;  %v5519_v34 = vmul.f32 1.442695, %v5479_v32 }
 0x3fa   : > { %v7392_v55 = vpop.eup %7391  ;;  %7409 = vpow2.f32 %v5515_v14  ;;  %v6806_v22 = vpop.f32.mrb[213].mxu1  ;;  %v5480_v20 = vmin.f32 %v5380_v56, 3.0 }
 0x3fb   : > { %v7394_v59 = vpop.eup %7393  ;;  %v5633_v39 = vmax.f32 %v10642_v17, 1.1920929e-07  ;;  %v10645_v8 = vmul.f32 %v7392_v55, %v7386_v11  ;;  %7411 = vpow2.f32 %v5517_v63  ;;  %v6808_v6 = vpop.f32.mrb[214].mxu1  ;;  %v6807_v28 = vadd.f32 %v6806_v22, %v6805_v47 }
 0x3fc   : > { %v7396_v4 = vpop.eup %7395  ;;  %v5085_v16 = vadd.f32 1.0, %v7394_v59  ;;  %7413 = vpow2.f32 %v6651_v43  ;;  %v6809_v58 = vpop.f32.mrb[215].mxu1  ;;  %v5521_v52 = vmul.f32 1.442695, %v5480_v20  ;;  %vm5889_vm3 = vcmp.le.f32.partialorder %v10642_v17, 0.0031308 }
 0x3fd   : > { %v6917_v13 = vpop.f32.mrb[212].mxu0  ;;  %v7398_v60 = vpop.eup %7397  ;;  %7415 = vlog2.f32 %v5633_v39  ;;  %v5634_v62 = vmax.f32 %v10645_v8, 1.1920929e-07  ;;  %v4897_v37 = vadd.f32 %v6807_v28, %v10610_v5  ;;  %v6810_v3 = vadd.f32 %v6809_v58, %v6808_v6 }
 0x3fe   : > { %v6918_v31 = vpop.f32.mrb[213].mxu0  ;;  %v7400_v18 = vpop.eup %7399  ;;  %7417 = vrcp.f32 %v5085_v16  ;;  %v5086_v36 = vadd.f32 1.0, %v7398_v60  ;;  %vm5890_vm4 = vcmp.le.f32.partialorder %v10645_v8, 0.0031308 }
 0x3ff   : > { %v6920_v61 = vpop.f32.mrb[214].mxu0  ;;  %v5664_v7 = vmul.f32 0.6931472, %v7400_v18  ;;  %7419 = vlog2.f32 %v5634_v62  ;;  %v6919_v1 = vadd.f32 %v6918_v31, %v6917_v13  ;;  %v6652_v21 = vmul.f32 -1.442695, %v4897_v37 }
 0x400   : > { %v6921_v41 = vpop.f32.mrb[215].mxu0  ;;  %v7402_v12 = vpop.eup %7401  ;;  %7421 = vrcp.f32 %v5086_v36  ;;  %v4900_v14 = vadd.f32 %v6810_v3, %v10610_v5  ;;  %v5599_v36 = vmul.f32 12.92, %v10633_v23 }
 0x401   : > { %v10650_v25 = vadd.f32 %v6921_v41, %v6920_v61  ;;  %v7404_v19 = vpop.eup %7403  ;;  %v5727_v24 = vmul.f32 0.41666666, %v5664_v7  ;;  %v5666_v46 = vmul.f32 0.6931472, %v7402_v12  ;;  %7423 = vpow2.f32 %v6652_v21  ;;  %v6811_v29 = vpop.f32.mrb[216].mxu1 }
 0x402   : > { %v7406_v45 = vpop.eup %7405  ;;  %v10652_v2 = vmul.f32 %v7404_v19, %v7390_v42  ;;  %7425 = vpow2.f32 %v5519_v34  ;;  %v6812_v40 = vpop.f32.mrb[217].mxu1  ;;  %v6653_v47 = vmul.f32 -1.442695, %v4900_v14  ;;  %v5385_v55 = vadd.f32 %v6919_v1, %v10615_v10 }
 0x403   : > { %v7408_v0 = vpop.eup %7407  ;;  %v5759_v53 = vmul.f32 1.442695, %v5727_v24  ;;  %v5728_v27 = vmul.f32 0.41666666, %v5666_v46  ;;  %v10654_v51 = vmul.f32 %v7406_v45, %v7396_v4  ;;  %7427 = vpow2.f32 %v5521_v52  ;;  %v6814_v54 = vpop.f32.mrb[218].mxu1 }
 0x404   : > { %v7410_v48 = vpop.eup %7409  ;;  %v5635_v33 = vmax.f32 %v10652_v2, 1.1920929e-07  ;;  %v5087_v63 = vadd.f32 1.0, %v7408_v0  ;;  %v6813_v11 = vadd.f32 %v6812_v40, %v6811_v29  ;;  %v6815_v9 = vpop.f32.mrb[219].mxu1  ;;  %v5481_v31 = vmin.f32 %v5385_v55, 3.0 }
 0x405   : > { %v7412_v30 = vpop.eup %7411  ;;  %7429 = vpow2.f32 %v5759_v53  ;;  %v5761_v15 = vmul.f32 1.442695, %v5728_v27  ;;  %v5636_v35 = vmax.f32 %v10654_v51, 1.1920929e-07  ;;  %v10659_v50 = vadd.f32 %v6815_v9, %v6814_v54 }
 0x406   : > { %v7414_v44 = vpop.eup %7413  ;;  %7431 = vlog2.f32 %v5635_v33  ;;  %v4905_v3 = vadd.f32 %v6813_v11, %v10610_v5  ;;  %v5523_v29 = vmul.f32 1.442695, %v5481_v31  ;;  %v5600_v54 = vmul.f32 12.92, %v10636_v49 }
 0x407   : > { %v7416_v38 = vpop.eup %7415  ;;  %7433 = vpow2.f32 %v5761_v15  ;;  %v5088_v57 = vadd.f32 1.0, %v7414_v44  ;;  %v6923_v26 = vpop.f32.mrb[216].mxu0  ;;  %v5601_v55 = vmul.f32 12.92, %v10642_v17  ;;  %v5602_v49 = vmul.f32 12.92, %v10645_v8 }
 0x408   : > { %v7418_v42 = vpop.eup %7417  ;;  %v5668_v43 = vmul.f32 0.6931472, %v7416_v38  ;;  %7435 = vlog2.f32 %v5636_v35  ;;  %v6924_v22 = vpop.f32.mrb[217].mxu0  ;;  %vm5891_vm5 = vcmp.le.f32.partialorder %v10652_v2, 0.0031308 }
 0x409   : > { %v7420_v32 = vpop.eup %7419  ;;  %7437 = vrcp.f32 %v5087_v63  ;;  %v10662_v59 = vmul.f32 %v7418_v42, %v7410_v48  ;;  %v6926_v6 = vpop.f32.mrb[218].mxu0  ;;  %v10675_v24 = vadd.f32 %v6924_v22, %v6923_v26  ;;  %v6654_v48 = vmul.f32 -1.442695, %v4905_v3 }
 0x40a   : > { %v6817_v39 = vpop.f32.mrb[220].mxu1  ;;  %v7422_v56 = vpop.eup %7421  ;;  %v5729_v4 = vmul.f32 0.41666666, %v5668_v43  ;;  %v5670_v16 = vmul.f32 0.6931472, %v7420_v32  ;;  %7439 = vrcp.f32 %v5088_v57 }
 0x40b   : > { %v5637_v28 = vmax.f32 %v10662_v59, 1.1920929e-07  ;;  %v10665_v58 = vmul.f32 %v7422_v56, %v7412_v30  ;;  %v6818_v13 = vpop.f32.mrb[221].mxu1  ;;  %v7424_v60 = vpop.eup %7423  ;;  %7441 = vpow2.f32 %v6653_v47  ;;  %vm5892_vm6 = vcmp.le.f32.partialorder %v10654_v51, 0.0031308 }
 0x40c   : > { %v5763_v62 = vmul.f32 1.442695, %v5729_v4  ;;  %v5730_v34 = vmul.f32 0.41666666, %v5670_v16  ;;  %v7426_v18 = vpop.eup %7425  ;;  %v6820_v61 = vpop.f32.mrb[222].mxu1  ;;  %v5089_v1 = vadd.f32 1.0, %v7424_v60  ;;  %v10671_v21 = vadd.f32 %v6818_v13, %v6817_v39 }
 0x40d   : > { %7443 = vlog2.f32 %v5637_v28  ;;  %v5638_v37 = vmax.f32 %v10665_v58, 1.1920929e-07  ;;  %v7428_v7 = vpop.eup %7427  ;;  %v6821_v41 = vpop.f32.mrb[223].mxu1  ;;  %vm5893_vm7 = vcmp.le.f32.partialorder %v10662_v59, 0.0031308  ;;  %vm5894_vm8 = vcmp.le.f32.partialorder %v10665_v58, 0.0031308 }
 0x40e   : > { %7445 = vpow2.f32 %v5763_v62  ;;  %v5765_v20 = vmul.f32 1.442695, %v5730_v34  ;;  %v10673_v19 = vadd.f32 %v6821_v41, %v6820_v61  ;;  %v6927_v46 = vpop.f32.mrb[219].mxu0  ;;  %v5388_v34 = vadd.f32 %v10650_v25, %v10615_v10 }
 0x40f   : > { %v7430_v12 = vpop.eup %7429  ;;  %7447 = vlog2.f32 %v5638_v37  ;;  %v10677_v0 = vadd.f32 %v6927_v46, %v6926_v6  ;;  %v10679_v53 = vpop.f32.mrb[220].mxu0  ;;  %v4908_v46 = vadd.f32 %v10659_v50, %v10610_v5  ;;  %v4913_v17 = vadd.f32 %v10671_v21, %v10610_v5 }
 0x410   : > { %v7432_v52 = vpop.eup %7431  ;;  %v5823_v45 = vmul.f32 1.055, %v7430_v12  ;;  %7449 = vpow2.f32 %v5765_v20  ;;  %v10681_v33 = vpop.f32.mrb[221].mxu0  ;;  %v10752_v21 = vmul.f32 12.92, %v10662_v59 }
 0x411   : > { %v7434_v27 = vpop.eup %7433  ;;  %v5672_v40 = vmul.f32 0.6931472, %v7432_v52  ;;  %v10683_v35 = vpop.f32.mrb[222].mxu0  ;;  %7451 = vrcp.f32 %v5089_v1 }
 0x412   : > { %v7436_v14 = vpop.eup %7435  ;;  %v6691_v30 = vadd.f32 -0.055, %v5823_v45  ;;  %v5824_v15 = vmul.f32 1.055, %v7434_v27  ;;  %7453 = vpow2.f32 %v5523_v29  ;;  %v10694_v43 = vpop.f32.mrb[223].mxu0  ;;  %v5482_v27 = vmin.f32 %v5388_v34, 3.0 }
 0x413   : > { %v7438_v63 = vpop.eup %7437  ;;  %v5731_v44 = vmul.f32 0.41666666, %v5672_v40  ;;  %v5674_v11 = vmul.f32 0.6931472, %v7436_v14  ;;  %7455 = vpow2.f32 %v6654_v48 }
 0x414   : > { %v7440_v9 = vpop.eup %7439  ;;  %v10688_v38 = vsel %vm5887_vm1, %v5599_v36, %v6691_v30  ;;  %v6692_v57 = vadd.f32 -0.055, %v5824_v15  ;;  %v10690_v26 = vmul.f32 %v7438_v63, %v7426_v18  ;;  %v5603_v30 = vmul.f32 12.92, %v10652_v2 }
 0x415   : > { %v10692_v42 = vpop.f32.mrb[224].mxu1  ;;  %v5983_v47 = vmax.f32 %v10688_v38, 1.1920929e-07  ;;  %v10699_v22 = vmul.f32 %v7440_v9, %v7428_v7  ;;  %v7442_v23 = vpop.eup %7441  ;;  %v5767_v6 = vmul.f32 1.442695, %v5731_v44  ;;  %v5732_v56 = vmul.f32 0.41666666, %v5674_v11 }
 0x416   : > { %v10701_v32 = vpop.f32.mrb[225].mxu1  ;;  %v10703_v39 = vsel %vm5888_vm2, %v5600_v54, %v6692_v57  ;;  %v5090_v37 = vadd.f32 1.0, %v7442_v23  ;;  %v5639_v3 = vmax.f32 %v10690_v26, 1.1920929e-07  ;;  %v10735_v44 = vmul.f32 12.92, %v10654_v51 }
 0x417   : > { %v7444_v4 = vpop.eup %7443  ;;  %7457 = vlog2.f32 %v5983_v47  ;;  %v5984_v16 = vmax.f32 %v10703_v39, 1.1920929e-07  ;;  %v10708_v28 = vpop.f32.mrb[226].mxu1  ;;  %v5769_v60 = vmul.f32 1.442695, %v5732_v56  ;;  %v5640_v25 = vmax.f32 %v10699_v22, 1.1920929e-07 }
 0x418   : > { %v7446_v13 = vpop.eup %7445  ;;  %7459 = vpow2.f32 %v5767_v6  ;;  %v5676_v62 = vmul.f32 0.6931472, %v7444_v4  ;;  %v10712_v31 = vpop.f32.mrb[227].mxu1  ;;  %v6655_v47 = vmul.f32 -1.442695, %v4908_v46 }
 0x419   : > { %v7448_v18 = vpop.eup %7447  ;;  %7461 = vlog2.f32 %v5984_v16  ;;  %v5825_v36 = vmul.f32 1.055, %v7446_v13  ;;  %v10715_v61 = vpop.f32.mrb[224].mxu0  ;;  %v5525_v4 = vmul.f32 1.442695, %v5482_v27 }
 0x41a   : > { %v7450_v7 = vpop.eup %7449  ;;  %7463 = vpow2.f32 %v5769_v60  ;;  %v5733_v20 = vmul.f32 0.41666666, %v5676_v62  ;;  %v5678_v1 = vmul.f32 0.6931472, %v7448_v18  ;;  %v10721_v52 = vpop.f32.mrb[225].mxu0  ;;  %v5393_v60 = vadd.f32 %v10675_v24, %v10615_v10 }
 0x41b   : > { %v6693_v41 = vadd.f32 -0.055, %v5825_v36  ;;  %v5826_v12 = vmul.f32 1.055, %v7450_v7  ;;  %7465 = vlog2.f32 %v5639_v3  ;;  %v7452_v40 = vpop.eup %7451  ;;  %v10730_v63 = vpop.f32.mrb[226].mxu0 }
 0x41c   : > { %v5771_v45 = vmul.f32 1.442695, %v5733_v20  ;;  %v5734_v29 = vmul.f32 0.41666666, %v5678_v1  ;;  %7467 = vrcp.f32 %v5090_v37  ;;  %v7454_v50 = vpop.eup %7453  ;;  %v10747_v23 = vpop.f32.mrb[227].mxu0  ;;  %v10767_v37 = vadd.f32 %v10701_v32, %v10692_v42 }
 0x41d   : > { %v10725_v48 = vsel %vm5889_vm3, %v5601_v55, %v6693_v41  ;;  %v6694_v14 = vadd.f32 -0.055, %v5826_v12  ;;  %v7456_v6 = vpop.eup %7455  ;;  %v10759_v13 = vmul.f32 %v7454_v50, %v7452_v40  ;;  %v6656_v36 = vmul.f32 -1.442695, %v4913_v17 }
 0x41e   : > { %v10728_v15 = vpop.f32.mrb[228].mxu1  ;;  %v5985_v54 = vmax.f32 %v10725_v48, 1.1920929e-07  ;;  %7469 = vpow2.f32 %v5771_v45  ;;  %v5773_v57 = vmul.f32 1.442695, %v5734_v29  ;;  %v5091_v1 = vadd.f32 1.0, %v7456_v6 }
 0x41f   : > { %v10739_v11 = vpop.f32.mrb[229].mxu1  ;;  %v10743_v9 = vsel %vm5890_vm4, %v5602_v49, %v6694_v14  ;;  %7471 = vlog2.f32 %v5640_v25  ;;  %v10757_v49 = vmul.f32 12.92, %v10665_v58  ;;  %v5641_v41 = vmax.f32 %v10759_v13, 1.1920929e-07 }
 0x420   : > { %v10745_v55 = vpop.f32.mrb[230].mxu1  ;;  %7473 = vlog2.f32 %v5985_v54  ;;  %v5986_v56 = vmax.f32 %v10743_v9, 1.1920929e-07  ;;  %v10775_v25 = vmul.f32 12.92, %v10688_v38  ;;  %v10779_v29 = vmul.f32 12.92, %v10690_v26 }
 0x421   : > { %v10754_v8 = vpop.f32.mrb[231].mxu1  ;;  %v7458_v16 = vpop.eup %7457  ;;  %7475 = vpow2.f32 %v5773_v57  ;;  %v4916_v50 = vadd.f32 %v10673_v19, %v10610_v5  ;;  %v5483_v54 = vmin.f32 %v5393_v60, 3.0  ;;  %vm6239_vm10 = vcmp.le.f32.partialorder %v10688_v38, 0.0031308 }
 0x422   : > { %v10763_v62 = vpop.f32.mrb[228].mxu0  ;;  %v7460_v34 = vpop.eup %7459  ;;  %v6016_v18 = vmul.f32 0.6931472, %v7458_v16  ;;  %7477 = vlog2.f32 %v5986_v56  ;;  %vm6240_vm11 = vcmp.le.f32.partialorder %v10703_v39, 0.0031308 }
 0x423   : > { %v10769_v3 = vpop.f32.mrb[229].mxu0  ;;  %v7462_v7 = vpop.eup %7461  ;;  %v5827_v20 = vmul.f32 1.055, %v7460_v34  ;;  %7479 = vpow2.f32 %v6655_v47  ;;  %v10792_v34 = vmul.f32 12.92, %v10703_v39 }
 0x424   : > { %v10772_v12 = vpop.f32.mrb[230].mxu0  ;;  %v7464_v24 = vpop.eup %7463  ;;  %v6079_v46 = vmul.f32 0.41666666, %v6016_v18  ;;  %v6018_v45 = vmul.f32 0.6931472, %v7462_v7  ;;  %7481 = vpow2.f32 %v5525_v4 }
 0x425   : > { %v6695_v42 = vadd.f32 -0.055, %v5827_v20  ;;  %v5828_v32 = vmul.f32 1.055, %v7464_v24  ;;  %7483 = vlog2.f32 %v5641_v41  ;;  %v7466_v27 = vpop.eup %7465  ;;  %v10783_v17 = vpop.f32.mrb[231].mxu0 }
 0x426   : > { %v6111_v40 = vmul.f32 1.442695, %v6079_v46  ;;  %v6080_v14 = vmul.f32 0.41666666, %v6018_v45  ;;  %v7468_v57 = vpop.eup %7467  ;;  %v5680_v56 = vmul.f32 0.6931472, %v7466_v27  ;;  %7485 = vrcp.f32 %v5091_v1 }
 0x427   : > { %v10787_v47 = vsel %vm5891_vm5, %v5603_v30, %v6695_v42  ;;  %v6696_v6 = vadd.f32 -0.055, %v5828_v32  ;;  %v10805_v24 = vmul.f32 12.92, %v10699_v22  ;;  %v5527_v46 = vmul.f32 1.442695, %v5483_v54 }
 0x428   : > { %v10789_v4 = vpop.f32.mrb[232].mxu1  ;;  %v7470_v16 = vpop.eup %7469  ;;  %7487 = vpow2.f32 %v6111_v40  ;;  %v6113_v18 = vmul.f32 1.442695, %v6080_v14  ;;  %v5987_v19 = vmax.f32 %v10787_v47, 1.1920929e-07  ;;  %v5735_v20 = vmul.f32 0.41666666, %v5680_v56 }
 0x429   : > { %v10796_v60 = vpop.f32.mrb[233].mxu1  ;;  %v7472_v2 = vpop.eup %7471  ;;  %v10801_v30 = vsel %vm5892_vm6, %v10735_v44, %v6696_v6  ;;  %v5829_v7 = vmul.f32 1.055, %v7470_v16  ;;  %7489 = vpow2.f32 %v6656_v36  ;;  %v5396_v36 = vadd.f32 %v10677_v0, %v10615_v10 }
 0x42a   : > { %v7474_v1 = vpop.eup %7473  ;;  %7491 = vpow2.f32 %v6113_v18  ;;  %v5988_v41 = vmax.f32 %v10801_v30, 1.1920929e-07  ;;  %v10807_v45 = vpop.f32.mrb[234].mxu1  ;;  %v5775_v51 = vmul.f32 1.442695, %v5735_v20  ;;  %v5682_v14 = vmul.f32 0.6931472, %v7472_v2 }
 0x42b   : > { %v7476_v42 = vpop.eup %7475  ;;  %v6020_v32 = vmul.f32 0.6931472, %v7474_v1  ;;  %7493 = vlog2.f32 %v5987_v19  ;;  %v6697_v27 = vadd.f32 -0.055, %v5829_v7  ;;  %v10816_v18 = vpop.f32.mrb[235].mxu1 }
 0x42c   : > { %v7478_v44 = vpop.eup %7477  ;;  %7495 = vlog2.f32 %v5988_v41  ;;  %v5830_v40 = vmul.f32 1.055, %v7476_v42  ;;  %v10820_v2 = vmul.f32 12.92, %v10725_v48  ;;  %v6657_v0 = vmul.f32 -1.442695, %v4916_v50 }
 0x42d   : > { %v7480_v6 = vpop.eup %7479  ;;  %v6081_v56 = vmul.f32 0.41666666, %v6020_v32  ;;  %v6022_v16 = vmul.f32 0.6931472, %v7478_v44  ;;  %v10814_v54 = vsel %vm5893_vm7, %v10752_v21, %v6697_v27  ;;  %7497 = vpow2.f32 %v5775_v51 }
 0x42e   : > { %v7482_v19 = vpop.eup %7481  ;;  %v5989_v10 = vmax.f32 %v10814_v54, 1.1920929e-07  ;;  %7499 = vpow2.f32 %v5527_v46  ;;  %v10823_v7 = vpop.f32.mrb[232].mxu0  ;;  %v6698_v21 = vadd.f32 -0.055, %v5830_v40  ;;  %v5736_v42 = vmul.f32 0.41666666, %v5682_v14 }
 0x42f   : > { %11728 = vst [vmem:[#allocation25_spill] sm:$0xff] %v10823_v7  ;;  %v7484_v20 = vpop.eup %7483  ;;  %v6115_v1 = vmul.f32 1.442695, %v6081_v56  ;;  %v6082_v59 = vmul.f32 0.41666666, %v6022_v16  ;;  %v10825_v41 = vmul.f32 %v7482_v19, %v7468_v57  ;;  %v5484_v27 = vmin.f32 %v5396_v36, 3.0 }
 0x430   : > { %7501 = vlog2.f32 %v5989_v10  ;;  %v5684_v32 = vmul.f32 0.6931472, %v7484_v20  ;;  %v10828_v51 = vpop.f32.mrb[233].mxu0  ;;  %v7486_v44 = vpop.eup %7485  ;;  %v10833_v46 = vsel %vm5894_vm8, %v10757_v49, %v6698_v21  ;;  %v5092_v56 = vadd.f32 1.0, %v7480_v6 }
 0x431   : > { %11729 = vst [vmem:[#allocation26_spill] sm:$0xff] %v10828_v51  ;;  %7503 = vpow2.f32 %v6115_v1  ;;  %v6117_v50 = vmul.f32 1.442695, %v6082_v59  ;;  %v10837_v57 = vpop.f32.mrb[234].mxu0  ;;  %v5990_v14 = vmax.f32 %v10833_v46, 1.1920929e-07  ;;  %v5642_v36 = vmax.f32 %v10825_v41, 1.1920929e-07 }
 0x432   : > { %v10835_v40 = vpop.f32.mrb[236].mxu1  ;;  %11730 = vst [vmem:[#allocation27_spill] sm:$0xff] %v10837_v57  ;;  %v7488_v16 = vpop.eup %7487  ;;  %7505 = vpow2.f32 %v6657_v0  ;;  %v4921_v19 = vadd.f32 %v10767_v37, %v10610_v5  ;;  %vm5895_vm12 = vcmp.le.f32.partialorder %v10690_v26, 0.0031308  ;;  %v5777_v49 = vmul.f32 1.442695, %v5736_v42 }
 0x433   : > { %v10843_v10 = vpop.eup %7489  ;;  %v6175_v58 = vmul.f32 1.055, %v7488_v16  ;;  %7507 = vpow2.f32 %v6117_v50  ;;  %v5737_v6 = vmul.f32 0.41666666, %v5684_v32  ;;  %v10847_v1 = vmul.f32 12.92, %v10743_v9 }
 0x434   : > { %v7492_v20 = vpop.eup %7491  ;;  %7509 = vlog2.f32 %v5990_v14  ;;  %v5529_v59 = vmul.f32 1.442695, %v5484_v27  ;;  %v10849_v21 = vpop.f32.mrb[237].mxu1  ;;  %v6658_v27 = vmul.f32 -1.442695, %v4921_v19  ;;  %v6828_v14 = vadd.f32 %v10712_v31, %v10708_v28 }
 0x435   : > { %v10851_v0 = vpop.f32.mrb[235].mxu0  ;;  %v7494_v57 = vpop.eup %7493  ;;  %v6723_v37 = vadd.f32 -0.055, %v6175_v58  ;;  %v6176_v42 = vmul.f32 1.055, %v7492_v20  ;;  %7511 = vpow2.f32 %v5777_v49 }
 0x436   : > { %11731 = vst [vmem:[#allocation31_spill] sm:$0xff] %v10851_v0  ;;  %v5779_v32 = vmul.f32 1.442695, %v5737_v6  ;;  %v7496_v50 = vpop.eup %7495  ;;  %v6024_v16 = vmul.f32 0.6931472, %v7494_v57  ;;  %7513 = vlog2.f32 %v5642_v36  ;;  %v10862_v0 = vpop.f32.mrb[238].mxu1  ;;  %v4924_v6 = vadd.f32 %v6828_v14, %v10610_v5 }
 0x437   : > { %v10864_v51 = vpop.f32.mrb[236].mxu0  ;;  %v7498_v7 = vpop.eup %7497  ;;  %v6271_v58 = vsel %vm6239_vm10, %v10775_v25, %v6723_v37  ;;  %v6724_v20 = vadd.f32 -0.055, %v6176_v42  ;;  %vm6241_vm13 = vcmp.le.f32.partialorder %v10725_v48, 0.0031308 }
 0x438   : > { %11733 = vst [vmem:[#allocation32_spill] sm:$0xff] %v10864_v51  ;;  %v6026_v49 = vmul.f32 0.6931472, %v7496_v50  ;;  %7515 = vpow2.f32 %v5779_v32  ;;  %v10870_v57 = vpop.f32.mrb[239].mxu1  ;;  %v10872_v36 = vpop.f32.mrb[237].mxu0  ;;  %6304 = vst.msk [vmem:[%s10858_s27] sm:$0xff] %vm6303_vm9, %v6271_v58 }
 0x439   : > { %11734 = vst [vmem:[#allocation28_spill] sm:$0xff] %v10872_v36  ;;  %v7500_v28 = vpop.eup %7499  ;;  %v6083_v31 = vmul.f32 0.41666666, %v6024_v16  ;;  %v5831_v19 = vmul.f32 1.055, %v7498_v7  ;;  %7517 = vrcp.f32 %v5092_v56  ;;  %v10877_v38 = vpop.f32.mrb[238].mxu0  ;;  %v6272_v25 = vsel %vm6240_vm11, %v10792_v34, %v6724_v20 }
 0x43a   : > { %11735 = vst [vmem:[#allocation5_spill] sm:$0xff] %v10877_v38  ;;  %vm6242_vm14 = vcmp.le.f32.partialorder %v10743_v9, 0.0031308  ;;  %v6084_v37 = vmul.f32 0.41666666, %v6026_v49  ;;  %v10886_v32 = vmul.f32 %v7500_v28, %v7486_v44  ;;  %v10888_v50 = vpop.f32.mrb[240].mxu1  ;;  %v7502_v56 = vpop.eup %7501  ;;  %7519 = vpow2.f32 %v5529_v59 }
 0x43b   : > { %v10884_v42 = vmul.f32 12.92, %v10759_v13  ;;  %v10890_v7 = vpop.f32.mrb[239].mxu0  ;;  %6305 = vst.msk [vmem:[%s10858_s27 + $0x8] sm:$0xff] %vm6303_vm9, %v6272_v25  ;;  %v10895_v5 = vmul.f32 12.92, %v10787_v47  ;;  %v7504_v16 = vpop.eup %7503  ;;  %7521 = vpow2.f32 %v6658_v27  ;;  %v6831_v9 = vadd.f32 %v10739_v11, %v10728_v15 }
 0x43c   : > { %11736 = vst [vmem:[#allocation29_spill] sm:$0xff] %v10890_v7  ;;  %v6119_v39 = vmul.f32 1.442695, %v6083_v31  ;;  %v6699_v34 = vadd.f32 -0.055, %v5831_v19  ;;  %v7506_v20 = vpop.eup %7505  ;;  %v5643_v25 = vmax.f32 %v10886_v32, 1.1920929e-07 }
 0x43d   : > { %v6121_v14 = vmul.f32 1.442695, %v6084_v37  ;;  %v6028_v58 = vmul.f32 0.6931472, %v7502_v56  ;;  %vm5896_vm15 = vcmp.le.f32.partialorder %v10699_v22, 0.0031308  ;;  %v7508_v59 = vpop.eup %7507 }
 0x43e   : > { %v6659_v44 = vmul.f32 -1.442695, %v4924_v6  ;;  %v6177_v49 = vmul.f32 1.055, %v7504_v16  ;;  %7523 = vpow2.f32 %v6119_v39  ;;  %v10901_v28 = vsel %vm5895_vm12, %v10779_v29, %v6699_v34  ;;  %v10904_v31 = vpop.f32.mrb[241].mxu1  ;;  %v7510_v56 = vpop.eup %7509 }
 0x43f   : > { %v10907_v19 = vmul.f32 12.92, %v10801_v30  ;;  %7525 = vpow2.f32 %v6121_v14  ;;  %v6085_v37 = vmul.f32 0.41666666, %v6028_v58  ;;  %v5991_v27 = vmax.f32 %v10901_v28, 1.1920929e-07  ;;  %v10911_v6 = vpop.f32.mrb[242].mxu1  ;;  %v7512_v34 = vpop.eup %7511 }
 0x440   : > { %vm5897_vm0 = vcmp.le.f32.partialorder %v10759_v13, 0.0031308  ;;  %11737 = vst [vmem:[#allocation17_spill] sm:$0xff] %v10911_v6  ;;  %v6725_v26 = vadd.f32 -0.055, %v6177_v49  ;;  %v5093_v39 = vadd.f32 1.0, %v10843_v10  ;;  %7527 = vlog2.f32 %v5643_v25  ;;  %v7514_v14 = vpop.eup %7513 }
 0x441   : > { %v6178_v29 = vmul.f32 1.055, %v7508_v59  ;;  %v6123_v16 = vmul.f32 1.442695, %v6085_v37  ;;  %v6030_v7 = vmul.f32 0.6931472, %v7510_v56  ;;  %7529 = vlog2.f32 %v5991_v27 }
 0x442   : > { %v5094_v38 = vadd.f32 1.0, %v7506_v20  ;;  %v6273_v58 = vsel %vm6241_vm13, %v10820_v2, %v6725_v26  ;;  %v5832_v51 = vmul.f32 1.055, %v7512_v34  ;;  %7531 = vpow2.f32 %v6659_v44  ;;  %v10917_v6 = vpop.f32.mrb[243].mxu1  ;;  %v10919_v49 = vpop.f32.mrb[240].mxu0 }
 0x443   : > { %v6726_v36 = vadd.f32 -0.055, %v6178_v29  ;;  %v7516_v59 = vpop.eup %7515  ;;  %6306 = vst.msk [vmem:[%s10858_s27 + $0x10] sm:$0xff] %vm6303_vm9, %v6273_v58  ;;  %7533 = vpow2.f32 %v6123_v16  ;;  %v6086_v10 = vmul.f32 0.41666666, %v6030_v7  ;;  %v6931_v20 = vadd.f32 %v10681_v33, %v10679_v53 }
 0x444   : > { %v5686_v25 = vmul.f32 0.6931472, %v7514_v14  ;;  %v10925_v37 = vpop.f32.mrb[244].mxu1  ;;  %v10927_v48 = vpop.f32.mrb[241].mxu0  ;;  %vm6243_vm1 = vcmp.le.f32.partialorder %v10787_v47, 0.0031308  ;;  %v6934_v7 = vadd.f32 %v10694_v43, %v10683_v35  ;;  %7535 = vrcp.f32 %v5093_v39 }
 0x445   : > { %v7518_v2 = vpop.eup %7517  ;;  %v6274_v44 = vsel %vm6242_vm14, %v10847_v1, %v6726_v36  ;;  %v6700_v27 = vadd.f32 -0.055, %v5832_v51  ;;  %v5833_v56 = vmul.f32 1.055, %v7516_v59  ;;  %v10935_v26 = vpop.f32.mrb[245].mxu1  ;;  %7537 = vrcp.f32 %v5094_v38 }
 0x446   : > { %v10937_v29 = vpop.f32.mrb[242].mxu0  ;;  %6307 = vst.msk [vmem:[%s10858_s27 + $0x18] sm:$0xff] %vm6303_vm9, %v6274_v44  ;;  %v6125_v53 = vmul.f32 1.442695, %v6086_v10  ;;  %v10943_v1 = vpop.f32.mrb[246].mxu1  ;;  %v6834_v34 = vadd.f32 %v10754_v8, %v10745_v55 }
 0x447   : > { %v5738_v33 = vmul.f32 0.41666666, %v5686_v25  ;;  %v10945_v36 = vpop.f32.mrb[243].mxu0  ;;  %v7520_v51 = vpop.eup %7519  ;;  %v10950_v35 = vsel %vm5896_vm15, %v10805_v24, %v6700_v27  ;;  %v6701_v43 = vadd.f32 -0.055, %v5833_v56 }
 0x448   : > { %v10954_v16 = vpop.f32.mrb[247].mxu1  ;;  %v7522_v39 = vpop.eup %7521  ;;  %vm6244_vm2 = vcmp.le.f32.partialorder %v10801_v30, 0.0031308  ;;  %v10958_v15 = vmul.f32 12.92, %v10814_v54  ;;  %7539 = vpow2.f32 %v6125_v53  ;;  %v5992_v11 = vmax.f32 %v10950_v35, 1.1920929e-07 }
 0x449   : > { %v7524_v14 = vpop.eup %7523  ;;  %v10964_v22 = vsel %vm5897_vm0, %v10884_v42, %v6701_v43  ;;  %v5781_v24 = vmul.f32 1.442695, %v5738_v33  ;;  %v10966_v38 = vmul.f32 %v7520_v51, %v7518_v2  ;;  %v5095_v55 = vadd.f32 1.0, %v7522_v39  ;;  %v10968_v8 = vpop.f32.mrb[244].mxu0  ;;  %v10980_v2 = vld [vmem:[%s11458_s19] ss:$0 sm:$0xff] }
 0x44a   : > { %v7526_v58 = vpop.eup %7525  ;;  %v6179_v59 = vmul.f32 1.055, %v7524_v14  ;;  %vm6245_vm3 = vcmp.le.f32.partialorder %v10814_v54, 0.0031308  ;;  %7541 = vlog2.f32 %v5992_v11  ;;  %v5993_v10 = vmax.f32 %v10964_v22, 1.1920929e-07  ;;  %v10975_v44 = vpop.f32.mrb[245].mxu0 }
 0x44b   : > { %v10973_v25 = vmul.f32 12.92, %v10825_v41  ;;  %11738 = vst [vmem:[#allocation18_spill] sm:$0xff] %v10975_v44  ;;  %v7528_v13 = vpop.eup %7527  ;;  %v6180_v42 = vmul.f32 1.055, %v7526_v58  ;;  %7543 = vpow2.f32 %v5781_v24  ;;  %v5401_v27 = vadd.f32 %v10980_v2, %v6931_v20  ;;  %v10985_v39 = vpop.f32.mrb[246].mxu0 }
 0x44c   : > { %v5404_v56 = vadd.f32 %v10980_v2, %v6934_v7  ;;  %v7530_v53 = vpop.eup %7529  ;;  %v6727_v33 = vadd.f32 -0.055, %v6179_v59  ;;  %7545 = vlog2.f32 %v5993_v10  ;;  %v5688_v51 = vmul.f32 0.6931472, %v7528_v13  ;;  %v10992_v59 = vpop.f32.mrb[247].mxu0 }
 0x44d   : > { %v5644_v43 = vmax.f32 %v10966_v38, 1.1920929e-07  ;;  %v7532_v11 = vpop.eup %7531  ;;  %v6728_v14 = vadd.f32 -0.055, %v6180_v42  ;;  %v5958_v24 = vmul.f32 12.92, %v10833_v46  ;;  %7547 = vrcp.f32 %v5095_v55 }
 0x44e   : > { %v6032_v58 = vmul.f32 0.6931472, %v7530_v53  ;;  %v7534_v44 = vpop.eup %7533  ;;  %v6275_v20 = vsel %vm6243_vm1, %v10895_v5, %v6727_v33  ;;  %vm6246_vm4 = vcmp.le.f32.partialorder %v10833_v46, 0.0031308  ;;  %v5739_v7 = vmul.f32 0.41666666, %v5688_v51 }
 0x44f   : > { %7549 = vlog2.f32 %v5644_v43  ;;  %6308 = vst.msk [vmem:[%s10858_s27 + $0x20] sm:$0xff] %vm6303_vm9, %v6275_v20  ;;  %v6276_v10 = vsel %vm6244_vm2, %v10907_v19, %v6728_v14  ;;  %v6181_v13 = vmul.f32 1.055, %v7534_v44  ;;  %v5485_v55 = vmin.f32 %v5401_v27, 3.0  ;;  %v10999_v53 = vpop.eup %7535  ;;  %v11006_v51 = vld [vmem:[%s11450_s11] ss:$0 sm:$0xff] }
 0x450   : > { %v6087_v42 = vmul.f32 0.41666666, %v6032_v58  ;;  %6309 = vst.msk [vmem:[%s10858_s27 + $0x28] sm:$0xff] %vm6303_vm9, %v6276_v10  ;;  %v5783_v47 = vmul.f32 1.442695, %v5739_v7  ;;  %v5096_v5 = vadd.f32 1.0, %v7532_v11  ;;  %v4929_v43 = vadd.f32 %v11006_v51, %v6831_v9  ;;  %v11009_v20 = vpop.eup %7537 }
 0x451   : > { %v5486_v33 = vmin.f32 %v5404_v56, 3.0  ;;  %v6729_v30 = vadd.f32 -0.055, %v6181_v13  ;;  %vm5898_vm5 = vcmp.le.f32.partialorder %v10825_v41, 0.0031308  ;;  %v4932_v27 = vadd.f32 %v11006_v51, %v6834_v34  ;;  %v11015_v7 = vpop.f32.mrb[248].mxu0 }
 0x452   : > { %v6127_v19 = vmul.f32 1.442695, %v6087_v42  ;;  %v5531_v44 = vmul.f32 1.442695, %v5485_v55  ;;  %v7540_v14 = vpop.eup %7539  ;;  %7551 = vpow2.f32 %v5783_v47  ;;  %v6660_v11 = vmul.f32 -1.442695, %v4929_v43 }
 0x453   : > { %v5533_v56 = vmul.f32 1.442695, %v5486_v33  ;;  %v6937_v58 = vadd.f32 %v10721_v52, %v10715_v61  ;;  %v6277_v9 = vsel %vm6245_vm3, %v10958_v15, %v6729_v30  ;;  %v6182_v10 = vmul.f32 1.055, %v7540_v14  ;;  %v11020_v42 = vpop.f32.mrb[248].mxu1  ;;  %v11022_v55 = vpop.f32.mrb[249].mxu0 }
 0x454   : > { %7553 = vpow2.f32 %v6127_v19  ;;  %v6661_v13 = vmul.f32 -1.442695, %v4932_v27  ;;  %v7542_v34 = vpop.eup %7541  ;;  %6310 = vst.msk [vmem:[%s10858_s27 + $0x30] sm:$0xff] %vm6303_vm9, %v6277_v9  ;;  %v6940_v61 = vadd.f32 %v10747_v23, %v10730_v63  ;;  %v6837_v52 = vadd.f32 %v10796_v60, %v10789_v4  ;;  %v11031_v54 = vpop.f32.mrb[249].mxu1 }
 0x455   : > { %7555 = vpow2.f32 %v5531_v44  ;;  %v5409_v47 = vadd.f32 %v10980_v2, %v6937_v58  ;;  %v11033_v15 = vpop.f32.mrb[250].mxu0  ;;  %v7544_v33 = vpop.eup %7543  ;;  %v6730_v43 = vadd.f32 -0.055, %v6182_v10  ;;  %v6034_v30 = vmul.f32 0.6931472, %v7542_v34 }
 0x456   : > { %7557 = vpow2.f32 %v5533_v56  ;;  %v11037_v19 = vadd.f32 %v10816_v18, %v10807_v45  ;;  %v11039_v44 = vpop.f32.mrb[250].mxu1  ;;  %v11041_v27 = vpop.f32.mrb[251].mxu0  ;;  %v5834_v23 = vmul.f32 1.055, %v7544_v33  ;;  %v5412_v60 = vadd.f32 %v10980_v2, %v6940_v61 }
 0x457   : > { %11739 = vst [vmem:[#allocation30_spill] sm:$0xff] %v11041_v27  ;;  %v7546_v63 = vpop.eup %7545  ;;  %7559 = vrcp.f32 %v5096_v5  ;;  %v5487_v4 = vmin.f32 %v5409_v47, 3.0  ;;  %v11044_v14 = vpop.f32.mrb[251].mxu1  ;;  %v6278_v56 = vsel %vm6246_vm4, %v5958_v24, %v6730_v43  ;;  %v6088_v9 = vmul.f32 0.41666666, %v6034_v30 }
 0x458   : > { %v11046_v58 = vpop.eup %7547  ;;  %v6036_v45 = vmul.f32 0.6931472, %v7546_v63  ;;  %7561 = vpow2.f32 %v6660_v11  ;;  %6311 = vst.msk [vmem:[%s10858_s27 + $0x38] sm:$0xff] %vm6303_vm9, %v6278_v56  ;;  %v6702_v10 = vadd.f32 -0.055, %v5834_v23  ;;  %v5488_v33 = vmin.f32 %v5412_v60, 3.0 }
 0x459   : > { %v7550_v18 = vpop.eup %7549  ;;  %v5535_v34 = vmul.f32 1.442695, %v5487_v4  ;;  %v4937_v5 = vadd.f32 %v11006_v51, %v6837_v52  ;;  %v6129_v47 = vmul.f32 1.442695, %v6088_v9  ;;  %7563 = vpow2.f32 %v6661_v13 }
 0x45a   : > { %v6089_v61 = vmul.f32 0.41666666, %v6036_v45  ;;  %v5690_v27 = vmul.f32 0.6931472, %v7550_v18  ;;  %v11056_v46 = vsel %vm5898_vm5, %v10973_v25, %v6702_v10  ;;  %v5537_v24 = vmul.f32 1.442695, %v5488_v33 }
 0x45b   : > { %7565 = vpow2.f32 %v5535_v34  ;;  %v5994_v43 = vmax.f32 %v11056_v46, 1.1920929e-07  ;;  %v5611_v63 = vmul.f32 12.92, %v10886_v32  ;;  %v6662_v52 = vmul.f32 -1.442695, %v4937_v5 }
 0x45c   : > { %7567 = vpow2.f32 %v6129_v47  ;;  %v6131_v11 = vmul.f32 1.442695, %v6089_v61  ;;  %v7552_v30 = vpop.eup %7551  ;;  %v5740_v23 = vmul.f32 0.41666666, %v5690_v27  ;;  %v6943_v41 = vadd.f32 %v10769_v3, %v10763_v62 }
 0x45d   : > { %7569 = vpow2.f32 %v5537_v24  ;;  %v5835_v13 = vmul.f32 1.055, %v7552_v30  ;;  %v6946_v25 = vadd.f32 %v10783_v17, %v10772_v12  ;;  %v6843_v45 = vadd.f32 %v10849_v21, %v10835_v40 }
 0x45e   : > { %v7554_v4 = vpop.eup %7553  ;;  %7571 = vpow2.f32 %v6131_v11  ;;  %v5785_v9 = vmul.f32 1.442695, %v5740_v23  ;;  %v5959_v27 = vmul.f32 12.92, %v10901_v28  ;;  %vm5899_vm6 = vcmp.le.f32.partialorder %v10886_v32, 0.0031308 }
 0x45f   : > { %v7556_v60 = vpop.eup %7555  ;;  %v6183_v56 = vmul.f32 1.055, %v7554_v4  ;;  %7573 = vlog2.f32 %v5994_v43  ;;  %v6703_v10 = vadd.f32 -0.055, %v5835_v13  ;;  %v5417_v17 = vadd.f32 %v10980_v2, %v6943_v41 }
 0x460   : > { %v7558_v18 = vpop.eup %7557  ;;  %v11069_v34 = vmul.f32 %v7556_v60, %v10999_v53  ;;  %7575 = vpow2.f32 %v5785_v9  ;;  %vm6247_vm7 = vcmp.le.f32.partialorder %v10901_v28, 0.0031308  ;;  %v5420_v32 = vadd.f32 %v10980_v2, %v6946_v25 }
 0x461   : > { %v7560_v62 = vpop.eup %7559  ;;  %v6731_v3 = vadd.f32 -0.055, %v6183_v56  ;;  %v11072_v12 = vmul.f32 %v7558_v18, %v11009_v20  ;;  %v11076_v40 = vsel %vm5899_vm6, %v5611_v63, %v6703_v10  ;;  %7577 = vpow2.f32 %v6662_v52 }
 0x462   : > { %v7562_v33 = vpop.eup %7561  ;;  %v5645_v21 = vmax.f32 %v11069_v34, 1.1920929e-07  ;;  %v5995_v53 = vmax.f32 %v11076_v40, 1.1920929e-07  ;;  %v5960_v20 = vmul.f32 12.92, %v10950_v35  ;;  %vm6248_vm8 = vcmp.le.f32.partialorder %v10950_v35, 0.0031308 }
 0x463   : > { %v6279_v5 = vsel %vm6247_vm7, %v5959_v27, %v6731_v3  ;;  %v7564_v47 = vpop.eup %7563  ;;  %v5646_v28 = vmax.f32 %v11072_v12, 1.1920929e-07  ;;  %v5961_v24 = vmul.f32 12.92, %v10964_v22  ;;  %v5097_v11 = vadd.f32 1.0, %v7562_v33  ;;  %v11095_v60 = vpop.f32.mrb[252].mxu1 }
 0x464   : > { %6312 = vst.msk [vmem:[%s10858_s27 + $0x40] sm:$0xff] %vm6303_vm9, %v6279_v5  ;;  %7579 = vlog2.f32 %v5645_v21  ;;  %v5489_v43 = vmin.f32 %v5417_v17, 3.0  ;;  %v4940_v23 = vadd.f32 %v11006_v51, %v11037_v19  ;;  %v5490_v52 = vmin.f32 %v5420_v32, 3.0  ;;  %v11100_v19 = vpop.f32.mrb[253].mxu1 }
 0x465   : > { %v7566_v61 = vpop.eup %7565  ;;  %7581 = vlog2.f32 %v5995_v53  ;;  %vm6249_vm10 = vcmp.le.f32.partialorder %v10964_v22, 0.0031308  ;;  %v5098_v41 = vadd.f32 1.0, %v7564_v47  ;;  %v6846_v25 = vadd.f32 %v10870_v57, %v10862_v0  ;;  %v11104_v0 = vpop.f32.mrb[254].mxu1  ;;  %v11743_v22 = vld [vmem:[#allocation31_spill] sm:$0xff] }
 0x466   : > { %v7568_v30 = vpop.eup %7567  ;;  %7583 = vlog2.f32 %v5646_v28  ;;  %v11088_v63 = vmul.f32 %v7566_v61, %v11046_v58  ;;  %v5612_v9 = vmul.f32 12.92, %v10966_v38  ;;  %v5539_v18 = vmul.f32 1.442695, %v5489_v43  ;;  %v11109_v28 = vpop.f32.mrb[255].mxu1 }
 0x467   : > { %v7570_v4 = vpop.eup %7569  ;;  %v6184_v13 = vmul.f32 1.055, %v7568_v30  ;;  %v4945_v27 = vadd.f32 %v11006_v51, %v6843_v45  ;;  %7585 = vrcp.f32 %v5097_v11  ;;  %v6663_v21 = vmul.f32 -1.442695, %v4940_v23 }
 0x468   : > { %v7572_v56 = vpop.eup %7571  ;;  %v5647_v58 = vmax.f32 %v11088_v63, 1.1920929e-07  ;;  %v11102_v33 = vmul.f32 %v7570_v4, %v7560_v62  ;;  %v5541_v32 = vmul.f32 1.442695, %v5490_v52  ;;  %vm5900_vm11 = vcmp.le.f32.partialorder %v10966_v38, 0.0031308  ;;  %v11740_v4 = vld [vmem:[#allocation25_spill] sm:$0xff] }
 0x469   : > { %v7574_v10 = vpop.eup %7573  ;;  %v6732_v3 = vadd.f32 -0.055, %v6184_v13  ;;  %v6185_v17 = vmul.f32 1.055, %v7572_v56  ;;  %v6664_v35 = vmul.f32 -1.442695, %v4945_v27  ;;  %v6849_v38 = vadd.f32 %v10904_v31, %v10888_v50 }
 0x46a   : > { %v6038_v57 = vmul.f32 0.6931472, %v7574_v10  ;;  %7587 = vlog2.f32 %v5647_v58  ;;  %v7576_v5 = vpop.eup %7575  ;;  %v5648_v47 = vmax.f32 %v11102_v33, 1.1920929e-07  ;;  %v11741_v13 = vld [vmem:[#allocation26_spill] sm:$0xff]  ;;  %v11742_v10 = vld [vmem:[#allocation27_spill] sm:$0xff] }
 0x46b   : > { %v6280_v53 = vsel %vm6248_vm8, %v5960_v20, %v6732_v3  ;;  %v6733_v45 = vadd.f32 -0.055, %v6185_v17  ;;  %7589 = vrcp.f32 %v5098_v41  ;;  %v5836_v61 = vmul.f32 1.055, %v7576_v5  ;;  %v7578_v11 = vpop.eup %7577  ;;  %v11123_v3 = vpop.f32.mrb[0].mxu1 }
 0x46c   : > { %6313 = vst.msk [vmem:[%s10858_s27 + $0x48] sm:$0xff] %vm6303_vm9, %v6280_v53  ;;  %v6090_v62 = vmul.f32 0.41666666, %v6038_v57  ;;  %7591 = vpow2.f32 %v5539_v18  ;;  %v4948_v20 = vadd.f32 %v11006_v51, %v6846_v25  ;;  %v6949_v41 = vadd.f32 %v11741_v13, %v11740_v4 }
 0x46d   : > { %v6281_v43 = vsel %vm6249_vm10, %v5961_v24, %v6733_v45  ;;  %7593 = vlog2.f32 %v5648_v47  ;;  %v6704_v52 = vadd.f32 -0.055, %v5836_v61  ;;  %v6952_v24 = vadd.f32 %v11743_v22, %v11742_v10 }
 0x46e   : > { %v7580_v30 = vpop.eup %7579  ;;  %6314 = vst.msk [vmem:[%s10858_s27 + $0x50] sm:$0xff] %vm6303_vm9, %v6281_v43  ;;  %v6133_v23 = vmul.f32 1.442695, %v6090_v62  ;;  %7595 = vpow2.f32 %v5541_v32  ;;  %v6665_v18 = vmul.f32 -1.442695, %v4948_v20  ;;  %v5425_v57 = vadd.f32 %v10980_v2, %v6949_v41 }
 0x46f   : > { %v7582_v56 = vpop.eup %7581  ;;  %v5692_v58 = vmul.f32 0.6931472, %v7580_v30  ;;  %7597 = vpow2.f32 %v6663_v21  ;;  %v11127_v17 = vsel %vm5900_vm11, %v5612_v9, %v6704_v52  ;;  %v11130_v32 = vpop.f32.mrb[1].mxu1  ;;  %v5099_v21 = vadd.f32 1.0, %v7578_v11  ;;  %v11745_v11 = vld [vmem:[#allocation17_spill] sm:$0xff] }
 0x470   : > { %v7584_v27 = vpop.eup %7583  ;;  %7599 = vpow2.f32 %v6133_v23  ;;  %v6040_v25 = vmul.f32 0.6931472, %v7582_v56  ;;  %v5996_v5 = vmax.f32 %v11127_v17, 1.1920929e-07  ;;  %v11133_v53 = vpop.f32.mrb[2].mxu1  ;;  %v5491_v43 = vmin.f32 %v5425_v57, 3.0 }
 0x471   : > { %7601 = vpow2.f32 %v6664_v35  ;;  %v5741_v47 = vmul.f32 0.41666666, %v5692_v58  ;;  %v5694_v62 = vmul.f32 0.6931472, %v7584_v27  ;;  %v7586_v61 = vpop.eup %7585  ;;  %v11137_v9 = vpop.f32.mrb[3].mxu1  ;;  %v6852_v35 = vadd.f32 %v10917_v6, %v11745_v11 }
 0x472   : > { %v6091_v45 = vmul.f32 0.41666666, %v6040_v25  ;;  %7603 = vpow2.f32 %v6665_v18  ;;  %11744 = vst [vmem:[#allocation33_spill] sm:$0xff] %v11137_v9  ;;  %v5428_v41 = vadd.f32 %v10980_v2, %v6952_v24  ;;  %v5543_v18 = vmul.f32 1.442695, %v5491_v43 }
 0x473   : > { %7605 = vlog2.f32 %v5996_v5  ;;  %v5787_v23 = vmul.f32 1.442695, %v5741_v47  ;;  %v5742_v52 = vmul.f32 0.41666666, %v5694_v62  ;;  %v5962_v50 = vmul.f32 12.92, %v11056_v46 }
 0x474   : > { %v7588_v20 = vpop.eup %7587  ;;  %v6135_v30 = vmul.f32 1.442695, %v6091_v45  ;;  %7607 = vrcp.f32 %v5099_v21  ;;  %vm6250_vm12 = vcmp.le.f32.partialorder %v11056_v46, 0.0031308  ;;  %v11147_v6 = vmul.f32 12.92, %v11069_v34 }
 0x475   : > { %v7590_v4 = vpop.eup %7589  ;;  %v5696_v13 = vmul.f32 0.6931472, %v7588_v20  ;;  %v5789_v58 = vmul.f32 1.442695, %v5742_v52  ;;  %v5963_v57 = vmul.f32 12.92, %v11076_v40 }
 0x476   : > { %v7592_v56 = vpop.eup %7591  ;;  %7609 = vpow2.f32 %v6135_v30  ;;  %v5492_v45 = vmin.f32 %v5428_v41, 3.0  ;;  %v11747_v52 = vld [vmem:[#allocation28_spill] sm:$0xff]  ;;  %vm5901_vm13 = vcmp.le.f32.partialorder %v11069_v34, 0.0031308  ;;  %vm6251_vm14 = vcmp.le.f32.partialorder %v11076_v40, 0.0031308 }
 0x477   : > { %v7594_v10 = vpop.eup %7593  ;;  %7611 = vpow2.f32 %v5787_v23  ;;  %v5743_v31 = vmul.f32 0.41666666, %v5696_v13  ;;  %v11143_v22 = vmul.f32 %v7592_v56, %v7586_v61  ;;  %v4953_v61 = vadd.f32 %v11006_v51, %v6849_v38  ;;  %v11746_v23 = vld [vmem:[#allocation32_spill] sm:$0xff]  ;;  %v11748_v13 = vld [vmem:[#allocation5_spill] sm:$0xff] }
 0x478   : > { %v7596_v27 = vpop.eup %7595  ;;  %7613 = vpow2.f32 %v5789_v58  ;;  %v5698_v25 = vmul.f32 0.6931472, %v7594_v10  ;;  %v6955_v11 = vadd.f32 %v11747_v52, %v11746_v23  ;;  %v11749_v56 = vld [vmem:[#allocation29_spill] sm:$0xff]  ;;  %vm5902_vm15 = vcmp.le.f32.partialorder %v11072_v12, 0.0031308 }
 0x479   : > { %v7598_v24 = vpop.eup %7597  ;;  %v5791_v5 = vmul.f32 1.442695, %v5743_v31  ;;  %v5649_v21 = vmax.f32 %v11143_v22, 1.1920929e-07  ;;  %v11151_v43 = vmul.f32 %v7596_v27, %v7590_v4  ;;  %7615 = vpow2.f32 %v5543_v18 }
 0x47a   : > { %v7600_v47 = vpop.eup %7599  ;;  %v5744_v62 = vmul.f32 0.41666666, %v5698_v25  ;;  %v6958_v58 = vadd.f32 %v11749_v56, %v11748_v13  ;;  %v5100_v9 = vadd.f32 1.0, %v7598_v24  ;;  %v5545_v27 = vmul.f32 1.442695, %v5492_v45 }
 0x47b   : > { %v7602_v20 = vpop.eup %7601  ;;  %v6186_v30 = vmul.f32 1.055, %v7600_v47  ;;  %7617 = vpow2.f32 %v5791_v5  ;;  %v5650_v41 = vmax.f32 %v11151_v43, 1.1920929e-07  ;;  %v4956_v25 = vadd.f32 %v11006_v51, %v6852_v35 }
 0x47c   : > { %v7604_v10 = vpop.eup %7603  ;;  %v5793_v31 = vmul.f32 1.442695, %v5744_v62  ;;  %7619 = vlog2.f32 %v5649_v21  ;;  %v5101_v38 = vadd.f32 1.0, %v7602_v20  ;;  %v6666_v47 = vmul.f32 -1.442695, %v4953_v61 }
 0x47d   : > { %v7606_v4 = vpop.eup %7605  ;;  %v6734_v18 = vadd.f32 -0.055, %v6186_v30  ;;  %v5433_v23 = vadd.f32 %v10980_v2, %v6955_v11  ;;  %v6961_v21 = vadd.f32 %v10927_v48, %v10919_v49  ;;  %v11168_v62 = vadd.f32 %v10935_v26, %v10925_v37 }
 0x47e   : > { %v6042_v5 = vmul.f32 0.6931472, %v7606_v4  ;;  %7621 = vpow2.f32 %v5793_v31  ;;  %v7608_v52 = vpop.eup %7607  ;;  %v5436_v20 = vadd.f32 %v10980_v2, %v6958_v58  ;;  %v5102_v46 = vadd.f32 1.0, %v7604_v10 }
 0x47f   : > { %v6282_v24 = vsel %vm6250_vm12, %v5962_v50, %v6734_v18  ;;  %7623 = vlog2.f32 %v5650_v41  ;;  %v5493_v61 = vmin.f32 %v5433_v23, 3.0  ;;  %v6667_v56 = vmul.f32 -1.442695, %v4956_v25 }
 0x480   : > { %v7610_v45 = vpop.eup %7609  ;;  %6315 = vst.msk [vmem:[%s10858_s27 + $0x58] sm:$0xff] %vm6303_vm9, %v6282_v24  ;;  %v6092_v35 = vmul.f32 0.41666666, %v6042_v5  ;;  %7625 = vrcp.f32 %v5100_v9  ;;  %v5614_v58 = vmul.f32 12.92, %v11072_v12  ;;  %v5494_v41 = vmin.f32 %v5436_v20, 3.0 }
 0x481   : > { %v7612_v30 = vpop.eup %7611  ;;  %v6187_v11 = vmul.f32 1.055, %v7610_v45  ;;  %7627 = vrcp.f32 %v5101_v38  ;;  %v5547_v37 = vmul.f32 1.442695, %v5493_v61  ;;  %v5441_v34 = vadd.f32 %v10980_v2, %v6961_v21 }
 0x482   : > { %v7614_v50 = vpop.eup %7613  ;;  %v6137_v49 = vmul.f32 1.442695, %v6092_v35  ;;  %v5837_v48 = vmul.f32 1.055, %v7612_v30  ;;  %7629 = vpow2.f32 %v5545_v27  ;;  %v5549_v45 = vmul.f32 1.442695, %v5494_v41 }
 0x483   : > { %v6735_v26 = vadd.f32 -0.055, %v6187_v11  ;;  %v5838_v13 = vmul.f32 1.055, %v7614_v50  ;;  %7631 = vpow2.f32 %v6666_v47  ;;  %v7616_v9 = vpop.eup %7615  ;;  %vm5903_vm0 = vcmp.le.f32.partialorder %v11088_v63, 0.0031308 }
 0x484   : > { %7633 = vpow2.f32 %v6137_v49  ;;  %v6705_v31 = vadd.f32 -0.055, %v5837_v48  ;;  %v11177_v38 = vmul.f32 %v7616_v9, %v7608_v52  ;;  %v5616_v30 = vmul.f32 12.92, %v11102_v33 }
 0x485   : > { %v7618_v4 = vpop.eup %7617  ;;  %v6283_v10 = vsel %vm6251_vm14, %v5963_v57, %v6735_v26  ;;  %v6706_v18 = vadd.f32 -0.055, %v5838_v13  ;;  %7635 = vrcp.f32 %v5102_v46  ;;  %v5615_v57 = vmul.f32 12.92, %v11088_v63 }
 0x486   : > { %v7620_v27 = vpop.eup %7619  ;;  %6316 = vst.msk [vmem:[%s10858_s27 + $0x60] sm:$0xff] %vm6303_vm9, %v6283_v10  ;;  %v11184_v25 = vsel %vm5901_vm13, %v11147_v6, %v6705_v31  ;;  %v5839_v5 = vmul.f32 1.055, %v7618_v4  ;;  %7637 = vpow2.f32 %v5547_v37  ;;  %v5651_v24 = vmax.f32 %v11177_v38, 1.1920929e-07 }
 0x487   : > { %v5997_v47 = vmax.f32 %v11184_v25, 1.1920929e-07  ;;  %v11188_v40 = vsel %vm5902_vm15, %v5614_v58, %v6706_v18  ;;  %7639 = vpow2.f32 %v6667_v56  ;;  %v5700_v61 = vmul.f32 0.6931472, %v7620_v27 }
 0x488   : > { %v7622_v23 = vpop.eup %7621  ;;  %v5998_v52 = vmax.f32 %v11188_v40, 1.1920929e-07  ;;  %v6707_v12 = vadd.f32 -0.055, %v5839_v5  ;;  %vm5904_vm1 = vcmp.le.f32.partialorder %v11102_v33, 0.0031308  ;;  %v5495_v26 = vmin.f32 %v5441_v34, 3.0 }
 0x489   : > { %v7624_v6 = vpop.eup %7623  ;;  %7641 = vlog2.f32 %v5997_v47  ;;  %v5840_v35 = vmul.f32 1.055, %v7622_v23  ;;  %v5745_v48 = vmul.f32 0.41666666, %v5700_v61  ;;  %v5964_v41 = vmul.f32 12.92, %v11127_v17 }
 0x48a   : > { %v7626_v20 = vpop.eup %7625  ;;  %7643 = vlog2.f32 %v5998_v52  ;;  %v5702_v11 = vmul.f32 0.6931472, %v7624_v6  ;;  %v11196_v50 = vsel %vm5903_vm0, %v5615_v57, %v6707_v12  ;;  %v4961_v33 = vadd.f32 %v11006_v51, %v11168_v62 }
 0x48b   : > { %v7628_v46 = vpop.eup %7627  ;;  %v6708_v49 = vadd.f32 -0.055, %v5840_v35  ;;  %7645 = vlog2.f32 %v5651_v24  ;;  %v5999_v21 = vmax.f32 %v11196_v50, 1.1920929e-07  ;;  %v5795_v63 = vmul.f32 1.442695, %v5745_v48 }
 0x48c   : > { %v7630_v37 = vpop.eup %7629  ;;  %7647 = vpow2.f32 %v5549_v45  ;;  %v5746_v9 = vmul.f32 0.41666666, %v5702_v11  ;;  %vm6252_vm2 = vcmp.le.f32.partialorder %v11127_v17, 0.0031308  ;;  %v5551_v45 = vmul.f32 1.442695, %v5495_v26 }
 0x48d   : > { %v7632_v13 = vpop.eup %7631  ;;  %v11200_v56 = vsel %vm5904_vm1, %v5616_v30, %v6708_v49  ;;  %v11202_v31 = vmul.f32 %v7630_v37, %v7626_v20  ;;  %7649 = vlog2.f32 %v5999_v21  ;;  %v6964_v34 = vadd.f32 %v10945_v36, %v10937_v29  ;;  %v11750_v17 = vld [vmem:[#allocation18_spill] sm:$0xff] }
 0x48e   : > { %v7634_v58 = vpop.eup %7633  ;;  %v6000_v4 = vmax.f32 %v11200_v56, 1.1920929e-07  ;;  %7651 = vpow2.f32 %v5795_v63  ;;  %v5797_v27 = vmul.f32 1.442695, %v5746_v9  ;;  %v5103_v57 = vadd.f32 1.0, %v7632_v13 }
 0x48f   : > { %v7636_v10 = vpop.eup %7635  ;;  %v6188_v18 = vmul.f32 1.055, %v7634_v58  ;;  %v5652_v47 = vmax.f32 %v11202_v31, 1.1920929e-07  ;;  %v6858_v62 = vadd.f32 %v10954_v16, %v10943_v1  ;;  %v6967_v6 = vadd.f32 %v11750_v17, %v10968_v8 }
 0x490   : > { %v7638_v5 = vpop.eup %7637  ;;  %7653 = vlog2.f32 %v6000_v4  ;;  %v5617_v61 = vmul.f32 12.92, %v11143_v22  ;;  %v6668_v30 = vmul.f32 -1.442695, %v4961_v33  ;;  %v5444_v29 = vadd.f32 %v10980_v2, %v6964_v34 }
 0x491   : > { %v7640_v23 = vpop.eup %7639  ;;  %v6736_v52 = vadd.f32 -0.055, %v6188_v18  ;;  %7655 = vpow2.f32 %v5797_v27  ;;  %v11210_v24 = vmul.f32 %v7638_v5, %v7628_v46  ;;  %vm5905_vm3 = vcmp.le.f32.partialorder %v11143_v22, 0.0031308 }
 0x492   : > { %7657 = vlog2.f32 %v5652_v47  ;;  %v5104_v49 = vadd.f32 1.0, %v7640_v23  ;;  %v4964_v16 = vadd.f32 %v11006_v51, %v6858_v62  ;;  %v5496_v21 = vmin.f32 %v5444_v29, 3.0 }
 0x493   : > { %v7642_v12 = vpop.eup %7641  ;;  %v6284_v35 = vsel %vm6252_vm2, %v5964_v41, %v6736_v52  ;;  %v5653_v20 = vmax.f32 %v11210_v24, 1.1920929e-07  ;;  %7659 = vrcp.f32 %v5103_v57  ;;  %v6970_v4 = vadd.f32 %v10992_v59, %v10985_v39 }
 0x494   : > { %v7644_v11 = vpop.eup %7643  ;;  %6317 = vst.msk [vmem:[%s10858_s27 + $0x68] sm:$0xff] %vm6303_vm9, %v6284_v35  ;;  %v6044_v46 = vmul.f32 0.6931472, %v7642_v12  ;;  %v6669_v63 = vmul.f32 -1.442695, %v4964_v16  ;;  %v5449_v59 = vadd.f32 %v10980_v2, %v6967_v6 }
 0x495   : > { %v7646_v36 = vpop.eup %7645  ;;  %v6046_v1 = vmul.f32 0.6931472, %v7644_v11  ;;  %7661 = vlog2.f32 %v5653_v20  ;;  %v5553_v5 = vmul.f32 1.442695, %v5496_v21  ;;  %v5618_v62 = vmul.f32 12.92, %v11151_v43 }
 0x496   : > { %v7648_v8 = vpop.eup %7647  ;;  %v6093_v48 = vmul.f32 0.41666666, %v6044_v46  ;;  %v5704_v37 = vmul.f32 0.6931472, %v7646_v36  ;;  %7663 = vpow2.f32 %v5551_v45  ;;  %vm5906_vm4 = vcmp.le.f32.partialorder %v11151_v43, 0.0031308 }
 0x497   : > { %v6094_v26 = vmul.f32 0.41666666, %v6046_v1  ;;  %v11225_v13 = vmul.f32 %v7648_v8, %v7636_v10  ;;  %7665 = vpow2.f32 %v6668_v30  ;;  %v7650_v9 = vpop.eup %7649  ;;  %v5965_v36 = vmul.f32 12.92, %v11184_v25 }
 0x498   : > { %v6139_v58 = vmul.f32 1.442695, %v6093_v48  ;;  %v5747_v41 = vmul.f32 0.41666666, %v5704_v37  ;;  %7667 = vrcp.f32 %v5104_v49  ;;  %v7652_v18 = vpop.eup %7651  ;;  %v6048_v33 = vmul.f32 0.6931472, %v7650_v9 }
 0x499   : > { %v6141_v27 = vmul.f32 1.442695, %v6094_v26  ;;  %7669 = vpow2.f32 %v6669_v63  ;;  %v5841_v57 = vmul.f32 1.055, %v7652_v18  ;;  %v5654_v10 = vmax.f32 %v11225_v13, 1.1920929e-07 }
 0x49a   : > { %v7654_v47 = vpop.eup %7653  ;;  %7671 = vpow2.f32 %v6139_v58  ;;  %v5799_v23 = vmul.f32 1.442695, %v5747_v41  ;;  %v6095_v45 = vmul.f32 0.41666666, %v6048_v33  ;;  %vm6253_vm5 = vcmp.le.f32.partialorder %v11184_v25, 0.0031308 }
 0x49b   : > { %v7656_v52 = vpop.eup %7655  ;;  %7673 = vpow2.f32 %v6141_v27  ;;  %v6050_v34 = vmul.f32 0.6931472, %v7654_v47  ;;  %v6709_v12 = vadd.f32 -0.055, %v5841_v57  ;;  %v5966_v8 = vmul.f32 12.92, %v11188_v40 }
 0x49c   : > { %v7658_v17 = vpop.eup %7657  ;;  %v5842_v39 = vmul.f32 1.055, %v7656_v52  ;;  %7675 = vpow2.f32 %v5799_v23  ;;  %v6143_v35 = vmul.f32 1.442695, %v6095_v45  ;;  %vm6254_vm6 = vcmp.le.f32.partialorder %v11188_v40, 0.0031308 }
 0x49d   : > { %v6096_v20 = vmul.f32 0.41666666, %v6050_v34  ;;  %v5706_v30 = vmul.f32 0.6931472, %v7658_v17  ;;  %7677 = vlog2.f32 %v5654_v10  ;;  %v7660_v11 = vpop.eup %7659  ;;  %v11234_v46 = vsel %vm5905_vm3, %v5617_v61, %v6709_v12 }
 0x49e   : > { %v6710_v49 = vadd.f32 -0.055, %v5842_v39  ;;  %7679 = vpow2.f32 %v5553_v5  ;;  %v6001_v6 = vmax.f32 %v11234_v46, 1.1920929e-07  ;;  %v5619_v21 = vmul.f32 12.92, %v11177_v38 }
 0x49f   : > { %v7662_v29 = vpop.eup %7661  ;;  %7681 = vpow2.f32 %v6143_v35  ;;  %v6145_v1 = vmul.f32 1.442695, %v6096_v20  ;;  %v5748_v22 = vmul.f32 0.41666666, %v5706_v30  ;;  %v5497_v26 = vmin.f32 %v5449_v59, 3.0 }
 0x4a0   : > { %v7664_v16 = vpop.eup %7663  ;;  %v11241_v48 = vsel %vm5906_vm4, %v5618_v62, %v6710_v49  ;;  %v5708_v61 = vmul.f32 0.6931472, %v7662_v29  ;;  %vm5907_vm7 = vcmp.le.f32.partialorder %v11177_v38, 0.0031308  ;;  %v5452_v33 = vadd.f32 %v10980_v2, %v6970_v4 }
 0x4a1   : > { %v7666_v37 = vpop.eup %7665  ;;  %7683 = vpow2.f32 %v6145_v1  ;;  %v6002_v43 = vmax.f32 %v11241_v48, 1.1920929e-07  ;;  %v5801_v9 = vmul.f32 1.442695, %v5748_v22  ;;  %v11247_v41 = vmul.f32 %v7664_v16, %v7660_v11 }
 0x4a2   : > { %v7668_v63 = vpop.eup %7667  ;;  %7685 = vlog2.f32 %v6001_v6  ;;  %v5749_v58 = vmul.f32 0.41666666, %v5708_v61  ;;  %v5105_v27 = vadd.f32 1.0, %v7666_v37  ;;  %v6861_v5 = vadd.f32 %v11031_v54, %v11020_v42 }
 0x4a3   : > { %v7670_v18 = vpop.eup %7669  ;;  %7687 = vlog2.f32 %v6002_v43  ;;  %v5967_v57 = vmul.f32 12.92, %v11196_v50  ;;  %v5655_v10 = vmax.f32 %v11247_v41, 1.1920929e-07  ;;  %vm6255_vm8 = vcmp.le.f32.partialorder %v11196_v50, 0.0031308 }
 0x4a4   : > { %v7672_v47 = vpop.eup %7671  ;;  %7689 = vpow2.f32 %v5801_v9  ;;  %v5803_v23 = vmul.f32 1.442695, %v5749_v58  ;;  %v5106_v34 = vadd.f32 1.0, %v7670_v18  ;;  %v5555_v62 = vmul.f32 1.442695, %v5497_v26 }
 0x4a5   : > { %v7674_v52 = vpop.eup %7673  ;;  %v6189_v45 = vmul.f32 1.055, %v7672_v47  ;;  %7691 = vrcp.f32 %v5105_v27  ;;  %v5968_v2 = vmul.f32 12.92, %v11200_v56  ;;  %v5498_v42 = vmin.f32 %v5452_v33, 3.0 }
 0x4a6   : > { %v7676_v17 = vpop.eup %7675  ;;  %v6190_v12 = vmul.f32 1.055, %v7674_v52  ;;  %7693 = vpow2.f32 %v5803_v23  ;;  %vm6256_vm10 = vcmp.le.f32.partialorder %v11200_v56, 0.0031308  ;;  %v6864_v59 = vadd.f32 %v11044_v14, %v11039_v44 }
 0x4a7   : > { %v7678_v54 = vpop.eup %7677  ;;  %v6737_v4 = vadd.f32 -0.055, %v6189_v45  ;;  %v5843_v39 = vmul.f32 1.055, %v7676_v17  ;;  %7695 = vlog2.f32 %v5655_v10  ;;  %v5557_v11 = vmul.f32 1.442695, %v5498_v42 }
 0x4a8   : > { %v7680_v35 = vpop.eup %7679  ;;  %v6738_v20 = vadd.f32 -0.055, %v6190_v12  ;;  %v5710_v30 = vmul.f32 0.6931472, %v7678_v54  ;;  %7697 = vrcp.f32 %v5106_v34  ;;  %v5620_v25 = vmul.f32 12.92, %v11202_v31 }
 0x4a9   : > { %v7682_v49 = vpop.eup %7681  ;;  %v6285_v29 = vsel %vm6253_vm5, %v5965_v36, %v6737_v4  ;;  %v6711_v1 = vadd.f32 -0.055, %v5843_v39  ;;  %v11261_v6 = vmul.f32 %v7680_v35, %v7668_v63  ;;  %7699 = vpow2.f32 %v5555_v62  ;;  %v11751_v35 = vld [vmem:[#allocation30_spill] sm:$0xff] }
 0x4aa   : > { %6318 = vst.msk [vmem:[%s10858_s27 + $0x70] sm:$0xff] %vm6303_vm9, %v6285_v29  ;;  %v6286_v16 = vsel %vm6254_vm6, %v5966_v8, %v6738_v20  ;;  %v6191_v44 = vmul.f32 1.055, %v7682_v49  ;;  %v5750_v14 = vmul.f32 0.41666666, %v5710_v30  ;;  %7701 = vpow2.f32 %v5557_v11 }
 0x4ab   : > { %v7684_v22 = vpop.eup %7683  ;;  %6319 = vst.msk [vmem:[%s10858_s27 + $0x78] sm:$0xff] %vm6303_vm9, %v6286_v16  ;;  %v11271_v61 = vsel %vm5907_vm7, %v5619_v21, %v6711_v1  ;;  %v5656_v36 = vmax.f32 %v11261_v6, 1.1920929e-07  ;;  %v4969_v37 = vadd.f32 %v11006_v51, %v6861_v5  ;;  %vm5908_vm11 = vcmp.le.f32.partialorder %v11202_v31, 0.0031308 }
 0x4ac   : > { %v7686_v43 = vpop.eup %7685  ;;  %v6739_v40 = vadd.f32 -0.055, %v6191_v44  ;;  %v6192_v8 = vmul.f32 1.055, %v7684_v22  ;;  %v4972_v26 = vadd.f32 %v11006_v51, %v6864_v59  ;;  %v6003_v38 = vmax.f32 %v11271_v61, 1.1920929e-07 }
 0x4ad   : > { %v7688_v63 = vpop.eup %7687  ;;  %v6052_v9 = vmul.f32 0.6931472, %v7686_v43  ;;  %v5621_v21 = vmul.f32 12.92, %v11210_v24  ;;  %7703 = vlog2.f32 %v5656_v36  ;;  %v5805_v5 = vmul.f32 1.442695, %v5750_v14 }
 0x4ae   : > { %v7690_v58 = vpop.eup %7689  ;;  %v6287_v18 = vsel %vm6255_vm8, %v5967_v57, %v6739_v40  ;;  %v6740_v27 = vadd.f32 -0.055, %v6192_v8  ;;  %v6054_v33 = vmul.f32 0.6931472, %v7688_v63  ;;  %7705 = vlog2.f32 %v6003_v38 }
 0x4af   : > { %v7692_v47 = vpop.eup %7691  ;;  %6320 = vst.msk [vmem:[%s10858_s27 + $0x80] sm:$0xff] %vm6303_vm9, %v6287_v18  ;;  %v6097_v23 = vmul.f32 0.41666666, %v6052_v9  ;;  %v5844_v51 = vmul.f32 1.055, %v7690_v58  ;;  %7707 = vpow2.f32 %v5805_v5  ;;  %v6973_v39 = vadd.f32 %v11022_v55, %v11015_v7 }
 0x4b0   : > { %v6670_v10 = vmul.f32 -1.442695, %v4969_v37  ;;  %v7694_v52 = vpop.eup %7693  ;;  %v6288_v45 = vsel %vm6256_vm10, %v5968_v2, %v6740_v27  ;;  %v6098_v34 = vmul.f32 0.41666666, %v6054_v33  ;;  %v6671_v62 = vmul.f32 -1.442695, %v4972_v26 }
 0x4b1   : > { %v7696_v50 = vpop.eup %7695  ;;  %6321 = vst.msk [vmem:[%s10858_s27 + $0x88] sm:$0xff] %vm6303_vm9, %v6288_v45  ;;  %v6147_v57 = vmul.f32 1.442695, %v6097_v23  ;;  %v6712_v17 = vadd.f32 -0.055, %v5844_v51  ;;  %v6976_v20 = vadd.f32 %v11751_v35, %v11033_v15  ;;  %v6867_v9 = vadd.f32 %v11100_v19, %v11095_v60 }
 0x4b2   : > { %v5845_v12 = vmul.f32 1.055, %v7694_v52  ;;  %7709 = vpow2.f32 %v6670_v10  ;;  %v7698_v42 = vpop.eup %7697  ;;  %v6149_v54 = vmul.f32 1.442695, %v6098_v34  ;;  %v5712_v4 = vmul.f32 0.6931472, %v7696_v50 }
 0x4b3   : > { %7711 = vpow2.f32 %v6671_v62  ;;  %v7700_v59 = vpop.eup %7699  ;;  %v11292_v56 = vsel %vm5908_vm11, %v5620_v25, %v6712_v17  ;;  %vm5909_vm12 = vcmp.le.f32.partialorder %v11210_v24, 0.0031308  ;;  %v5622_v16 = vmul.f32 12.92, %v11225_v13  ;;  %v11315_v37 = vld [vmem:[%s11458_s19] ss:$0 sm:$0xff] }
 0x4b4   : > { %7713 = vpow2.f32 %v6147_v57  ;;  %v6713_v2 = vadd.f32 -0.055, %v5845_v12  ;;  %v7702_v30 = vpop.eup %7701  ;;  %v6004_v11 = vmax.f32 %v11292_v56, 1.1920929e-07  ;;  %v5751_v29 = vmul.f32 0.41666666, %v5712_v4 }
 0x4b5   : > { %7715 = vpow2.f32 %v6149_v54  ;;  %v11300_v7 = vmul.f32 %v7700_v59, %v7692_v47  ;;  %v11302_v55 = vmul.f32 %v7702_v30, %v7698_v42  ;;  %v5969_v24 = vmul.f32 12.92, %v11234_v46  ;;  %v7823_v52 = vld [vmem:[%s11450_s11] ss:$0 sm:$0xff] }
 0x4b6   : > { %v11298_v49 = vsel %vm5909_vm12, %v5621_v21, %v6713_v2  ;;  %7717 = vlog2.f32 %v6004_v11  ;;  %v5807_v15 = vmul.f32 1.442695, %v5751_v29  ;;  %vm5910_vm13 = vcmp.le.f32.partialorder %v11225_v13, 0.0031308 }
 0x4b7   : > { %v6005_v31 = vmax.f32 %v11298_v49, 1.1920929e-07  ;;  %v7704_v1 = vpop.eup %7703  ;;  %v5657_v44 = vmax.f32 %v11300_v7, 1.1920929e-07  ;;  %v5658_v14 = vmax.f32 %v11302_v55, 1.1920929e-07  ;;  %vm6257_vm14 = vcmp.le.f32.partialorder %v11234_v46, 0.0031308 }
 0x4b8   : > { %v5714_v22 = vmul.f32 0.6931472, %v7704_v1  ;;  %v7706_v25 = vpop.eup %7705  ;;  %v5970_v36 = vmul.f32 12.92, %v11241_v48  ;;  %v5457_v43 = vadd.f32 %v11315_v37, %v6973_v39  ;;  %v5460_v40 = vadd.f32 %v11315_v37, %v6976_v20 }
 0x4b9   : > { %7719 = vlog2.f32 %v6005_v31  ;;  %v7708_v8 = vpop.eup %7707  ;;  %v6056_v26 = vmul.f32 0.6931472, %v7706_v25  ;;  %vm6258_vm15 = vcmp.le.f32.partialorder %v11241_v48, 0.0031308  ;;  %v4977_v45 = vadd.f32 %v7823_v52, %v6867_v9 }
 0x4ba   : > { %7721 = vpow2.f32 %v5807_v15  ;;  %v5752_v63 = vmul.f32 0.41666666, %v5714_v22  ;;  %v5846_v21 = vmul.f32 1.055, %v7708_v8  ;;  %v5499_v58 = vmin.f32 %v5457_v43, 3.0 }
 0x4bb   : > { %7723 = vlog2.f32 %v5657_v44  ;;  %v6099_v27 = vmul.f32 0.41666666, %v6056_v26  ;;  %v5500_v47 = vmin.f32 %v5460_v40, 3.0  ;;  %v6870_v60 = vadd.f32 %v11109_v28, %v11104_v0 }
 0x4bc   : > { %v7710_v38 = vpop.eup %7709  ;;  %7725 = vlog2.f32 %v5658_v14  ;;  %v5809_v33 = vmul.f32 1.442695, %v5752_v63  ;;  %v6714_v51 = vadd.f32 -0.055, %v5846_v21  ;;  %v5623_v50 = vmul.f32 12.92, %v11247_v41 }
 0x4bd   : > { %v7712_v18 = vpop.eup %7711  ;;  %v5107_v5 = vadd.f32 1.0, %v7710_v38  ;;  %v6151_v62 = vmul.f32 1.442695, %v6099_v27  ;;  %v5559_v12 = vmul.f32 1.442695, %v5499_v58  ;;  %v4980_v35 = vadd.f32 %v7823_v52, %v6870_v60 }
 0x4be   : > { %v7714_v23 = vpop.eup %7713  ;;  %v5108_v10 = vadd.f32 1.0, %v7712_v18  ;;  %7727 = vpow2.f32 %v5809_v33  ;;  %v11330_v17 = vsel %vm5910_vm13, %v5622_v16, %v6714_v51  ;;  %v5561_v0 = vmul.f32 1.442695, %v5500_v47 }
 0x4bf   : > { %v7716_v19 = vpop.eup %7715  ;;  %v6193_v34 = vmul.f32 1.055, %v7714_v23  ;;  %7729 = vrcp.f32 %v5107_v5  ;;  %v6006_v4 = vmax.f32 %v11330_v17, 1.1920929e-07  ;;  %v6672_v59 = vmul.f32 -1.442695, %v4977_v45 }
 0x4c0   : > { %v6194_v57 = vmul.f32 1.055, %v7716_v19  ;;  %v7718_v42 = vpop.eup %7717  ;;  %7731 = vpow2.f32 %v6151_v62  ;;  %v6979_v20 = vadd.f32 %v11130_v32, %v11123_v3  ;;  %v6673_v46 = vmul.f32 -1.442695, %v4980_v35 }
 0x4c1   : > { %v6741_v54 = vadd.f32 -0.055, %v6193_v34  ;;  %v6058_v39 = vmul.f32 0.6931472, %v7718_v42  ;;  %7733 = vrcp.f32 %v5108_v10  ;;  %vm5911_vm0 = vcmp.le.f32.partialorder %v11247_v41, 0.0031308 }
 0x4c2   : > { %v6742_v28 = vadd.f32 -0.055, %v6194_v57  ;;  %7735 = vlog2.f32 %v6006_v4  ;;  %v5465_v15 = vadd.f32 %v11315_v37, %v6979_v20  ;;  %v5624_v5 = vmul.f32 12.92, %v11261_v6 }
 0x4c3   : > { %v7720_v2 = vpop.eup %7719  ;;  %v6289_v13 = vsel %vm6257_vm14, %v5969_v24, %v6741_v54  ;;  %v6100_v29 = vmul.f32 0.41666666, %v6058_v39  ;;  %7737 = vpow2.f32 %v5559_v12  ;;  %vm5912_vm1 = vcmp.le.f32.partialorder %v11261_v6, 0.0031308 }
 0x4c4   : > { %v7722_v30 = vpop.eup %7721  ;;  %6322 = vst.msk [vmem:[%s10858_s27 + $0x90] sm:$0xff] %vm6303_vm9, %v6289_v13  ;;  %v6290_v11 = vsel %vm6258_vm15, %v5970_v36, %v6742_v28  ;;  %v6060_v31 = vmul.f32 0.6931472, %v7720_v2  ;;  %7739 = vpow2.f32 %v5561_v0  ;;  %v11752_v36 = vld [vmem:[#allocation33_spill] sm:$0xff]  ;;  %v5501_v63 = vmin.f32 %v5465_v15, 3.0 }
 0x4c5   : > { %v7724_v1 = vpop.eup %7723  ;;  %6323 = vst.msk [vmem:[%s10858_s27 + $0x98] sm:$0xff] %vm6303_vm9, %v6290_v11  ;;  %v5847_v16 = vmul.f32 1.055, %v7722_v30  ;;  %v6153_v14 = vmul.f32 1.442695, %v6100_v29  ;;  %7741 = vpow2.f32 %v6672_v59  ;;  %v6982_v43 = vadd.f32 %v11752_v36, %v11133_v53 }
 0x4c6   : > { %v7726_v44 = vpop.eup %7725  ;;  %v6101_v3 = vmul.f32 0.41666666, %v6060_v31  ;;  %v5716_v32 = vmul.f32 0.6931472, %v7724_v1  ;;  %7743 = vpow2.f32 %v6673_v46  ;;  %v5563_v23 = vmul.f32 1.442695, %v5501_v63 }
 0x4c7   : > { %v6715_v24 = vadd.f32 -0.055, %v5847_v16  ;;  %v5718_v48 = vmul.f32 0.6931472, %v7726_v44  ;;  %7745 = vpow2.f32 %v6153_v14  ;;  %v5468_v51 = vadd.f32 %v11315_v37, %v6982_v43 }
 0x4c8   : > { %v6155_v22 = vmul.f32 1.442695, %v6101_v3  ;;  %v5753_v25 = vmul.f32 0.41666666, %v5716_v32  ;;  %v7728_v40 = vpop.eup %7727  ;;  %v5971_v52 = vmul.f32 12.92, %v11271_v61 }
 0x4c9   : > { %v11347_v8 = vsel %vm5911_vm0, %v5623_v50, %v6715_v24  ;;  %v5754_v26 = vmul.f32 0.41666666, %v5718_v48  ;;  %v7730_v9 = vpop.eup %7729  ;;  %v5848_v58 = vmul.f32 1.055, %v7728_v40  ;;  %vm6259_vm2 = vcmp.le.f32.partialorder %v11271_v61, 0.0031308 }
 0x4ca   : > { %7747 = vpow2.f32 %v6155_v22  ;;  %v6007_v38 = vmax.f32 %v11347_v8, 1.1920929e-07  ;;  %v7732_v21 = vpop.eup %7731  ;;  %v5811_v41 = vmul.f32 1.442695, %v5753_v25  ;;  %v5502_v4 = vmin.f32 %v5468_v51, 3.0 }
 0x4cb   : > { %v5813_v18 = vmul.f32 1.442695, %v5754_v26  ;;  %v7734_v27 = vpop.eup %7733  ;;  %v6195_v33 = vmul.f32 1.055, %v7732_v21  ;;  %v6716_v47 = vadd.f32 -0.055, %v5848_v58 }
 0x4cc   : > { %7749 = vlog2.f32 %v6007_v38  ;;  %v7736_v53 = vpop.eup %7735  ;;  %v5972_v13 = vmul.f32 12.92, %v11292_v56  ;;  %v5565_v11 = vmul.f32 1.442695, %v5502_v4  ;;  %vm6260_vm3 = vcmp.le.f32.partialorder %v11292_v56, 0.0031308 }
 0x4cd   : > { %7751 = vpow2.f32 %v5811_v41  ;;  %v7738_v10 = vpop.eup %7737  ;;  %v6743_v45 = vadd.f32 -0.055, %v6195_v33  ;;  %v6062_v60 = vmul.f32 0.6931472, %v7736_v53  ;;  %v11355_v34 = vsel %vm5912_vm1, %v5624_v5, %v6716_v47 }
 0x4ce   : > { %7753 = vpow2.f32 %v5813_v18  ;;  %v7740_v19 = vpop.eup %7739  ;;  %v11357_v62 = vmul.f32 %v7738_v10, %v7730_v9  ;;  %v6008_v12 = vmax.f32 %v11355_v34, 1.1920929e-07  ;;  %v5973_v31 = vmul.f32 12.92, %v11298_v49 }
 0x4cf   : > { %v7742_v6 = vpop.eup %7741  ;;  %v6291_v50 = vsel %vm6259_vm2, %v5971_v52, %v6743_v45  ;;  %v6102_v57 = vmul.f32 0.41666666, %v6062_v60  ;;  %v11363_v54 = vmul.f32 %v7740_v19, %v7734_v27  ;;  %7755 = vpow2.f32 %v5563_v23 }
 0x4d0   : > { %v7744_v42 = vpop.eup %7743  ;;  %6324 = vst.msk [vmem:[%s10858_s27 + $0xa0] sm:$0xff] %vm6303_vm9, %v6291_v50  ;;  %v5659_v37 = vmax.f32 %v11357_v62, 1.1920929e-07  ;;  %7757 = vlog2.f32 %v6008_v12  ;;  %v5109_v28 = vadd.f32 1.0, %v7742_v6  ;;  %vm6261_vm4 = vcmp.le.f32.partialorder %v11298_v49, 0.0031308 }
 0x4d1   : > { %v7746_v0 = vpop.eup %7745  ;;  %v6157_v61 = vmul.f32 1.442695, %v6102_v57  ;;  %v5660_v59 = vmax.f32 %v11363_v54, 1.1920929e-07  ;;  %v5110_v35 = vadd.f32 1.0, %v7744_v42  ;;  %v5625_v56 = vmul.f32 12.92, %v11300_v7 }
 0x4d2   : > { %v6196_v39 = vmul.f32 1.055, %v7746_v0  ;;  %7759 = vlog2.f32 %v5659_v37  ;;  %vm5913_vm5 = vcmp.le.f32.partialorder %v11300_v7, 0.0031308  ;;  %v5626_v49 = vmul.f32 12.92, %v11302_v55 }
 0x4d3   : > { %7761 = vpow2.f32 %v6157_v61  ;;  %vm5914_vm6 = vcmp.le.f32.partialorder %v11302_v55, 0.0031308  ;;  %v5974_v33 = vmul.f32 12.92, %v11330_v17  ;;  %vm6262_vm7 = vcmp.le.f32.partialorder %v11330_v17, 0.0031308 }
 0x4d4   : > { %v7748_v2 = vpop.eup %7747  ;;  %v6744_v20 = vadd.f32 -0.055, %v6196_v39  ;;  %7763 = vlog2.f32 %v5660_v59  ;;  %v5975_v4 = vmul.f32 12.92, %v11347_v8  ;;  %vm6263_vm8 = vcmp.le.f32.partialorder %v11347_v8, 0.0031308 }
 0x4d5   : > { %v6197_v30 = vmul.f32 1.055, %v7748_v2  ;;  %7765 = vrcp.f32 %v5109_v28  ;;  %vm6264_vm10 = vcmp.le.f32.partialorder %v11355_v34, 0.0031308  ;;  %v5627_v8 = vmul.f32 12.92, %v11357_v62 }
 0x4d6   : > { %v7750_v29 = vpop.eup %7749  ;;  %v6292_v16 = vsel %vm6260_vm3, %v5972_v13, %v6744_v20  ;;  %7767 = vrcp.f32 %v5110_v35  ;;  %vm5915_vm11 = vcmp.le.f32.partialorder %v11357_v62, 0.0031308  ;;  %vm5916_vm12 = vcmp.le.f32.partialorder %v11363_v54, 0.0031308 }
 0x4d7   : > { %v7752_v1 = vpop.eup %7751  ;;  %v6745_v46 = vadd.f32 -0.055, %v6197_v30  ;;  %v6064_v15 = vmul.f32 0.6931472, %v7750_v29  ;;  %6325 = vst.msk [vmem:[%s10858_s27 + $0xa8] sm:$0xff] %vm6303_vm9, %v6292_v16  ;;  %7769 = vpow2.f32 %v5565_v11 }
 0x4d8   : > { %v7754_v44 = vpop.eup %7753  ;;  %v5849_v14 = vmul.f32 1.055, %v7752_v1  ;;  %v5976_v11 = vmul.f32 12.92, %v11355_v34 }
 0x4d9   : > { %v6293_v3 = vsel %vm6261_vm4, %v5973_v31, %v6745_v46  ;;  %v6103_v32 = vmul.f32 0.41666666, %v6064_v15  ;;  %v5850_v24 = vmul.f32 1.055, %v7754_v44  ;;  %v7756_v22 = vpop.eup %7755 }
 0x4da   : > { %6326 = vst.msk [vmem:[%s10858_s27 + $0xb0] sm:$0xff] %vm6303_vm9, %v6293_v3  ;;  %v6717_v48 = vadd.f32 -0.055, %v5849_v14  ;;  %v7758_v43 = vpop.eup %7757 }
 0x4db   : > { %v6159_v25 = vmul.f32 1.442695, %v6103_v32  ;;  %v6718_v36 = vadd.f32 -0.055, %v5850_v24  ;;  %v6066_v63 = vmul.f32 0.6931472, %v7758_v43 }
 0x4dc   : > { %v11376_v40 = vsel %vm5913_vm5, %v5625_v56, %v6717_v48  ;;  %v7760_v26 = vpop.eup %7759 }
 0x4dd   : > { %7771 = vpow2.f32 %v6159_v25  ;;  %v6009_v9 = vmax.f32 %v11376_v40, 1.1920929e-07  ;;  %v7762_v38 = vpop.eup %7761  ;;  %v11381_v21 = vsel %vm5914_vm6, %v5626_v49, %v6718_v36  ;;  %v5720_v58 = vmul.f32 0.6931472, %v7760_v26 }
 0x4de   : > { %v7764_v41 = vpop.eup %7763  ;;  %v6198_v18 = vmul.f32 1.055, %v7762_v38  ;;  %v6104_v7 = vmul.f32 0.41666666, %v6066_v63  ;;  %v6010_v5 = vmax.f32 %v11381_v21, 1.1920929e-07 }
 0x4df   : > { %7773 = vlog2.f32 %v6009_v9  ;;  %v7766_v27 = vpop.eup %7765  ;;  %v5755_v53 = vmul.f32 0.41666666, %v5720_v58  ;;  %v5722_v10 = vmul.f32 0.6931472, %v7764_v41  ;;  %v5628_v25 = vmul.f32 12.92, %v11363_v54 }
 0x4e0   : > { %v7768_v47 = vpop.eup %7767  ;;  %v6746_v23 = vadd.f32 -0.055, %v6198_v18  ;;  %v6161_v51 = vmul.f32 1.442695, %v6104_v7  ;;  %v11385_v55 = vmul.f32 %v7766_v27, %v7756_v22  ;;  %7775 = vlog2.f32 %v6010_v5 }
 0x4e1   : > { %v5815_v52 = vmul.f32 1.442695, %v5755_v53  ;;  %v7770_v45 = vpop.eup %7769  ;;  %v5756_v19 = vmul.f32 0.41666666, %v5722_v10  ;;  %v5977_v41 = vmul.f32 12.92, %v11376_v40 }
 0x4e2   : > { %v6294_v60 = vsel %vm6262_vm7, %v5974_v33, %v6746_v23  ;;  %7777 = vpow2.f32 %v6161_v51  ;;  %v5661_v6 = vmax.f32 %v11385_v55, 1.1920929e-07  ;;  %v11391_v50 = vmul.f32 %v7770_v45, %v7768_v47 }
 0x4e3   : > { %6327 = vst.msk [vmem:[%s10858_s27 + $0xb8] sm:$0xff] %vm6303_vm9, %v6294_v60  ;;  %7779 = vpow2.f32 %v5815_v52  ;;  %v5817_v57 = vmul.f32 1.442695, %v5756_v19  ;;  %vm6265_vm13 = vcmp.le.f32.partialorder %v11376_v40, 0.0031308 }
 0x4e4   : > { %7781 = vlog2.f32 %v5661_v6  ;;  %v5662_v12 = vmax.f32 %v11391_v50, 1.1920929e-07  ;;  %v5978_v33 = vmul.f32 12.92, %v11381_v21  ;;  %vm6266_vm14 = vcmp.le.f32.partialorder %v11381_v21, 0.0031308 }
 0x4e5   : > { %7783 = vpow2.f32 %v5817_v57  ;;  %v5629_v40 = vmul.f32 12.92, %v11385_v55  ;;  %vm5917_vm15 = vcmp.le.f32.partialorder %v11385_v55, 0.0031308  ;;  %vm5918_vm0 = vcmp.le.f32.partialorder %v11391_v50, 0.0031308 }
 0x4e6   : > { %7785 = vlog2.f32 %v5662_v12 }
 0x4e7   : > { %v7772_v42 = vpop.eup %7771 }
 0x4e8   : > { %v6199_v17 = vmul.f32 1.055, %v7772_v42  ;;  %v5630_v42 = vmul.f32 12.92, %v11391_v50 }
 0x4e9   : > { %v7774_v37 = vpop.eup %7773 }
 0x4ea   : > { %v6747_v0 = vadd.f32 -0.055, %v6199_v17  ;;  %v6068_v61 = vmul.f32 0.6931472, %v7774_v37  ;;  %v7776_v28 = vpop.eup %7775 }
 0x4eb   : > { %v6070_v13 = vmul.f32 0.6931472, %v7776_v28 }
 0x4ec   : > { %v6295_v39 = vsel %vm6263_vm8, %v5975_v4, %v6747_v0  ;;  %v6105_v59 = vmul.f32 0.41666666, %v6068_v61  ;;  %v7778_v2 = vpop.eup %7777 }
 0x4ed   : > { %6328 = vst.msk [vmem:[%s10858_s27 + $0xc0] sm:$0xff] %vm6303_vm9, %v6295_v39  ;;  %v7780_v35 = vpop.eup %7779  ;;  %v6200_v20 = vmul.f32 1.055, %v7778_v2  ;;  %v6106_v29 = vmul.f32 0.41666666, %v6070_v13 }
 0x4ee   : > { %v6163_v30 = vmul.f32 1.442695, %v6105_v59  ;;  %v5851_v31 = vmul.f32 1.055, %v7780_v35  ;;  %v7782_v1 = vpop.eup %7781 }
 0x4ef   : > { %v6748_v16 = vadd.f32 -0.055, %v6200_v20  ;;  %v7784_v46 = vpop.eup %7783  ;;  %v6165_v15 = vmul.f32 1.442695, %v6106_v29  ;;  %v5724_v14 = vmul.f32 0.6931472, %v7782_v1 }
 0x4f0   : > { %7787 = vpow2.f32 %v6163_v30  ;;  %v6719_v44 = vadd.f32 -0.055, %v5851_v31  ;;  %v7786_v3 = vpop.eup %7785  ;;  %v5852_v24 = vmul.f32 1.055, %v7784_v46 }
 0x4f1   : > { %v6296_v32 = vsel %vm6264_vm10, %v5976_v11, %v6748_v16  ;;  %7789 = vpow2.f32 %v6165_v15  ;;  %v5757_v48 = vmul.f32 0.41666666, %v5724_v14  ;;  %v5726_v22 = vmul.f32 0.6931472, %v7786_v3 }
 0x4f2   : > { %6329 = vst.msk [vmem:[%s10858_s27 + $0xc8] sm:$0xff] %vm6303_vm9, %v6296_v32  ;;  %v11404_v56 = vsel %vm5915_vm11, %v5627_v8, %v6719_v44  ;;  %v6720_v36 = vadd.f32 -0.055, %v5852_v24 }
 0x4f3   : > { %v6011_v34 = vmax.f32 %v11404_v56, 1.1920929e-07  ;;  %v5819_v43 = vmul.f32 1.442695, %v5757_v48  ;;  %v5758_v49 = vmul.f32 0.41666666, %v5726_v22 }
 0x4f4   : > { %v11409_v62 = vsel %vm5916_vm12, %v5628_v25, %v6720_v36  ;;  %v5979_v55 = vmul.f32 12.92, %v11404_v56  ;;  %vm6267_vm1 = vcmp.le.f32.partialorder %v11404_v56, 0.0031308 }
 0x4f5   : > { %7791 = vlog2.f32 %v6011_v34  ;;  %v5821_v26 = vmul.f32 1.442695, %v5758_v49  ;;  %v6012_v63 = vmax.f32 %v11409_v62, 1.1920929e-07  ;;  %v5980_v31 = vmul.f32 12.92, %v11409_v62 }
 0x4f6   : > { %7793 = vpow2.f32 %v5819_v43  ;;  %vm6268_vm2 = vcmp.le.f32.partialorder %v11409_v62, 0.0031308 }
 0x4f7   : > { %7795 = vpow2.f32 %v5821_v26 }
 0x4f8   : > { %7797 = vlog2.f32 %v6012_v63 }
 0x4fa   : > { %v7788_v9 = vpop.eup %7787 }
 0x4fb   : > { %v6201_v38 = vmul.f32 1.055, %v7788_v9  ;;  %v7790_v58 = vpop.eup %7789 }
 0x4fc   : > { %v6202_v7 = vmul.f32 1.055, %v7790_v58 }
 0x4fd   : > { %v6749_v18 = vadd.f32 -0.055, %v6201_v38 }
 0x4fe   : > { %v6750_v5 = vadd.f32 -0.055, %v6202_v7 }
 0x4ff   : > { %v6297_v54 = vsel %vm6265_vm13, %v5977_v41, %v6749_v18  ;;  %v7792_v27 = vpop.eup %7791 }
 0x500   : > { %6330 = vst.msk [vmem:[%s10858_s27 + $0xd0] sm:$0xff] %vm6303_vm9, %v6297_v54  ;;  %v7794_v53 = vpop.eup %7793  ;;  %v6072_v47 = vmul.f32 0.6931472, %v7792_v27  ;;  %v6298_v23 = vsel %vm6266_vm14, %v5978_v33, %v6750_v5 }
 0x501   : > { %v5853_v51 = vmul.f32 1.055, %v7794_v53  ;;  %v7796_v10 = vpop.eup %7795  ;;  %6331 = vst.msk [vmem:[%s10858_s27 + $0xd8] sm:$0xff] %vm6303_vm9, %v6298_v23 }
 0x502   : > { %v6107_v52 = vmul.f32 0.41666666, %v6072_v47  ;;  %v7798_v45 = vpop.eup %7797  ;;  %v5854_v19 = vmul.f32 1.055, %v7796_v10 }
 0x503   : > { %v6721_v60 = vadd.f32 -0.055, %v5853_v51  ;;  %v6074_v57 = vmul.f32 0.6931472, %v7798_v45 }
 0x504   : > { %v6167_v6 = vmul.f32 1.442695, %v6107_v52  ;;  %v6722_v21 = vadd.f32 -0.055, %v5854_v19 }
 0x505   : > { %v5949_v12 = vsel %vm5917_vm15, %v5629_v40, %v6721_v60  ;;  %v6108_v17 = vmul.f32 0.41666666, %v6074_v57 }
 0x506   : > { %7799 = vpow2.f32 %v6167_v6  ;;  %v6013_v37 = vmax.f32 %v5949_v12, 1.1920929e-07  ;;  %v5950_v4 = vsel %vm5918_vm0, %v5630_v42, %v6722_v21  ;;  %v5981_v32 = vmul.f32 12.92, %v5949_v12 }
 0x507   : > { %v6169_v0 = vmul.f32 1.442695, %v6108_v17  ;;  %v6014_v61 = vmax.f32 %v5950_v4, 1.1920929e-07  ;;  %vm6269_vm3 = vcmp.le.f32.partialorder %v5949_v12, 0.0031308 }
 0x508   : > { %7801 = vlog2.f32 %v6013_v37  ;;  %v5982_v22 = vmul.f32 12.92, %v5950_v4  ;;  %vm6270_vm4 = vcmp.le.f32.partialorder %v5950_v4, 0.0031308 }
 0x509   : > { %7803 = vpow2.f32 %v6169_v0 }
 0x50a   : > { %7805 = vlog2.f32 %v6014_v61 }
 0x510   : > { %v7800_v28 = vpop.eup %7799 }
 0x511   : > { %v6203_v39 = vmul.f32 1.055, %v7800_v28 }
 0x512   : > { %v7802_v59 = vpop.eup %7801 }
 0x513   : > { %v6751_v2 = vadd.f32 -0.055, %v6203_v39  ;;  %v6076_v13 = vmul.f32 0.6931472, %v7802_v59  ;;  %v7804_v35 = vpop.eup %7803 }
 0x514   : > { %v7806_v20 = vpop.eup %7805  ;;  %v6204_v30 = vmul.f32 1.055, %v7804_v35 }
 0x515   : > { %v6299_v50 = vsel %vm6267_vm1, %v5979_v55, %v6751_v2  ;;  %v6109_v11 = vmul.f32 0.41666666, %v6076_v13  ;;  %v6078_v29 = vmul.f32 0.6931472, %v7806_v20 }
 0x516   : > { %6332 = vst.msk [vmem:[%s10858_s27 + $0xe0] sm:$0xff] %vm6303_vm9, %v6299_v50  ;;  %v6752_v1 = vadd.f32 -0.055, %v6204_v30 }
 0x517   : > { %v6171_v16 = vmul.f32 1.442695, %v6109_v11  ;;  %v6110_v8 = vmul.f32 0.41666666, %v6078_v29 }
 0x518   : > { %v6300_v46 = vsel %vm6268_vm2, %v5980_v31, %v6752_v1 }
 0x519   : > { %7807 = vpow2.f32 %v6171_v16  ;;  %6333 = vst.msk [vmem:[%s10858_s27 + $0xe8] sm:$0xff] %vm6303_vm9, %v6300_v46  ;;  %v6173_v15 = vmul.f32 1.442695, %v6110_v8 }
 0x51b   : > { %7809 = vpow2.f32 %v6173_v15 }
 0x523   : > { %v7808_v44 = vpop.eup %7807 }
 0x524   : > { %v6205_v14 = vmul.f32 1.055, %v7808_v44 }
 0x525   : > { %v7810_v3 = vpop.eup %7809 }
 0x526   : > { %v6753_v24 = vadd.f32 -0.055, %v6205_v14  ;;  %v6206_v56 = vmul.f32 1.055, %v7810_v3 }
 0x528   : > { %v6301_v48 = vsel %vm6269_vm3, %v5981_v32, %v6753_v24  ;;  %v6754_v34 = vadd.f32 -0.055, %v6206_v56 }
 0x529   : > { %6334 = vst.msk [vmem:[%s10858_s27 + $0xf0] sm:$0xff] %vm6303_vm9, %v6301_v48 }
 0x52a   : > { %v6302_v25 = vsel %vm6270_vm4, %v5982_v22, %v6754_v34 }
 0x52b   : > { %6335 = vst.msk [vmem:[%s10858_s27 + $0xf8] sm:$0xff] %vm6303_vm9, %v6302_v25 }
 0x52c PF: > { %s11753_s21 = sld [smem:[#allocation2_spill]] }
 0x532   : > { %s30_s1 = sadd.s32 1, %s11753_s21  }
 0x533   : > { %p27_p4 = scmp.ge.s32.totalorder %s30_s1, 4  }
 0x535   :  { %29 = sbr.rel (!%p27_p4) target bundleno = 6 (0x6), region = 136 }

</bundles_post_ra>
